<compile_context>
chip_gen: v7x
topology: tpu7x:2x2x1
jax: 0.10.0
libtpu: 0.0.40
codegen_flags: <defaults>
</compile_context>

<pallas_src>
import functools
import math

import numpy as np
import jax
import jax.numpy as jnp
from jax.experimental import pallas as pl
from jax.experimental.pallas import tpu as pltpu

NEG_INF = -1e9
LN_EPS = 1e-12


# ----------------------- in-kernel building blocks --------------------------

def _mm(x, w_bf16, b):
    """x: [R,K] f32, w: [K,N] bf16, b: [1,N] f32 -> [R,N] f32 (MXU, f32 acc)."""
    return jnp.dot(x.astype(jnp.bfloat16), w_bf16,
                   preferred_element_type=jnp.float32) + b


def _layernorm(x, g, b):
    mu = jnp.mean(x, axis=-1, keepdims=True)
    var = jnp.mean((x - mu) * (x - mu), axis=-1, keepdims=True)
    return (x - mu) * jax.lax.rsqrt(var + LN_EPS) * g + b


def _gelu(x):
    # TODO(synk): HF BERT uses exact erf-GELU; tanh approximation is used here.
    return 0.5 * x * (1.0 + jnp.tanh(0.7978845608028654 * (x + 0.044715 * x * x * x)))


def _mha(q, k, v, wo_bf16, bo, bias, num_heads):
    """All-heads attention for one batch element, fully in VMEM/vregs.

    q: [Sq,H] f32; k,v: [Sk,H] f32; wo: [H,H] bf16; bo: [1,H] f32;
    bias: additive mask broadcastable to [Sq,Sk].
    The per-head loop is statically unrolled; the output projection is
    accumulated per head (ctx_h @ Wo[h-slice]) so no concat/transpose is needed.
    """
    sq, h = q.shape
    dh = h // num_heads
    scale = 1.0 / math.sqrt(dh)
    out = jnp.zeros((sq, h), jnp.float32)
    for hd in range(num_heads):
        sl = slice(hd * dh, (hd + 1) * dh)
        qh = q[:, sl].astype(jnp.bfloat16)
        kh = k[:, sl].astype(jnp.bfloat16)
        vh = v[:, sl].astype(jnp.bfloat16)
        s = jax.lax.dot_general(qh, kh, (((1,), (1,)), ((), ())),
                                preferred_element_type=jnp.float32) * scale + bias
        m = jnp.max(s, axis=-1, keepdims=True)
        p = jnp.exp(s - m)
        p = p * pl.reciprocal(jnp.sum(p, axis=-1, keepdims=True), approx=True)
        ctx = jnp.dot(p.astype(jnp.bfloat16), vh, preferred_element_type=jnp.float32)
        out = out + jnp.dot(ctx.astype(jnp.bfloat16), wo_bf16[sl, :],
                            preferred_element_type=jnp.float32)
    return out + bo


# ------------------------------ fused kernels --------------------------------

def _encoder_stack_kernel(x_ref, mask_ref, eg_ref, eb_ref,
                          wqkv_ref, bqkv_ref, wo_ref, bo_ref,
                          alng_ref, alnb_ref,
                          fw1_ref, fb1_ref, fw2_ref, fb2_ref,
                          flng_ref, flnb_ref,
                          out_ref, *, num_heads, num_layers):
    """Embedding LN + full BERT encoder stack for one batch element."""
    x = _layernorm(x_ref[0], eg_ref[...], eb_ref[...])          # [S, H]
    h = x.shape[-1]
    # padding bias generated in-kernel: 0 where keep, -1e9 where pad -> [1, S]
    pad_bias = (mask_ref[0] - 1.0) * (-NEG_INF)
    for l in range(num_layers):                                  # static unroll
        qkv = _mm(x, wqkv_ref[l], bqkv_ref[l])                   # fused QKV
        attn = _mha(qkv[:, :h], qkv[:, h:2 * h], qkv[:, 2 * h:],
                    wo_ref[l], bo_ref[l], pad_bias, num_heads)
        x = _layernorm(x + attn, alng_ref[l], alnb_ref[l])
        mid = _gelu(_mm(x, fw1_ref[l], fb1_ref[l]))
        ffn = _mm(mid, fw2_ref[l], fb2_ref[l])
        x = _layernorm(x + ffn, flng_ref[l], flnb_ref[l])
    out_ref[0] = x


def _decoder_stack_kernel(y_ref, mem_ref, mask_ref, eg_ref, eb_ref,
                          swqkv_ref, sbqkv_ref, swo_ref, sbo_ref, ln1g_ref, ln1b_ref,
                          cwq_ref, cbq_ref, cwkv_ref, cbkv_ref, cwo_ref, cbo_ref,
                          ln2g_ref, ln2b_ref,
                          fw1_ref, fb1_ref, fw2_ref, fb2_ref, ln3g_ref, ln3b_ref,
                          fcow_ref, fcob_ref,
                          out_ref, *, num_heads, num_layers):
    """Embedding LN + 3-layer transformer decoder + fc_out, one batch element.

    TODO(synk): the custom TransformerDecoder internals are not given; a
    standard post-LN causal self-attn + memory-key-padding cross-attn + ReLU
    FFN decoder layer is assumed (same as the previous version).
    """
    y = _layernorm(y_ref[0], eg_ref[...], eb_ref[...])           # [T, H]
    mem = mem_ref[0]                                             # [S, H]
    t, h = y.shape
    row = jax.lax.broadcasted_iota(jnp.int32, (t, t), 0)
    col = jax.lax.broadcasted_iota(jnp.int32, (t, t), 1)
    causal_bias = jnp.where(row >= col, 0.0, NEG_INF)            # [T, T], in-kernel
    pad_bias = (mask_ref[0] - 1.0) * (-NEG_INF)                  # [1, S]
    for l in range(num_layers):                                  # static unroll
        qkv = _mm(y, swqkv_ref[l], sbqkv_ref[l])                 # fused QKV
        sa = _mha(qkv[:, :h], qkv[:, h:2 * h], qkv[:, 2 * h:],
                  swo_ref[l], sbo_ref[l], causal_bias, num_heads)
        y = _layernorm(y + sa, ln1g_ref[l], ln1b_ref[l])
        q = _mm(y, cwq_ref[l], cbq_ref[l])
        kv = _mm(mem, cwkv_ref[l], cbkv_ref[l])                  # fused KV on memory
        ca = _mha(q, kv[:, :h], kv[:, h:],
                  cwo_ref[l], cbo_ref[l], pad_bias, num_heads)
        y = _layernorm(y + ca, ln2g_ref[l], ln2b_ref[l])
        mid = jnp.maximum(_mm(y, fw1_ref[l], fb1_ref[l]), 0.0)
        ffn = _mm(mid, fw2_ref[l], fb2_ref[l])
        y = _layernorm(y + ffn, ln3g_ref[l], ln3b_ref[l])
    # fused vocab head, padded to a lane-dense (128-multiple) output
    out_ref[0] = _mm(y, fcow_ref[...], fcob_ref[...])


# --------------------------- pallas_call wrappers ----------------------------

def _batched_spec(shape):
    nd = len(shape)
    return pl.BlockSpec((1,) + tuple(shape[1:]),
                        lambda i, _nd=nd: (i,) + (0,) * (_nd - 1))


def _shared_spec(shape):
    nd = len(shape)
    return pl.BlockSpec(tuple(shape), lambda i, _nd=nd: (0,) * _nd)


def encoder_stack(x_emb, mask3, p, num_heads):
    b, s, h = x_emb.shape
    batched = [x_emb, mask3]
    shared = [p["emb_g"], p["emb_b"],
              p["wqkv"], p["bqkv"], p["wo"], p["bo"],
              p["aln_g"], p["aln_b"],
              p["fw1"], p["fb1"], p["fw2"], p["fb2"],
              p["fln_g"], p["fln_b"]]
    return pl.pallas_call(
        functools.partial(_encoder_stack_kernel, num_heads=num_heads,
                          num_layers=p["wqkv"].shape[0]),
        grid=(b,),
        in_specs=[_batched_spec(a.shape) for a in batched]
                 + [_shared_spec(a.shape) for a in shared],
        out_specs=_batched_spec((b, s, h)),
        out_shape=jax.ShapeDtypeStruct((b, s, h), jnp.float32),
        compiler_params=pltpu.CompilerParams(dimension_semantics=("parallel",)),
    )(*batched, *shared)


def decoder_stack(y_emb, memory, mask3, p, num_heads, vocab_pad):
    b, t, h = y_emb.shape
    batched = [y_emb, memory, mask3]
    shared = [p["emb_g"], p["emb_b"],
              p["s_wqkv"], p["s_bqkv"], p["s_wo"], p["s_bo"], p["ln1_g"], p["ln1_b"],
              p["c_wq"], p["c_bq"], p["c_wkv"], p["c_bkv"], p["c_wo"], p["c_bo"],
              p["ln2_g"], p["ln2_b"],
              p["f_w1"], p["f_b1"], p["f_w2"], p["f_b2"], p["ln3_g"], p["ln3_b"],
              p["fco_w"], p["fco_b"]]
    return pl.pallas_call(
        functools.partial(_decoder_stack_kernel, num_heads=num_heads,
                          num_layers=p["s_wqkv"].shape[0]),
        grid=(b,),
        in_specs=[_batched_spec(a.shape) for a in batched]
                 + [_shared_spec(a.shape) for a in shared],
        out_specs=_batched_spec((b, t, vocab_pad)),
        out_shape=jax.ShapeDtypeStruct((b, t, vocab_pad), jnp.float32),
        compiler_params=pltpu.CompilerParams(dimension_semantics=("parallel",)),
    )(*batched, *shared)


# ------------------------- parameter packing / init --------------------------

def init_params(key, cfg):
    keys = iter(jax.random.split(key, 512))

    def w(*shape):
        return jax.random.normal(next(keys), shape, jnp.float32) * 0.02

    def zeros(*shape):
        return jnp.zeros(shape, jnp.float32)

    def ones(*shape):
        return jnp.ones(shape, jnp.float32)

    h, i_dim, ff, v = cfg["hidden"], cfg["intermediate"], cfg["dim_feedforward"], cfg["vocab"]

    def attn_block():
        return {"wq": w(h, h), "bq": zeros(h), "wk": w(h, h), "bk": zeros(h),
                "wv": w(h, h), "bv": zeros(h), "wo": w(h, h), "bo": zeros(h)}

    return {
        "embeddings": {
            "word_emb": w(v, h), "pos_emb": w(cfg["max_pos"], h), "type_emb": w(2, h),
            "emb_ln_g": ones(h), "emb_ln_b": zeros(h),
        },
        "encoder_layers": [
            {"attn": attn_block(),
             "attn_ln_g": ones(h), "attn_ln_b": zeros(h),
             "ffn_w1": w(h, i_dim), "ffn_b1": zeros(i_dim),
             "ffn_w2": w(i_dim, h), "ffn_b2": zeros(h),
             "ffn_ln_g": ones(h), "ffn_ln_b": zeros(h)}
            for _ in range(cfg["num_encoder_layers"])
        ],
        "decoder_layers": [
            {"self_attn": attn_block(), "cross_attn": attn_block(),
             "ln1_g": ones(h), "ln1_b": zeros(h),
             "ln2_g": ones(h), "ln2_b": zeros(h),
             "ln3_g": ones(h), "ln3_b": zeros(h),
             "ff_w1": w(h, ff), "ff_b1": zeros(ff),
             "ff_w2": w(ff, h), "ff_b2": zeros(h)}
            for _ in range(cfg["num_decoder_layers"])
        ],
        "fc_out_w": w(h, v),
        "fc_out_b": zeros(v),
    }


def pack_encoder_params(layers):
    def stk(fn):
        return jnp.stack([fn(lp) for lp in layers])

    return {
        # fused QKV: wq|wk|wv -> [L, H, 3H] bf16
        "wqkv": stk(lambda lp: jnp.concatenate(
            [lp["attn"]["wq"], lp["attn"]["wk"], lp["attn"]["wv"]], axis=1)
        ).astype(jnp.bfloat16),
        "bqkv": stk(lambda lp: jnp.concatenate(
            [lp["attn"]["bq"], lp["attn"]["bk"], lp["attn"]["bv"]])[None, :]),
        "wo": stk(lambda lp: lp["attn"]["wo"]).astype(jnp.bfloat16),
        "bo": stk(lambda lp: lp["attn"]["bo"][None, :]),
        "aln_g": stk(lambda lp: lp["attn_ln_g"][None, :]),
        "aln_b": stk(lambda lp: lp["attn_ln_b"][None, :]),
        "fw1": stk(lambda lp: lp["ffn_w1"]).astype(jnp.bfloat16),
        "fb1": stk(lambda lp: lp["ffn_b1"][None, :]),
        "fw2": stk(lambda lp: lp["ffn_w2"]).astype(jnp.bfloat16),
        "fb2": stk(lambda lp: lp["ffn_b2"][None, :]),
        "fln_g": stk(lambda lp: lp["ffn_ln_g"][None, :]),
        "fln_b": stk(lambda lp: lp["ffn_ln_b"][None, :]),
    }


def pack_decoder_params(layers, fc_out_w, fc_out_b, vocab_pad):
    def stk(fn):
        return jnp.stack([fn(lp) for lp in layers])

    pad = vocab_pad - fc_out_w.shape[1]
    return {
        "s_wqkv": stk(lambda lp: jnp.concatenate(
            [lp["self_attn"]["wq"], lp["self_attn"]["wk"], lp["self_attn"]["wv"]],
            axis=1)).astype(jnp.bfloat16),
        "s_bqkv": stk(lambda lp: jnp.concatenate(
            [lp["self_attn"]["bq"], lp["self_attn"]["bk"], lp["self_attn"]["bv"]])[None, :]),
        "s_wo": stk(lambda lp: lp["self_attn"]["wo"]).astype(jnp.bfloat16),
        "s_bo": stk(lambda lp: lp["self_attn"]["bo"][None, :]),
        "ln1_g": stk(lambda lp: lp["ln1_g"][None, :]),
        "ln1_b": stk(lambda lp: lp["ln1_b"][None, :]),
        "c_wq": stk(lambda lp: lp["cross_attn"]["wq"]).astype(jnp.bfloat16),
        "c_bq": stk(lambda lp: lp["cross_attn"]["bq"][None, :]),
        # fused KV on memory: wk|wv -> [L, H, 2H] bf16
        "c_wkv": stk(lambda lp: jnp.concatenate(
            [lp["cross_attn"]["wk"], lp["cross_attn"]["wv"]], axis=1)
        ).astype(jnp.bfloat16),
        "c_bkv": stk(lambda lp: jnp.concatenate(
            [lp["cross_attn"]["bk"], lp["cross_attn"]["bv"]])[None, :]),
        "c_wo": stk(lambda lp: lp["cross_attn"]["wo"]).astype(jnp.bfloat16),
        "c_bo": stk(lambda lp: lp["cross_attn"]["bo"][None, :]),
        "ln2_g": stk(lambda lp: lp["ln2_g"][None, :]),
        "ln2_b": stk(lambda lp: lp["ln2_b"][None, :]),
        "f_w1": stk(lambda lp: lp["ff_w1"]).astype(jnp.bfloat16),
        "f_b1": stk(lambda lp: lp["ff_b1"][None, :]),
        "f_w2": stk(lambda lp: lp["ff_w2"]).astype(jnp.bfloat16),
        "f_b2": stk(lambda lp: lp["ff_b2"][None, :]),
        "ln3_g": stk(lambda lp: lp["ln3_g"][None, :]),
        "ln3_b": stk(lambda lp: lp["ln3_b"][None, :]),
        # lane-dense vocab head: pad V -> multiple of 128
        "fco_w": jnp.pad(fc_out_w, ((0, 0), (0, pad))).astype(jnp.bfloat16),
        "fco_b": jnp.pad(fc_out_b, ((0, pad),))[None, :],
    }


# ------------------------------ forward (glue) -------------------------------

def make_forward(cfg, params):
    num_heads = cfg["num_heads"]
    vocab = cfg["vocab"]
    vocab_pad = ((vocab + 127) // 128) * 128

    emb = params["embeddings"]
    emb_g = emb["emb_ln_g"][None, :]
    emb_b = emb["emb_ln_b"][None, :]
    enc_p = pack_encoder_params(params["encoder_layers"])
    enc_p.update(emb_g=emb_g, emb_b=emb_b)
    dec_p = pack_decoder_params(params["decoder_layers"], params["fc_out_w"],
                                params["fc_out_b"], vocab_pad)
    dec_p.update(emb_g=emb_g, emb_b=emb_b)
    tables = {"word": emb["word_emb"], "pos": emb["pos_emb"], "type": emb["type_emb"]}

    def fwd(tables, enc_p, dec_p, src_ids, src_types, src_mask, tgt_ids, tgt_types):
        def embed_sum(ids, types):   # gathers stay in XLA; LN is fused in-kernel
            s = ids.shape[1]
            return (tables["word"][ids]
                    + tables["pos"][jnp.arange(s)][None, :, :]
                    + tables["type"][types])

        mask3 = src_mask.astype(jnp.float32)[:, None, :]          # [B, 1, S]
        memory = encoder_stack(embed_sum(src_ids, src_types), mask3, enc_p, num_heads)
        logits = decoder_stack(embed_sum(tgt_ids, tgt_types), memory, mask3,
                               dec_p, num_heads, vocab_pad)
        return logits[..., :vocab]                                 # [B, T, vocab]

    jitted = jax.jit(fwd)
    return lambda *args: jitted(tables, enc_p, dec_p, *args)


# ---------------------------------- main -------------------------------------

if __name__ == "__main__":
    cfg = {
        "vocab": 64,
        "hidden": 32,
        "num_heads": 4,
        "intermediate": 64,       # encoder FFN dim
        "dim_feedforward": 128,   # decoder FFN dim (as in module __init__)
        "num_encoder_layers": 2,
        "num_decoder_layers": 3,
        "max_pos": 64,
        "max_tgt_len": 8,
    }
    CLS_ID, SEP_ID, PAD_ID = 1, 2, 0
    batch, src_len, max_tgt_len = 2, 8, cfg["max_tgt_len"]

    key = jax.random.PRNGKey(0)
    pkey, dkey = jax.random.split(key)
    params = init_params(pkey, cfg)
    forward = make_forward(cfg, params)

    # --- deterministic synthetic "tokenized" inputs ---
    k1, k2 = jax.random.split(dkey)
    src_ids_np = np.array(jax.random.randint(k1, (batch, src_len), 3, cfg["vocab"]), dtype=np.int32)
    src_ids_np[:, 0] = CLS_ID
    src_ids_np[0, -1] = SEP_ID
    src_ids_np[1, -3] = SEP_ID
    src_ids_np[1, -2:] = PAD_ID
    src_mask_np = (src_ids_np != PAD_ID).astype(np.int32)
    src_types_np = np.zeros((batch, src_len), dtype=np.int32)

    tgt_ids_np = np.array(jax.random.randint(k2, (batch, max_tgt_len), 3, cfg["vocab"]), dtype=np.int32)
    tgt_ids_np[:, 0] = CLS_ID
    tgt_ids_np[0, 5] = SEP_ID
    tgt_ids_np[0, 6:] = PAD_ID
    tgt_ids_np[1, 7] = SEP_ID
    tgt_mask_np = (tgt_ids_np != PAD_ID).astype(np.int32)
    tgt_types_np = np.zeros((batch, max_tgt_len), dtype=np.int32)

    # --- host-side SEP-token deletion, exactly mirroring the PyTorch/numpy glue ---
    end_index = np.argwhere(tgt_ids_np == SEP_ID)[:, 1]
    for i in range(len(end_index)):
        end_index[i] += max_tgt_len * i
    tgt_ids_del = np.delete(tgt_ids_np.reshape(-1), end_index).reshape(batch, -1)
    tgt_types_del = np.delete(tgt_types_np.reshape(-1), end_index).reshape(batch, -1)
    _tgt_mask_del = np.delete(tgt_mask_np.reshape(-1), end_index).reshape(batch, -1)  # unused downstream (as in reference)

    out = forward(jnp.asarray(src_ids_np), jnp.asarray(src_types_np),
                  jnp.asarray(src_mask_np),
                  jnp.asarray(tgt_ids_del), jnp.asarray(tgt_types_del))
    out = jax.block_until_ready(out)

    expected = (batch, max_tgt_len - 1, cfg["vocab"])
    assert out.shape == expected, (out.shape, expected)
    assert bool(jnp.all(jnp.isfinite(out)))
    print("KERNEL_OK")
</pallas_src>

<mosaic_0001>
module attributes {stable_mosaic.version = 11 : i64} {
  func.func @_encoder_stack_kernel(%arg0: i32, %arg1: memref<1x8x32xf32, #tpu.memory_space<vmem>>, %arg2: memref<1x1x8xf32, #tpu.memory_space<vmem>>, %arg3: memref<1x32xf32, #tpu.memory_space<vmem>>, %arg4: memref<1x32xf32, #tpu.memory_space<vmem>>, %arg5: memref<2x32x96xbf16, #tpu.memory_space<vmem>>, %arg6: memref<2x1x96xf32, #tpu.memory_space<vmem>>, %arg7: memref<2x32x32xbf16, #tpu.memory_space<vmem>>, %arg8: memref<2x1x32xf32, #tpu.memory_space<vmem>>, %arg9: memref<2x1x32xf32, #tpu.memory_space<vmem>>, %arg10: memref<2x1x32xf32, #tpu.memory_space<vmem>>, %arg11: memref<2x32x64xbf16, #tpu.memory_space<vmem>>, %arg12: memref<2x1x64xf32, #tpu.memory_space<vmem>>, %arg13: memref<2x64x32xbf16, #tpu.memory_space<vmem>>, %arg14: memref<2x1x32xf32, #tpu.memory_space<vmem>>, %arg15: memref<2x1x32xf32, #tpu.memory_space<vmem>>, %arg16: memref<2x1x32xf32, #tpu.memory_space<vmem>>, %arg17: memref<1x8x32xf32, #tpu.memory_space<vmem>>) attributes {dimension_semantics = [#tpu.dimension_semantics<parallel>], iteration_bounds = array<i64: 2>, scalar_prefetch = 0 : i64, scratch_operands = 0 : i64, tpu.core_type = #tpu.core_type<tc>, window_params = [{transform_indices = @transform_0, window_bounds = array<i64: 1, 8, 32>}, {transform_indices = @transform_1, window_bounds = array<i64: 1, 1, 8>}, {pipeline_mode = #tpu.pipeline_mode<synchronous>, transform_indices = @transform_2, window_bounds = array<i64: 1, 32>}, {pipeline_mode = #tpu.pipeline_mode<synchronous>, transform_indices = @transform_3, window_bounds = array<i64: 1, 32>}, {pipeline_mode = #tpu.pipeline_mode<synchronous>, transform_indices = @transform_4, window_bounds = array<i64: 2, 32, 96>}, {pipeline_mode = #tpu.pipeline_mode<synchronous>, transform_indices = @transform_5, window_bounds = array<i64: 2, 1, 96>}, {pipeline_mode = #tpu.pipeline_mode<synchronous>, transform_indices = @transform_6, window_bounds = array<i64: 2, 32, 32>}, {pipeline_mode = #tpu.pipeline_mode<synchronous>, transform_indices = @transform_7, window_bounds = array<i64: 2, 1, 32>}, {pipeline_mode = #tpu.pipeline_mode<synchronous>, transform_indices = @transform_8, window_bounds = array<i64: 2, 1, 32>}, {pipeline_mode = #tpu.pipeline_mode<synchronous>, transform_indices = @transform_9, window_bounds = array<i64: 2, 1, 32>}, {pipeline_mode = #tpu.pipeline_mode<synchronous>, transform_indices = @transform_10, window_bounds = array<i64: 2, 32, 64>}, {pipeline_mode = #tpu.pipeline_mode<synchronous>, transform_indices = @transform_11, window_bounds = array<i64: 2, 1, 64>}, {pipeline_mode = #tpu.pipeline_mode<synchronous>, transform_indices = @transform_12, window_bounds = array<i64: 2, 64, 32>}, {pipeline_mode = #tpu.pipeline_mode<synchronous>, transform_indices = @transform_13, window_bounds = array<i64: 2, 1, 32>}, {pipeline_mode = #tpu.pipeline_mode<synchronous>, transform_indices = @transform_14, window_bounds = array<i64: 2, 1, 32>}, {pipeline_mode = #tpu.pipeline_mode<synchronous>, transform_indices = @transform_15, window_bounds = array<i64: 2, 1, 32>}, {transform_indices = @transform_16, window_bounds = array<i64: 1, 8, 32>}]} {
    %c0 = arith.constant 0 : index
    %c0_0 = arith.constant 0 : index
    %c0_1 = arith.constant 0 : index
    %0 = vector.load %arg1[%c0, %c0_0, %c0_1] : memref<1x8x32xf32, #tpu.memory_space<vmem>>, vector<1x8x32xf32>
    %1 = vector.shape_cast %0 : vector<1x8x32xf32> to vector<8x32xf32>
    %c0_2 = arith.constant 0 : index
    %c0_3 = arith.constant 0 : index
    %2 = vector.load %arg3[%c0_2, %c0_3] : memref<1x32xf32, #tpu.memory_space<vmem>>, vector<1x32xf32>
    %c0_4 = arith.constant 0 : index
    %c0_5 = arith.constant 0 : index
    %3 = vector.load %arg4[%c0_4, %c0_5] : memref<1x32xf32, #tpu.memory_space<vmem>>, vector<1x32xf32>
    %cst = arith.constant dense<0.000000e+00> : vector<8xf32>
    %4 = vector.multi_reduction <add>, %1, %cst [1] : vector<8x32xf32> to vector<8xf32>
    %5 = vector.shape_cast %4 : vector<8xf32> to vector<8x1xf32>
    %cst_6 = arith.constant 3.200000e+01 : f32
    %6 = vector.broadcast %cst_6 : f32 to vector<8x1xf32>
    %7 = arith.divf %5, %6 : vector<8x1xf32>
    %8 = vector.broadcast %7 : vector<8x1xf32> to vector<8x32xf32>
    %9 = arith.subf %1, %8 : vector<8x32xf32>
    %10 = vector.broadcast %7 : vector<8x1xf32> to vector<8x32xf32>
    %11 = arith.subf %1, %10 : vector<8x32xf32>
    %12 = arith.mulf %9, %11 : vector<8x32xf32>
    %cst_7 = arith.constant dense<0.000000e+00> : vector<8xf32>
    %13 = vector.multi_reduction <add>, %12, %cst_7 [1] : vector<8x32xf32> to vector<8xf32>
    %14 = vector.shape_cast %13 : vector<8xf32> to vector<8x1xf32>
    %cst_8 = arith.constant 3.200000e+01 : f32
    %15 = vector.broadcast %cst_8 : f32 to vector<8x1xf32>
    %16 = arith.divf %14, %15 : vector<8x1xf32>
    %17 = vector.broadcast %7 : vector<8x1xf32> to vector<8x32xf32>
    %18 = arith.subf %1, %17 : vector<8x32xf32>
    %cst_9 = arith.constant 9.99999996E-13 : f32
    %19 = vector.broadcast %cst_9 : f32 to vector<8x1xf32>
    %20 = arith.addf %16, %19 : vector<8x1xf32>
    %21 = math.rsqrt %20 : vector<8x1xf32>
    %22 = vector.broadcast %21 : vector<8x1xf32> to vector<8x32xf32>
    %23 = arith.mulf %18, %22 : vector<8x32xf32>
    %24 = vector.broadcast %2 : vector<1x32xf32> to vector<8x32xf32>
    %25 = arith.mulf %23, %24 : vector<8x32xf32>
    %26 = vector.broadcast %3 : vector<1x32xf32> to vector<8x32xf32>
    %27 = arith.addf %25, %26 : vector<8x32xf32>
    %c0_10 = arith.constant 0 : index
    %c0_11 = arith.constant 0 : index
    %c0_12 = arith.constant 0 : index
    %28 = vector.load %arg2[%c0_10, %c0_11, %c0_12] : memref<1x1x8xf32, #tpu.memory_space<vmem>>, vector<1x1x8xf32>
    %29 = vector.shape_cast %28 : vector<1x1x8xf32> to vector<1x8xf32>
    %cst_13 = arith.constant 1.000000e+00 : f32
    %30 = vector.broadcast %cst_13 : f32 to vector<1x8xf32>
    %31 = arith.subf %29, %30 : vector<1x8xf32>
    %cst_14 = arith.constant 1.000000e+09 : f32
    %32 = vector.broadcast %cst_14 : f32 to vector<1x8xf32>
    %33 = arith.mulf %31, %32 : vector<1x8xf32>
    %c0_15 = arith.constant 0 : index
    %c0_16 = arith.constant 0 : index
    %c0_17 = arith.constant 0 : index
    %34 = vector.load %arg5[%c0_15, %c0_16, %c0_17] : memref<2x32x96xbf16, #tpu.memory_space<vmem>>, vector<1x32x96xbf16>
    %35 = vector.shape_cast %34 : vector<1x32x96xbf16> to vector<32x96xbf16>
    %c0_18 = arith.constant 0 : index
    %c0_19 = arith.constant 0 : index
    %c0_20 = arith.constant 0 : index
    %36 = vector.load %arg6[%c0_18, %c0_19, %c0_20] : memref<2x1x96xf32, #tpu.memory_space<vmem>>, vector<1x1x96xf32>
    %37 = vector.shape_cast %36 : vector<1x1x96xf32> to vector<1x96xf32>
    %38 = arith.truncf %27 : vector<8x32xf32> to vector<8x32xbf16>
    %cst_21 = arith.constant dense<0.000000e+00> : vector<8x96xf32>
    %39 = tpu.matmul %38, %35, %cst_21 {dimension_numbers = #tpu.dot_dimension_numbers<[1], [0], [0], [1], [0, 0, 1, 1], [], []>} : vector<8x32xbf16>, vector<32x96xbf16>, vector<8x96xf32> -> vector<8x96xf32>
    %40 = vector.broadcast %37 : vector<1x96xf32> to vector<8x96xf32>
    %41 = arith.addf %39, %40 : vector<8x96xf32>
    %42 = vector.extract_strided_slice %41 {offsets = [0, 0], sizes = [8, 32], strides = [1, 1]} : vector<8x96xf32> to vector<8x32xf32>
    %43 = vector.extract_strided_slice %41 {offsets = [0, 32], sizes = [8, 32], strides = [1, 1]} : vector<8x96xf32> to vector<8x32xf32>
    %44 = vector.extract_strided_slice %41 {offsets = [0, 64], sizes = [8, 32], strides = [1, 1]} : vector<8x96xf32> to vector<8x32xf32>
    %c0_22 = arith.constant 0 : index
    %c0_23 = arith.constant 0 : index
    %c0_24 = arith.constant 0 : index
    %45 = vector.load %arg7[%c0_22, %c0_23, %c0_24] : memref<2x32x32xbf16, #tpu.memory_space<vmem>>, vector<1x32x32xbf16>
    %46 = vector.shape_cast %45 : vector<1x32x32xbf16> to vector<32x32xbf16>
    %c0_25 = arith.constant 0 : index
    %c0_26 = arith.constant 0 : index
    %c0_27 = arith.constant 0 : index
    %47 = vector.load %arg8[%c0_25, %c0_26, %c0_27] : memref<2x1x32xf32, #tpu.memory_space<vmem>>, vector<1x1x32xf32>
    %48 = vector.shape_cast %47 : vector<1x1x32xf32> to vector<1x32xf32>
    %cst_28 = arith.constant 0.000000e+00 : f32
    %49 = vector.broadcast %cst_28 : f32 to vector<8x32xf32>
    %50 = vector.extract_strided_slice %42 {offsets = [0, 0], sizes = [8, 8], strides = [1, 1]} : vector<8x32xf32> to vector<8x8xf32>
    %51 = arith.truncf %50 : vector<8x8xf32> to vector<8x8xbf16>
    %52 = vector.extract_strided_slice %43 {offsets = [0, 0], sizes = [8, 8], strides = [1, 1]} : vector<8x32xf32> to vector<8x8xf32>
    %53 = arith.truncf %52 : vector<8x8xf32> to vector<8x8xbf16>
    %54 = vector.extract_strided_slice %44 {offsets = [0, 0], sizes = [8, 8], strides = [1, 1]} : vector<8x32xf32> to vector<8x8xf32>
    %55 = arith.truncf %54 : vector<8x8xf32> to vector<8x8xbf16>
    %cst_29 = arith.constant dense<0.000000e+00> : vector<8x8xf32>
    %56 = tpu.matmul %51, %53, %cst_29 {dimension_numbers = #tpu.dot_dimension_numbers<[1], [1], [0], [0], [0, 0, 1, 0], [], []>} : vector<8x8xbf16>, vector<8x8xbf16>, vector<8x8xf32> -> vector<8x8xf32>
    %cst_30 = arith.constant 0.353553385 : f32
    %57 = vector.broadcast %cst_30 : f32 to vector<8x8xf32>
    %58 = arith.mulf %56, %57 : vector<8x8xf32>
    %59 = vector.broadcast %33 : vector<1x8xf32> to vector<8x8xf32>
    %60 = arith.addf %58, %59 : vector<8x8xf32>
    %cst_31 = arith.constant dense<0xFF800000> : vector<8xf32>
    %61 = vector.multi_reduction <maximumf>, %60, %cst_31 [1] : vector<8x8xf32> to vector<8xf32>
    %62 = vector.shape_cast %61 : vector<8xf32> to vector<8x1xf32>
    %63 = vector.broadcast %62 : vector<8x1xf32> to vector<8x8xf32>
    %64 = arith.subf %60, %63 : vector<8x8xf32>
    %65 = math.exp %64 : vector<8x8xf32>
    %cst_32 = arith.constant dense<0.000000e+00> : vector<8xf32>
    %66 = vector.multi_reduction <add>, %65, %cst_32 [1] : vector<8x8xf32> to vector<8xf32>
    %67 = vector.shape_cast %66 : vector<8xf32> to vector<8x1xf32>
    %68 = tpu.reciprocal %67 {approx = true} : vector<8x1xf32> -> vector<8x1xf32>
    %69 = vector.broadcast %68 : vector<8x1xf32> to vector<8x8xf32>
    %70 = arith.mulf %65, %69 : vector<8x8xf32>
    %71 = arith.truncf %70 : vector<8x8xf32> to vector<8x8xbf16>
    %cst_33 = arith.constant dense<0.000000e+00> : vector<8x8xf32>
    %72 = tpu.matmul %71, %55, %cst_33 {dimension_numbers = #tpu.dot_dimension_numbers<[1], [0], [0], [1], [0, 0, 1, 1], [], []>} : vector<8x8xbf16>, vector<8x8xbf16>, vector<8x8xf32> -> vector<8x8xf32>
    %73 = arith.truncf %72 : vector<8x8xf32> to vector<8x8xbf16>
    %74 = vector.extract_strided_slice %46 {offsets = [0, 0], sizes = [8, 32], strides = [1, 1]} : vector<32x32xbf16> to vector<8x32xbf16>
    %cst_34 = arith.constant dense<0.000000e+00> : vector<8x32xf32>
    %75 = tpu.matmul %73, %74, %cst_34 {dimension_numbers = #tpu.dot_dimension_numbers<[1], [0], [0], [1], [0, 0, 1, 1], [], []>} : vector<8x8xbf16>, vector<8x32xbf16>, vector<8x32xf32> -> vector<8x32xf32>
    %76 = arith.addf %49, %75 : vector<8x32xf32>
    %77 = vector.extract_strided_slice %42 {offsets = [0, 8], sizes = [8, 8], strides = [1, 1]} : vector<8x32xf32> to vector<8x8xf32>
    %78 = arith.truncf %77 : vector<8x8xf32> to vector<8x8xbf16>
    %79 = vector.extract_strided_slice %43 {offsets = [0, 8], sizes = [8, 8], strides = [1, 1]} : vector<8x32xf32> to vector<8x8xf32>
    %80 = arith.truncf %79 : vector<8x8xf32> to vector<8x8xbf16>
    %81 = vector.extract_strided_slice %44 {offsets = [0, 8], sizes = [8, 8], strides = [1, 1]} : vector<8x32xf32> to vector<8x8xf32>
    %82 = arith.truncf %81 : vector<8x8xf32> to vector<8x8xbf16>
    %cst_35 = arith.constant dense<0.000000e+00> : vector<8x8xf32>
    %83 = tpu.matmul %78, %80, %cst_35 {dimension_numbers = #tpu.dot_dimension_numbers<[1], [1], [0], [0], [0, 0, 1, 0], [], []>} : vector<8x8xbf16>, vector<8x8xbf16>, vector<8x8xf32> -> vector<8x8xf32>
    %cst_36 = arith.constant 0.353553385 : f32
    %84 = vector.broadcast %cst_36 : f32 to vector<8x8xf32>
    %85 = arith.mulf %83, %84 : vector<8x8xf32>
    %86 = vector.broadcast %33 : vector<1x8xf32> to vector<8x8xf32>
    %87 = arith.addf %85, %86 : vector<8x8xf32>
    %cst_37 = arith.constant dense<0xFF800000> : vector<8xf32>
    %88 = vector.multi_reduction <maximumf>, %87, %cst_37 [1] : vector<8x8xf32> to vector<8xf32>
    %89 = vector.shape_cast %88 : vector<8xf32> to vector<8x1xf32>
    %90 = vector.broadcast %89 : vector<8x1xf32> to vector<8x8xf32>
    %91 = arith.subf %87, %90 : vector<8x8xf32>
    %92 = math.exp %91 : vector<8x8xf32>
    %cst_38 = arith.constant dense<0.000000e+00> : vector<8xf32>
    %93 = vector.multi_reduction <add>, %92, %cst_38 [1] : vector<8x8xf32> to vector<8xf32>
    %94 = vector.shape_cast %93 : vector<8xf32> to vector<8x1xf32>
    %95 = tpu.reciprocal %94 {approx = true} : vector<8x1xf32> -> vector<8x1xf32>
    %96 = vector.broadcast %95 : vector<8x1xf32> to vector<8x8xf32>
    %97 = arith.mulf %92, %96 : vector<8x8xf32>
    %98 = arith.truncf %97 : vector<8x8xf32> to vector<8x8xbf16>
    %cst_39 = arith.constant dense<0.000000e+00> : vector<8x8xf32>
    %99 = tpu.matmul %98, %82, %cst_39 {dimension_numbers = #tpu.dot_dimension_numbers<[1], [0], [0], [1], [0, 0, 1, 1], [], []>} : vector<8x8xbf16>, vector<8x8xbf16>, vector<8x8xf32> -> vector<8x8xf32>
    %100 = arith.truncf %99 : vector<8x8xf32> to vector<8x8xbf16>
    %101 = vector.extract_strided_slice %46 {offsets = [8, 0], sizes = [8, 32], strides = [1, 1]} : vector<32x32xbf16> to vector<8x32xbf16>
    %cst_40 = arith.constant dense<0.000000e+00> : vector<8x32xf32>
    %102 = tpu.matmul %100, %101, %cst_40 {dimension_numbers = #tpu.dot_dimension_numbers<[1], [0], [0], [1], [0, 0, 1, 1], [], []>} : vector<8x8xbf16>, vector<8x32xbf16>, vector<8x32xf32> -> vector<8x32xf32>
    %103 = arith.addf %76, %102 : vector<8x32xf32>
    %104 = vector.extract_strided_slice %42 {offsets = [0, 16], sizes = [8, 8], strides = [1, 1]} : vector<8x32xf32> to vector<8x8xf32>
    %105 = arith.truncf %104 : vector<8x8xf32> to vector<8x8xbf16>
    %106 = vector.extract_strided_slice %43 {offsets = [0, 16], sizes = [8, 8], strides = [1, 1]} : vector<8x32xf32> to vector<8x8xf32>
    %107 = arith.truncf %106 : vector<8x8xf32> to vector<8x8xbf16>
    %108 = vector.extract_strided_slice %44 {offsets = [0, 16], sizes = [8, 8], strides = [1, 1]} : vector<8x32xf32> to vector<8x8xf32>
    %109 = arith.truncf %108 : vector<8x8xf32> to vector<8x8xbf16>
    %cst_41 = arith.constant dense<0.000000e+00> : vector<8x8xf32>
    %110 = tpu.matmul %105, %107, %cst_41 {dimension_numbers = #tpu.dot_dimension_numbers<[1], [1], [0], [0], [0, 0, 1, 0], [], []>} : vector<8x8xbf16>, vector<8x8xbf16>, vector<8x8xf32> -> vector<8x8xf32>
    %cst_42 = arith.constant 0.353553385 : f32
    %111 = vector.broadcast %cst_42 : f32 to vector<8x8xf32>
    %112 = arith.mulf %110, %111 : vector<8x8xf32>
    %113 = vector.broadcast %33 : vector<1x8xf32> to vector<8x8xf32>
    %114 = arith.addf %112, %113 : vector<8x8xf32>
    %cst_43 = arith.constant dense<0xFF800000> : vector<8xf32>
    %115 = vector.multi_reduction <maximumf>, %114, %cst_43 [1] : vector<8x8xf32> to vector<8xf32>
    %116 = vector.shape_cast %115 : vector<8xf32> to vector<8x1xf32>
    %117 = vector.broadcast %116 : vector<8x1xf32> to vector<8x8xf32>
    %118 = arith.subf %114, %117 : vector<8x8xf32>
    %119 = math.exp %118 : vector<8x8xf32>
    %cst_44 = arith.constant dense<0.000000e+00> : vector<8xf32>
    %120 = vector.multi_reduction <add>, %119, %cst_44 [1] : vector<8x8xf32> to vector<8xf32>
    %121 = vector.shape_cast %120 : vector<8xf32> to vector<8x1xf32>
    %122 = tpu.reciprocal %121 {approx = true} : vector<8x1xf32> -> vector<8x1xf32>
    %123 = vector.broadcast %122 : vector<8x1xf32> to vector<8x8xf32>
    %124 = arith.mulf %119, %123 : vector<8x8xf32>
    %125 = arith.truncf %124 : vector<8x8xf32> to vector<8x8xbf16>
    %cst_45 = arith.constant dense<0.000000e+00> : vector<8x8xf32>
    %126 = tpu.matmul %125, %109, %cst_45 {dimension_numbers = #tpu.dot_dimension_numbers<[1], [0], [0], [1], [0, 0, 1, 1], [], []>} : vector<8x8xbf16>, vector<8x8xbf16>, vector<8x8xf32> -> vector<8x8xf32>
    %127 = arith.truncf %126 : vector<8x8xf32> to vector<8x8xbf16>
    %128 = vector.extract_strided_slice %46 {offsets = [16, 0], sizes = [8, 32], strides = [1, 1]} : vector<32x32xbf16> to vector<8x32xbf16>
    %cst_46 = arith.constant dense<0.000000e+00> : vector<8x32xf32>
    %129 = tpu.matmul %127, %128, %cst_46 {dimension_numbers = #tpu.dot_dimension_numbers<[1], [0], [0], [1], [0, 0, 1, 1], [], []>} : vector<8x8xbf16>, vector<8x32xbf16>, vector<8x32xf32> -> vector<8x32xf32>
    %130 = arith.addf %103, %129 : vector<8x32xf32>
    %131 = vector.extract_strided_slice %42 {offsets = [0, 24], sizes = [8, 8], strides = [1, 1]} : vector<8x32xf32> to vector<8x8xf32>
    %132 = arith.truncf %131 : vector<8x8xf32> to vector<8x8xbf16>
    %133 = vector.extract_strided_slice %43 {offsets = [0, 24], sizes = [8, 8], strides = [1, 1]} : vector<8x32xf32> to vector<8x8xf32>
    %134 = arith.truncf %133 : vector<8x8xf32> to vector<8x8xbf16>
    %135 = vector.extract_strided_slice %44 {offsets = [0, 24], sizes = [8, 8], strides = [1, 1]} : vector<8x32xf32> to vector<8x8xf32>
    %136 = arith.truncf %135 : vector<8x8xf32> to vector<8x8xbf16>
    %cst_47 = arith.constant dense<0.000000e+00> : vector<8x8xf32>
    %137 = tpu.matmul %132, %134, %cst_47 {dimension_numbers = #tpu.dot_dimension_numbers<[1], [1], [0], [0], [0, 0, 1, 0], [], []>} : vector<8x8xbf16>, vector<8x8xbf16>, vector<8x8xf32> -> vector<8x8xf32>
    %cst_48 = arith.constant 0.353553385 : f32
    %138 = vector.broadcast %cst_48 : f32 to vector<8x8xf32>
    %139 = arith.mulf %137, %138 : vector<8x8xf32>
    %140 = vector.broadcast %33 : vector<1x8xf32> to vector<8x8xf32>
    %141 = arith.addf %139, %140 : vector<8x8xf32>
    %cst_49 = arith.constant dense<0xFF800000> : vector<8xf32>
    %142 = vector.multi_reduction <maximumf>, %141, %cst_49 [1] : vector<8x8xf32> to vector<8xf32>
    %143 = vector.shape_cast %142 : vector<8xf32> to vector<8x1xf32>
    %144 = vector.broadcast %143 : vector<8x1xf32> to vector<8x8xf32>
    %145 = arith.subf %141, %144 : vector<8x8xf32>
    %146 = math.exp %145 : vector<8x8xf32>
    %cst_50 = arith.constant dense<0.000000e+00> : vector<8xf32>
    %147 = vector.multi_reduction <add>, %146, %cst_50 [1] : vector<8x8xf32> to vector<8xf32>
    %148 = vector.shape_cast %147 : vector<8xf32> to vector<8x1xf32>
    %149 = tpu.reciprocal %148 {approx = true} : vector<8x1xf32> -> vector<8x1xf32>
    %150 = vector.broadcast %149 : vector<8x1xf32> to vector<8x8xf32>
    %151 = arith.mulf %146, %150 : vector<8x8xf32>
    %152 = arith.truncf %151 : vector<8x8xf32> to vector<8x8xbf16>
    %cst_51 = arith.constant dense<0.000000e+00> : vector<8x8xf32>
    %153 = tpu.matmul %152, %136, %cst_51 {dimension_numbers = #tpu.dot_dimension_numbers<[1], [0], [0], [1], [0, 0, 1, 1], [], []>} : vector<8x8xbf16>, vector<8x8xbf16>, vector<8x8xf32> -> vector<8x8xf32>
    %154 = arith.truncf %153 : vector<8x8xf32> to vector<8x8xbf16>
    %155 = vector.extract_strided_slice %46 {offsets = [24, 0], sizes = [8, 32], strides = [1, 1]} : vector<32x32xbf16> to vector<8x32xbf16>
    %cst_52 = arith.constant dense<0.000000e+00> : vector<8x32xf32>
    %156 = tpu.matmul %154, %155, %cst_52 {dimension_numbers = #tpu.dot_dimension_numbers<[1], [0], [0], [1], [0, 0, 1, 1], [], []>} : vector<8x8xbf16>, vector<8x32xbf16>, vector<8x32xf32> -> vector<8x32xf32>
    %157 = arith.addf %130, %156 : vector<8x32xf32>
    %158 = vector.broadcast %48 : vector<1x32xf32> to vector<8x32xf32>
    %159 = arith.addf %157, %158 : vector<8x32xf32>
    %160 = arith.addf %27, %159 : vector<8x32xf32>
    %c0_53 = arith.constant 0 : index
    %c0_54 = arith.constant 0 : index
    %c0_55 = arith.constant 0 : index
    %161 = vector.load %arg9[%c0_53, %c0_54, %c0_55] : memref<2x1x32xf32, #tpu.memory_space<vmem>>, vector<1x1x32xf32>
    %162 = vector.shape_cast %161 : vector<1x1x32xf32> to vector<1x32xf32>
    %c0_56 = arith.constant 0 : index
    %c0_57 = arith.constant 0 : index
    %c0_58 = arith.constant 0 : index
    %163 = vector.load %arg10[%c0_56, %c0_57, %c0_58] : memref<2x1x32xf32, #tpu.memory_space<vmem>>, vector<1x1x32xf32>
    %164 = vector.shape_cast %163 : vector<1x1x32xf32> to vector<1x32xf32>
    %cst_59 = arith.constant dense<0.000000e+00> : vector<8xf32>
    %165 = vector.multi_reduction <add>, %160, %cst_59 [1] : vector<8x32xf32> to vector<8xf32>
    %166 = vector.shape_cast %165 : vector<8xf32> to vector<8x1xf32>
    %cst_60 = arith.constant 3.200000e+01 : f32
    %167 = vector.broadcast %cst_60 : f32 to vector<8x1xf32>
    %168 = arith.divf %166, %167 : vector<8x1xf32>
    %169 = vector.broadcast %168 : vector<8x1xf32> to vector<8x32xf32>
    %170 = arith.subf %160, %169 : vector<8x32xf32>
    %171 = vector.broadcast %168 : vector<8x1xf32> to vector<8x32xf32>
    %172 = arith.subf %160, %171 : vector<8x32xf32>
    %173 = arith.mulf %170, %172 : vector<8x32xf32>
    %cst_61 = arith.constant dense<0.000000e+00> : vector<8xf32>
    %174 = vector.multi_reduction <add>, %173, %cst_61 [1] : vector<8x32xf32> to vector<8xf32>
    %175 = vector.shape_cast %174 : vector<8xf32> to vector<8x1xf32>
    %cst_62 = arith.constant 3.200000e+01 : f32
    %176 = vector.broadcast %cst_62 : f32 to vector<8x1xf32>
    %177 = arith.divf %175, %176 : vector<8x1xf32>
    %178 = vector.broadcast %168 : vector<8x1xf32> to vector<8x32xf32>
    %179 = arith.subf %160, %178 : vector<8x32xf32>
    %cst_63 = arith.constant 9.99999996E-13 : f32
    %180 = vector.broadcast %cst_63 : f32 to vector<8x1xf32>
    %181 = arith.addf %177, %180 : vector<8x1xf32>
    %182 = math.rsqrt %181 : vector<8x1xf32>
    %183 = vector.broadcast %182 : vector<8x1xf32> to vector<8x32xf32>
    %184 = arith.mulf %179, %183 : vector<8x32xf32>
    %185 = vector.broadcast %162 : vector<1x32xf32> to vector<8x32xf32>
    %186 = arith.mulf %184, %185 : vector<8x32xf32>
    %187 = vector.broadcast %164 : vector<1x32xf32> to vector<8x32xf32>
    %188 = arith.addf %186, %187 : vector<8x32xf32>
    %c0_64 = arith.constant 0 : index
    %c0_65 = arith.constant 0 : index
    %c0_66 = arith.constant 0 : index
    %189 = vector.load %arg11[%c0_64, %c0_65, %c0_66] : memref<2x32x64xbf16, #tpu.memory_space<vmem>>, vector<1x32x64xbf16>
    %190 = vector.shape_cast %189 : vector<1x32x64xbf16> to vector<32x64xbf16>
    %c0_67 = arith.constant 0 : index
    %c0_68 = arith.constant 0 : index
    %c0_69 = arith.constant 0 : index
    %191 = vector.load %arg12[%c0_67, %c0_68, %c0_69] : memref<2x1x64xf32, #tpu.memory_space<vmem>>, vector<1x1x64xf32>
    %192 = vector.shape_cast %191 : vector<1x1x64xf32> to vector<1x64xf32>
    %193 = arith.truncf %188 : vector<8x32xf32> to vector<8x32xbf16>
    %cst_70 = arith.constant dense<0.000000e+00> : vector<8x64xf32>
    %194 = tpu.matmul %193, %190, %cst_70 {dimension_numbers = #tpu.dot_dimension_numbers<[1], [0], [0], [1], [0, 0, 1, 1], [], []>} : vector<8x32xbf16>, vector<32x64xbf16>, vector<8x64xf32> -> vector<8x64xf32>
    %195 = vector.broadcast %192 : vector<1x64xf32> to vector<8x64xf32>
    %196 = arith.addf %194, %195 : vector<8x64xf32>
    %cst_71 = arith.constant 5.000000e-01 : f32
    %197 = vector.broadcast %cst_71 : f32 to vector<8x64xf32>
    %198 = arith.mulf %197, %196 : vector<8x64xf32>
    %cst_72 = arith.constant 4.471500e-02 : f32
    %199 = vector.broadcast %cst_72 : f32 to vector<8x64xf32>
    %200 = arith.mulf %199, %196 : vector<8x64xf32>
    %201 = arith.mulf %200, %196 : vector<8x64xf32>
    %202 = arith.mulf %201, %196 : vector<8x64xf32>
    %203 = arith.addf %196, %202 : vector<8x64xf32>
    %cst_73 = arith.constant 0.797884583 : f32
    %204 = vector.broadcast %cst_73 : f32 to vector<8x64xf32>
    %205 = arith.mulf %204, %203 : vector<8x64xf32>
    %206 = math.tanh %205 : vector<8x64xf32>
    %cst_74 = arith.constant 1.000000e+00 : f32
    %207 = vector.broadcast %cst_74 : f32 to vector<8x64xf32>
    %208 = arith.addf %207, %206 : vector<8x64xf32>
    %209 = arith.mulf %198, %208 : vector<8x64xf32>
    %c0_75 = arith.constant 0 : index
    %c0_76 = arith.constant 0 : index
    %c0_77 = arith.constant 0 : index
    %210 = vector.load %arg13[%c0_75, %c0_76, %c0_77] : memref<2x64x32xbf16, #tpu.memory_space<vmem>>, vector<1x64x32xbf16>
    %211 = vector.shape_cast %210 : vector<1x64x32xbf16> to vector<64x32xbf16>
    %c0_78 = arith.constant 0 : index
    %c0_79 = arith.constant 0 : index
    %c0_80 = arith.constant 0 : index
    %212 = vector.load %arg14[%c0_78, %c0_79, %c0_80] : memref<2x1x32xf32, #tpu.memory_space<vmem>>, vector<1x1x32xf32>
    %213 = vector.shape_cast %212 : vector<1x1x32xf32> to vector<1x32xf32>
    %214 = arith.truncf %209 : vector<8x64xf32> to vector<8x64xbf16>
    %cst_81 = arith.constant dense<0.000000e+00> : vector<8x32xf32>
    %215 = tpu.matmul %214, %211, %cst_81 {dimension_numbers = #tpu.dot_dimension_numbers<[1], [0], [0], [1], [0, 0, 1, 1], [], []>} : vector<8x64xbf16>, vector<64x32xbf16>, vector<8x32xf32> -> vector<8x32xf32>
    %216 = vector.broadcast %213 : vector<1x32xf32> to vector<8x32xf32>
    %217 = arith.addf %215, %216 : vector<8x32xf32>
    %218 = arith.addf %188, %217 : vector<8x32xf32>
    %c0_82 = arith.constant 0 : index
    %c0_83 = arith.constant 0 : index
    %c0_84 = arith.constant 0 : index
    %219 = vector.load %arg15[%c0_82, %c0_83, %c0_84] : memref<2x1x32xf32, #tpu.memory_space<vmem>>, vector<1x1x32xf32>
    %220 = vector.shape_cast %219 : vector<1x1x32xf32> to vector<1x32xf32>
    %c0_85 = arith.constant 0 : index
    %c0_86 = arith.constant 0 : index
    %c0_87 = arith.constant 0 : index
    %221 = vector.load %arg16[%c0_85, %c0_86, %c0_87] : memref<2x1x32xf32, #tpu.memory_space<vmem>>, vector<1x1x32xf32>
    %222 = vector.shape_cast %221 : vector<1x1x32xf32> to vector<1x32xf32>
    %cst_88 = arith.constant dense<0.000000e+00> : vector<8xf32>
    %223 = vector.multi_reduction <add>, %218, %cst_88 [1] : vector<8x32xf32> to vector<8xf32>
    %224 = vector.shape_cast %223 : vector<8xf32> to vector<8x1xf32>
    %cst_89 = arith.constant 3.200000e+01 : f32
    %225 = vector.broadcast %cst_89 : f32 to vector<8x1xf32>
    %226 = arith.divf %224, %225 : vector<8x1xf32>
    %227 = vector.broadcast %226 : vector<8x1xf32> to vector<8x32xf32>
    %228 = arith.subf %218, %227 : vector<8x32xf32>
    %229 = vector.broadcast %226 : vector<8x1xf32> to vector<8x32xf32>
    %230 = arith.subf %218, %229 : vector<8x32xf32>
    %231 = arith.mulf %228, %230 : vector<8x32xf32>
    %cst_90 = arith.constant dense<0.000000e+00> : vector<8xf32>
    %232 = vector.multi_reduction <add>, %231, %cst_90 [1] : vector<8x32xf32> to vector<8xf32>
    %233 = vector.shape_cast %232 : vector<8xf32> to vector<8x1xf32>
    %cst_91 = arith.constant 3.200000e+01 : f32
    %234 = vector.broadcast %cst_91 : f32 to vector<8x1xf32>
    %235 = arith.divf %233, %234 : vector<8x1xf32>
    %236 = vector.broadcast %226 : vector<8x1xf32> to vector<8x32xf32>
    %237 = arith.subf %218, %236 : vector<8x32xf32>
    %cst_92 = arith.constant 9.99999996E-13 : f32
    %238 = vector.broadcast %cst_92 : f32 to vector<8x1xf32>
    %239 = arith.addf %235, %238 : vector<8x1xf32>
    %240 = math.rsqrt %239 : vector<8x1xf32>
    %241 = vector.broadcast %240 : vector<8x1xf32> to vector<8x32xf32>
    %242 = arith.mulf %237, %241 : vector<8x32xf32>
    %243 = vector.broadcast %220 : vector<1x32xf32> to vector<8x32xf32>
    %244 = arith.mulf %242, %243 : vector<8x32xf32>
    %245 = vector.broadcast %222 : vector<1x32xf32> to vector<8x32xf32>
    %246 = arith.addf %244, %245 : vector<8x32xf32>
    %c1 = arith.constant 1 : index
    %c0_93 = arith.constant 0 : index
    %c0_94 = arith.constant 0 : index
    %247 = vector.load %arg5[%c1, %c0_93, %c0_94] : memref<2x32x96xbf16, #tpu.memory_space<vmem>>, vector<1x32x96xbf16>
    %248 = vector.shape_cast %247 : vector<1x32x96xbf16> to vector<32x96xbf16>
    %c1_95 = arith.constant 1 : index
    %c0_96 = arith.constant 0 : index
    %c0_97 = arith.constant 0 : index
    %249 = vector.load %arg6[%c1_95, %c0_96, %c0_97] : memref<2x1x96xf32, #tpu.memory_space<vmem>>, vector<1x1x96xf32>
    %250 = vector.shape_cast %249 : vector<1x1x96xf32> to vector<1x96xf32>
    %251 = arith.truncf %246 : vector<8x32xf32> to vector<8x32xbf16>
    %cst_98 = arith.constant dense<0.000000e+00> : vector<8x96xf32>
    %252 = tpu.matmul %251, %248, %cst_98 {dimension_numbers = #tpu.dot_dimension_numbers<[1], [0], [0], [1], [0, 0, 1, 1], [], []>} : vector<8x32xbf16>, vector<32x96xbf16>, vector<8x96xf32> -> vector<8x96xf32>
    %253 = vector.broadcast %250 : vector<1x96xf32> to vector<8x96xf32>
    %254 = arith.addf %252, %253 : vector<8x96xf32>
    %255 = vector.extract_strided_slice %254 {offsets = [0, 0], sizes = [8, 32], strides = [1, 1]} : vector<8x96xf32> to vector<8x32xf32>
    %256 = vector.extract_strided_slice %254 {offsets = [0, 32], sizes = [8, 32], strides = [1, 1]} : vector<8x96xf32> to vector<8x32xf32>
    %257 = vector.extract_strided_slice %254 {offsets = [0, 64], sizes = [8, 32], strides = [1, 1]} : vector<8x96xf32> to vector<8x32xf32>
    %c1_99 = arith.constant 1 : index
    %c0_100 = arith.constant 0 : index
    %c0_101 = arith.constant 0 : index
    %258 = vector.load %arg7[%c1_99, %c0_100, %c0_101] : memref<2x32x32xbf16, #tpu.memory_space<vmem>>, vector<1x32x32xbf16>
    %259 = vector.shape_cast %258 : vector<1x32x32xbf16> to vector<32x32xbf16>
    %c1_102 = arith.constant 1 : index
    %c0_103 = arith.constant 0 : index
    %c0_104 = arith.constant 0 : index
    %260 = vector.load %arg8[%c1_102, %c0_103, %c0_104] : memref<2x1x32xf32, #tpu.memory_space<vmem>>, vector<1x1x32xf32>
    %261 = vector.shape_cast %260 : vector<1x1x32xf32> to vector<1x32xf32>
    %cst_105 = arith.constant 0.000000e+00 : f32
    %262 = vector.broadcast %cst_105 : f32 to vector<8x32xf32>
    %263 = vector.extract_strided_slice %255 {offsets = [0, 0], sizes = [8, 8], strides = [1, 1]} : vector<8x32xf32> to vector<8x8xf32>
    %264 = arith.truncf %263 : vector<8x8xf32> to vector<8x8xbf16>
    %265 = vector.extract_strided_slice %256 {offsets = [0, 0], sizes = [8, 8], strides = [1, 1]} : vector<8x32xf32> to vector<8x8xf32>
    %266 = arith.truncf %265 : vector<8x8xf32> to vector<8x8xbf16>
    %267 = vector.extract_strided_slice %257 {offsets = [0, 0], sizes = [8, 8], strides = [1, 1]} : vector<8x32xf32> to vector<8x8xf32>
    %268 = arith.truncf %267 : vector<8x8xf32> to vector<8x8xbf16>
    %cst_106 = arith.constant dense<0.000000e+00> : vector<8x8xf32>
    %269 = tpu.matmul %264, %266, %cst_106 {dimension_numbers = #tpu.dot_dimension_numbers<[1], [1], [0], [0], [0, 0, 1, 0], [], []>} : vector<8x8xbf16>, vector<8x8xbf16>, vector<8x8xf32> -> vector<8x8xf32>
    %cst_107 = arith.constant 0.353553385 : f32
    %270 = vector.broadcast %cst_107 : f32 to vector<8x8xf32>
    %271 = arith.mulf %269, %270 : vector<8x8xf32>
    %272 = vector.broadcast %33 : vector<1x8xf32> to vector<8x8xf32>
    %273 = arith.addf %271, %272 : vector<8x8xf32>
    %cst_108 = arith.constant dense<0xFF800000> : vector<8xf32>
    %274 = vector.multi_reduction <maximumf>, %273, %cst_108 [1] : vector<8x8xf32> to vector<8xf32>
    %275 = vector.shape_cast %274 : vector<8xf32> to vector<8x1xf32>
    %276 = vector.broadcast %275 : vector<8x1xf32> to vector<8x8xf32>
    %277 = arith.subf %273, %276 : vector<8x8xf32>
    %278 = math.exp %277 : vector<8x8xf32>
    %cst_109 = arith.constant dense<0.000000e+00> : vector<8xf32>
    %279 = vector.multi_reduction <add>, %278, %cst_109 [1] : vector<8x8xf32> to vector<8xf32>
    %280 = vector.shape_cast %279 : vector<8xf32> to vector<8x1xf32>
    %281 = tpu.reciprocal %280 {approx = true} : vector<8x1xf32> -> vector<8x1xf32>
    %282 = vector.broadcast %281 : vector<8x1xf32> to vector<8x8xf32>
    %283 = arith.mulf %278, %282 : vector<8x8xf32>
    %284 = arith.truncf %283 : vector<8x8xf32> to vector<8x8xbf16>
    %cst_110 = arith.constant dense<0.000000e+00> : vector<8x8xf32>
    %285 = tpu.matmul %284, %268, %cst_110 {dimension_numbers = #tpu.dot_dimension_numbers<[1], [0], [0], [1], [0, 0, 1, 1], [], []>} : vector<8x8xbf16>, vector<8x8xbf16>, vector<8x8xf32> -> vector<8x8xf32>
    %286 = arith.truncf %285 : vector<8x8xf32> to vector<8x8xbf16>
    %287 = vector.extract_strided_slice %259 {offsets = [0, 0], sizes = [8, 32], strides = [1, 1]} : vector<32x32xbf16> to vector<8x32xbf16>
    %cst_111 = arith.constant dense<0.000000e+00> : vector<8x32xf32>
    %288 = tpu.matmul %286, %287, %cst_111 {dimension_numbers = #tpu.dot_dimension_numbers<[1], [0], [0], [1], [0, 0, 1, 1], [], []>} : vector<8x8xbf16>, vector<8x32xbf16>, vector<8x32xf32> -> vector<8x32xf32>
    %289 = arith.addf %262, %288 : vector<8x32xf32>
    %290 = vector.extract_strided_slice %255 {offsets = [0, 8], sizes = [8, 8], strides = [1, 1]} : vector<8x32xf32> to vector<8x8xf32>
    %291 = arith.truncf %290 : vector<8x8xf32> to vector<8x8xbf16>
    %292 = vector.extract_strided_slice %256 {offsets = [0, 8], sizes = [8, 8], strides = [1, 1]} : vector<8x32xf32> to vector<8x8xf32>
    %293 = arith.truncf %292 : vector<8x8xf32> to vector<8x8xbf16>
    %294 = vector.extract_strided_slice %257 {offsets = [0, 8], sizes = [8, 8], strides = [1, 1]} : vector<8x32xf32> to vector<8x8xf32>
    %295 = arith.truncf %294 : vector<8x8xf32> to vector<8x8xbf16>
    %cst_112 = arith.constant dense<0.000000e+00> : vector<8x8xf32>
    %296 = tpu.matmul %291, %293, %cst_112 {dimension_numbers = #tpu.dot_dimension_numbers<[1], [1], [0], [0], [0, 0, 1, 0], [], []>} : vector<8x8xbf16>, vector<8x8xbf16>, vector<8x8xf32> -> vector<8x8xf32>
    %cst_113 = arith.constant 0.353553385 : f32
    %297 = vector.broadcast %cst_113 : f32 to vector<8x8xf32>
    %298 = arith.mulf %296, %297 : vector<8x8xf32>
    %299 = vector.broadcast %33 : vector<1x8xf32> to vector<8x8xf32>
    %300 = arith.addf %298, %299 : vector<8x8xf32>
    %cst_114 = arith.constant dense<0xFF800000> : vector<8xf32>
    %301 = vector.multi_reduction <maximumf>, %300, %cst_114 [1] : vector<8x8xf32> to vector<8xf32>
    %302 = vector.shape_cast %301 : vector<8xf32> to vector<8x1xf32>
    %303 = vector.broadcast %302 : vector<8x1xf32> to vector<8x8xf32>
    %304 = arith.subf %300, %303 : vector<8x8xf32>
    %305 = math.exp %304 : vector<8x8xf32>
    %cst_115 = arith.constant dense<0.000000e+00> : vector<8xf32>
    %306 = vector.multi_reduction <add>, %305, %cst_115 [1] : vector<8x8xf32> to vector<8xf32>
    %307 = vector.shape_cast %306 : vector<8xf32> to vector<8x1xf32>
    %308 = tpu.reciprocal %307 {approx = true} : vector<8x1xf32> -> vector<8x1xf32>
    %309 = vector.broadcast %308 : vector<8x1xf32> to vector<8x8xf32>
    %310 = arith.mulf %305, %309 : vector<8x8xf32>
    %311 = arith.truncf %310 : vector<8x8xf32> to vector<8x8xbf16>
    %cst_116 = arith.constant dense<0.000000e+00> : vector<8x8xf32>
    %312 = tpu.matmul %311, %295, %cst_116 {dimension_numbers = #tpu.dot_dimension_numbers<[1], [0], [0], [1], [0, 0, 1, 1], [], []>} : vector<8x8xbf16>, vector<8x8xbf16>, vector<8x8xf32> -> vector<8x8xf32>
    %313 = arith.truncf %312 : vector<8x8xf32> to vector<8x8xbf16>
    %314 = vector.extract_strided_slice %259 {offsets = [8, 0], sizes = [8, 32], strides = [1, 1]} : vector<32x32xbf16> to vector<8x32xbf16>
    %cst_117 = arith.constant dense<0.000000e+00> : vector<8x32xf32>
    %315 = tpu.matmul %313, %314, %cst_117 {dimension_numbers = #tpu.dot_dimension_numbers<[1], [0], [0], [1], [0, 0, 1, 1], [], []>} : vector<8x8xbf16>, vector<8x32xbf16>, vector<8x32xf32> -> vector<8x32xf32>
    %316 = arith.addf %289, %315 : vector<8x32xf32>
    %317 = vector.extract_strided_slice %255 {offsets = [0, 16], sizes = [8, 8], strides = [1, 1]} : vector<8x32xf32> to vector<8x8xf32>
    %318 = arith.truncf %317 : vector<8x8xf32> to vector<8x8xbf16>
    %319 = vector.extract_strided_slice %256 {offsets = [0, 16], sizes = [8, 8], strides = [1, 1]} : vector<8x32xf32> to vector<8x8xf32>
    %320 = arith.truncf %319 : vector<8x8xf32> to vector<8x8xbf16>
    %321 = vector.extract_strided_slice %257 {offsets = [0, 16], sizes = [8, 8], strides = [1, 1]} : vector<8x32xf32> to vector<8x8xf32>
    %322 = arith.truncf %321 : vector<8x8xf32> to vector<8x8xbf16>
    %cst_118 = arith.constant dense<0.000000e+00> : vector<8x8xf32>
    %323 = tpu.matmul %318, %320, %cst_118 {dimension_numbers = #tpu.dot_dimension_numbers<[1], [1], [0], [0], [0, 0, 1, 0], [], []>} : vector<8x8xbf16>, vector<8x8xbf16>, vector<8x8xf32> -> vector<8x8xf32>
    %cst_119 = arith.constant 0.353553385 : f32
    %324 = vector.broadcast %cst_119 : f32 to vector<8x8xf32>
    %325 = arith.mulf %323, %324 : vector<8x8xf32>
    %326 = vector.broadcast %33 : vector<1x8xf32> to vector<8x8xf32>
    %327 = arith.addf %325, %326 : vector<8x8xf32>
    %cst_120 = arith.constant dense<0xFF800000> : vector<8xf32>
    %328 = vector.multi_reduction <maximumf>, %327, %cst_120 [1] : vector<8x8xf32> to vector<8xf32>
    %329 = vector.shape_cast %328 : vector<8xf32> to vector<8x1xf32>
    %330 = vector.broadcast %329 : vector<8x1xf32> to vector<8x8xf32>
    %331 = arith.subf %327, %330 : vector<8x8xf32>
    %332 = math.exp %331 : vector<8x8xf32>
    %cst_121 = arith.constant dense<0.000000e+00> : vector<8xf32>
    %333 = vector.multi_reduction <add>, %332, %cst_121 [1] : vector<8x8xf32> to vector<8xf32>
    %334 = vector.shape_cast %333 : vector<8xf32> to vector<8x1xf32>
    %335 = tpu.reciprocal %334 {approx = true} : vector<8x1xf32> -> vector<8x1xf32>
    %336 = vector.broadcast %335 : vector<8x1xf32> to vector<8x8xf32>
    %337 = arith.mulf %332, %336 : vector<8x8xf32>
    %338 = arith.truncf %337 : vector<8x8xf32> to vector<8x8xbf16>
    %cst_122 = arith.constant dense<0.000000e+00> : vector<8x8xf32>
    %339 = tpu.matmul %338, %322, %cst_122 {dimension_numbers = #tpu.dot_dimension_numbers<[1], [0], [0], [1], [0, 0, 1, 1], [], []>} : vector<8x8xbf16>, vector<8x8xbf16>, vector<8x8xf32> -> vector<8x8xf32>
    %340 = arith.truncf %339 : vector<8x8xf32> to vector<8x8xbf16>
    %341 = vector.extract_strided_slice %259 {offsets = [16, 0], sizes = [8, 32], strides = [1, 1]} : vector<32x32xbf16> to vector<8x32xbf16>
    %cst_123 = arith.constant dense<0.000000e+00> : vector<8x32xf32>
    %342 = tpu.matmul %340, %341, %cst_123 {dimension_numbers = #tpu.dot_dimension_numbers<[1], [0], [0], [1], [0, 0, 1, 1], [], []>} : vector<8x8xbf16>, vector<8x32xbf16>, vector<8x32xf32> -> vector<8x32xf32>
    %343 = arith.addf %316, %342 : vector<8x32xf32>
    %344 = vector.extract_strided_slice %255 {offsets = [0, 24], sizes = [8, 8], strides = [1, 1]} : vector<8x32xf32> to vector<8x8xf32>
    %345 = arith.truncf %344 : vector<8x8xf32> to vector<8x8xbf16>
    %346 = vector.extract_strided_slice %256 {offsets = [0, 24], sizes = [8, 8], strides = [1, 1]} : vector<8x32xf32> to vector<8x8xf32>
    %347 = arith.truncf %346 : vector<8x8xf32> to vector<8x8xbf16>
    %348 = vector.extract_strided_slice %257 {offsets = [0, 24], sizes = [8, 8], strides = [1, 1]} : vector<8x32xf32> to vector<8x8xf32>
    %349 = arith.truncf %348 : vector<8x8xf32> to vector<8x8xbf16>
    %cst_124 = arith.constant dense<0.000000e+00> : vector<8x8xf32>
    %350 = tpu.matmul %345, %347, %cst_124 {dimension_numbers = #tpu.dot_dimension_numbers<[1], [1], [0], [0], [0, 0, 1, 0], [], []>} : vector<8x8xbf16>, vector<8x8xbf16>, vector<8x8xf32> -> vector<8x8xf32>
    %cst_125 = arith.constant 0.353553385 : f32
    %351 = vector.broadcast %cst_125 : f32 to vector<8x8xf32>
    %352 = arith.mulf %350, %351 : vector<8x8xf32>
    %353 = vector.broadcast %33 : vector<1x8xf32> to vector<8x8xf32>
    %354 = arith.addf %352, %353 : vector<8x8xf32>
    %cst_126 = arith.constant dense<0xFF800000> : vector<8xf32>
    %355 = vector.multi_reduction <maximumf>, %354, %cst_126 [1] : vector<8x8xf32> to vector<8xf32>
    %356 = vector.shape_cast %355 : vector<8xf32> to vector<8x1xf32>
    %357 = vector.broadcast %356 : vector<8x1xf32> to vector<8x8xf32>
    %358 = arith.subf %354, %357 : vector<8x8xf32>
    %359 = math.exp %358 : vector<8x8xf32>
    %cst_127 = arith.constant dense<0.000000e+00> : vector<8xf32>
    %360 = vector.multi_reduction <add>, %359, %cst_127 [1] : vector<8x8xf32> to vector<8xf32>
    %361 = vector.shape_cast %360 : vector<8xf32> to vector<8x1xf32>
    %362 = tpu.reciprocal %361 {approx = true} : vector<8x1xf32> -> vector<8x1xf32>
    %363 = vector.broadcast %362 : vector<8x1xf32> to vector<8x8xf32>
    %364 = arith.mulf %359, %363 : vector<8x8xf32>
    %365 = arith.truncf %364 : vector<8x8xf32> to vector<8x8xbf16>
    %cst_128 = arith.constant dense<0.000000e+00> : vector<8x8xf32>
    %366 = tpu.matmul %365, %349, %cst_128 {dimension_numbers = #tpu.dot_dimension_numbers<[1], [0], [0], [1], [0, 0, 1, 1], [], []>} : vector<8x8xbf16>, vector<8x8xbf16>, vector<8x8xf32> -> vector<8x8xf32>
    %367 = arith.truncf %366 : vector<8x8xf32> to vector<8x8xbf16>
    %368 = vector.extract_strided_slice %259 {offsets = [24, 0], sizes = [8, 32], strides = [1, 1]} : vector<32x32xbf16> to vector<8x32xbf16>
    %cst_129 = arith.constant dense<0.000000e+00> : vector<8x32xf32>
    %369 = tpu.matmul %367, %368, %cst_129 {dimension_numbers = #tpu.dot_dimension_numbers<[1], [0], [0], [1], [0, 0, 1, 1], [], []>} : vector<8x8xbf16>, vector<8x32xbf16>, vector<8x32xf32> -> vector<8x32xf32>
    %370 = arith.addf %343, %369 : vector<8x32xf32>
    %371 = vector.broadcast %261 : vector<1x32xf32> to vector<8x32xf32>
    %372 = arith.addf %370, %371 : vector<8x32xf32>
    %373 = arith.addf %246, %372 : vector<8x32xf32>
    %c1_130 = arith.constant 1 : index
    %c0_131 = arith.constant 0 : index
    %c0_132 = arith.constant 0 : index
    %374 = vector.load %arg9[%c1_130, %c0_131, %c0_132] : memref<2x1x32xf32, #tpu.memory_space<vmem>>, vector<1x1x32xf32>
    %375 = vector.shape_cast %374 : vector<1x1x32xf32> to vector<1x32xf32>
    %c1_133 = arith.constant 1 : index
    %c0_134 = arith.constant 0 : index
    %c0_135 = arith.constant 0 : index
    %376 = vector.load %arg10[%c1_133, %c0_134, %c0_135] : memref<2x1x32xf32, #tpu.memory_space<vmem>>, vector<1x1x32xf32>
    %377 = vector.shape_cast %376 : vector<1x1x32xf32> to vector<1x32xf32>
    %cst_136 = arith.constant dense<0.000000e+00> : vector<8xf32>
    %378 = vector.multi_reduction <add>, %373, %cst_136 [1] : vector<8x32xf32> to vector<8xf32>
    %379 = vector.shape_cast %378 : vector<8xf32> to vector<8x1xf32>
    %cst_137 = arith.constant 3.200000e+01 : f32
    %380 = vector.broadcast %cst_137 : f32 to vector<8x1xf32>
    %381 = arith.divf %379, %380 : vector<8x1xf32>
    %382 = vector.broadcast %381 : vector<8x1xf32> to vector<8x32xf32>
    %383 = arith.subf %373, %382 : vector<8x32xf32>
    %384 = vector.broadcast %381 : vector<8x1xf32> to vector<8x32xf32>
    %385 = arith.subf %373, %384 : vector<8x32xf32>
    %386 = arith.mulf %383, %385 : vector<8x32xf32>
    %cst_138 = arith.constant dense<0.000000e+00> : vector<8xf32>
    %387 = vector.multi_reduction <add>, %386, %cst_138 [1] : vector<8x32xf32> to vector<8xf32>
    %388 = vector.shape_cast %387 : vector<8xf32> to vector<8x1xf32>
    %cst_139 = arith.constant 3.200000e+01 : f32
    %389 = vector.broadcast %cst_139 : f32 to vector<8x1xf32>
    %390 = arith.divf %388, %389 : vector<8x1xf32>
    %391 = vector.broadcast %381 : vector<8x1xf32> to vector<8x32xf32>
    %392 = arith.subf %373, %391 : vector<8x32xf32>
    %cst_140 = arith.constant 9.99999996E-13 : f32
    %393 = vector.broadcast %cst_140 : f32 to vector<8x1xf32>
    %394 = arith.addf %390, %393 : vector<8x1xf32>
    %395 = math.rsqrt %394 : vector<8x1xf32>
    %396 = vector.broadcast %395 : vector<8x1xf32> to vector<8x32xf32>
    %397 = arith.mulf %392, %396 : vector<8x32xf32>
    %398 = vector.broadcast %375 : vector<1x32xf32> to vector<8x32xf32>
    %399 = arith.mulf %397, %398 : vector<8x32xf32>
    %400 = vector.broadcast %377 : vector<1x32xf32> to vector<8x32xf32>
    %401 = arith.addf %399, %400 : vector<8x32xf32>
    %c1_141 = arith.constant 1 : index
    %c0_142 = arith.constant 0 : index
    %c0_143 = arith.constant 0 : index
    %402 = vector.load %arg11[%c1_141, %c0_142, %c0_143] : memref<2x32x64xbf16, #tpu.memory_space<vmem>>, vector<1x32x64xbf16>
    %403 = vector.shape_cast %402 : vector<1x32x64xbf16> to vector<32x64xbf16>
    %c1_144 = arith.constant 1 : index
    %c0_145 = arith.constant 0 : index
    %c0_146 = arith.constant 0 : index
    %404 = vector.load %arg12[%c1_144, %c0_145, %c0_146] : memref<2x1x64xf32, #tpu.memory_space<vmem>>, vector<1x1x64xf32>
    %405 = vector.shape_cast %404 : vector<1x1x64xf32> to vector<1x64xf32>
    %406 = arith.truncf %401 : vector<8x32xf32> to vector<8x32xbf16>
    %cst_147 = arith.constant dense<0.000000e+00> : vector<8x64xf32>
    %407 = tpu.matmul %406, %403, %cst_147 {dimension_numbers = #tpu.dot_dimension_numbers<[1], [0], [0], [1], [0, 0, 1, 1], [], []>} : vector<8x32xbf16>, vector<32x64xbf16>, vector<8x64xf32> -> vector<8x64xf32>
    %408 = vector.broadcast %405 : vector<1x64xf32> to vector<8x64xf32>
    %409 = arith.addf %407, %408 : vector<8x64xf32>
    %cst_148 = arith.constant 5.000000e-01 : f32
    %410 = vector.broadcast %cst_148 : f32 to vector<8x64xf32>
    %411 = arith.mulf %410, %409 : vector<8x64xf32>
    %cst_149 = arith.constant 4.471500e-02 : f32
    %412 = vector.broadcast %cst_149 : f32 to vector<8x64xf32>
    %413 = arith.mulf %412, %409 : vector<8x64xf32>
    %414 = arith.mulf %413, %409 : vector<8x64xf32>
    %415 = arith.mulf %414, %409 : vector<8x64xf32>
    %416 = arith.addf %409, %415 : vector<8x64xf32>
    %cst_150 = arith.constant 0.797884583 : f32
    %417 = vector.broadcast %cst_150 : f32 to vector<8x64xf32>
    %418 = arith.mulf %417, %416 : vector<8x64xf32>
    %419 = math.tanh %418 : vector<8x64xf32>
    %cst_151 = arith.constant 1.000000e+00 : f32
    %420 = vector.broadcast %cst_151 : f32 to vector<8x64xf32>
    %421 = arith.addf %420, %419 : vector<8x64xf32>
    %422 = arith.mulf %411, %421 : vector<8x64xf32>
    %c1_152 = arith.constant 1 : index
    %c0_153 = arith.constant 0 : index
    %c0_154 = arith.constant 0 : index
    %423 = vector.load %arg13[%c1_152, %c0_153, %c0_154] : memref<2x64x32xbf16, #tpu.memory_space<vmem>>, vector<1x64x32xbf16>
    %424 = vector.shape_cast %423 : vector<1x64x32xbf16> to vector<64x32xbf16>
    %c1_155 = arith.constant 1 : index
    %c0_156 = arith.constant 0 : index
    %c0_157 = arith.constant 0 : index
    %425 = vector.load %arg14[%c1_155, %c0_156, %c0_157] : memref<2x1x32xf32, #tpu.memory_space<vmem>>, vector<1x1x32xf32>
    %426 = vector.shape_cast %425 : vector<1x1x32xf32> to vector<1x32xf32>
    %427 = arith.truncf %422 : vector<8x64xf32> to vector<8x64xbf16>
    %cst_158 = arith.constant dense<0.000000e+00> : vector<8x32xf32>
    %428 = tpu.matmul %427, %424, %cst_158 {dimension_numbers = #tpu.dot_dimension_numbers<[1], [0], [0], [1], [0, 0, 1, 1], [], []>} : vector<8x64xbf16>, vector<64x32xbf16>, vector<8x32xf32> -> vector<8x32xf32>
    %429 = vector.broadcast %426 : vector<1x32xf32> to vector<8x32xf32>
    %430 = arith.addf %428, %429 : vector<8x32xf32>
    %431 = arith.addf %401, %430 : vector<8x32xf32>
    %c1_159 = arith.constant 1 : index
    %c0_160 = arith.constant 0 : index
    %c0_161 = arith.constant 0 : index
    %432 = vector.load %arg15[%c1_159, %c0_160, %c0_161] : memref<2x1x32xf32, #tpu.memory_space<vmem>>, vector<1x1x32xf32>
    %433 = vector.shape_cast %432 : vector<1x1x32xf32> to vector<1x32xf32>
    %c1_162 = arith.constant 1 : index
    %c0_163 = arith.constant 0 : index
    %c0_164 = arith.constant 0 : index
    %434 = vector.load %arg16[%c1_162, %c0_163, %c0_164] : memref<2x1x32xf32, #tpu.memory_space<vmem>>, vector<1x1x32xf32>
    %435 = vector.shape_cast %434 : vector<1x1x32xf32> to vector<1x32xf32>
    %cst_165 = arith.constant dense<0.000000e+00> : vector<8xf32>
    %436 = vector.multi_reduction <add>, %431, %cst_165 [1] : vector<8x32xf32> to vector<8xf32>
    %437 = vector.shape_cast %436 : vector<8xf32> to vector<8x1xf32>
    %cst_166 = arith.constant 3.200000e+01 : f32
    %438 = vector.broadcast %cst_166 : f32 to vector<8x1xf32>
    %439 = arith.divf %437, %438 : vector<8x1xf32>
    %440 = vector.broadcast %439 : vector<8x1xf32> to vector<8x32xf32>
    %441 = arith.subf %431, %440 : vector<8x32xf32>
    %442 = vector.broadcast %439 : vector<8x1xf32> to vector<8x32xf32>
    %443 = arith.subf %431, %442 : vector<8x32xf32>
    %444 = arith.mulf %441, %443 : vector<8x32xf32>
    %cst_167 = arith.constant dense<0.000000e+00> : vector<8xf32>
    %445 = vector.multi_reduction <add>, %444, %cst_167 [1] : vector<8x32xf32> to vector<8xf32>
    %446 = vector.shape_cast %445 : vector<8xf32> to vector<8x1xf32>
    %cst_168 = arith.constant 3.200000e+01 : f32
    %447 = vector.broadcast %cst_168 : f32 to vector<8x1xf32>
    %448 = arith.divf %446, %447 : vector<8x1xf32>
    %449 = vector.broadcast %439 : vector<8x1xf32> to vector<8x32xf32>
    %450 = arith.subf %431, %449 : vector<8x32xf32>
    %cst_169 = arith.constant 9.99999996E-13 : f32
    %451 = vector.broadcast %cst_169 : f32 to vector<8x1xf32>
    %452 = arith.addf %448, %451 : vector<8x1xf32>
    %453 = math.rsqrt %452 : vector<8x1xf32>
    %454 = vector.broadcast %453 : vector<8x1xf32> to vector<8x32xf32>
    %455 = arith.mulf %450, %454 : vector<8x32xf32>
    %456 = vector.broadcast %433 : vector<1x32xf32> to vector<8x32xf32>
    %457 = arith.mulf %455, %456 : vector<8x32xf32>
    %458 = vector.broadcast %435 : vector<1x32xf32> to vector<8x32xf32>
    %459 = arith.addf %457, %458 : vector<8x32xf32>
    %c0_170 = arith.constant 0 : index
    %c0_171 = arith.constant 0 : index
    %c0_172 = arith.constant 0 : index
    %460 = vector.load %arg17[%c0_170, %c0_171, %c0_172] : memref<1x8x32xf32, #tpu.memory_space<vmem>>, vector<1x8x32xf32>
    %461 = vector.shape_cast %460 : vector<1x8x32xf32> to vector<8x32xf32>
    %462 = vector.shape_cast %459 : vector<8x32xf32> to vector<1x8x32xf32>
    tpu.vector_store %arg17[%c0_170, %c0_171, %c0_172], %462 {strides = array<i32>} : memref<1x8x32xf32, #tpu.memory_space<vmem>>, vector<1x8x32xf32>,
    return
  }
  func.func @transform_0(%arg0: i32) -> (i32, i32, i32) {
    %c0_i32 = arith.constant 0 : i32
    %c0_i32_0 = arith.constant 0 : i32
    %c0_i32_1 = arith.constant 0 : i32
    return %arg0, %c0_i32, %c0_i32_0 : i32, i32, i32
  }
  func.func @transform_1(%arg0: i32) -> (i32, i32, i32) {
    %c0_i32 = arith.constant 0 : i32
    %c0_i32_0 = arith.constant 0 : i32
    %c0_i32_1 = arith.constant 0 : i32
    return %arg0, %c0_i32, %c0_i32_0 : i32, i32, i32
  }
  func.func @transform_2(%arg0: i32) -> (i32, i32) {
    %c0_i32 = arith.constant 0 : i32
    %c0_i32_0 = arith.constant 0 : i32
    %c0_i32_1 = arith.constant 0 : i32
    return %c0_i32, %c0_i32_0 : i32, i32
  }
  func.func @transform_3(%arg0: i32) -> (i32, i32) {
    %c0_i32 = arith.constant 0 : i32
    %c0_i32_0 = arith.constant 0 : i32
    %c0_i32_1 = arith.constant 0 : i32
    return %c0_i32, %c0_i32_0 : i32, i32
  }
  func.func @transform_4(%arg0: i32) -> (i32, i32, i32) {
    %c0_i32 = arith.constant 0 : i32
    %c0_i32_0 = arith.constant 0 : i32
    %c0_i32_1 = arith.constant 0 : i32
    %c0_i32_2 = arith.constant 0 : i32
    return %c0_i32, %c0_i32_0, %c0_i32_1 : i32, i32, i32
  }
  func.func @transform_5(%arg0: i32) -> (i32, i32, i32) {
    %c0_i32 = arith.constant 0 : i32
    %c0_i32_0 = arith.constant 0 : i32
    %c0_i32_1 = arith.constant 0 : i32
    %c0_i32_2 = arith.constant 0 : i32
    return %c0_i32, %c0_i32_0, %c0_i32_1 : i32, i32, i32
  }
  func.func @transform_6(%arg0: i32) -> (i32, i32, i32) {
    %c0_i32 = arith.constant 0 : i32
    %c0_i32_0 = arith.constant 0 : i32
    %c0_i32_1 = arith.constant 0 : i32
    %c0_i32_2 = arith.constant 0 : i32
    return %c0_i32, %c0_i32_0, %c0_i32_1 : i32, i32, i32
  }
  func.func @transform_7(%arg0: i32) -> (i32, i32, i32) {
    %c0_i32 = arith.constant 0 : i32
    %c0_i32_0 = arith.constant 0 : i32
    %c0_i32_1 = arith.constant 0 : i32
    %c0_i32_2 = arith.constant 0 : i32
    return %c0_i32, %c0_i32_0, %c0_i32_1 : i32, i32, i32
  }
  func.func @transform_8(%arg0: i32) -> (i32, i32, i32) {
    %c0_i32 = arith.constant 0 : i32
    %c0_i32_0 = arith.constant 0 : i32
    %c0_i32_1 = arith.constant 0 : i32
    %c0_i32_2 = arith.constant 0 : i32
    return %c0_i32, %c0_i32_0, %c0_i32_1 : i32, i32, i32
  }
  func.func @transform_9(%arg0: i32) -> (i32, i32, i32) {
    %c0_i32 = arith.constant 0 : i32
    %c0_i32_0 = arith.constant 0 : i32
    %c0_i32_1 = arith.constant 0 : i32
    %c0_i32_2 = arith.constant 0 : i32
    return %c0_i32, %c0_i32_0, %c0_i32_1 : i32, i32, i32
  }
  func.func @transform_10(%arg0: i32) -> (i32, i32, i32) {
    %c0_i32 = arith.constant 0 : i32
    %c0_i32_0 = arith.constant 0 : i32
    %c0_i32_1 = arith.constant 0 : i32
    %c0_i32_2 = arith.constant 0 : i32
    return %c0_i32, %c0_i32_0, %c0_i32_1 : i32, i32, i32
  }
  func.func @transform_11(%arg0: i32) -> (i32, i32, i32) {
    %c0_i32 = arith.constant 0 : i32
    %c0_i32_0 = arith.constant 0 : i32
    %c0_i32_1 = arith.constant 0 : i32
    %c0_i32_2 = arith.constant 0 : i32
    return %c0_i32, %c0_i32_0, %c0_i32_1 : i32, i32, i32
  }
  func.func @transform_12(%arg0: i32) -> (i32, i32, i32) {
    %c0_i32 = arith.constant 0 : i32
    %c0_i32_0 = arith.constant 0 : i32
    %c0_i32_1 = arith.constant 0 : i32
    %c0_i32_2 = arith.constant 0 : i32
    return %c0_i32, %c0_i32_0, %c0_i32_1 : i32, i32, i32
  }
  func.func @transform_13(%arg0: i32) -> (i32, i32, i32) {
    %c0_i32 = arith.constant 0 : i32
    %c0_i32_0 = arith.constant 0 : i32
    %c0_i32_1 = arith.constant 0 : i32
    %c0_i32_2 = arith.constant 0 : i32
    return %c0_i32, %c0_i32_0, %c0_i32_1 : i32, i32, i32
  }
  func.func @transform_14(%arg0: i32) -> (i32, i32, i32) {
    %c0_i32 = arith.constant 0 : i32
    %c0_i32_0 = arith.constant 0 : i32
    %c0_i32_1 = arith.constant 0 : i32
    %c0_i32_2 = arith.constant 0 : i32
    return %c0_i32, %c0_i32_0, %c0_i32_1 : i32, i32, i32
  }
  func.func @transform_15(%arg0: i32) -> (i32, i32, i32) {
    %c0_i32 = arith.constant 0 : i32
    %c0_i32_0 = arith.constant 0 : i32
    %c0_i32_1 = arith.constant 0 : i32
    %c0_i32_2 = arith.constant 0 : i32
    return %c0_i32, %c0_i32_0, %c0_i32_1 : i32, i32, i32
  }
  func.func @transform_16(%arg0: i32) -> (i32, i32, i32) {
    %c0_i32 = arith.constant 0 : i32
    %c0_i32_0 = arith.constant 0 : i32
    %c0_i32_1 = arith.constant 0 : i32
    return %arg0, %c0_i32, %c0_i32_0 : i32, i32, i32
  }
}

module attributes {stable_mosaic.version = 11 : i64} {
  func.func @_decoder_stack_kernel(%arg0: i32, %arg1: memref<1x7x32xf32, #tpu.memory_space<vmem>>, %arg2: memref<1x8x32xf32, #tpu.memory_space<vmem>>, %arg3: memref<1x1x8xf32, #tpu.memory_space<vmem>>, %arg4: memref<1x32xf32, #tpu.memory_space<vmem>>, %arg5: memref<1x32xf32, #tpu.memory_space<vmem>>, %arg6: memref<3x32x96xbf16, #tpu.memory_space<vmem>>, %arg7: memref<3x1x96xf32, #tpu.memory_space<vmem>>, %arg8: memref<3x32x32xbf16, #tpu.memory_space<vmem>>, %arg9: memref<3x1x32xf32, #tpu.memory_space<vmem>>, %arg10: memref<3x1x32xf32, #tpu.memory_space<vmem>>, %arg11: memref<3x1x32xf32, #tpu.memory_space<vmem>>, %arg12: memref<3x32x32xbf16, #tpu.memory_space<vmem>>, %arg13: memref<3x1x32xf32, #tpu.memory_space<vmem>>, %arg14: memref<3x32x64xbf16, #tpu.memory_space<vmem>>, %arg15: memref<3x1x64xf32, #tpu.memory_space<vmem>>, %arg16: memref<3x32x32xbf16, #tpu.memory_space<vmem>>, %arg17: memref<3x1x32xf32, #tpu.memory_space<vmem>>, %arg18: memref<3x1x32xf32, #tpu.memory_space<vmem>>, %arg19: memref<3x1x32xf32, #tpu.memory_space<vmem>>, %arg20: memref<3x32x128xbf16, #tpu.memory_space<vmem>>, %arg21: memref<3x1x128xf32, #tpu.memory_space<vmem>>, %arg22: memref<3x128x32xbf16, #tpu.memory_space<vmem>>, %arg23: memref<3x1x32xf32, #tpu.memory_space<vmem>>, %arg24: memref<3x1x32xf32, #tpu.memory_space<vmem>>, %arg25: memref<3x1x32xf32, #tpu.memory_space<vmem>>, %arg26: memref<32x128xbf16, #tpu.memory_space<vmem>>, %arg27: memref<1x128xf32, #tpu.memory_space<vmem>>, %arg28: memref<1x7x128xf32, #tpu.memory_space<vmem>>) attributes {dimension_semantics = [#tpu.dimension_semantics<parallel>], iteration_bounds = array<i64: 2>, scalar_prefetch = 0 : i64, scratch_operands = 0 : i64, tpu.core_type = #tpu.core_type<tc>, window_params = [{transform_indices = @transform_0, window_bounds = array<i64: 1, 7, 32>}, {transform_indices = @transform_1, window_bounds = array<i64: 1, 8, 32>}, {transform_indices = @transform_2, window_bounds = array<i64: 1, 1, 8>}, {pipeline_mode = #tpu.pipeline_mode<synchronous>, transform_indices = @transform_3, window_bounds = array<i64: 1, 32>}, {pipeline_mode = #tpu.pipeline_mode<synchronous>, transform_indices = @transform_4, window_bounds = array<i64: 1, 32>}, {pipeline_mode = #tpu.pipeline_mode<synchronous>, transform_indices = @transform_5, window_bounds = array<i64: 3, 32, 96>}, {pipeline_mode = #tpu.pipeline_mode<synchronous>, transform_indices = @transform_6, window_bounds = array<i64: 3, 1, 96>}, {pipeline_mode = #tpu.pipeline_mode<synchronous>, transform_indices = @transform_7, window_bounds = array<i64: 3, 32, 32>}, {pipeline_mode = #tpu.pipeline_mode<synchronous>, transform_indices = @transform_8, window_bounds = array<i64: 3, 1, 32>}, {pipeline_mode = #tpu.pipeline_mode<synchronous>, transform_indices = @transform_9, window_bounds = array<i64: 3, 1, 32>}, {pipeline_mode = #tpu.pipeline_mode<synchronous>, transform_indices = @transform_10, window_bounds = array<i64: 3, 1, 32>}, {pipeline_mode = #tpu.pipeline_mode<synchronous>, transform_indices = @transform_11, window_bounds = array<i64: 3, 32, 32>}, {pipeline_mode = #tpu.pipeline_mode<synchronous>, transform_indices = @transform_12, window_bounds = array<i64: 3, 1, 32>}, {pipeline_mode = #tpu.pipeline_mode<synchronous>, transform_indices = @transform_13, window_bounds = array<i64: 3, 32, 64>}, {pipeline_mode = #tpu.pipeline_mode<synchronous>, transform_indices = @transform_14, window_bounds = array<i64: 3, 1, 64>}, {pipeline_mode = #tpu.pipeline_mode<synchronous>, transform_indices = @transform_15, window_bounds = array<i64: 3, 32, 32>}, {pipeline_mode = #tpu.pipeline_mode<synchronous>, transform_indices = @transform_16, window_bounds = array<i64: 3, 1, 32>}, {pipeline_mode = #tpu.pipeline_mode<synchronous>, transform_indices = @transform_17, window_bounds = array<i64: 3, 1, 32>}, {pipeline_mode = #tpu.pipeline_mode<synchronous>, transform_indices = @transform_18, window_bounds = array<i64: 3, 1, 32>}, {pipeline_mode = #tpu.pipeline_mode<synchronous>, transform_indices = @transform_19, window_bounds = array<i64: 3, 32, 128>}, {pipeline_mode = #tpu.pipeline_mode<synchronous>, transform_indices = @transform_20, window_bounds = array<i64: 3, 1, 128>}, {pipeline_mode = #tpu.pipeline_mode<synchronous>, transform_indices = @transform_21, window_bounds = array<i64: 3, 128, 32>}, {pipeline_mode = #tpu.pipeline_mode<synchronous>, transform_indices = @transform_22, window_bounds = array<i64: 3, 1, 32>}, {pipeline_mode = #tpu.pipeline_mode<synchronous>, transform_indices = @transform_23, window_bounds = array<i64: 3, 1, 32>}, {pipeline_mode = #tpu.pipeline_mode<synchronous>, transform_indices = @transform_24, window_bounds = array<i64: 3, 1, 32>}, {pipeline_mode = #tpu.pipeline_mode<synchronous>, transform_indices = @transform_25, window_bounds = array<i64: 32, 128>}, {pipeline_mode = #tpu.pipeline_mode<synchronous>, transform_indices = @transform_26, window_bounds = array<i64: 1, 128>}, {transform_indices = @transform_27, window_bounds = array<i64: 1, 7, 128>}]} {
    %c0 = arith.constant 0 : index
    %c0_0 = arith.constant 0 : index
    %c0_1 = arith.constant 0 : index
    %0 = vector.load %arg1[%c0, %c0_0, %c0_1] : memref<1x7x32xf32, #tpu.memory_space<vmem>>, vector<1x7x32xf32>
    %1 = vector.shape_cast %0 : vector<1x7x32xf32> to vector<7x32xf32>
    %c0_2 = arith.constant 0 : index
    %c0_3 = arith.constant 0 : index
    %2 = vector.load %arg4[%c0_2, %c0_3] : memref<1x32xf32, #tpu.memory_space<vmem>>, vector<1x32xf32>
    %c0_4 = arith.constant 0 : index
    %c0_5 = arith.constant 0 : index
    %3 = vector.load %arg5[%c0_4, %c0_5] : memref<1x32xf32, #tpu.memory_space<vmem>>, vector<1x32xf32>
    %cst = arith.constant dense<0.000000e+00> : vector<7xf32>
    %4 = vector.multi_reduction <add>, %1, %cst [1] : vector<7x32xf32> to vector<7xf32>
    %5 = vector.shape_cast %4 : vector<7xf32> to vector<7x1xf32>
    %cst_6 = arith.constant 3.200000e+01 : f32
    %6 = vector.broadcast %cst_6 : f32 to vector<7x1xf32>
    %7 = arith.divf %5, %6 : vector<7x1xf32>
    %8 = vector.broadcast %7 : vector<7x1xf32> to vector<7x32xf32>
    %9 = arith.subf %1, %8 : vector<7x32xf32>
    %10 = vector.broadcast %7 : vector<7x1xf32> to vector<7x32xf32>
    %11 = arith.subf %1, %10 : vector<7x32xf32>
    %12 = arith.mulf %9, %11 : vector<7x32xf32>
    %cst_7 = arith.constant dense<0.000000e+00> : vector<7xf32>
    %13 = vector.multi_reduction <add>, %12, %cst_7 [1] : vector<7x32xf32> to vector<7xf32>
    %14 = vector.shape_cast %13 : vector<7xf32> to vector<7x1xf32>
    %cst_8 = arith.constant 3.200000e+01 : f32
    %15 = vector.broadcast %cst_8 : f32 to vector<7x1xf32>
    %16 = arith.divf %14, %15 : vector<7x1xf32>
    %17 = vector.broadcast %7 : vector<7x1xf32> to vector<7x32xf32>
    %18 = arith.subf %1, %17 : vector<7x32xf32>
    %cst_9 = arith.constant 9.99999996E-13 : f32
    %19 = vector.broadcast %cst_9 : f32 to vector<7x1xf32>
    %20 = arith.addf %16, %19 : vector<7x1xf32>
    %21 = math.rsqrt %20 : vector<7x1xf32>
    %22 = vector.broadcast %21 : vector<7x1xf32> to vector<7x32xf32>
    %23 = arith.mulf %18, %22 : vector<7x32xf32>
    %24 = vector.broadcast %2 : vector<1x32xf32> to vector<7x32xf32>
    %25 = arith.mulf %23, %24 : vector<7x32xf32>
    %26 = vector.broadcast %3 : vector<1x32xf32> to vector<7x32xf32>
    %27 = arith.addf %25, %26 : vector<7x32xf32>
    %c0_10 = arith.constant 0 : index
    %c0_11 = arith.constant 0 : index
    %c0_12 = arith.constant 0 : index
    %28 = vector.load %arg2[%c0_10, %c0_11, %c0_12] : memref<1x8x32xf32, #tpu.memory_space<vmem>>, vector<1x8x32xf32>
    %29 = vector.shape_cast %28 : vector<1x8x32xf32> to vector<8x32xf32>
    %30 = tpu.iota {dimensions = array<i32: 0>} : vector<7x7xi32>
    %31 = tpu.iota {dimensions = array<i32: 1>} : vector<7x7xi32>
    %32 = arith.cmpi sge, %30, %31 : vector<7x7xi32>
    %cst_13 = arith.constant 0.000000e+00 : f32
    %cst_14 = arith.constant -1.000000e+09 : f32
    %33 = vector.broadcast %cst_13 : f32 to vector<7x7xf32>
    %34 = vector.broadcast %cst_14 : f32 to vector<7x7xf32>
    %35 = arith.select %32, %33, %34 : vector<7x7xi1>, vector<7x7xf32>
    %c0_15 = arith.constant 0 : index
    %c0_16 = arith.constant 0 : index
    %c0_17 = arith.constant 0 : index
    %36 = vector.load %arg3[%c0_15, %c0_16, %c0_17] : memref<1x1x8xf32, #tpu.memory_space<vmem>>, vector<1x1x8xf32>
    %37 = vector.shape_cast %36 : vector<1x1x8xf32> to vector<1x8xf32>
    %cst_18 = arith.constant 1.000000e+00 : f32
    %38 = vector.broadcast %cst_18 : f32 to vector<1x8xf32>
    %39 = arith.subf %37, %38 : vector<1x8xf32>
    %cst_19 = arith.constant 1.000000e+09 : f32
    %40 = vector.broadcast %cst_19 : f32 to vector<1x8xf32>
    %41 = arith.mulf %39, %40 : vector<1x8xf32>
    %c0_20 = arith.constant 0 : index
    %c0_21 = arith.constant 0 : index
    %c0_22 = arith.constant 0 : index
    %42 = vector.load %arg6[%c0_20, %c0_21, %c0_22] : memref<3x32x96xbf16, #tpu.memory_space<vmem>>, vector<1x32x96xbf16>
    %43 = vector.shape_cast %42 : vector<1x32x96xbf16> to vector<32x96xbf16>
    %c0_23 = arith.constant 0 : index
    %c0_24 = arith.constant 0 : index
    %c0_25 = arith.constant 0 : index
    %44 = vector.load %arg7[%c0_23, %c0_24, %c0_25] : memref<3x1x96xf32, #tpu.memory_space<vmem>>, vector<1x1x96xf32>
    %45 = vector.shape_cast %44 : vector<1x1x96xf32> to vector<1x96xf32>
    %46 = arith.truncf %27 : vector<7x32xf32> to vector<7x32xbf16>
    %cst_26 = arith.constant dense<0.000000e+00> : vector<7x96xf32>
    %47 = tpu.matmul %46, %43, %cst_26 {dimension_numbers = #tpu.dot_dimension_numbers<[1], [0], [0], [1], [0, 0, 1, 1], [], []>} : vector<7x32xbf16>, vector<32x96xbf16>, vector<7x96xf32> -> vector<7x96xf32>
    %48 = vector.broadcast %45 : vector<1x96xf32> to vector<7x96xf32>
    %49 = arith.addf %47, %48 : vector<7x96xf32>
    %50 = vector.extract_strided_slice %49 {offsets = [0, 0], sizes = [7, 32], strides = [1, 1]} : vector<7x96xf32> to vector<7x32xf32>
    %51 = vector.extract_strided_slice %49 {offsets = [0, 32], sizes = [7, 32], strides = [1, 1]} : vector<7x96xf32> to vector<7x32xf32>
    %52 = vector.extract_strided_slice %49 {offsets = [0, 64], sizes = [7, 32], strides = [1, 1]} : vector<7x96xf32> to vector<7x32xf32>
    %c0_27 = arith.constant 0 : index
    %c0_28 = arith.constant 0 : index
    %c0_29 = arith.constant 0 : index
    %53 = vector.load %arg8[%c0_27, %c0_28, %c0_29] : memref<3x32x32xbf16, #tpu.memory_space<vmem>>, vector<1x32x32xbf16>
    %54 = vector.shape_cast %53 : vector<1x32x32xbf16> to vector<32x32xbf16>
    %c0_30 = arith.constant 0 : index
    %c0_31 = arith.constant 0 : index
    %c0_32 = arith.constant 0 : index
    %55 = vector.load %arg9[%c0_30, %c0_31, %c0_32] : memref<3x1x32xf32, #tpu.memory_space<vmem>>, vector<1x1x32xf32>
    %56 = vector.shape_cast %55 : vector<1x1x32xf32> to vector<1x32xf32>
    %cst_33 = arith.constant 0.000000e+00 : f32
    %57 = vector.broadcast %cst_33 : f32 to vector<7x32xf32>
    %58 = vector.extract_strided_slice %50 {offsets = [0, 0], sizes = [7, 8], strides = [1, 1]} : vector<7x32xf32> to vector<7x8xf32>
    %59 = arith.truncf %58 : vector<7x8xf32> to vector<7x8xbf16>
    %60 = vector.extract_strided_slice %51 {offsets = [0, 0], sizes = [7, 8], strides = [1, 1]} : vector<7x32xf32> to vector<7x8xf32>
    %61 = arith.truncf %60 : vector<7x8xf32> to vector<7x8xbf16>
    %62 = vector.extract_strided_slice %52 {offsets = [0, 0], sizes = [7, 8], strides = [1, 1]} : vector<7x32xf32> to vector<7x8xf32>
    %63 = arith.truncf %62 : vector<7x8xf32> to vector<7x8xbf16>
    %cst_34 = arith.constant dense<0.000000e+00> : vector<7x7xf32>
    %64 = tpu.matmul %59, %61, %cst_34 {dimension_numbers = #tpu.dot_dimension_numbers<[1], [1], [0], [0], [0, 0, 1, 0], [], []>} : vector<7x8xbf16>, vector<7x8xbf16>, vector<7x7xf32> -> vector<7x7xf32>
    %cst_35 = arith.constant 0.353553385 : f32
    %65 = vector.broadcast %cst_35 : f32 to vector<7x7xf32>
    %66 = arith.mulf %64, %65 : vector<7x7xf32>
    %67 = arith.addf %66, %35 : vector<7x7xf32>
    %cst_36 = arith.constant dense<0xFF800000> : vector<7xf32>
    %68 = vector.multi_reduction <maximumf>, %67, %cst_36 [1] : vector<7x7xf32> to vector<7xf32>
    %69 = vector.shape_cast %68 : vector<7xf32> to vector<7x1xf32>
    %70 = vector.broadcast %69 : vector<7x1xf32> to vector<7x7xf32>
    %71 = arith.subf %67, %70 : vector<7x7xf32>
    %72 = math.exp %71 : vector<7x7xf32>
    %cst_37 = arith.constant dense<0.000000e+00> : vector<7xf32>
    %73 = vector.multi_reduction <add>, %72, %cst_37 [1] : vector<7x7xf32> to vector<7xf32>
    %74 = vector.shape_cast %73 : vector<7xf32> to vector<7x1xf32>
    %75 = tpu.reciprocal %74 {approx = true} : vector<7x1xf32> -> vector<7x1xf32>
    %76 = vector.broadcast %75 : vector<7x1xf32> to vector<7x7xf32>
    %77 = arith.mulf %72, %76 : vector<7x7xf32>
    %78 = arith.truncf %77 : vector<7x7xf32> to vector<7x7xbf16>
    %cst_38 = arith.constant dense<0.000000e+00> : vector<7x8xf32>
    %79 = tpu.matmul %78, %63, %cst_38 {dimension_numbers = #tpu.dot_dimension_numbers<[1], [0], [0], [1], [0, 0, 1, 1], [], []>} : vector<7x7xbf16>, vector<7x8xbf16>, vector<7x8xf32> -> vector<7x8xf32>
    %80 = arith.truncf %79 : vector<7x8xf32> to vector<7x8xbf16>
    %81 = vector.extract_strided_slice %54 {offsets = [0, 0], sizes = [8, 32], strides = [1, 1]} : vector<32x32xbf16> to vector<8x32xbf16>
    %cst_39 = arith.constant dense<0.000000e+00> : vector<7x32xf32>
    %82 = tpu.matmul %80, %81, %cst_39 {dimension_numbers = #tpu.dot_dimension_numbers<[1], [0], [0], [1], [0, 0, 1, 1], [], []>} : vector<7x8xbf16>, vector<8x32xbf16>, vector<7x32xf32> -> vector<7x32xf32>
    %83 = arith.addf %57, %82 : vector<7x32xf32>
    %84 = vector.extract_strided_slice %50 {offsets = [0, 8], sizes = [7, 8], strides = [1, 1]} : vector<7x32xf32> to vector<7x8xf32>
    %85 = arith.truncf %84 : vector<7x8xf32> to vector<7x8xbf16>
    %86 = vector.extract_strided_slice %51 {offsets = [0, 8], sizes = [7, 8], strides = [1, 1]} : vector<7x32xf32> to vector<7x8xf32>
    %87 = arith.truncf %86 : vector<7x8xf32> to vector<7x8xbf16>
    %88 = vector.extract_strided_slice %52 {offsets = [0, 8], sizes = [7, 8], strides = [1, 1]} : vector<7x32xf32> to vector<7x8xf32>
    %89 = arith.truncf %88 : vector<7x8xf32> to vector<7x8xbf16>
    %cst_40 = arith.constant dense<0.000000e+00> : vector<7x7xf32>
    %90 = tpu.matmul %85, %87, %cst_40 {dimension_numbers = #tpu.dot_dimension_numbers<[1], [1], [0], [0], [0, 0, 1, 0], [], []>} : vector<7x8xbf16>, vector<7x8xbf16>, vector<7x7xf32> -> vector<7x7xf32>
    %cst_41 = arith.constant 0.353553385 : f32
    %91 = vector.broadcast %cst_41 : f32 to vector<7x7xf32>
    %92 = arith.mulf %90, %91 : vector<7x7xf32>
    %93 = arith.addf %92, %35 : vector<7x7xf32>
    %cst_42 = arith.constant dense<0xFF800000> : vector<7xf32>
    %94 = vector.multi_reduction <maximumf>, %93, %cst_42 [1] : vector<7x7xf32> to vector<7xf32>
    %95 = vector.shape_cast %94 : vector<7xf32> to vector<7x1xf32>
    %96 = vector.broadcast %95 : vector<7x1xf32> to vector<7x7xf32>
    %97 = arith.subf %93, %96 : vector<7x7xf32>
    %98 = math.exp %97 : vector<7x7xf32>
    %cst_43 = arith.constant dense<0.000000e+00> : vector<7xf32>
    %99 = vector.multi_reduction <add>, %98, %cst_43 [1] : vector<7x7xf32> to vector<7xf32>
    %100 = vector.shape_cast %99 : vector<7xf32> to vector<7x1xf32>
    %101 = tpu.reciprocal %100 {approx = true} : vector<7x1xf32> -> vector<7x1xf32>
    %102 = vector.broadcast %101 : vector<7x1xf32> to vector<7x7xf32>
    %103 = arith.mulf %98, %102 : vector<7x7xf32>
    %104 = arith.truncf %103 : vector<7x7xf32> to vector<7x7xbf16>
    %cst_44 = arith.constant dense<0.000000e+00> : vector<7x8xf32>
    %105 = tpu.matmul %104, %89, %cst_44 {dimension_numbers = #tpu.dot_dimension_numbers<[1], [0], [0], [1], [0, 0, 1, 1], [], []>} : vector<7x7xbf16>, vector<7x8xbf16>, vector<7x8xf32> -> vector<7x8xf32>
    %106 = arith.truncf %105 : vector<7x8xf32> to vector<7x8xbf16>
    %107 = vector.extract_strided_slice %54 {offsets = [8, 0], sizes = [8, 32], strides = [1, 1]} : vector<32x32xbf16> to vector<8x32xbf16>
    %cst_45 = arith.constant dense<0.000000e+00> : vector<7x32xf32>
    %108 = tpu.matmul %106, %107, %cst_45 {dimension_numbers = #tpu.dot_dimension_numbers<[1], [0], [0], [1], [0, 0, 1, 1], [], []>} : vector<7x8xbf16>, vector<8x32xbf16>, vector<7x32xf32> -> vector<7x32xf32>
    %109 = arith.addf %83, %108 : vector<7x32xf32>
    %110 = vector.extract_strided_slice %50 {offsets = [0, 16], sizes = [7, 8], strides = [1, 1]} : vector<7x32xf32> to vector<7x8xf32>
    %111 = arith.truncf %110 : vector<7x8xf32> to vector<7x8xbf16>
    %112 = vector.extract_strided_slice %51 {offsets = [0, 16], sizes = [7, 8], strides = [1, 1]} : vector<7x32xf32> to vector<7x8xf32>
    %113 = arith.truncf %112 : vector<7x8xf32> to vector<7x8xbf16>
    %114 = vector.extract_strided_slice %52 {offsets = [0, 16], sizes = [7, 8], strides = [1, 1]} : vector<7x32xf32> to vector<7x8xf32>
    %115 = arith.truncf %114 : vector<7x8xf32> to vector<7x8xbf16>
    %cst_46 = arith.constant dense<0.000000e+00> : vector<7x7xf32>
    %116 = tpu.matmul %111, %113, %cst_46 {dimension_numbers = #tpu.dot_dimension_numbers<[1], [1], [0], [0], [0, 0, 1, 0], [], []>} : vector<7x8xbf16>, vector<7x8xbf16>, vector<7x7xf32> -> vector<7x7xf32>
    %cst_47 = arith.constant 0.353553385 : f32
    %117 = vector.broadcast %cst_47 : f32 to vector<7x7xf32>
    %118 = arith.mulf %116, %117 : vector<7x7xf32>
    %119 = arith.addf %118, %35 : vector<7x7xf32>
    %cst_48 = arith.constant dense<0xFF800000> : vector<7xf32>
    %120 = vector.multi_reduction <maximumf>, %119, %cst_48 [1] : vector<7x7xf32> to vector<7xf32>
    %121 = vector.shape_cast %120 : vector<7xf32> to vector<7x1xf32>
    %122 = vector.broadcast %121 : vector<7x1xf32> to vector<7x7xf32>
    %123 = arith.subf %119, %122 : vector<7x7xf32>
    %124 = math.exp %123 : vector<7x7xf32>
    %cst_49 = arith.constant dense<0.000000e+00> : vector<7xf32>
    %125 = vector.multi_reduction <add>, %124, %cst_49 [1] : vector<7x7xf32> to vector<7xf32>
    %126 = vector.shape_cast %125 : vector<7xf32> to vector<7x1xf32>
    %127 = tpu.reciprocal %126 {approx = true} : vector<7x1xf32> -> vector<7x1xf32>
    %128 = vector.broadcast %127 : vector<7x1xf32> to vector<7x7xf32>
    %129 = arith.mulf %124, %128 : vector<7x7xf32>
    %130 = arith.truncf %129 : vector<7x7xf32> to vector<7x7xbf16>
    %cst_50 = arith.constant dense<0.000000e+00> : vector<7x8xf32>
    %131 = tpu.matmul %130, %115, %cst_50 {dimension_numbers = #tpu.dot_dimension_numbers<[1], [0], [0], [1], [0, 0, 1, 1], [], []>} : vector<7x7xbf16>, vector<7x8xbf16>, vector<7x8xf32> -> vector<7x8xf32>
    %132 = arith.truncf %131 : vector<7x8xf32> to vector<7x8xbf16>
    %133 = vector.extract_strided_slice %54 {offsets = [16, 0], sizes = [8, 32], strides = [1, 1]} : vector<32x32xbf16> to vector<8x32xbf16>
    %cst_51 = arith.constant dense<0.000000e+00> : vector<7x32xf32>
    %134 = tpu.matmul %132, %133, %cst_51 {dimension_numbers = #tpu.dot_dimension_numbers<[1], [0], [0], [1], [0, 0, 1, 1], [], []>} : vector<7x8xbf16>, vector<8x32xbf16>, vector<7x32xf32> -> vector<7x32xf32>
    %135 = arith.addf %109, %134 : vector<7x32xf32>
    %136 = vector.extract_strided_slice %50 {offsets = [0, 24], sizes = [7, 8], strides = [1, 1]} : vector<7x32xf32> to vector<7x8xf32>
    %137 = arith.truncf %136 : vector<7x8xf32> to vector<7x8xbf16>
    %138 = vector.extract_strided_slice %51 {offsets = [0, 24], sizes = [7, 8], strides = [1, 1]} : vector<7x32xf32> to vector<7x8xf32>
    %139 = arith.truncf %138 : vector<7x8xf32> to vector<7x8xbf16>
    %140 = vector.extract_strided_slice %52 {offsets = [0, 24], sizes = [7, 8], strides = [1, 1]} : vector<7x32xf32> to vector<7x8xf32>
    %141 = arith.truncf %140 : vector<7x8xf32> to vector<7x8xbf16>
    %cst_52 = arith.constant dense<0.000000e+00> : vector<7x7xf32>
    %142 = tpu.matmul %137, %139, %cst_52 {dimension_numbers = #tpu.dot_dimension_numbers<[1], [1], [0], [0], [0, 0, 1, 0], [], []>} : vector<7x8xbf16>, vector<7x8xbf16>, vector<7x7xf32> -> vector<7x7xf32>
    %cst_53 = arith.constant 0.353553385 : f32
    %143 = vector.broadcast %cst_53 : f32 to vector<7x7xf32>
    %144 = arith.mulf %142, %143 : vector<7x7xf32>
    %145 = arith.addf %144, %35 : vector<7x7xf32>
    %cst_54 = arith.constant dense<0xFF800000> : vector<7xf32>
    %146 = vector.multi_reduction <maximumf>, %145, %cst_54 [1] : vector<7x7xf32> to vector<7xf32>
    %147 = vector.shape_cast %146 : vector<7xf32> to vector<7x1xf32>
    %148 = vector.broadcast %147 : vector<7x1xf32> to vector<7x7xf32>
    %149 = arith.subf %145, %148 : vector<7x7xf32>
    %150 = math.exp %149 : vector<7x7xf32>
    %cst_55 = arith.constant dense<0.000000e+00> : vector<7xf32>
    %151 = vector.multi_reduction <add>, %150, %cst_55 [1] : vector<7x7xf32> to vector<7xf32>
    %152 = vector.shape_cast %151 : vector<7xf32> to vector<7x1xf32>
    %153 = tpu.reciprocal %152 {approx = true} : vector<7x1xf32> -> vector<7x1xf32>
    %154 = vector.broadcast %153 : vector<7x1xf32> to vector<7x7xf32>
    %155 = arith.mulf %150, %154 : vector<7x7xf32>
    %156 = arith.truncf %155 : vector<7x7xf32> to vector<7x7xbf16>
    %cst_56 = arith.constant dense<0.000000e+00> : vector<7x8xf32>
    %157 = tpu.matmul %156, %141, %cst_56 {dimension_numbers = #tpu.dot_dimension_numbers<[1], [0], [0], [1], [0, 0, 1, 1], [], []>} : vector<7x7xbf16>, vector<7x8xbf16>, vector<7x8xf32> -> vector<7x8xf32>
    %158 = arith.truncf %157 : vector<7x8xf32> to vector<7x8xbf16>
    %159 = vector.extract_strided_slice %54 {offsets = [24, 0], sizes = [8, 32], strides = [1, 1]} : vector<32x32xbf16> to vector<8x32xbf16>
    %cst_57 = arith.constant dense<0.000000e+00> : vector<7x32xf32>
    %160 = tpu.matmul %158, %159, %cst_57 {dimension_numbers = #tpu.dot_dimension_numbers<[1], [0], [0], [1], [0, 0, 1, 1], [], []>} : vector<7x8xbf16>, vector<8x32xbf16>, vector<7x32xf32> -> vector<7x32xf32>
    %161 = arith.addf %135, %160 : vector<7x32xf32>
    %162 = vector.broadcast %56 : vector<1x32xf32> to vector<7x32xf32>
    %163 = arith.addf %161, %162 : vector<7x32xf32>
    %164 = arith.addf %27, %163 : vector<7x32xf32>
    %c0_58 = arith.constant 0 : index
    %c0_59 = arith.constant 0 : index
    %c0_60 = arith.constant 0 : index
    %165 = vector.load %arg10[%c0_58, %c0_59, %c0_60] : memref<3x1x32xf32, #tpu.memory_space<vmem>>, vector<1x1x32xf32>
    %166 = vector.shape_cast %165 : vector<1x1x32xf32> to vector<1x32xf32>
    %c0_61 = arith.constant 0 : index
    %c0_62 = arith.constant 0 : index
    %c0_63 = arith.constant 0 : index
    %167 = vector.load %arg11[%c0_61, %c0_62, %c0_63] : memref<3x1x32xf32, #tpu.memory_space<vmem>>, vector<1x1x32xf32>
    %168 = vector.shape_cast %167 : vector<1x1x32xf32> to vector<1x32xf32>
    %cst_64 = arith.constant dense<0.000000e+00> : vector<7xf32>
    %169 = vector.multi_reduction <add>, %164, %cst_64 [1] : vector<7x32xf32> to vector<7xf32>
    %170 = vector.shape_cast %169 : vector<7xf32> to vector<7x1xf32>
    %cst_65 = arith.constant 3.200000e+01 : f32
    %171 = vector.broadcast %cst_65 : f32 to vector<7x1xf32>
    %172 = arith.divf %170, %171 : vector<7x1xf32>
    %173 = vector.broadcast %172 : vector<7x1xf32> to vector<7x32xf32>
    %174 = arith.subf %164, %173 : vector<7x32xf32>
    %175 = vector.broadcast %172 : vector<7x1xf32> to vector<7x32xf32>
    %176 = arith.subf %164, %175 : vector<7x32xf32>
    %177 = arith.mulf %174, %176 : vector<7x32xf32>
    %cst_66 = arith.constant dense<0.000000e+00> : vector<7xf32>
    %178 = vector.multi_reduction <add>, %177, %cst_66 [1] : vector<7x32xf32> to vector<7xf32>
    %179 = vector.shape_cast %178 : vector<7xf32> to vector<7x1xf32>
    %cst_67 = arith.constant 3.200000e+01 : f32
    %180 = vector.broadcast %cst_67 : f32 to vector<7x1xf32>
    %181 = arith.divf %179, %180 : vector<7x1xf32>
    %182 = vector.broadcast %172 : vector<7x1xf32> to vector<7x32xf32>
    %183 = arith.subf %164, %182 : vector<7x32xf32>
    %cst_68 = arith.constant 9.99999996E-13 : f32
    %184 = vector.broadcast %cst_68 : f32 to vector<7x1xf32>
    %185 = arith.addf %181, %184 : vector<7x1xf32>
    %186 = math.rsqrt %185 : vector<7x1xf32>
    %187 = vector.broadcast %186 : vector<7x1xf32> to vector<7x32xf32>
    %188 = arith.mulf %183, %187 : vector<7x32xf32>
    %189 = vector.broadcast %166 : vector<1x32xf32> to vector<7x32xf32>
    %190 = arith.mulf %188, %189 : vector<7x32xf32>
    %191 = vector.broadcast %168 : vector<1x32xf32> to vector<7x32xf32>
    %192 = arith.addf %190, %191 : vector<7x32xf32>
    %c0_69 = arith.constant 0 : index
    %c0_70 = arith.constant 0 : index
    %c0_71 = arith.constant 0 : index
    %193 = vector.load %arg12[%c0_69, %c0_70, %c0_71] : memref<3x32x32xbf16, #tpu.memory_space<vmem>>, vector<1x32x32xbf16>
    %194 = vector.shape_cast %193 : vector<1x32x32xbf16> to vector<32x32xbf16>
    %c0_72 = arith.constant 0 : index
    %c0_73 = arith.constant 0 : index
    %c0_74 = arith.constant 0 : index
    %195 = vector.load %arg13[%c0_72, %c0_73, %c0_74] : memref<3x1x32xf32, #tpu.memory_space<vmem>>, vector<1x1x32xf32>
    %196 = vector.shape_cast %195 : vector<1x1x32xf32> to vector<1x32xf32>
    %197 = arith.truncf %192 : vector<7x32xf32> to vector<7x32xbf16>
    %cst_75 = arith.constant dense<0.000000e+00> : vector<7x32xf32>
    %198 = tpu.matmul %197, %194, %cst_75 {dimension_numbers = #tpu.dot_dimension_numbers<[1], [0], [0], [1], [0, 0, 1, 1], [], []>} : vector<7x32xbf16>, vector<32x32xbf16>, vector<7x32xf32> -> vector<7x32xf32>
    %199 = vector.broadcast %196 : vector<1x32xf32> to vector<7x32xf32>
    %200 = arith.addf %198, %199 : vector<7x32xf32>
    %c0_76 = arith.constant 0 : index
    %c0_77 = arith.constant 0 : index
    %c0_78 = arith.constant 0 : index
    %201 = vector.load %arg14[%c0_76, %c0_77, %c0_78] : memref<3x32x64xbf16, #tpu.memory_space<vmem>>, vector<1x32x64xbf16>
    %202 = vector.shape_cast %201 : vector<1x32x64xbf16> to vector<32x64xbf16>
    %c0_79 = arith.constant 0 : index
    %c0_80 = arith.constant 0 : index
    %c0_81 = arith.constant 0 : index
    %203 = vector.load %arg15[%c0_79, %c0_80, %c0_81] : memref<3x1x64xf32, #tpu.memory_space<vmem>>, vector<1x1x64xf32>
    %204 = vector.shape_cast %203 : vector<1x1x64xf32> to vector<1x64xf32>
    %205 = arith.truncf %29 : vector<8x32xf32> to vector<8x32xbf16>
    %cst_82 = arith.constant dense<0.000000e+00> : vector<8x64xf32>
    %206 = tpu.matmul %205, %202, %cst_82 {dimension_numbers = #tpu.dot_dimension_numbers<[1], [0], [0], [1], [0, 0, 1, 1], [], []>} : vector<8x32xbf16>, vector<32x64xbf16>, vector<8x64xf32> -> vector<8x64xf32>
    %207 = vector.broadcast %204 : vector<1x64xf32> to vector<8x64xf32>
    %208 = arith.addf %206, %207 : vector<8x64xf32>
    %209 = vector.extract_strided_slice %208 {offsets = [0, 0], sizes = [8, 32], strides = [1, 1]} : vector<8x64xf32> to vector<8x32xf32>
    %210 = vector.extract_strided_slice %208 {offsets = [0, 32], sizes = [8, 32], strides = [1, 1]} : vector<8x64xf32> to vector<8x32xf32>
    %c0_83 = arith.constant 0 : index
    %c0_84 = arith.constant 0 : index
    %c0_85 = arith.constant 0 : index
    %211 = vector.load %arg16[%c0_83, %c0_84, %c0_85] : memref<3x32x32xbf16, #tpu.memory_space<vmem>>, vector<1x32x32xbf16>
    %212 = vector.shape_cast %211 : vector<1x32x32xbf16> to vector<32x32xbf16>
    %c0_86 = arith.constant 0 : index
    %c0_87 = arith.constant 0 : index
    %c0_88 = arith.constant 0 : index
    %213 = vector.load %arg17[%c0_86, %c0_87, %c0_88] : memref<3x1x32xf32, #tpu.memory_space<vmem>>, vector<1x1x32xf32>
    %214 = vector.shape_cast %213 : vector<1x1x32xf32> to vector<1x32xf32>
    %cst_89 = arith.constant 0.000000e+00 : f32
    %215 = vector.broadcast %cst_89 : f32 to vector<7x32xf32>
    %216 = vector.extract_strided_slice %200 {offsets = [0, 0], sizes = [7, 8], strides = [1, 1]} : vector<7x32xf32> to vector<7x8xf32>
    %217 = arith.truncf %216 : vector<7x8xf32> to vector<7x8xbf16>
    %218 = vector.extract_strided_slice %209 {offsets = [0, 0], sizes = [8, 8], strides = [1, 1]} : vector<8x32xf32> to vector<8x8xf32>
    %219 = arith.truncf %218 : vector<8x8xf32> to vector<8x8xbf16>
    %220 = vector.extract_strided_slice %210 {offsets = [0, 0], sizes = [8, 8], strides = [1, 1]} : vector<8x32xf32> to vector<8x8xf32>
    %221 = arith.truncf %220 : vector<8x8xf32> to vector<8x8xbf16>
    %cst_90 = arith.constant dense<0.000000e+00> : vector<7x8xf32>
    %222 = tpu.matmul %217, %219, %cst_90 {dimension_numbers = #tpu.dot_dimension_numbers<[1], [1], [0], [0], [0, 0, 1, 0], [], []>} : vector<7x8xbf16>, vector<8x8xbf16>, vector<7x8xf32> -> vector<7x8xf32>
    %cst_91 = arith.constant 0.353553385 : f32
    %223 = vector.broadcast %cst_91 : f32 to vector<7x8xf32>
    %224 = arith.mulf %222, %223 : vector<7x8xf32>
    %225 = vector.broadcast %41 : vector<1x8xf32> to vector<7x8xf32>
    %226 = arith.addf %224, %225 : vector<7x8xf32>
    %cst_92 = arith.constant dense<0xFF800000> : vector<7xf32>
    %227 = vector.multi_reduction <maximumf>, %226, %cst_92 [1] : vector<7x8xf32> to vector<7xf32>
    %228 = vector.shape_cast %227 : vector<7xf32> to vector<7x1xf32>
    %229 = vector.broadcast %228 : vector<7x1xf32> to vector<7x8xf32>
    %230 = arith.subf %226, %229 : vector<7x8xf32>
    %231 = math.exp %230 : vector<7x8xf32>
    %cst_93 = arith.constant dense<0.000000e+00> : vector<7xf32>
    %232 = vector.multi_reduction <add>, %231, %cst_93 [1] : vector<7x8xf32> to vector<7xf32>
    %233 = vector.shape_cast %232 : vector<7xf32> to vector<7x1xf32>
    %234 = tpu.reciprocal %233 {approx = true} : vector<7x1xf32> -> vector<7x1xf32>
    %235 = vector.broadcast %234 : vector<7x1xf32> to vector<7x8xf32>
    %236 = arith.mulf %231, %235 : vector<7x8xf32>
    %237 = arith.truncf %236 : vector<7x8xf32> to vector<7x8xbf16>
    %cst_94 = arith.constant dense<0.000000e+00> : vector<7x8xf32>
    %238 = tpu.matmul %237, %221, %cst_94 {dimension_numbers = #tpu.dot_dimension_numbers<[1], [0], [0], [1], [0, 0, 1, 1], [], []>} : vector<7x8xbf16>, vector<8x8xbf16>, vector<7x8xf32> -> vector<7x8xf32>
    %239 = arith.truncf %238 : vector<7x8xf32> to vector<7x8xbf16>
    %240 = vector.extract_strided_slice %212 {offsets = [0, 0], sizes = [8, 32], strides = [1, 1]} : vector<32x32xbf16> to vector<8x32xbf16>
    %cst_95 = arith.constant dense<0.000000e+00> : vector<7x32xf32>
    %241 = tpu.matmul %239, %240, %cst_95 {dimension_numbers = #tpu.dot_dimension_numbers<[1], [0], [0], [1], [0, 0, 1, 1], [], []>} : vector<7x8xbf16>, vector<8x32xbf16>, vector<7x32xf32> -> vector<7x32xf32>
    %242 = arith.addf %215, %241 : vector<7x32xf32>
    %243 = vector.extract_strided_slice %200 {offsets = [0, 8], sizes = [7, 8], strides = [1, 1]} : vector<7x32xf32> to vector<7x8xf32>
    %244 = arith.truncf %243 : vector<7x8xf32> to vector<7x8xbf16>
    %245 = vector.extract_strided_slice %209 {offsets = [0, 8], sizes = [8, 8], strides = [1, 1]} : vector<8x32xf32> to vector<8x8xf32>
    %246 = arith.truncf %245 : vector<8x8xf32> to vector<8x8xbf16>
    %247 = vector.extract_strided_slice %210 {offsets = [0, 8], sizes = [8, 8], strides = [1, 1]} : vector<8x32xf32> to vector<8x8xf32>
    %248 = arith.truncf %247 : vector<8x8xf32> to vector<8x8xbf16>
    %cst_96 = arith.constant dense<0.000000e+00> : vector<7x8xf32>
    %249 = tpu.matmul %244, %246, %cst_96 {dimension_numbers = #tpu.dot_dimension_numbers<[1], [1], [0], [0], [0, 0, 1, 0], [], []>} : vector<7x8xbf16>, vector<8x8xbf16>, vector<7x8xf32> -> vector<7x8xf32>
    %cst_97 = arith.constant 0.353553385 : f32
    %250 = vector.broadcast %cst_97 : f32 to vector<7x8xf32>
    %251 = arith.mulf %249, %250 : vector<7x8xf32>
    %252 = vector.broadcast %41 : vector<1x8xf32> to vector<7x8xf32>
    %253 = arith.addf %251, %252 : vector<7x8xf32>
    %cst_98 = arith.constant dense<0xFF800000> : vector<7xf32>
    %254 = vector.multi_reduction <maximumf>, %253, %cst_98 [1] : vector<7x8xf32> to vector<7xf32>
    %255 = vector.shape_cast %254 : vector<7xf32> to vector<7x1xf32>
    %256 = vector.broadcast %255 : vector<7x1xf32> to vector<7x8xf32>
    %257 = arith.subf %253, %256 : vector<7x8xf32>
    %258 = math.exp %257 : vector<7x8xf32>
    %cst_99 = arith.constant dense<0.000000e+00> : vector<7xf32>
    %259 = vector.multi_reduction <add>, %258, %cst_99 [1] : vector<7x8xf32> to vector<7xf32>
    %260 = vector.shape_cast %259 : vector<7xf32> to vector<7x1xf32>
    %261 = tpu.reciprocal %260 {approx = true} : vector<7x1xf32> -> vector<7x1xf32>
    %262 = vector.broadcast %261 : vector<7x1xf32> to vector<7x8xf32>
    %263 = arith.mulf %258, %262 : vector<7x8xf32>
    %264 = arith.truncf %263 : vector<7x8xf32> to vector<7x8xbf16>
    %cst_100 = arith.constant dense<0.000000e+00> : vector<7x8xf32>
    %265 = tpu.matmul %264, %248, %cst_100 {dimension_numbers = #tpu.dot_dimension_numbers<[1], [0], [0], [1], [0, 0, 1, 1], [], []>} : vector<7x8xbf16>, vector<8x8xbf16>, vector<7x8xf32> -> vector<7x8xf32>
    %266 = arith.truncf %265 : vector<7x8xf32> to vector<7x8xbf16>
    %267 = vector.extract_strided_slice %212 {offsets = [8, 0], sizes = [8, 32], strides = [1, 1]} : vector<32x32xbf16> to vector<8x32xbf16>
    %cst_101 = arith.constant dense<0.000000e+00> : vector<7x32xf32>
    %268 = tpu.matmul %266, %267, %cst_101 {dimension_numbers = #tpu.dot_dimension_numbers<[1], [0], [0], [1], [0, 0, 1, 1], [], []>} : vector<7x8xbf16>, vector<8x32xbf16>, vector<7x32xf32> -> vector<7x32xf32>
    %269 = arith.addf %242, %268 : vector<7x32xf32>
    %270 = vector.extract_strided_slice %200 {offsets = [0, 16], sizes = [7, 8], strides = [1, 1]} : vector<7x32xf32> to vector<7x8xf32>
    %271 = arith.truncf %270 : vector<7x8xf32> to vector<7x8xbf16>
    %272 = vector.extract_strided_slice %209 {offsets = [0, 16], sizes = [8, 8], strides = [1, 1]} : vector<8x32xf32> to vector<8x8xf32>
    %273 = arith.truncf %272 : vector<8x8xf32> to vector<8x8xbf16>
    %274 = vector.extract_strided_slice %210 {offsets = [0, 16], sizes = [8, 8], strides = [1, 1]} : vector<8x32xf32> to vector<8x8xf32>
    %275 = arith.truncf %274 : vector<8x8xf32> to vector<8x8xbf16>
    %cst_102 = arith.constant dense<0.000000e+00> : vector<7x8xf32>
    %276 = tpu.matmul %271, %273, %cst_102 {dimension_numbers = #tpu.dot_dimension_numbers<[1], [1], [0], [0], [0, 0, 1, 0], [], []>} : vector<7x8xbf16>, vector<8x8xbf16>, vector<7x8xf32> -> vector<7x8xf32>
    %cst_103 = arith.constant 0.353553385 : f32
    %277 = vector.broadcast %cst_103 : f32 to vector<7x8xf32>
    %278 = arith.mulf %276, %277 : vector<7x8xf32>
    %279 = vector.broadcast %41 : vector<1x8xf32> to vector<7x8xf32>
    %280 = arith.addf %278, %279 : vector<7x8xf32>
    %cst_104 = arith.constant dense<0xFF800000> : vector<7xf32>
    %281 = vector.multi_reduction <maximumf>, %280, %cst_104 [1] : vector<7x8xf32> to vector<7xf32>
    %282 = vector.shape_cast %281 : vector<7xf32> to vector<7x1xf32>
    %283 = vector.broadcast %282 : vector<7x1xf32> to vector<7x8xf32>
    %284 = arith.subf %280, %283 : vector<7x8xf32>
    %285 = math.exp %284 : vector<7x8xf32>
    %cst_105 = arith.constant dense<0.000000e+00> : vector<7xf32>
    %286 = vector.multi_reduction <add>, %285, %cst_105 [1] : vector<7x8xf32> to vector<7xf32>
    %287 = vector.shape_cast %286 : vector<7xf32> to vector<7x1xf32>
    %288 = tpu.reciprocal %287 {approx = true} : vector<7x1xf32> -> vector<7x1xf32>
    %289 = vector.broadcast %288 : vector<7x1xf32> to vector<7x8xf32>
    %290 = arith.mulf %285, %289 : vector<7x8xf32>
    %291 = arith.truncf %290 : vector<7x8xf32> to vector<7x8xbf16>
    %cst_106 = arith.constant dense<0.000000e+00> : vector<7x8xf32>
    %292 = tpu.matmul %291, %275, %cst_106 {dimension_numbers = #tpu.dot_dimension_numbers<[1], [0], [0], [1], [0, 0, 1, 1], [], []>} : vector<7x8xbf16>, vector<8x8xbf16>, vector<7x8xf32> -> vector<7x8xf32>
    %293 = arith.truncf %292 : vector<7x8xf32> to vector<7x8xbf16>
    %294 = vector.extract_strided_slice %212 {offsets = [16, 0], sizes = [8, 32], strides = [1, 1]} : vector<32x32xbf16> to vector<8x32xbf16>
    %cst_107 = arith.constant dense<0.000000e+00> : vector<7x32xf32>
    %295 = tpu.matmul %293, %294, %cst_107 {dimension_numbers = #tpu.dot_dimension_numbers<[1], [0], [0], [1], [0, 0, 1, 1], [], []>} : vector<7x8xbf16>, vector<8x32xbf16>, vector<7x32xf32> -> vector<7x32xf32>
    %296 = arith.addf %269, %295 : vector<7x32xf32>
    %297 = vector.extract_strided_slice %200 {offsets = [0, 24], sizes = [7, 8], strides = [1, 1]} : vector<7x32xf32> to vector<7x8xf32>
    %298 = arith.truncf %297 : vector<7x8xf32> to vector<7x8xbf16>
    %299 = vector.extract_strided_slice %209 {offsets = [0, 24], sizes = [8, 8], strides = [1, 1]} : vector<8x32xf32> to vector<8x8xf32>
    %300 = arith.truncf %299 : vector<8x8xf32> to vector<8x8xbf16>
    %301 = vector.extract_strided_slice %210 {offsets = [0, 24], sizes = [8, 8], strides = [1, 1]} : vector<8x32xf32> to vector<8x8xf32>
    %302 = arith.truncf %301 : vector<8x8xf32> to vector<8x8xbf16>
    %cst_108 = arith.constant dense<0.000000e+00> : vector<7x8xf32>
    %303 = tpu.matmul %298, %300, %cst_108 {dimension_numbers = #tpu.dot_dimension_numbers<[1], [1], [0], [0], [0, 0, 1, 0], [], []>} : vector<7x8xbf16>, vector<8x8xbf16>, vector<7x8xf32> -> vector<7x8xf32>
    %cst_109 = arith.constant 0.353553385 : f32
    %304 = vector.broadcast %cst_109 : f32 to vector<7x8xf32>
    %305 = arith.mulf %303, %304 : vector<7x8xf32>
    %306 = vector.broadcast %41 : vector<1x8xf32> to vector<7x8xf32>
    %307 = arith.addf %305, %306 : vector<7x8xf32>
    %cst_110 = arith.constant dense<0xFF800000> : vector<7xf32>
    %308 = vector.multi_reduction <maximumf>, %307, %cst_110 [1] : vector<7x8xf32> to vector<7xf32>
    %309 = vector.shape_cast %308 : vector<7xf32> to vector<7x1xf32>
    %310 = vector.broadcast %309 : vector<7x1xf32> to vector<7x8xf32>
    %311 = arith.subf %307, %310 : vector<7x8xf32>
    %312 = math.exp %311 : vector<7x8xf32>
    %cst_111 = arith.constant dense<0.000000e+00> : vector<7xf32>
    %313 = vector.multi_reduction <add>, %312, %cst_111 [1] : vector<7x8xf32> to vector<7xf32>
    %314 = vector.shape_cast %313 : vector<7xf32> to vector<7x1xf32>
    %315 = tpu.reciprocal %314 {approx = true} : vector<7x1xf32> -> vector<7x1xf32>
    %316 = vector.broadcast %315 : vector<7x1xf32> to vector<7x8xf32>
    %317 = arith.mulf %312, %316 : vector<7x8xf32>
    %318 = arith.truncf %317 : vector<7x8xf32> to vector<7x8xbf16>
    %cst_112 = arith.constant dense<0.000000e+00> : vector<7x8xf32>
    %319 = tpu.matmul %318, %302, %cst_112 {dimension_numbers = #tpu.dot_dimension_numbers<[1], [0], [0], [1], [0, 0, 1, 1], [], []>} : vector<7x8xbf16>, vector<8x8xbf16>, vector<7x8xf32> -> vector<7x8xf32>
    %320 = arith.truncf %319 : vector<7x8xf32> to vector<7x8xbf16>
    %321 = vector.extract_strided_slice %212 {offsets = [24, 0], sizes = [8, 32], strides = [1, 1]} : vector<32x32xbf16> to vector<8x32xbf16>
    %cst_113 = arith.constant dense<0.000000e+00> : vector<7x32xf32>
    %322 = tpu.matmul %320, %321, %cst_113 {dimension_numbers = #tpu.dot_dimension_numbers<[1], [0], [0], [1], [0, 0, 1, 1], [], []>} : vector<7x8xbf16>, vector<8x32xbf16>, vector<7x32xf32> -> vector<7x32xf32>
    %323 = arith.addf %296, %322 : vector<7x32xf32>
    %324 = vector.broadcast %214 : vector<1x32xf32> to vector<7x32xf32>
    %325 = arith.addf %323, %324 : vector<7x32xf32>
    %326 = arith.addf %192, %325 : vector<7x32xf32>
    %c0_114 = arith.constant 0 : index
    %c0_115 = arith.constant 0 : index
    %c0_116 = arith.constant 0 : index
    %327 = vector.load %arg18[%c0_114, %c0_115, %c0_116] : memref<3x1x32xf32, #tpu.memory_space<vmem>>, vector<1x1x32xf32>
    %328 = vector.shape_cast %327 : vector<1x1x32xf32> to vector<1x32xf32>
    %c0_117 = arith.constant 0 : index
    %c0_118 = arith.constant 0 : index
    %c0_119 = arith.constant 0 : index
    %329 = vector.load %arg19[%c0_117, %c0_118, %c0_119] : memref<3x1x32xf32, #tpu.memory_space<vmem>>, vector<1x1x32xf32>
    %330 = vector.shape_cast %329 : vector<1x1x32xf32> to vector<1x32xf32>
    %cst_120 = arith.constant dense<0.000000e+00> : vector<7xf32>
    %331 = vector.multi_reduction <add>, %326, %cst_120 [1] : vector<7x32xf32> to vector<7xf32>
    %332 = vector.shape_cast %331 : vector<7xf32> to vector<7x1xf32>
    %cst_121 = arith.constant 3.200000e+01 : f32
    %333 = vector.broadcast %cst_121 : f32 to vector<7x1xf32>
    %334 = arith.divf %332, %333 : vector<7x1xf32>
    %335 = vector.broadcast %334 : vector<7x1xf32> to vector<7x32xf32>
    %336 = arith.subf %326, %335 : vector<7x32xf32>
    %337 = vector.broadcast %334 : vector<7x1xf32> to vector<7x32xf32>
    %338 = arith.subf %326, %337 : vector<7x32xf32>
    %339 = arith.mulf %336, %338 : vector<7x32xf32>
    %cst_122 = arith.constant dense<0.000000e+00> : vector<7xf32>
    %340 = vector.multi_reduction <add>, %339, %cst_122 [1] : vector<7x32xf32> to vector<7xf32>
    %341 = vector.shape_cast %340 : vector<7xf32> to vector<7x1xf32>
    %cst_123 = arith.constant 3.200000e+01 : f32
    %342 = vector.broadcast %cst_123 : f32 to vector<7x1xf32>
    %343 = arith.divf %341, %342 : vector<7x1xf32>
    %344 = vector.broadcast %334 : vector<7x1xf32> to vector<7x32xf32>
    %345 = arith.subf %326, %344 : vector<7x32xf32>
    %cst_124 = arith.constant 9.99999996E-13 : f32
    %346 = vector.broadcast %cst_124 : f32 to vector<7x1xf32>
    %347 = arith.addf %343, %346 : vector<7x1xf32>
    %348 = math.rsqrt %347 : vector<7x1xf32>
    %349 = vector.broadcast %348 : vector<7x1xf32> to vector<7x32xf32>
    %350 = arith.mulf %345, %349 : vector<7x32xf32>
    %351 = vector.broadcast %328 : vector<1x32xf32> to vector<7x32xf32>
    %352 = arith.mulf %350, %351 : vector<7x32xf32>
    %353 = vector.broadcast %330 : vector<1x32xf32> to vector<7x32xf32>
    %354 = arith.addf %352, %353 : vector<7x32xf32>
    %c0_125 = arith.constant 0 : index
    %c0_126 = arith.constant 0 : index
    %c0_127 = arith.constant 0 : index
    %355 = vector.load %arg20[%c0_125, %c0_126, %c0_127] : memref<3x32x128xbf16, #tpu.memory_space<vmem>>, vector<1x32x128xbf16>
    %356 = vector.shape_cast %355 : vector<1x32x128xbf16> to vector<32x128xbf16>
    %c0_128 = arith.constant 0 : index
    %c0_129 = arith.constant 0 : index
    %c0_130 = arith.constant 0 : index
    %357 = vector.load %arg21[%c0_128, %c0_129, %c0_130] : memref<3x1x128xf32, #tpu.memory_space<vmem>>, vector<1x1x128xf32>
    %358 = vector.shape_cast %357 : vector<1x1x128xf32> to vector<1x128xf32>
    %359 = arith.truncf %354 : vector<7x32xf32> to vector<7x32xbf16>
    %cst_131 = arith.constant dense<0.000000e+00> : vector<7x128xf32>
    %360 = tpu.matmul %359, %356, %cst_131 {dimension_numbers = #tpu.dot_dimension_numbers<[1], [0], [0], [1], [0, 0, 1, 1], [], []>} : vector<7x32xbf16>, vector<32x128xbf16>, vector<7x128xf32> -> vector<7x128xf32>
    %361 = vector.broadcast %358 : vector<1x128xf32> to vector<7x128xf32>
    %362 = arith.addf %360, %361 : vector<7x128xf32>
    %cst_132 = arith.constant 0.000000e+00 : f32
    %363 = vector.broadcast %cst_132 : f32 to vector<7x128xf32>
    %364 = arith.maximumf %362, %363 : vector<7x128xf32>
    %c0_133 = arith.constant 0 : index
    %c0_134 = arith.constant 0 : index
    %c0_135 = arith.constant 0 : index
    %365 = vector.load %arg22[%c0_133, %c0_134, %c0_135] : memref<3x128x32xbf16, #tpu.memory_space<vmem>>, vector<1x128x32xbf16>
    %366 = vector.shape_cast %365 : vector<1x128x32xbf16> to vector<128x32xbf16>
    %c0_136 = arith.constant 0 : index
    %c0_137 = arith.constant 0 : index
    %c0_138 = arith.constant 0 : index
    %367 = vector.load %arg23[%c0_136, %c0_137, %c0_138] : memref<3x1x32xf32, #tpu.memory_space<vmem>>, vector<1x1x32xf32>
    %368 = vector.shape_cast %367 : vector<1x1x32xf32> to vector<1x32xf32>
    %369 = arith.truncf %364 : vector<7x128xf32> to vector<7x128xbf16>
    %cst_139 = arith.constant dense<0.000000e+00> : vector<7x32xf32>
    %370 = tpu.matmul %369, %366, %cst_139 {dimension_numbers = #tpu.dot_dimension_numbers<[1], [0], [0], [1], [0, 0, 1, 1], [], []>} : vector<7x128xbf16>, vector<128x32xbf16>, vector<7x32xf32> -> vector<7x32xf32>
    %371 = vector.broadcast %368 : vector<1x32xf32> to vector<7x32xf32>
    %372 = arith.addf %370, %371 : vector<7x32xf32>
    %373 = arith.addf %354, %372 : vector<7x32xf32>
    %c0_140 = arith.constant 0 : index
    %c0_141 = arith.constant 0 : index
    %c0_142 = arith.constant 0 : index
    %374 = vector.load %arg24[%c0_140, %c0_141, %c0_142] : memref<3x1x32xf32, #tpu.memory_space<vmem>>, vector<1x1x32xf32>
    %375 = vector.shape_cast %374 : vector<1x1x32xf32> to vector<1x32xf32>
    %c0_143 = arith.constant 0 : index
    %c0_144 = arith.constant 0 : index
    %c0_145 = arith.constant 0 : index
    %376 = vector.load %arg25[%c0_143, %c0_144, %c0_145] : memref<3x1x32xf32, #tpu.memory_space<vmem>>, vector<1x1x32xf32>
    %377 = vector.shape_cast %376 : vector<1x1x32xf32> to vector<1x32xf32>
    %cst_146 = arith.constant dense<0.000000e+00> : vector<7xf32>
    %378 = vector.multi_reduction <add>, %373, %cst_146 [1] : vector<7x32xf32> to vector<7xf32>
    %379 = vector.shape_cast %378 : vector<7xf32> to vector<7x1xf32>
    %cst_147 = arith.constant 3.200000e+01 : f32
    %380 = vector.broadcast %cst_147 : f32 to vector<7x1xf32>
    %381 = arith.divf %379, %380 : vector<7x1xf32>
    %382 = vector.broadcast %381 : vector<7x1xf32> to vector<7x32xf32>
    %383 = arith.subf %373, %382 : vector<7x32xf32>
    %384 = vector.broadcast %381 : vector<7x1xf32> to vector<7x32xf32>
    %385 = arith.subf %373, %384 : vector<7x32xf32>
    %386 = arith.mulf %383, %385 : vector<7x32xf32>
    %cst_148 = arith.constant dense<0.000000e+00> : vector<7xf32>
    %387 = vector.multi_reduction <add>, %386, %cst_148 [1] : vector<7x32xf32> to vector<7xf32>
    %388 = vector.shape_cast %387 : vector<7xf32> to vector<7x1xf32>
    %cst_149 = arith.constant 3.200000e+01 : f32
    %389 = vector.broadcast %cst_149 : f32 to vector<7x1xf32>
    %390 = arith.divf %388, %389 : vector<7x1xf32>
    %391 = vector.broadcast %381 : vector<7x1xf32> to vector<7x32xf32>
    %392 = arith.subf %373, %391 : vector<7x32xf32>
    %cst_150 = arith.constant 9.99999996E-13 : f32
    %393 = vector.broadcast %cst_150 : f32 to vector<7x1xf32>
    %394 = arith.addf %390, %393 : vector<7x1xf32>
    %395 = math.rsqrt %394 : vector<7x1xf32>
    %396 = vector.broadcast %395 : vector<7x1xf32> to vector<7x32xf32>
    %397 = arith.mulf %392, %396 : vector<7x32xf32>
    %398 = vector.broadcast %375 : vector<1x32xf32> to vector<7x32xf32>
    %399 = arith.mulf %397, %398 : vector<7x32xf32>
    %400 = vector.broadcast %377 : vector<1x32xf32> to vector<7x32xf32>
    %401 = arith.addf %399, %400 : vector<7x32xf32>
    %c1 = arith.constant 1 : index
    %c0_151 = arith.constant 0 : index
    %c0_152 = arith.constant 0 : index
    %402 = vector.load %arg6[%c1, %c0_151, %c0_152] : memref<3x32x96xbf16, #tpu.memory_space<vmem>>, vector<1x32x96xbf16>
    %403 = vector.shape_cast %402 : vector<1x32x96xbf16> to vector<32x96xbf16>
    %c1_153 = arith.constant 1 : index
    %c0_154 = arith.constant 0 : index
    %c0_155 = arith.constant 0 : index
    %404 = vector.load %arg7[%c1_153, %c0_154, %c0_155] : memref<3x1x96xf32, #tpu.memory_space<vmem>>, vector<1x1x96xf32>
    %405 = vector.shape_cast %404 : vector<1x1x96xf32> to vector<1x96xf32>
    %406 = arith.truncf %401 : vector<7x32xf32> to vector<7x32xbf16>
    %cst_156 = arith.constant dense<0.000000e+00> : vector<7x96xf32>
    %407 = tpu.matmul %406, %403, %cst_156 {dimension_numbers = #tpu.dot_dimension_numbers<[1], [0], [0], [1], [0, 0, 1, 1], [], []>} : vector<7x32xbf16>, vector<32x96xbf16>, vector<7x96xf32> -> vector<7x96xf32>
    %408 = vector.broadcast %405 : vector<1x96xf32> to vector<7x96xf32>
    %409 = arith.addf %407, %408 : vector<7x96xf32>
    %410 = vector.extract_strided_slice %409 {offsets = [0, 0], sizes = [7, 32], strides = [1, 1]} : vector<7x96xf32> to vector<7x32xf32>
    %411 = vector.extract_strided_slice %409 {offsets = [0, 32], sizes = [7, 32], strides = [1, 1]} : vector<7x96xf32> to vector<7x32xf32>
    %412 = vector.extract_strided_slice %409 {offsets = [0, 64], sizes = [7, 32], strides = [1, 1]} : vector<7x96xf32> to vector<7x32xf32>
    %c1_157 = arith.constant 1 : index
    %c0_158 = arith.constant 0 : index
    %c0_159 = arith.constant 0 : index
    %413 = vector.load %arg8[%c1_157, %c0_158, %c0_159] : memref<3x32x32xbf16, #tpu.memory_space<vmem>>, vector<1x32x32xbf16>
    %414 = vector.shape_cast %413 : vector<1x32x32xbf16> to vector<32x32xbf16>
    %c1_160 = arith.constant 1 : index
    %c0_161 = arith.constant 0 : index
    %c0_162 = arith.constant 0 : index
    %415 = vector.load %arg9[%c1_160, %c0_161, %c0_162] : memref<3x1x32xf32, #tpu.memory_space<vmem>>, vector<1x1x32xf32>
    %416 = vector.shape_cast %415 : vector<1x1x32xf32> to vector<1x32xf32>
    %cst_163 = arith.constant 0.000000e+00 : f32
    %417 = vector.broadcast %cst_163 : f32 to vector<7x32xf32>
    %418 = vector.extract_strided_slice %410 {offsets = [0, 0], sizes = [7, 8], strides = [1, 1]} : vector<7x32xf32> to vector<7x8xf32>
    %419 = arith.truncf %418 : vector<7x8xf32> to vector<7x8xbf16>
    %420 = vector.extract_strided_slice %411 {offsets = [0, 0], sizes = [7, 8], strides = [1, 1]} : vector<7x32xf32> to vector<7x8xf32>
    %421 = arith.truncf %420 : vector<7x8xf32> to vector<7x8xbf16>
    %422 = vector.extract_strided_slice %412 {offsets = [0, 0], sizes = [7, 8], strides = [1, 1]} : vector<7x32xf32> to vector<7x8xf32>
    %423 = arith.truncf %422 : vector<7x8xf32> to vector<7x8xbf16>
    %cst_164 = arith.constant dense<0.000000e+00> : vector<7x7xf32>
    %424 = tpu.matmul %419, %421, %cst_164 {dimension_numbers = #tpu.dot_dimension_numbers<[1], [1], [0], [0], [0, 0, 1, 0], [], []>} : vector<7x8xbf16>, vector<7x8xbf16>, vector<7x7xf32> -> vector<7x7xf32>
    %cst_165 = arith.constant 0.353553385 : f32
    %425 = vector.broadcast %cst_165 : f32 to vector<7x7xf32>
    %426 = arith.mulf %424, %425 : vector<7x7xf32>
    %427 = arith.addf %426, %35 : vector<7x7xf32>
    %cst_166 = arith.constant dense<0xFF800000> : vector<7xf32>
    %428 = vector.multi_reduction <maximumf>, %427, %cst_166 [1] : vector<7x7xf32> to vector<7xf32>
    %429 = vector.shape_cast %428 : vector<7xf32> to vector<7x1xf32>
    %430 = vector.broadcast %429 : vector<7x1xf32> to vector<7x7xf32>
    %431 = arith.subf %427, %430 : vector<7x7xf32>
    %432 = math.exp %431 : vector<7x7xf32>
    %cst_167 = arith.constant dense<0.000000e+00> : vector<7xf32>
    %433 = vector.multi_reduction <add>, %432, %cst_167 [1] : vector<7x7xf32> to vector<7xf32>
    %434 = vector.shape_cast %433 : vector<7xf32> to vector<7x1xf32>
    %435 = tpu.reciprocal %434 {approx = true} : vector<7x1xf32> -> vector<7x1xf32>
    %436 = vector.broadcast %435 : vector<7x1xf32> to vector<7x7xf32>
    %437 = arith.mulf %432, %436 : vector<7x7xf32>
    %438 = arith.truncf %437 : vector<7x7xf32> to vector<7x7xbf16>
    %cst_168 = arith.constant dense<0.000000e+00> : vector<7x8xf32>
    %439 = tpu.matmul %438, %423, %cst_168 {dimension_numbers = #tpu.dot_dimension_numbers<[1], [0], [0], [1], [0, 0, 1, 1], [], []>} : vector<7x7xbf16>, vector<7x8xbf16>, vector<7x8xf32> -> vector<7x8xf32>
    %440 = arith.truncf %439 : vector<7x8xf32> to vector<7x8xbf16>
    %441 = vector.extract_strided_slice %414 {offsets = [0, 0], sizes = [8, 32], strides = [1, 1]} : vector<32x32xbf16> to vector<8x32xbf16>
    %cst_169 = arith.constant dense<0.000000e+00> : vector<7x32xf32>
    %442 = tpu.matmul %440, %441, %cst_169 {dimension_numbers = #tpu.dot_dimension_numbers<[1], [0], [0], [1], [0, 0, 1, 1], [], []>} : vector<7x8xbf16>, vector<8x32xbf16>, vector<7x32xf32> -> vector<7x32xf32>
    %443 = arith.addf %417, %442 : vector<7x32xf32>
    %444 = vector.extract_strided_slice %410 {offsets = [0, 8], sizes = [7, 8], strides = [1, 1]} : vector<7x32xf32> to vector<7x8xf32>
    %445 = arith.truncf %444 : vector<7x8xf32> to vector<7x8xbf16>
    %446 = vector.extract_strided_slice %411 {offsets = [0, 8], sizes = [7, 8], strides = [1, 1]} : vector<7x32xf32> to vector<7x8xf32>
    %447 = arith.truncf %446 : vector<7x8xf32> to vector<7x8xbf16>
    %448 = vector.extract_strided_slice %412 {offsets = [0, 8], sizes = [7, 8], strides = [1, 1]} : vector<7x32xf32> to vector<7x8xf32>
    %449 = arith.truncf %448 : vector<7x8xf32> to vector<7x8xbf16>
    %cst_170 = arith.constant dense<0.000000e+00> : vector<7x7xf32>
    %450 = tpu.matmul %445, %447, %cst_170 {dimension_numbers = #tpu.dot_dimension_numbers<[1], [1], [0], [0], [0, 0, 1, 0], [], []>} : vector<7x8xbf16>, vector<7x8xbf16>, vector<7x7xf32> -> vector<7x7xf32>
    %cst_171 = arith.constant 0.353553385 : f32
    %451 = vector.broadcast %cst_171 : f32 to vector<7x7xf32>
    %452 = arith.mulf %450, %451 : vector<7x7xf32>
    %453 = arith.addf %452, %35 : vector<7x7xf32>
    %cst_172 = arith.constant dense<0xFF800000> : vector<7xf32>
    %454 = vector.multi_reduction <maximumf>, %453, %cst_172 [1] : vector<7x7xf32> to vector<7xf32>
    %455 = vector.shape_cast %454 : vector<7xf32> to vector<7x1xf32>
    %456 = vector.broadcast %455 : vector<7x1xf32> to vector<7x7xf32>
    %457 = arith.subf %453, %456 : vector<7x7xf32>
    %458 = math.exp %457 : vector<7x7xf32>
    %cst_173 = arith.constant dense<0.000000e+00> : vector<7xf32>
    %459 = vector.multi_reduction <add>, %458, %cst_173 [1] : vector<7x7xf32> to vector<7xf32>
    %460 = vector.shape_cast %459 : vector<7xf32> to vector<7x1xf32>
    %461 = tpu.reciprocal %460 {approx = true} : vector<7x1xf32> -> vector<7x1xf32>
    %462 = vector.broadcast %461 : vector<7x1xf32> to vector<7x7xf32>
    %463 = arith.mulf %458, %462 : vector<7x7xf32>
    %464 = arith.truncf %463 : vector<7x7xf32> to vector<7x7xbf16>
    %cst_174 = arith.constant dense<0.000000e+00> : vector<7x8xf32>
    %465 = tpu.matmul %464, %449, %cst_174 {dimension_numbers = #tpu.dot_dimension_numbers<[1], [0], [0], [1], [0, 0, 1, 1], [], []>} : vector<7x7xbf16>, vector<7x8xbf16>, vector<7x8xf32> -> vector<7x8xf32>
    %466 = arith.truncf %465 : vector<7x8xf32> to vector<7x8xbf16>
    %467 = vector.extract_strided_slice %414 {offsets = [8, 0], sizes = [8, 32], strides = [1, 1]} : vector<32x32xbf16> to vector<8x32xbf16>
    %cst_175 = arith.constant dense<0.000000e+00> : vector<7x32xf32>
    %468 = tpu.matmul %466, %467, %cst_175 {dimension_numbers = #tpu.dot_dimension_numbers<[1], [0], [0], [1], [0, 0, 1, 1], [], []>} : vector<7x8xbf16>, vector<8x32xbf16>, vector<7x32xf32> -> vector<7x32xf32>
    %469 = arith.addf %443, %468 : vector<7x32xf32>
    %470 = vector.extract_strided_slice %410 {offsets = [0, 16], sizes = [7, 8], strides = [1, 1]} : vector<7x32xf32> to vector<7x8xf32>
    %471 = arith.truncf %470 : vector<7x8xf32> to vector<7x8xbf16>
    %472 = vector.extract_strided_slice %411 {offsets = [0, 16], sizes = [7, 8], strides = [1, 1]} : vector<7x32xf32> to vector<7x8xf32>
    %473 = arith.truncf %472 : vector<7x8xf32> to vector<7x8xbf16>
    %474 = vector.extract_strided_slice %412 {offsets = [0, 16], sizes = [7, 8], strides = [1, 1]} : vector<7x32xf32> to vector<7x8xf32>
    %475 = arith.truncf %474 : vector<7x8xf32> to vector<7x8xbf16>
    %cst_176 = arith.constant dense<0.000000e+00> : vector<7x7xf32>
    %476 = tpu.matmul %471, %473, %cst_176 {dimension_numbers = #tpu.dot_dimension_numbers<[1], [1], [0], [0], [0, 0, 1, 0], [], []>} : vector<7x8xbf16>, vector<7x8xbf16>, vector<7x7xf32> -> vector<7x7xf32>
    %cst_177 = arith.constant 0.353553385 : f32
    %477 = vector.broadcast %cst_177 : f32 to vector<7x7xf32>
    %478 = arith.mulf %476, %477 : vector<7x7xf32>
    %479 = arith.addf %478, %35 : vector<7x7xf32>
    %cst_178 = arith.constant dense<0xFF800000> : vector<7xf32>
    %480 = vector.multi_reduction <maximumf>, %479, %cst_178 [1] : vector<7x7xf32> to vector<7xf32>
    %481 = vector.shape_cast %480 : vector<7xf32> to vector<7x1xf32>
    %482 = vector.broadcast %481 : vector<7x1xf32> to vector<7x7xf32>
    %483 = arith.subf %479, %482 : vector<7x7xf32>
    %484 = math.exp %483 : vector<7x7xf32>
    %cst_179 = arith.constant dense<0.000000e+00> : vector<7xf32>
    %485 = vector.multi_reduction <add>, %484, %cst_179 [1] : vector<7x7xf32> to vector<7xf32>
    %486 = vector.shape_cast %485 : vector<7xf32> to vector<7x1xf32>
    %487 = tpu.reciprocal %486 {approx = true} : vector<7x1xf32> -> vector<7x1xf32>
    %488 = vector.broadcast %487 : vector<7x1xf32> to vector<7x7xf32>
    %489 = arith.mulf %484, %488 : vector<7x7xf32>
    %490 = arith.truncf %489 : vector<7x7xf32> to vector<7x7xbf16>
    %cst_180 = arith.constant dense<0.000000e+00> : vector<7x8xf32>
    %491 = tpu.matmul %490, %475, %cst_180 {dimension_numbers = #tpu.dot_dimension_numbers<[1], [0], [0], [1], [0, 0, 1, 1], [], []>} : vector<7x7xbf16>, vector<7x8xbf16>, vector<7x8xf32> -> vector<7x8xf32>
    %492 = arith.truncf %491 : vector<7x8xf32> to vector<7x8xbf16>
    %493 = vector.extract_strided_slice %414 {offsets = [16, 0], sizes = [8, 32], strides = [1, 1]} : vector<32x32xbf16> to vector<8x32xbf16>
    %cst_181 = arith.constant dense<0.000000e+00> : vector<7x32xf32>
    %494 = tpu.matmul %492, %493, %cst_181 {dimension_numbers = #tpu.dot_dimension_numbers<[1], [0], [0], [1], [0, 0, 1, 1], [], []>} : vector<7x8xbf16>, vector<8x32xbf16>, vector<7x32xf32> -> vector<7x32xf32>
    %495 = arith.addf %469, %494 : vector<7x32xf32>
    %496 = vector.extract_strided_slice %410 {offsets = [0, 24], sizes = [7, 8], strides = [1, 1]} : vector<7x32xf32> to vector<7x8xf32>
    %497 = arith.truncf %496 : vector<7x8xf32> to vector<7x8xbf16>
    %498 = vector.extract_strided_slice %411 {offsets = [0, 24], sizes = [7, 8], strides = [1, 1]} : vector<7x32xf32> to vector<7x8xf32>
    %499 = arith.truncf %498 : vector<7x8xf32> to vector<7x8xbf16>
    %500 = vector.extract_strided_slice %412 {offsets = [0, 24], sizes = [7, 8], strides = [1, 1]} : vector<7x32xf32> to vector<7x8xf32>
    %501 = arith.truncf %500 : vector<7x8xf32> to vector<7x8xbf16>
    %cst_182 = arith.constant dense<0.000000e+00> : vector<7x7xf32>
    %502 = tpu.matmul %497, %499, %cst_182 {dimension_numbers = #tpu.dot_dimension_numbers<[1], [1], [0], [0], [0, 0, 1, 0], [], []>} : vector<7x8xbf16>, vector<7x8xbf16>, vector<7x7xf32> -> vector<7x7xf32>
    %cst_183 = arith.constant 0.353553385 : f32
    %503 = vector.broadcast %cst_183 : f32 to vector<7x7xf32>
    %504 = arith.mulf %502, %503 : vector<7x7xf32>
    %505 = arith.addf %504, %35 : vector<7x7xf32>
    %cst_184 = arith.constant dense<0xFF800000> : vector<7xf32>
    %506 = vector.multi_reduction <maximumf>, %505, %cst_184 [1] : vector<7x7xf32> to vector<7xf32>
    %507 = vector.shape_cast %506 : vector<7xf32> to vector<7x1xf32>
    %508 = vector.broadcast %507 : vector<7x1xf32> to vector<7x7xf32>
    %509 = arith.subf %505, %508 : vector<7x7xf32>
    %510 = math.exp %509 : vector<7x7xf32>
    %cst_185 = arith.constant dense<0.000000e+00> : vector<7xf32>
    %511 = vector.multi_reduction <add>, %510, %cst_185 [1] : vector<7x7xf32> to vector<7xf32>
    %512 = vector.shape_cast %511 : vector<7xf32> to vector<7x1xf32>
    %513 = tpu.reciprocal %512 {approx = true} : vector<7x1xf32> -> vector<7x1xf32>
    %514 = vector.broadcast %513 : vector<7x1xf32> to vector<7x7xf32>
    %515 = arith.mulf %510, %514 : vector<7x7xf32>
    %516 = arith.truncf %515 : vector<7x7xf32> to vector<7x7xbf16>
    %cst_186 = arith.constant dense<0.000000e+00> : vector<7x8xf32>
    %517 = tpu.matmul %516, %501, %cst_186 {dimension_numbers = #tpu.dot_dimension_numbers<[1], [0], [0], [1], [0, 0, 1, 1], [], []>} : vector<7x7xbf16>, vector<7x8xbf16>, vector<7x8xf32> -> vector<7x8xf32>
    %518 = arith.truncf %517 : vector<7x8xf32> to vector<7x8xbf16>
    %519 = vector.extract_strided_slice %414 {offsets = [24, 0], sizes = [8, 32], strides = [1, 1]} : vector<32x32xbf16> to vector<8x32xbf16>
    %cst_187 = arith.constant dense<0.000000e+00> : vector<7x32xf32>
    %520 = tpu.matmul %518, %519, %cst_187 {dimension_numbers = #tpu.dot_dimension_numbers<[1], [0], [0], [1], [0, 0, 1, 1], [], []>} : vector<7x8xbf16>, vector<8x32xbf16>, vector<7x32xf32> -> vector<7x32xf32>
    %521 = arith.addf %495, %520 : vector<7x32xf32>
    %522 = vector.broadcast %416 : vector<1x32xf32> to vector<7x32xf32>
    %523 = arith.addf %521, %522 : vector<7x32xf32>
    %524 = arith.addf %401, %523 : vector<7x32xf32>
    %c1_188 = arith.constant 1 : index
    %c0_189 = arith.constant 0 : index
    %c0_190 = arith.constant 0 : index
    %525 = vector.load %arg10[%c1_188, %c0_189, %c0_190] : memref<3x1x32xf32, #tpu.memory_space<vmem>>, vector<1x1x32xf32>
    %526 = vector.shape_cast %525 : vector<1x1x32xf32> to vector<1x32xf32>
    %c1_191 = arith.constant 1 : index
    %c0_192 = arith.constant 0 : index
    %c0_193 = arith.constant 0 : index
    %527 = vector.load %arg11[%c1_191, %c0_192, %c0_193] : memref<3x1x32xf32, #tpu.memory_space<vmem>>, vector<1x1x32xf32>
    %528 = vector.shape_cast %527 : vector<1x1x32xf32> to vector<1x32xf32>
    %cst_194 = arith.constant dense<0.000000e+00> : vector<7xf32>
    %529 = vector.multi_reduction <add>, %524, %cst_194 [1] : vector<7x32xf32> to vector<7xf32>
    %530 = vector.shape_cast %529 : vector<7xf32> to vector<7x1xf32>
    %cst_195 = arith.constant 3.200000e+01 : f32
    %531 = vector.broadcast %cst_195 : f32 to vector<7x1xf32>
    %532 = arith.divf %530, %531 : vector<7x1xf32>
    %533 = vector.broadcast %532 : vector<7x1xf32> to vector<7x32xf32>
    %534 = arith.subf %524, %533 : vector<7x32xf32>
    %535 = vector.broadcast %532 : vector<7x1xf32> to vector<7x32xf32>
    %536 = arith.subf %524, %535 : vector<7x32xf32>
    %537 = arith.mulf %534, %536 : vector<7x32xf32>
    %cst_196 = arith.constant dense<0.000000e+00> : vector<7xf32>
    %538 = vector.multi_reduction <add>, %537, %cst_196 [1] : vector<7x32xf32> to vector<7xf32>
    %539 = vector.shape_cast %538 : vector<7xf32> to vector<7x1xf32>
    %cst_197 = arith.constant 3.200000e+01 : f32
    %540 = vector.broadcast %cst_197 : f32 to vector<7x1xf32>
    %541 = arith.divf %539, %540 : vector<7x1xf32>
    %542 = vector.broadcast %532 : vector<7x1xf32> to vector<7x32xf32>
    %543 = arith.subf %524, %542 : vector<7x32xf32>
    %cst_198 = arith.constant 9.99999996E-13 : f32
    %544 = vector.broadcast %cst_198 : f32 to vector<7x1xf32>
    %545 = arith.addf %541, %544 : vector<7x1xf32>
    %546 = math.rsqrt %545 : vector<7x1xf32>
    %547 = vector.broadcast %546 : vector<7x1xf32> to vector<7x32xf32>
    %548 = arith.mulf %543, %547 : vector<7x32xf32>
    %549 = vector.broadcast %526 : vector<1x32xf32> to vector<7x32xf32>
    %550 = arith.mulf %548, %549 : vector<7x32xf32>
    %551 = vector.broadcast %528 : vector<1x32xf32> to vector<7x32xf32>
    %552 = arith.addf %550, %551 : vector<7x32xf32>
    %c1_199 = arith.constant 1 : index
    %c0_200 = arith.constant 0 : index
    %c0_201 = arith.constant 0 : index
    %553 = vector.load %arg12[%c1_199, %c0_200, %c0_201] : memref<3x32x32xbf16, #tpu.memory_space<vmem>>, vector<1x32x32xbf16>
    %554 = vector.shape_cast %553 : vector<1x32x32xbf16> to vector<32x32xbf16>
    %c1_202 = arith.constant 1 : index
    %c0_203 = arith.constant 0 : index
    %c0_204 = arith.constant 0 : index
    %555 = vector.load %arg13[%c1_202, %c0_203, %c0_204] : memref<3x1x32xf32, #tpu.memory_space<vmem>>, vector<1x1x32xf32>
    %556 = vector.shape_cast %555 : vector<1x1x32xf32> to vector<1x32xf32>
    %557 = arith.truncf %552 : vector<7x32xf32> to vector<7x32xbf16>
    %cst_205 = arith.constant dense<0.000000e+00> : vector<7x32xf32>
    %558 = tpu.matmul %557, %554, %cst_205 {dimension_numbers = #tpu.dot_dimension_numbers<[1], [0], [0], [1], [0, 0, 1, 1], [], []>} : vector<7x32xbf16>, vector<32x32xbf16>, vector<7x32xf32> -> vector<7x32xf32>
    %559 = vector.broadcast %556 : vector<1x32xf32> to vector<7x32xf32>
    %560 = arith.addf %558, %559 : vector<7x32xf32>
    %c1_206 = arith.constant 1 : index
    %c0_207 = arith.constant 0 : index
    %c0_208 = arith.constant 0 : index
    %561 = vector.load %arg14[%c1_206, %c0_207, %c0_208] : memref<3x32x64xbf16, #tpu.memory_space<vmem>>, vector<1x32x64xbf16>
    %562 = vector.shape_cast %561 : vector<1x32x64xbf16> to vector<32x64xbf16>
    %c1_209 = arith.constant 1 : index
    %c0_210 = arith.constant 0 : index
    %c0_211 = arith.constant 0 : index
    %563 = vector.load %arg15[%c1_209, %c0_210, %c0_211] : memref<3x1x64xf32, #tpu.memory_space<vmem>>, vector<1x1x64xf32>
    %564 = vector.shape_cast %563 : vector<1x1x64xf32> to vector<1x64xf32>
    %565 = arith.truncf %29 : vector<8x32xf32> to vector<8x32xbf16>
    %cst_212 = arith.constant dense<0.000000e+00> : vector<8x64xf32>
    %566 = tpu.matmul %565, %562, %cst_212 {dimension_numbers = #tpu.dot_dimension_numbers<[1], [0], [0], [1], [0, 0, 1, 1], [], []>} : vector<8x32xbf16>, vector<32x64xbf16>, vector<8x64xf32> -> vector<8x64xf32>
    %567 = vector.broadcast %564 : vector<1x64xf32> to vector<8x64xf32>
    %568 = arith.addf %566, %567 : vector<8x64xf32>
    %569 = vector.extract_strided_slice %568 {offsets = [0, 0], sizes = [8, 32], strides = [1, 1]} : vector<8x64xf32> to vector<8x32xf32>
    %570 = vector.extract_strided_slice %568 {offsets = [0, 32], sizes = [8, 32], strides = [1, 1]} : vector<8x64xf32> to vector<8x32xf32>
    %c1_213 = arith.constant 1 : index
    %c0_214 = arith.constant 0 : index
    %c0_215 = arith.constant 0 : index
    %571 = vector.load %arg16[%c1_213, %c0_214, %c0_215] : memref<3x32x32xbf16, #tpu.memory_space<vmem>>, vector<1x32x32xbf16>
    %572 = vector.shape_cast %571 : vector<1x32x32xbf16> to vector<32x32xbf16>
    %c1_216 = arith.constant 1 : index
    %c0_217 = arith.constant 0 : index
    %c0_218 = arith.constant 0 : index
    %573 = vector.load %arg17[%c1_216, %c0_217, %c0_218] : memref<3x1x32xf32, #tpu.memory_space<vmem>>, vector<1x1x32xf32>
    %574 = vector.shape_cast %573 : vector<1x1x32xf32> to vector<1x32xf32>
    %cst_219 = arith.constant 0.000000e+00 : f32
    %575 = vector.broadcast %cst_219 : f32 to vector<7x32xf32>
    %576 = vector.extract_strided_slice %560 {offsets = [0, 0], sizes = [7, 8], strides = [1, 1]} : vector<7x32xf32> to vector<7x8xf32>
    %577 = arith.truncf %576 : vector<7x8xf32> to vector<7x8xbf16>
    %578 = vector.extract_strided_slice %569 {offsets = [0, 0], sizes = [8, 8], strides = [1, 1]} : vector<8x32xf32> to vector<8x8xf32>
    %579 = arith.truncf %578 : vector<8x8xf32> to vector<8x8xbf16>
    %580 = vector.extract_strided_slice %570 {offsets = [0, 0], sizes = [8, 8], strides = [1, 1]} : vector<8x32xf32> to vector<8x8xf32>
    %581 = arith.truncf %580 : vector<8x8xf32> to vector<8x8xbf16>
    %cst_220 = arith.constant dense<0.000000e+00> : vector<7x8xf32>
    %582 = tpu.matmul %577, %579, %cst_220 {dimension_numbers = #tpu.dot_dimension_numbers<[1], [1], [0], [0], [0, 0, 1, 0], [], []>} : vector<7x8xbf16>, vector<8x8xbf16>, vector<7x8xf32> -> vector<7x8xf32>
    %cst_221 = arith.constant 0.353553385 : f32
    %583 = vector.broadcast %cst_221 : f32 to vector<7x8xf32>
    %584 = arith.mulf %582, %583 : vector<7x8xf32>
    %585 = vector.broadcast %41 : vector<1x8xf32> to vector<7x8xf32>
    %586 = arith.addf %584, %585 : vector<7x8xf32>
    %cst_222 = arith.constant dense<0xFF800000> : vector<7xf32>
    %587 = vector.multi_reduction <maximumf>, %586, %cst_222 [1] : vector<7x8xf32> to vector<7xf32>
    %588 = vector.shape_cast %587 : vector<7xf32> to vector<7x1xf32>
    %589 = vector.broadcast %588 : vector<7x1xf32> to vector<7x8xf32>
    %590 = arith.subf %586, %589 : vector<7x8xf32>
    %591 = math.exp %590 : vector<7x8xf32>
    %cst_223 = arith.constant dense<0.000000e+00> : vector<7xf32>
    %592 = vector.multi_reduction <add>, %591, %cst_223 [1] : vector<7x8xf32> to vector<7xf32>
    %593 = vector.shape_cast %592 : vector<7xf32> to vector<7x1xf32>
    %594 = tpu.reciprocal %593 {approx = true} : vector<7x1xf32> -> vector<7x1xf32>
    %595 = vector.broadcast %594 : vector<7x1xf32> to vector<7x8xf32>
    %596 = arith.mulf %591, %595 : vector<7x8xf32>
    %597 = arith.truncf %596 : vector<7x8xf32> to vector<7x8xbf16>
    %cst_224 = arith.constant dense<0.000000e+00> : vector<7x8xf32>
    %598 = tpu.matmul %597, %581, %cst_224 {dimension_numbers = #tpu.dot_dimension_numbers<[1], [0], [0], [1], [0, 0, 1, 1], [], []>} : vector<7x8xbf16>, vector<8x8xbf16>, vector<7x8xf32> -> vector<7x8xf32>
    %599 = arith.truncf %598 : vector<7x8xf32> to vector<7x8xbf16>
    %600 = vector.extract_strided_slice %572 {offsets = [0, 0], sizes = [8, 32], strides = [1, 1]} : vector<32x32xbf16> to vector<8x32xbf16>
    %cst_225 = arith.constant dense<0.000000e+00> : vector<7x32xf32>
    %601 = tpu.matmul %599, %600, %cst_225 {dimension_numbers = #tpu.dot_dimension_numbers<[1], [0], [0], [1], [0, 0, 1, 1], [], []>} : vector<7x8xbf16>, vector<8x32xbf16>, vector<7x32xf32> -> vector<7x32xf32>
    %602 = arith.addf %575, %601 : vector<7x32xf32>
    %603 = vector.extract_strided_slice %560 {offsets = [0, 8], sizes = [7, 8], strides = [1, 1]} : vector<7x32xf32> to vector<7x8xf32>
    %604 = arith.truncf %603 : vector<7x8xf32> to vector<7x8xbf16>
    %605 = vector.extract_strided_slice %569 {offsets = [0, 8], sizes = [8, 8], strides = [1, 1]} : vector<8x32xf32> to vector<8x8xf32>
    %606 = arith.truncf %605 : vector<8x8xf32> to vector<8x8xbf16>
    %607 = vector.extract_strided_slice %570 {offsets = [0, 8], sizes = [8, 8], strides = [1, 1]} : vector<8x32xf32> to vector<8x8xf32>
    %608 = arith.truncf %607 : vector<8x8xf32> to vector<8x8xbf16>
    %cst_226 = arith.constant dense<0.000000e+00> : vector<7x8xf32>
    %609 = tpu.matmul %604, %606, %cst_226 {dimension_numbers = #tpu.dot_dimension_numbers<[1], [1], [0], [0], [0, 0, 1, 0], [], []>} : vector<7x8xbf16>, vector<8x8xbf16>, vector<7x8xf32> -> vector<7x8xf32>
    %cst_227 = arith.constant 0.353553385 : f32
    %610 = vector.broadcast %cst_227 : f32 to vector<7x8xf32>
    %611 = arith.mulf %609, %610 : vector<7x8xf32>
    %612 = vector.broadcast %41 : vector<1x8xf32> to vector<7x8xf32>
    %613 = arith.addf %611, %612 : vector<7x8xf32>
    %cst_228 = arith.constant dense<0xFF800000> : vector<7xf32>
    %614 = vector.multi_reduction <maximumf>, %613, %cst_228 [1] : vector<7x8xf32> to vector<7xf32>
    %615 = vector.shape_cast %614 : vector<7xf32> to vector<7x1xf32>
    %616 = vector.broadcast %615 : vector<7x1xf32> to vector<7x8xf32>
    %617 = arith.subf %613, %616 : vector<7x8xf32>
    %618 = math.exp %617 : vector<7x8xf32>
    %cst_229 = arith.constant dense<0.000000e+00> : vector<7xf32>
    %619 = vector.multi_reduction <add>, %618, %cst_229 [1] : vector<7x8xf32> to vector<7xf32>
    %620 = vector.shape_cast %619 : vector<7xf32> to vector<7x1xf32>
    %621 = tpu.reciprocal %620 {approx = true} : vector<7x1xf32> -> vector<7x1xf32>
    %622 = vector.broadcast %621 : vector<7x1xf32> to vector<7x8xf32>
    %623 = arith.mulf %618, %622 : vector<7x8xf32>
    %624 = arith.truncf %623 : vector<7x8xf32> to vector<7x8xbf16>
    %cst_230 = arith.constant dense<0.000000e+00> : vector<7x8xf32>
    %625 = tpu.matmul %624, %608, %cst_230 {dimension_numbers = #tpu.dot_dimension_numbers<[1], [0], [0], [1], [0, 0, 1, 1], [], []>} : vector<7x8xbf16>, vector<8x8xbf16>, vector<7x8xf32> -> vector<7x8xf32>
    %626 = arith.truncf %625 : vector<7x8xf32> to vector<7x8xbf16>
    %627 = vector.extract_strided_slice %572 {offsets = [8, 0], sizes = [8, 32], strides = [1, 1]} : vector<32x32xbf16> to vector<8x32xbf16>
    %cst_231 = arith.constant dense<0.000000e+00> : vector<7x32xf32>
    %628 = tpu.matmul %626, %627, %cst_231 {dimension_numbers = #tpu.dot_dimension_numbers<[1], [0], [0], [1], [0, 0, 1, 1], [], []>} : vector<7x8xbf16>, vector<8x32xbf16>, vector<7x32xf32> -> vector<7x32xf32>
    %629 = arith.addf %602, %628 : vector<7x32xf32>
    %630 = vector.extract_strided_slice %560 {offsets = [0, 16], sizes = [7, 8], strides = [1, 1]} : vector<7x32xf32> to vector<7x8xf32>
    %631 = arith.truncf %630 : vector<7x8xf32> to vector<7x8xbf16>
    %632 = vector.extract_strided_slice %569 {offsets = [0, 16], sizes = [8, 8], strides = [1, 1]} : vector<8x32xf32> to vector<8x8xf32>
    %633 = arith.truncf %632 : vector<8x8xf32> to vector<8x8xbf16>
    %634 = vector.extract_strided_slice %570 {offsets = [0, 16], sizes = [8, 8], strides = [1, 1]} : vector<8x32xf32> to vector<8x8xf32>
    %635 = arith.truncf %634 : vector<8x8xf32> to vector<8x8xbf16>
    %cst_232 = arith.constant dense<0.000000e+00> : vector<7x8xf32>
    %636 = tpu.matmul %631, %633, %cst_232 {dimension_numbers = #tpu.dot_dimension_numbers<[1], [1], [0], [0], [0, 0, 1, 0], [], []>} : vector<7x8xbf16>, vector<8x8xbf16>, vector<7x8xf32> -> vector<7x8xf32>
    %cst_233 = arith.constant 0.353553385 : f32
    %637 = vector.broadcast %cst_233 : f32 to vector<7x8xf32>
    %638 = arith.mulf %636, %637 : vector<7x8xf32>
    %639 = vector.broadcast %41 : vector<1x8xf32> to vector<7x8xf32>
    %640 = arith.addf %638, %639 : vector<7x8xf32>
    %cst_234 = arith.constant dense<0xFF800000> : vector<7xf32>
    %641 = vector.multi_reduction <maximumf>, %640, %cst_234 [1] : vector<7x8xf32> to vector<7xf32>
    %642 = vector.shape_cast %641 : vector<7xf32> to vector<7x1xf32>
    %643 = vector.broadcast %642 : vector<7x1xf32> to vector<7x8xf32>
    %644 = arith.subf %640, %643 : vector<7x8xf32>
    %645 = math.exp %644 : vector<7x8xf32>
    %cst_235 = arith.constant dense<0.000000e+00> : vector<7xf32>
    %646 = vector.multi_reduction <add>, %645, %cst_235 [1] : vector<7x8xf32> to vector<7xf32>
    %647 = vector.shape_cast %646 : vector<7xf32> to vector<7x1xf32>
    %648 = tpu.reciprocal %647 {approx = true} : vector<7x1xf32> -> vector<7x1xf32>
    %649 = vector.broadcast %648 : vector<7x1xf32> to vector<7x8xf32>
    %650 = arith.mulf %645, %649 : vector<7x8xf32>
    %651 = arith.truncf %650 : vector<7x8xf32> to vector<7x8xbf16>
    %cst_236 = arith.constant dense<0.000000e+00> : vector<7x8xf32>
    %652 = tpu.matmul %651, %635, %cst_236 {dimension_numbers = #tpu.dot_dimension_numbers<[1], [0], [0], [1], [0, 0, 1, 1], [], []>} : vector<7x8xbf16>, vector<8x8xbf16>, vector<7x8xf32> -> vector<7x8xf32>
    %653 = arith.truncf %652 : vector<7x8xf32> to vector<7x8xbf16>
    %654 = vector.extract_strided_slice %572 {offsets = [16, 0], sizes = [8, 32], strides = [1, 1]} : vector<32x32xbf16> to vector<8x32xbf16>
    %cst_237 = arith.constant dense<0.000000e+00> : vector<7x32xf32>
    %655 = tpu.matmul %653, %654, %cst_237 {dimension_numbers = #tpu.dot_dimension_numbers<[1], [0], [0], [1], [0, 0, 1, 1], [], []>} : vector<7x8xbf16>, vector<8x32xbf16>, vector<7x32xf32> -> vector<7x32xf32>
    %656 = arith.addf %629, %655 : vector<7x32xf32>
    %657 = vector.extract_strided_slice %560 {offsets = [0, 24], sizes = [7, 8], strides = [1, 1]} : vector<7x32xf32> to vector<7x8xf32>
    %658 = arith.truncf %657 : vector<7x8xf32> to vector<7x8xbf16>
    %659 = vector.extract_strided_slice %569 {offsets = [0, 24], sizes = [8, 8], strides = [1, 1]} : vector<8x32xf32> to vector<8x8xf32>
    %660 = arith.truncf %659 : vector<8x8xf32> to vector<8x8xbf16>
    %661 = vector.extract_strided_slice %570 {offsets = [0, 24], sizes = [8, 8], strides = [1, 1]} : vector<8x32xf32> to vector<8x8xf32>
    %662 = arith.truncf %661 : vector<8x8xf32> to vector<8x8xbf16>
    %cst_238 = arith.constant dense<0.000000e+00> : vector<7x8xf32>
    %663 = tpu.matmul %658, %660, %cst_238 {dimension_numbers = #tpu.dot_dimension_numbers<[1], [1], [0], [0], [0, 0, 1, 0], [], []>} : vector<7x8xbf16>, vector<8x8xbf16>, vector<7x8xf32> -> vector<7x8xf32>
    %cst_239 = arith.constant 0.353553385 : f32
    %664 = vector.broadcast %cst_239 : f32 to vector<7x8xf32>
    %665 = arith.mulf %663, %664 : vector<7x8xf32>
    %666 = vector.broadcast %41 : vector<1x8xf32> to vector<7x8xf32>
    %667 = arith.addf %665, %666 : vector<7x8xf32>
    %cst_240 = arith.constant dense<0xFF800000> : vector<7xf32>
    %668 = vector.multi_reduction <maximumf>, %667, %cst_240 [1] : vector<7x8xf32> to vector<7xf32>
    %669 = vector.shape_cast %668 : vector<7xf32> to vector<7x1xf32>
    %670 = vector.broadcast %669 : vector<7x1xf32> to vector<7x8xf32>
    %671 = arith.subf %667, %670 : vector<7x8xf32>
    %672 = math.exp %671 : vector<7x8xf32>
    %cst_241 = arith.constant dense<0.000000e+00> : vector<7xf32>
    %673 = vector.multi_reduction <add>, %672, %cst_241 [1] : vector<7x8xf32> to vector<7xf32>
    %674 = vector.shape_cast %673 : vector<7xf32> to vector<7x1xf32>
    %675 = tpu.reciprocal %674 {approx = true} : vector<7x1xf32> -> vector<7x1xf32>
    %676 = vector.broadcast %675 : vector<7x1xf32> to vector<7x8xf32>
    %677 = arith.mulf %672, %676 : vector<7x8xf32>
    %678 = arith.truncf %677 : vector<7x8xf32> to vector<7x8xbf16>
    %cst_242 = arith.constant dense<0.000000e+00> : vector<7x8xf32>
    %679 = tpu.matmul %678, %662, %cst_242 {dimension_numbers = #tpu.dot_dimension_numbers<[1], [0], [0], [1], [0, 0, 1, 1], [], []>} : vector<7x8xbf16>, vector<8x8xbf16>, vector<7x8xf32> -> vector<7x8xf32>
    %680 = arith.truncf %679 : vector<7x8xf32> to vector<7x8xbf16>
    %681 = vector.extract_strided_slice %572 {offsets = [24, 0], sizes = [8, 32], strides = [1, 1]} : vector<32x32xbf16> to vector<8x32xbf16>
    %cst_243 = arith.constant dense<0.000000e+00> : vector<7x32xf32>
    %682 = tpu.matmul %680, %681, %cst_243 {dimension_numbers = #tpu.dot_dimension_numbers<[1], [0], [0], [1], [0, 0, 1, 1], [], []>} : vector<7x8xbf16>, vector<8x32xbf16>, vector<7x32xf32> -> vector<7x32xf32>
    %683 = arith.addf %656, %682 : vector<7x32xf32>
    %684 = vector.broadcast %574 : vector<1x32xf32> to vector<7x32xf32>
    %685 = arith.addf %683, %684 : vector<7x32xf32>
    %686 = arith.addf %552, %685 : vector<7x32xf32>
    %c1_244 = arith.constant 1 : index
    %c0_245 = arith.constant 0 : index
    %c0_246 = arith.constant 0 : index
    %687 = vector.load %arg18[%c1_244, %c0_245, %c0_246] : memref<3x1x32xf32, #tpu.memory_space<vmem>>, vector<1x1x32xf32>
    %688 = vector.shape_cast %687 : vector<1x1x32xf32> to vector<1x32xf32>
    %c1_247 = arith.constant 1 : index
    %c0_248 = arith.constant 0 : index
    %c0_249 = arith.constant 0 : index
    %689 = vector.load %arg19[%c1_247, %c0_248, %c0_249] : memref<3x1x32xf32, #tpu.memory_space<vmem>>, vector<1x1x32xf32>
    %690 = vector.shape_cast %689 : vector<1x1x32xf32> to vector<1x32xf32>
    %cst_250 = arith.constant dense<0.000000e+00> : vector<7xf32>
    %691 = vector.multi_reduction <add>, %686, %cst_250 [1] : vector<7x32xf32> to vector<7xf32>
    %692 = vector.shape_cast %691 : vector<7xf32> to vector<7x1xf32>
    %cst_251 = arith.constant 3.200000e+01 : f32
    %693 = vector.broadcast %cst_251 : f32 to vector<7x1xf32>
    %694 = arith.divf %692, %693 : vector<7x1xf32>
    %695 = vector.broadcast %694 : vector<7x1xf32> to vector<7x32xf32>
    %696 = arith.subf %686, %695 : vector<7x32xf32>
    %697 = vector.broadcast %694 : vector<7x1xf32> to vector<7x32xf32>
    %698 = arith.subf %686, %697 : vector<7x32xf32>
    %699 = arith.mulf %696, %698 : vector<7x32xf32>
    %cst_252 = arith.constant dense<0.000000e+00> : vector<7xf32>
    %700 = vector.multi_reduction <add>, %699, %cst_252 [1] : vector<7x32xf32> to vector<7xf32>
    %701 = vector.shape_cast %700 : vector<7xf32> to vector<7x1xf32>
    %cst_253 = arith.constant 3.200000e+01 : f32
    %702 = vector.broadcast %cst_253 : f32 to vector<7x1xf32>
    %703 = arith.divf %701, %702 : vector<7x1xf32>
    %704 = vector.broadcast %694 : vector<7x1xf32> to vector<7x32xf32>
    %705 = arith.subf %686, %704 : vector<7x32xf32>
    %cst_254 = arith.constant 9.99999996E-13 : f32
    %706 = vector.broadcast %cst_254 : f32 to vector<7x1xf32>
    %707 = arith.addf %703, %706 : vector<7x1xf32>
    %708 = math.rsqrt %707 : vector<7x1xf32>
    %709 = vector.broadcast %708 : vector<7x1xf32> to vector<7x32xf32>
    %710 = arith.mulf %705, %709 : vector<7x32xf32>
    %711 = vector.broadcast %688 : vector<1x32xf32> to vector<7x32xf32>
    %712 = arith.mulf %710, %711 : vector<7x32xf32>
    %713 = vector.broadcast %690 : vector<1x32xf32> to vector<7x32xf32>
    %714 = arith.addf %712, %713 : vector<7x32xf32>
    %c1_255 = arith.constant 1 : index
    %c0_256 = arith.constant 0 : index
    %c0_257 = arith.constant 0 : index
    %715 = vector.load %arg20[%c1_255, %c0_256, %c0_257] : memref<3x32x128xbf16, #tpu.memory_space<vmem>>, vector<1x32x128xbf16>
    %716 = vector.shape_cast %715 : vector<1x32x128xbf16> to vector<32x128xbf16>
    %c1_258 = arith.constant 1 : index
    %c0_259 = arith.constant 0 : index
    %c0_260 = arith.constant 0 : index
    %717 = vector.load %arg21[%c1_258, %c0_259, %c0_260] : memref<3x1x128xf32, #tpu.memory_space<vmem>>, vector<1x1x128xf32>
    %718 = vector.shape_cast %717 : vector<1x1x128xf32> to vector<1x128xf32>
    %719 = arith.truncf %714 : vector<7x32xf32> to vector<7x32xbf16>
    %cst_261 = arith.constant dense<0.000000e+00> : vector<7x128xf32>
    %720 = tpu.matmul %719, %716, %cst_261 {dimension_numbers = #tpu.dot_dimension_numbers<[1], [0], [0], [1], [0, 0, 1, 1], [], []>} : vector<7x32xbf16>, vector<32x128xbf16>, vector<7x128xf32> -> vector<7x128xf32>
    %721 = vector.broadcast %718 : vector<1x128xf32> to vector<7x128xf32>
    %722 = arith.addf %720, %721 : vector<7x128xf32>
    %cst_262 = arith.constant 0.000000e+00 : f32
    %723 = vector.broadcast %cst_262 : f32 to vector<7x128xf32>
    %724 = arith.maximumf %722, %723 : vector<7x128xf32>
    %c1_263 = arith.constant 1 : index
    %c0_264 = arith.constant 0 : index
    %c0_265 = arith.constant 0 : index
    %725 = vector.load %arg22[%c1_263, %c0_264, %c0_265] : memref<3x128x32xbf16, #tpu.memory_space<vmem>>, vector<1x128x32xbf16>
    %726 = vector.shape_cast %725 : vector<1x128x32xbf16> to vector<128x32xbf16>
    %c1_266 = arith.constant 1 : index
    %c0_267 = arith.constant 0 : index
    %c0_268 = arith.constant 0 : index
    %727 = vector.load %arg23[%c1_266, %c0_267, %c0_268] : memref<3x1x32xf32, #tpu.memory_space<vmem>>, vector<1x1x32xf32>
    %728 = vector.shape_cast %727 : vector<1x1x32xf32> to vector<1x32xf32>
    %729 = arith.truncf %724 : vector<7x128xf32> to vector<7x128xbf16>
    %cst_269 = arith.constant dense<0.000000e+00> : vector<7x32xf32>
    %730 = tpu.matmul %729, %726, %cst_269 {dimension_numbers = #tpu.dot_dimension_numbers<[1], [0], [0], [1], [0, 0, 1, 1], [], []>} : vector<7x128xbf16>, vector<128x32xbf16>, vector<7x32xf32> -> vector<7x32xf32>
    %731 = vector.broadcast %728 : vector<1x32xf32> to vector<7x32xf32>
    %732 = arith.addf %730, %731 : vector<7x32xf32>
    %733 = arith.addf %714, %732 : vector<7x32xf32>
    %c1_270 = arith.constant 1 : index
    %c0_271 = arith.constant 0 : index
    %c0_272 = arith.constant 0 : index
    %734 = vector.load %arg24[%c1_270, %c0_271, %c0_272] : memref<3x1x32xf32, #tpu.memory_space<vmem>>, vector<1x1x32xf32>
    %735 = vector.shape_cast %734 : vector<1x1x32xf32> to vector<1x32xf32>
    %c1_273 = arith.constant 1 : index
    %c0_274 = arith.constant 0 : index
    %c0_275 = arith.constant 0 : index
    %736 = vector.load %arg25[%c1_273, %c0_274, %c0_275] : memref<3x1x32xf32, #tpu.memory_space<vmem>>, vector<1x1x32xf32>
    %737 = vector.shape_cast %736 : vector<1x1x32xf32> to vector<1x32xf32>
    %cst_276 = arith.constant dense<0.000000e+00> : vector<7xf32>
    %738 = vector.multi_reduction <add>, %733, %cst_276 [1] : vector<7x32xf32> to vector<7xf32>
    %739 = vector.shape_cast %738 : vector<7xf32> to vector<7x1xf32>
    %cst_277 = arith.constant 3.200000e+01 : f32
    %740 = vector.broadcast %cst_277 : f32 to vector<7x1xf32>
    %741 = arith.divf %739, %740 : vector<7x1xf32>
    %742 = vector.broadcast %741 : vector<7x1xf32> to vector<7x32xf32>
    %743 = arith.subf %733, %742 : vector<7x32xf32>
    %744 = vector.broadcast %741 : vector<7x1xf32> to vector<7x32xf32>
    %745 = arith.subf %733, %744 : vector<7x32xf32>
    %746 = arith.mulf %743, %745 : vector<7x32xf32>
    %cst_278 = arith.constant dense<0.000000e+00> : vector<7xf32>
    %747 = vector.multi_reduction <add>, %746, %cst_278 [1] : vector<7x32xf32> to vector<7xf32>
    %748 = vector.shape_cast %747 : vector<7xf32> to vector<7x1xf32>
    %cst_279 = arith.constant 3.200000e+01 : f32
    %749 = vector.broadcast %cst_279 : f32 to vector<7x1xf32>
    %750 = arith.divf %748, %749 : vector<7x1xf32>
    %751 = vector.broadcast %741 : vector<7x1xf32> to vector<7x32xf32>
    %752 = arith.subf %733, %751 : vector<7x32xf32>
    %cst_280 = arith.constant 9.99999996E-13 : f32
    %753 = vector.broadcast %cst_280 : f32 to vector<7x1xf32>
    %754 = arith.addf %750, %753 : vector<7x1xf32>
    %755 = math.rsqrt %754 : vector<7x1xf32>
    %756 = vector.broadcast %755 : vector<7x1xf32> to vector<7x32xf32>
    %757 = arith.mulf %752, %756 : vector<7x32xf32>
    %758 = vector.broadcast %735 : vector<1x32xf32> to vector<7x32xf32>
    %759 = arith.mulf %757, %758 : vector<7x32xf32>
    %760 = vector.broadcast %737 : vector<1x32xf32> to vector<7x32xf32>
    %761 = arith.addf %759, %760 : vector<7x32xf32>
    %c2 = arith.constant 2 : index
    %c0_281 = arith.constant 0 : index
    %c0_282 = arith.constant 0 : index
    %762 = vector.load %arg6[%c2, %c0_281, %c0_282] : memref<3x32x96xbf16, #tpu.memory_space<vmem>>, vector<1x32x96xbf16>
    %763 = vector.shape_cast %762 : vector<1x32x96xbf16> to vector<32x96xbf16>
    %c2_283 = arith.constant 2 : index
    %c0_284 = arith.constant 0 : index
    %c0_285 = arith.constant 0 : index
    %764 = vector.load %arg7[%c2_283, %c0_284, %c0_285] : memref<3x1x96xf32, #tpu.memory_space<vmem>>, vector<1x1x96xf32>
    %765 = vector.shape_cast %764 : vector<1x1x96xf32> to vector<1x96xf32>
    %766 = arith.truncf %761 : vector<7x32xf32> to vector<7x32xbf16>
    %cst_286 = arith.constant dense<0.000000e+00> : vector<7x96xf32>
    %767 = tpu.matmul %766, %763, %cst_286 {dimension_numbers = #tpu.dot_dimension_numbers<[1], [0], [0], [1], [0, 0, 1, 1], [], []>} : vector<7x32xbf16>, vector<32x96xbf16>, vector<7x96xf32> -> vector<7x96xf32>
    %768 = vector.broadcast %765 : vector<1x96xf32> to vector<7x96xf32>
    %769 = arith.addf %767, %768 : vector<7x96xf32>
    %770 = vector.extract_strided_slice %769 {offsets = [0, 0], sizes = [7, 32], strides = [1, 1]} : vector<7x96xf32> to vector<7x32xf32>
    %771 = vector.extract_strided_slice %769 {offsets = [0, 32], sizes = [7, 32], strides = [1, 1]} : vector<7x96xf32> to vector<7x32xf32>
    %772 = vector.extract_strided_slice %769 {offsets = [0, 64], sizes = [7, 32], strides = [1, 1]} : vector<7x96xf32> to vector<7x32xf32>
    %c2_287 = arith.constant 2 : index
    %c0_288 = arith.constant 0 : index
    %c0_289 = arith.constant 0 : index
    %773 = vector.load %arg8[%c2_287, %c0_288, %c0_289] : memref<3x32x32xbf16, #tpu.memory_space<vmem>>, vector<1x32x32xbf16>
    %774 = vector.shape_cast %773 : vector<1x32x32xbf16> to vector<32x32xbf16>
    %c2_290 = arith.constant 2 : index
    %c0_291 = arith.constant 0 : index
    %c0_292 = arith.constant 0 : index
    %775 = vector.load %arg9[%c2_290, %c0_291, %c0_292] : memref<3x1x32xf32, #tpu.memory_space<vmem>>, vector<1x1x32xf32>
    %776 = vector.shape_cast %775 : vector<1x1x32xf32> to vector<1x32xf32>
    %cst_293 = arith.constant 0.000000e+00 : f32
    %777 = vector.broadcast %cst_293 : f32 to vector<7x32xf32>
    %778 = vector.extract_strided_slice %770 {offsets = [0, 0], sizes = [7, 8], strides = [1, 1]} : vector<7x32xf32> to vector<7x8xf32>
    %779 = arith.truncf %778 : vector<7x8xf32> to vector<7x8xbf16>
    %780 = vector.extract_strided_slice %771 {offsets = [0, 0], sizes = [7, 8], strides = [1, 1]} : vector<7x32xf32> to vector<7x8xf32>
    %781 = arith.truncf %780 : vector<7x8xf32> to vector<7x8xbf16>
    %782 = vector.extract_strided_slice %772 {offsets = [0, 0], sizes = [7, 8], strides = [1, 1]} : vector<7x32xf32> to vector<7x8xf32>
    %783 = arith.truncf %782 : vector<7x8xf32> to vector<7x8xbf16>
    %cst_294 = arith.constant dense<0.000000e+00> : vector<7x7xf32>
    %784 = tpu.matmul %779, %781, %cst_294 {dimension_numbers = #tpu.dot_dimension_numbers<[1], [1], [0], [0], [0, 0, 1, 0], [], []>} : vector<7x8xbf16>, vector<7x8xbf16>, vector<7x7xf32> -> vector<7x7xf32>
    %cst_295 = arith.constant 0.353553385 : f32
    %785 = vector.broadcast %cst_295 : f32 to vector<7x7xf32>
    %786 = arith.mulf %784, %785 : vector<7x7xf32>
    %787 = arith.addf %786, %35 : vector<7x7xf32>
    %cst_296 = arith.constant dense<0xFF800000> : vector<7xf32>
    %788 = vector.multi_reduction <maximumf>, %787, %cst_296 [1] : vector<7x7xf32> to vector<7xf32>
    %789 = vector.shape_cast %788 : vector<7xf32> to vector<7x1xf32>
    %790 = vector.broadcast %789 : vector<7x1xf32> to vector<7x7xf32>
    %791 = arith.subf %787, %790 : vector<7x7xf32>
    %792 = math.exp %791 : vector<7x7xf32>
    %cst_297 = arith.constant dense<0.000000e+00> : vector<7xf32>
    %793 = vector.multi_reduction <add>, %792, %cst_297 [1] : vector<7x7xf32> to vector<7xf32>
    %794 = vector.shape_cast %793 : vector<7xf32> to vector<7x1xf32>
    %795 = tpu.reciprocal %794 {approx = true} : vector<7x1xf32> -> vector<7x1xf32>
    %796 = vector.broadcast %795 : vector<7x1xf32> to vector<7x7xf32>
    %797 = arith.mulf %792, %796 : vector<7x7xf32>
    %798 = arith.truncf %797 : vector<7x7xf32> to vector<7x7xbf16>
    %cst_298 = arith.constant dense<0.000000e+00> : vector<7x8xf32>
    %799 = tpu.matmul %798, %783, %cst_298 {dimension_numbers = #tpu.dot_dimension_numbers<[1], [0], [0], [1], [0, 0, 1, 1], [], []>} : vector<7x7xbf16>, vector<7x8xbf16>, vector<7x8xf32> -> vector<7x8xf32>
    %800 = arith.truncf %799 : vector<7x8xf32> to vector<7x8xbf16>
    %801 = vector.extract_strided_slice %774 {offsets = [0, 0], sizes = [8, 32], strides = [1, 1]} : vector<32x32xbf16> to vector<8x32xbf16>
    %cst_299 = arith.constant dense<0.000000e+00> : vector<7x32xf32>
    %802 = tpu.matmul %800, %801, %cst_299 {dimension_numbers = #tpu.dot_dimension_numbers<[1], [0], [0], [1], [0, 0, 1, 1], [], []>} : vector<7x8xbf16>, vector<8x32xbf16>, vector<7x32xf32> -> vector<7x32xf32>
    %803 = arith.addf %777, %802 : vector<7x32xf32>
    %804 = vector.extract_strided_slice %770 {offsets = [0, 8], sizes = [7, 8], strides = [1, 1]} : vector<7x32xf32> to vector<7x8xf32>
    %805 = arith.truncf %804 : vector<7x8xf32> to vector<7x8xbf16>
    %806 = vector.extract_strided_slice %771 {offsets = [0, 8], sizes = [7, 8], strides = [1, 1]} : vector<7x32xf32> to vector<7x8xf32>
    %807 = arith.truncf %806 : vector<7x8xf32> to vector<7x8xbf16>
    %808 = vector.extract_strided_slice %772 {offsets = [0, 8], sizes = [7, 8], strides = [1, 1]} : vector<7x32xf32> to vector<7x8xf32>
    %809 = arith.truncf %808 : vector<7x8xf32> to vector<7x8xbf16>
    %cst_300 = arith.constant dense<0.000000e+00> : vector<7x7xf32>
    %810 = tpu.matmul %805, %807, %cst_300 {dimension_numbers = #tpu.dot_dimension_numbers<[1], [1], [0], [0], [0, 0, 1, 0], [], []>} : vector<7x8xbf16>, vector<7x8xbf16>, vector<7x7xf32> -> vector<7x7xf32>
    %cst_301 = arith.constant 0.353553385 : f32
    %811 = vector.broadcast %cst_301 : f32 to vector<7x7xf32>
    %812 = arith.mulf %810, %811 : vector<7x7xf32>
    %813 = arith.addf %812, %35 : vector<7x7xf32>
    %cst_302 = arith.constant dense<0xFF800000> : vector<7xf32>
    %814 = vector.multi_reduction <maximumf>, %813, %cst_302 [1] : vector<7x7xf32> to vector<7xf32>
    %815 = vector.shape_cast %814 : vector<7xf32> to vector<7x1xf32>
    %816 = vector.broadcast %815 : vector<7x1xf32> to vector<7x7xf32>
    %817 = arith.subf %813, %816 : vector<7x7xf32>
    %818 = math.exp %817 : vector<7x7xf32>
    %cst_303 = arith.constant dense<0.000000e+00> : vector<7xf32>
    %819 = vector.multi_reduction <add>, %818, %cst_303 [1] : vector<7x7xf32> to vector<7xf32>
    %820 = vector.shape_cast %819 : vector<7xf32> to vector<7x1xf32>
    %821 = tpu.reciprocal %820 {approx = true} : vector<7x1xf32> -> vector<7x1xf32>
    %822 = vector.broadcast %821 : vector<7x1xf32> to vector<7x7xf32>
    %823 = arith.mulf %818, %822 : vector<7x7xf32>
    %824 = arith.truncf %823 : vector<7x7xf32> to vector<7x7xbf16>
    %cst_304 = arith.constant dense<0.000000e+00> : vector<7x8xf32>
    %825 = tpu.matmul %824, %809, %cst_304 {dimension_numbers = #tpu.dot_dimension_numbers<[1], [0], [0], [1], [0, 0, 1, 1], [], []>} : vector<7x7xbf16>, vector<7x8xbf16>, vector<7x8xf32> -> vector<7x8xf32>
    %826 = arith.truncf %825 : vector<7x8xf32> to vector<7x8xbf16>
    %827 = vector.extract_strided_slice %774 {offsets = [8, 0], sizes = [8, 32], strides = [1, 1]} : vector<32x32xbf16> to vector<8x32xbf16>
    %cst_305 = arith.constant dense<0.000000e+00> : vector<7x32xf32>
    %828 = tpu.matmul %826, %827, %cst_305 {dimension_numbers = #tpu.dot_dimension_numbers<[1], [0], [0], [1], [0, 0, 1, 1], [], []>} : vector<7x8xbf16>, vector<8x32xbf16>, vector<7x32xf32> -> vector<7x32xf32>
    %829 = arith.addf %803, %828 : vector<7x32xf32>
    %830 = vector.extract_strided_slice %770 {offsets = [0, 16], sizes = [7, 8], strides = [1, 1]} : vector<7x32xf32> to vector<7x8xf32>
    %831 = arith.truncf %830 : vector<7x8xf32> to vector<7x8xbf16>
    %832 = vector.extract_strided_slice %771 {offsets = [0, 16], sizes = [7, 8], strides = [1, 1]} : vector<7x32xf32> to vector<7x8xf32>
    %833 = arith.truncf %832 : vector<7x8xf32> to vector<7x8xbf16>
    %834 = vector.extract_strided_slice %772 {offsets = [0, 16], sizes = [7, 8], strides = [1, 1]} : vector<7x32xf32> to vector<7x8xf32>
    %835 = arith.truncf %834 : vector<7x8xf32> to vector<7x8xbf16>
    %cst_306 = arith.constant dense<0.000000e+00> : vector<7x7xf32>
    %836 = tpu.matmul %831, %833, %cst_306 {dimension_numbers = #tpu.dot_dimension_numbers<[1], [1], [0], [0], [0, 0, 1, 0], [], []>} : vector<7x8xbf16>, vector<7x8xbf16>, vector<7x7xf32> -> vector<7x7xf32>
    %cst_307 = arith.constant 0.353553385 : f32
    %837 = vector.broadcast %cst_307 : f32 to vector<7x7xf32>
    %838 = arith.mulf %836, %837 : vector<7x7xf32>
    %839 = arith.addf %838, %35 : vector<7x7xf32>
    %cst_308 = arith.constant dense<0xFF800000> : vector<7xf32>
    %840 = vector.multi_reduction <maximumf>, %839, %cst_308 [1] : vector<7x7xf32> to vector<7xf32>
    %841 = vector.shape_cast %840 : vector<7xf32> to vector<7x1xf32>
    %842 = vector.broadcast %841 : vector<7x1xf32> to vector<7x7xf32>
    %843 = arith.subf %839, %842 : vector<7x7xf32>
    %844 = math.exp %843 : vector<7x7xf32>
    %cst_309 = arith.constant dense<0.000000e+00> : vector<7xf32>
    %845 = vector.multi_reduction <add>, %844, %cst_309 [1] : vector<7x7xf32> to vector<7xf32>
    %846 = vector.shape_cast %845 : vector<7xf32> to vector<7x1xf32>
    %847 = tpu.reciprocal %846 {approx = true} : vector<7x1xf32> -> vector<7x1xf32>
    %848 = vector.broadcast %847 : vector<7x1xf32> to vector<7x7xf32>
    %849 = arith.mulf %844, %848 : vector<7x7xf32>
    %850 = arith.truncf %849 : vector<7x7xf32> to vector<7x7xbf16>
    %cst_310 = arith.constant dense<0.000000e+00> : vector<7x8xf32>
    %851 = tpu.matmul %850, %835, %cst_310 {dimension_numbers = #tpu.dot_dimension_numbers<[1], [0], [0], [1], [0, 0, 1, 1], [], []>} : vector<7x7xbf16>, vector<7x8xbf16>, vector<7x8xf32> -> vector<7x8xf32>
    %852 = arith.truncf %851 : vector<7x8xf32> to vector<7x8xbf16>
    %853 = vector.extract_strided_slice %774 {offsets = [16, 0], sizes = [8, 32], strides = [1, 1]} : vector<32x32xbf16> to vector<8x32xbf16>
    %cst_311 = arith.constant dense<0.000000e+00> : vector<7x32xf32>
    %854 = tpu.matmul %852, %853, %cst_311 {dimension_numbers = #tpu.dot_dimension_numbers<[1], [0], [0], [1], [0, 0, 1, 1], [], []>} : vector<7x8xbf16>, vector<8x32xbf16>, vector<7x32xf32> -> vector<7x32xf32>
    %855 = arith.addf %829, %854 : vector<7x32xf32>
    %856 = vector.extract_strided_slice %770 {offsets = [0, 24], sizes = [7, 8], strides = [1, 1]} : vector<7x32xf32> to vector<7x8xf32>
    %857 = arith.truncf %856 : vector<7x8xf32> to vector<7x8xbf16>
    %858 = vector.extract_strided_slice %771 {offsets = [0, 24], sizes = [7, 8], strides = [1, 1]} : vector<7x32xf32> to vector<7x8xf32>
    %859 = arith.truncf %858 : vector<7x8xf32> to vector<7x8xbf16>
    %860 = vector.extract_strided_slice %772 {offsets = [0, 24], sizes = [7, 8], strides = [1, 1]} : vector<7x32xf32> to vector<7x8xf32>
    %861 = arith.truncf %860 : vector<7x8xf32> to vector<7x8xbf16>
    %cst_312 = arith.constant dense<0.000000e+00> : vector<7x7xf32>
    %862 = tpu.matmul %857, %859, %cst_312 {dimension_numbers = #tpu.dot_dimension_numbers<[1], [1], [0], [0], [0, 0, 1, 0], [], []>} : vector<7x8xbf16>, vector<7x8xbf16>, vector<7x7xf32> -> vector<7x7xf32>
    %cst_313 = arith.constant 0.353553385 : f32
    %863 = vector.broadcast %cst_313 : f32 to vector<7x7xf32>
    %864 = arith.mulf %862, %863 : vector<7x7xf32>
    %865 = arith.addf %864, %35 : vector<7x7xf32>
    %cst_314 = arith.constant dense<0xFF800000> : vector<7xf32>
    %866 = vector.multi_reduction <maximumf>, %865, %cst_314 [1] : vector<7x7xf32> to vector<7xf32>
    %867 = vector.shape_cast %866 : vector<7xf32> to vector<7x1xf32>
    %868 = vector.broadcast %867 : vector<7x1xf32> to vector<7x7xf32>
    %869 = arith.subf %865, %868 : vector<7x7xf32>
    %870 = math.exp %869 : vector<7x7xf32>
    %cst_315 = arith.constant dense<0.000000e+00> : vector<7xf32>
    %871 = vector.multi_reduction <add>, %870, %cst_315 [1] : vector<7x7xf32> to vector<7xf32>
    %872 = vector.shape_cast %871 : vector<7xf32> to vector<7x1xf32>
    %873 = tpu.reciprocal %872 {approx = true} : vector<7x1xf32> -> vector<7x1xf32>
    %874 = vector.broadcast %873 : vector<7x1xf32> to vector<7x7xf32>
    %875 = arith.mulf %870, %874 : vector<7x7xf32>
    %876 = arith.truncf %875 : vector<7x7xf32> to vector<7x7xbf16>
    %cst_316 = arith.constant dense<0.000000e+00> : vector<7x8xf32>
    %877 = tpu.matmul %876, %861, %cst_316 {dimension_numbers = #tpu.dot_dimension_numbers<[1], [0], [0], [1], [0, 0, 1, 1], [], []>} : vector<7x7xbf16>, vector<7x8xbf16>, vector<7x8xf32> -> vector<7x8xf32>
    %878 = arith.truncf %877 : vector<7x8xf32> to vector<7x8xbf16>
    %879 = vector.extract_strided_slice %774 {offsets = [24, 0], sizes = [8, 32], strides = [1, 1]} : vector<32x32xbf16> to vector<8x32xbf16>
    %cst_317 = arith.constant dense<0.000000e+00> : vector<7x32xf32>
    %880 = tpu.matmul %878, %879, %cst_317 {dimension_numbers = #tpu.dot_dimension_numbers<[1], [0], [0], [1], [0, 0, 1, 1], [], []>} : vector<7x8xbf16>, vector<8x32xbf16>, vector<7x32xf32> -> vector<7x32xf32>
    %881 = arith.addf %855, %880 : vector<7x32xf32>
    %882 = vector.broadcast %776 : vector<1x32xf32> to vector<7x32xf32>
    %883 = arith.addf %881, %882 : vector<7x32xf32>
    %884 = arith.addf %761, %883 : vector<7x32xf32>
    %c2_318 = arith.constant 2 : index
    %c0_319 = arith.constant 0 : index
    %c0_320 = arith.constant 0 : index
    %885 = vector.load %arg10[%c2_318, %c0_319, %c0_320] : memref<3x1x32xf32, #tpu.memory_space<vmem>>, vector<1x1x32xf32>
    %886 = vector.shape_cast %885 : vector<1x1x32xf32> to vector<1x32xf32>
    %c2_321 = arith.constant 2 : index
    %c0_322 = arith.constant 0 : index
    %c0_323 = arith.constant 0 : index
    %887 = vector.load %arg11[%c2_321, %c0_322, %c0_323] : memref<3x1x32xf32, #tpu.memory_space<vmem>>, vector<1x1x32xf32>
    %888 = vector.shape_cast %887 : vector<1x1x32xf32> to vector<1x32xf32>
    %cst_324 = arith.constant dense<0.000000e+00> : vector<7xf32>
    %889 = vector.multi_reduction <add>, %884, %cst_324 [1] : vector<7x32xf32> to vector<7xf32>
    %890 = vector.shape_cast %889 : vector<7xf32> to vector<7x1xf32>
    %cst_325 = arith.constant 3.200000e+01 : f32
    %891 = vector.broadcast %cst_325 : f32 to vector<7x1xf32>
    %892 = arith.divf %890, %891 : vector<7x1xf32>
    %893 = vector.broadcast %892 : vector<7x1xf32> to vector<7x32xf32>
    %894 = arith.subf %884, %893 : vector<7x32xf32>
    %895 = vector.broadcast %892 : vector<7x1xf32> to vector<7x32xf32>
    %896 = arith.subf %884, %895 : vector<7x32xf32>
    %897 = arith.mulf %894, %896 : vector<7x32xf32>
    %cst_326 = arith.constant dense<0.000000e+00> : vector<7xf32>
    %898 = vector.multi_reduction <add>, %897, %cst_326 [1] : vector<7x32xf32> to vector<7xf32>
    %899 = vector.shape_cast %898 : vector<7xf32> to vector<7x1xf32>
    %cst_327 = arith.constant 3.200000e+01 : f32
    %900 = vector.broadcast %cst_327 : f32 to vector<7x1xf32>
    %901 = arith.divf %899, %900 : vector<7x1xf32>
    %902 = vector.broadcast %892 : vector<7x1xf32> to vector<7x32xf32>
    %903 = arith.subf %884, %902 : vector<7x32xf32>
    %cst_328 = arith.constant 9.99999996E-13 : f32
    %904 = vector.broadcast %cst_328 : f32 to vector<7x1xf32>
    %905 = arith.addf %901, %904 : vector<7x1xf32>
    %906 = math.rsqrt %905 : vector<7x1xf32>
    %907 = vector.broadcast %906 : vector<7x1xf32> to vector<7x32xf32>
    %908 = arith.mulf %903, %907 : vector<7x32xf32>
    %909 = vector.broadcast %886 : vector<1x32xf32> to vector<7x32xf32>
    %910 = arith.mulf %908, %909 : vector<7x32xf32>
    %911 = vector.broadcast %888 : vector<1x32xf32> to vector<7x32xf32>
    %912 = arith.addf %910, %911 : vector<7x32xf32>
    %c2_329 = arith.constant 2 : index
    %c0_330 = arith.constant 0 : index
    %c0_331 = arith.constant 0 : index
    %913 = vector.load %arg12[%c2_329, %c0_330, %c0_331] : memref<3x32x32xbf16, #tpu.memory_space<vmem>>, vector<1x32x32xbf16>
    %914 = vector.shape_cast %913 : vector<1x32x32xbf16> to vector<32x32xbf16>
    %c2_332 = arith.constant 2 : index
    %c0_333 = arith.constant 0 : index
    %c0_334 = arith.constant 0 : index
    %915 = vector.load %arg13[%c2_332, %c0_333, %c0_334] : memref<3x1x32xf32, #tpu.memory_space<vmem>>, vector<1x1x32xf32>
    %916 = vector.shape_cast %915 : vector<1x1x32xf32> to vector<1x32xf32>
    %917 = arith.truncf %912 : vector<7x32xf32> to vector<7x32xbf16>
    %cst_335 = arith.constant dense<0.000000e+00> : vector<7x32xf32>
    %918 = tpu.matmul %917, %914, %cst_335 {dimension_numbers = #tpu.dot_dimension_numbers<[1], [0], [0], [1], [0, 0, 1, 1], [], []>} : vector<7x32xbf16>, vector<32x32xbf16>, vector<7x32xf32> -> vector<7x32xf32>
    %919 = vector.broadcast %916 : vector<1x32xf32> to vector<7x32xf32>
    %920 = arith.addf %918, %919 : vector<7x32xf32>
    %c2_336 = arith.constant 2 : index
    %c0_337 = arith.constant 0 : index
    %c0_338 = arith.constant 0 : index
    %921 = vector.load %arg14[%c2_336, %c0_337, %c0_338] : memref<3x32x64xbf16, #tpu.memory_space<vmem>>, vector<1x32x64xbf16>
    %922 = vector.shape_cast %921 : vector<1x32x64xbf16> to vector<32x64xbf16>
    %c2_339 = arith.constant 2 : index
    %c0_340 = arith.constant 0 : index
    %c0_341 = arith.constant 0 : index
    %923 = vector.load %arg15[%c2_339, %c0_340, %c0_341] : memref<3x1x64xf32, #tpu.memory_space<vmem>>, vector<1x1x64xf32>
    %924 = vector.shape_cast %923 : vector<1x1x64xf32> to vector<1x64xf32>
    %925 = arith.truncf %29 : vector<8x32xf32> to vector<8x32xbf16>
    %cst_342 = arith.constant dense<0.000000e+00> : vector<8x64xf32>
    %926 = tpu.matmul %925, %922, %cst_342 {dimension_numbers = #tpu.dot_dimension_numbers<[1], [0], [0], [1], [0, 0, 1, 1], [], []>} : vector<8x32xbf16>, vector<32x64xbf16>, vector<8x64xf32> -> vector<8x64xf32>
    %927 = vector.broadcast %924 : vector<1x64xf32> to vector<8x64xf32>
    %928 = arith.addf %926, %927 : vector<8x64xf32>
    %929 = vector.extract_strided_slice %928 {offsets = [0, 0], sizes = [8, 32], strides = [1, 1]} : vector<8x64xf32> to vector<8x32xf32>
    %930 = vector.extract_strided_slice %928 {offsets = [0, 32], sizes = [8, 32], strides = [1, 1]} : vector<8x64xf32> to vector<8x32xf32>
    %c2_343 = arith.constant 2 : index
    %c0_344 = arith.constant 0 : index
    %c0_345 = arith.constant 0 : index
    %931 = vector.load %arg16[%c2_343, %c0_344, %c0_345] : memref<3x32x32xbf16, #tpu.memory_space<vmem>>, vector<1x32x32xbf16>
    %932 = vector.shape_cast %931 : vector<1x32x32xbf16> to vector<32x32xbf16>
    %c2_346 = arith.constant 2 : index
    %c0_347 = arith.constant 0 : index
    %c0_348 = arith.constant 0 : index
    %933 = vector.load %arg17[%c2_346, %c0_347, %c0_348] : memref<3x1x32xf32, #tpu.memory_space<vmem>>, vector<1x1x32xf32>
    %934 = vector.shape_cast %933 : vector<1x1x32xf32> to vector<1x32xf32>
    %cst_349 = arith.constant 0.000000e+00 : f32
    %935 = vector.broadcast %cst_349 : f32 to vector<7x32xf32>
    %936 = vector.extract_strided_slice %920 {offsets = [0, 0], sizes = [7, 8], strides = [1, 1]} : vector<7x32xf32> to vector<7x8xf32>
    %937 = arith.truncf %936 : vector<7x8xf32> to vector<7x8xbf16>
    %938 = vector.extract_strided_slice %929 {offsets = [0, 0], sizes = [8, 8], strides = [1, 1]} : vector<8x32xf32> to vector<8x8xf32>
    %939 = arith.truncf %938 : vector<8x8xf32> to vector<8x8xbf16>
    %940 = vector.extract_strided_slice %930 {offsets = [0, 0], sizes = [8, 8], strides = [1, 1]} : vector<8x32xf32> to vector<8x8xf32>
    %941 = arith.truncf %940 : vector<8x8xf32> to vector<8x8xbf16>
    %cst_350 = arith.constant dense<0.000000e+00> : vector<7x8xf32>
    %942 = tpu.matmul %937, %939, %cst_350 {dimension_numbers = #tpu.dot_dimension_numbers<[1], [1], [0], [0], [0, 0, 1, 0], [], []>} : vector<7x8xbf16>, vector<8x8xbf16>, vector<7x8xf32> -> vector<7x8xf32>
    %cst_351 = arith.constant 0.353553385 : f32
    %943 = vector.broadcast %cst_351 : f32 to vector<7x8xf32>
    %944 = arith.mulf %942, %943 : vector<7x8xf32>
    %945 = vector.broadcast %41 : vector<1x8xf32> to vector<7x8xf32>
    %946 = arith.addf %944, %945 : vector<7x8xf32>
    %cst_352 = arith.constant dense<0xFF800000> : vector<7xf32>
    %947 = vector.multi_reduction <maximumf>, %946, %cst_352 [1] : vector<7x8xf32> to vector<7xf32>
    %948 = vector.shape_cast %947 : vector<7xf32> to vector<7x1xf32>
    %949 = vector.broadcast %948 : vector<7x1xf32> to vector<7x8xf32>
    %950 = arith.subf %946, %949 : vector<7x8xf32>
    %951 = math.exp %950 : vector<7x8xf32>
    %cst_353 = arith.constant dense<0.000000e+00> : vector<7xf32>
    %952 = vector.multi_reduction <add>, %951, %cst_353 [1] : vector<7x8xf32> to vector<7xf32>
    %953 = vector.shape_cast %952 : vector<7xf32> to vector<7x1xf32>
    %954 = tpu.reciprocal %953 {approx = true} : vector<7x1xf32> -> vector<7x1xf32>
    %955 = vector.broadcast %954 : vector<7x1xf32> to vector<7x8xf32>
    %956 = arith.mulf %951, %955 : vector<7x8xf32>
    %957 = arith.truncf %956 : vector<7x8xf32> to vector<7x8xbf16>
    %cst_354 = arith.constant dense<0.000000e+00> : vector<7x8xf32>
    %958 = tpu.matmul %957, %941, %cst_354 {dimension_numbers = #tpu.dot_dimension_numbers<[1], [0], [0], [1], [0, 0, 1, 1], [], []>} : vector<7x8xbf16>, vector<8x8xbf16>, vector<7x8xf32> -> vector<7x8xf32>
    %959 = arith.truncf %958 : vector<7x8xf32> to vector<7x8xbf16>
    %960 = vector.extract_strided_slice %932 {offsets = [0, 0], sizes = [8, 32], strides = [1, 1]} : vector<32x32xbf16> to vector<8x32xbf16>
    %cst_355 = arith.constant dense<0.000000e+00> : vector<7x32xf32>
    %961 = tpu.matmul %959, %960, %cst_355 {dimension_numbers = #tpu.dot_dimension_numbers<[1], [0], [0], [1], [0, 0, 1, 1], [], []>} : vector<7x8xbf16>, vector<8x32xbf16>, vector<7x32xf32> -> vector<7x32xf32>
    %962 = arith.addf %935, %961 : vector<7x32xf32>
    %963 = vector.extract_strided_slice %920 {offsets = [0, 8], sizes = [7, 8], strides = [1, 1]} : vector<7x32xf32> to vector<7x8xf32>
    %964 = arith.truncf %963 : vector<7x8xf32> to vector<7x8xbf16>
    %965 = vector.extract_strided_slice %929 {offsets = [0, 8], sizes = [8, 8], strides = [1, 1]} : vector<8x32xf32> to vector<8x8xf32>
    %966 = arith.truncf %965 : vector<8x8xf32> to vector<8x8xbf16>
    %967 = vector.extract_strided_slice %930 {offsets = [0, 8], sizes = [8, 8], strides = [1, 1]} : vector<8x32xf32> to vector<8x8xf32>
    %968 = arith.truncf %967 : vector<8x8xf32> to vector<8x8xbf16>
    %cst_356 = arith.constant dense<0.000000e+00> : vector<7x8xf32>
    %969 = tpu.matmul %964, %966, %cst_356 {dimension_numbers = #tpu.dot_dimension_numbers<[1], [1], [0], [0], [0, 0, 1, 0], [], []>} : vector<7x8xbf16>, vector<8x8xbf16>, vector<7x8xf32> -> vector<7x8xf32>
    %cst_357 = arith.constant 0.353553385 : f32
    %970 = vector.broadcast %cst_357 : f32 to vector<7x8xf32>
    %971 = arith.mulf %969, %970 : vector<7x8xf32>
    %972 = vector.broadcast %41 : vector<1x8xf32> to vector<7x8xf32>
    %973 = arith.addf %971, %972 : vector<7x8xf32>
    %cst_358 = arith.constant dense<0xFF800000> : vector<7xf32>
    %974 = vector.multi_reduction <maximumf>, %973, %cst_358 [1] : vector<7x8xf32> to vector<7xf32>
    %975 = vector.shape_cast %974 : vector<7xf32> to vector<7x1xf32>
    %976 = vector.broadcast %975 : vector<7x1xf32> to vector<7x8xf32>
    %977 = arith.subf %973, %976 : vector<7x8xf32>
    %978 = math.exp %977 : vector<7x8xf32>
    %cst_359 = arith.constant dense<0.000000e+00> : vector<7xf32>
    %979 = vector.multi_reduction <add>, %978, %cst_359 [1] : vector<7x8xf32> to vector<7xf32>
    %980 = vector.shape_cast %979 : vector<7xf32> to vector<7x1xf32>
    %981 = tpu.reciprocal %980 {approx = true} : vector<7x1xf32> -> vector<7x1xf32>
    %982 = vector.broadcast %981 : vector<7x1xf32> to vector<7x8xf32>
    %983 = arith.mulf %978, %982 : vector<7x8xf32>
    %984 = arith.truncf %983 : vector<7x8xf32> to vector<7x8xbf16>
    %cst_360 = arith.constant dense<0.000000e+00> : vector<7x8xf32>
    %985 = tpu.matmul %984, %968, %cst_360 {dimension_numbers = #tpu.dot_dimension_numbers<[1], [0], [0], [1], [0, 0, 1, 1], [], []>} : vector<7x8xbf16>, vector<8x8xbf16>, vector<7x8xf32> -> vector<7x8xf32>
    %986 = arith.truncf %985 : vector<7x8xf32> to vector<7x8xbf16>
    %987 = vector.extract_strided_slice %932 {offsets = [8, 0], sizes = [8, 32], strides = [1, 1]} : vector<32x32xbf16> to vector<8x32xbf16>
    %cst_361 = arith.constant dense<0.000000e+00> : vector<7x32xf32>
    %988 = tpu.matmul %986, %987, %cst_361 {dimension_numbers = #tpu.dot_dimension_numbers<[1], [0], [0], [1], [0, 0, 1, 1], [], []>} : vector<7x8xbf16>, vector<8x32xbf16>, vector<7x32xf32> -> vector<7x32xf32>
    %989 = arith.addf %962, %988 : vector<7x32xf32>
    %990 = vector.extract_strided_slice %920 {offsets = [0, 16], sizes = [7, 8], strides = [1, 1]} : vector<7x32xf32> to vector<7x8xf32>
    %991 = arith.truncf %990 : vector<7x8xf32> to vector<7x8xbf16>
    %992 = vector.extract_strided_slice %929 {offsets = [0, 16], sizes = [8, 8], strides = [1, 1]} : vector<8x32xf32> to vector<8x8xf32>
    %993 = arith.truncf %992 : vector<8x8xf32> to vector<8x8xbf16>
    %994 = vector.extract_strided_slice %930 {offsets = [0, 16], sizes = [8, 8], strides = [1, 1]} : vector<8x32xf32> to vector<8x8xf32>
    %995 = arith.truncf %994 : vector<8x8xf32> to vector<8x8xbf16>
    %cst_362 = arith.constant dense<0.000000e+00> : vector<7x8xf32>
    %996 = tpu.matmul %991, %993, %cst_362 {dimension_numbers = #tpu.dot_dimension_numbers<[1], [1], [0], [0], [0, 0, 1, 0], [], []>} : vector<7x8xbf16>, vector<8x8xbf16>, vector<7x8xf32> -> vector<7x8xf32>
    %cst_363 = arith.constant 0.353553385 : f32
    %997 = vector.broadcast %cst_363 : f32 to vector<7x8xf32>
    %998 = arith.mulf %996, %997 : vector<7x8xf32>
    %999 = vector.broadcast %41 : vector<1x8xf32> to vector<7x8xf32>
    %1000 = arith.addf %998, %999 : vector<7x8xf32>
    %cst_364 = arith.constant dense<0xFF800000> : vector<7xf32>
    %1001 = vector.multi_reduction <maximumf>, %1000, %cst_364 [1] : vector<7x8xf32> to vector<7xf32>
    %1002 = vector.shape_cast %1001 : vector<7xf32> to vector<7x1xf32>
    %1003 = vector.broadcast %1002 : vector<7x1xf32> to vector<7x8xf32>
    %1004 = arith.subf %1000, %1003 : vector<7x8xf32>
    %1005 = math.exp %1004 : vector<7x8xf32>
    %cst_365 = arith.constant dense<0.000000e+00> : vector<7xf32>
    %1006 = vector.multi_reduction <add>, %1005, %cst_365 [1] : vector<7x8xf32> to vector<7xf32>
    %1007 = vector.shape_cast %1006 : vector<7xf32> to vector<7x1xf32>
    %1008 = tpu.reciprocal %1007 {approx = true} : vector<7x1xf32> -> vector<7x1xf32>
    %1009 = vector.broadcast %1008 : vector<7x1xf32> to vector<7x8xf32>
    %1010 = arith.mulf %1005, %1009 : vector<7x8xf32>
    %1011 = arith.truncf %1010 : vector<7x8xf32> to vector<7x8xbf16>
    %cst_366 = arith.constant dense<0.000000e+00> : vector<7x8xf32>
    %1012 = tpu.matmul %1011, %995, %cst_366 {dimension_numbers = #tpu.dot_dimension_numbers<[1], [0], [0], [1], [0, 0, 1, 1], [], []>} : vector<7x8xbf16>, vector<8x8xbf16>, vector<7x8xf32> -> vector<7x8xf32>
    %1013 = arith.truncf %1012 : vector<7x8xf32> to vector<7x8xbf16>
    %1014 = vector.extract_strided_slice %932 {offsets = [16, 0], sizes = [8, 32], strides = [1, 1]} : vector<32x32xbf16> to vector<8x32xbf16>
    %cst_367 = arith.constant dense<0.000000e+00> : vector<7x32xf32>
    %1015 = tpu.matmul %1013, %1014, %cst_367 {dimension_numbers = #tpu.dot_dimension_numbers<[1], [0], [0], [1], [0, 0, 1, 1], [], []>} : vector<7x8xbf16>, vector<8x32xbf16>, vector<7x32xf32> -> vector<7x32xf32>
    %1016 = arith.addf %989, %1015 : vector<7x32xf32>
    %1017 = vector.extract_strided_slice %920 {offsets = [0, 24], sizes = [7, 8], strides = [1, 1]} : vector<7x32xf32> to vector<7x8xf32>
    %1018 = arith.truncf %1017 : vector<7x8xf32> to vector<7x8xbf16>
    %1019 = vector.extract_strided_slice %929 {offsets = [0, 24], sizes = [8, 8], strides = [1, 1]} : vector<8x32xf32> to vector<8x8xf32>
    %1020 = arith.truncf %1019 : vector<8x8xf32> to vector<8x8xbf16>
    %1021 = vector.extract_strided_slice %930 {offsets = [0, 24], sizes = [8, 8], strides = [1, 1]} : vector<8x32xf32> to vector<8x8xf32>
    %1022 = arith.truncf %1021 : vector<8x8xf32> to vector<8x8xbf16>
    %cst_368 = arith.constant dense<0.000000e+00> : vector<7x8xf32>
    %1023 = tpu.matmul %1018, %1020, %cst_368 {dimension_numbers = #tpu.dot_dimension_numbers<[1], [1], [0], [0], [0, 0, 1, 0], [], []>} : vector<7x8xbf16>, vector<8x8xbf16>, vector<7x8xf32> -> vector<7x8xf32>
    %cst_369 = arith.constant 0.353553385 : f32
    %1024 = vector.broadcast %cst_369 : f32 to vector<7x8xf32>
    %1025 = arith.mulf %1023, %1024 : vector<7x8xf32>
    %1026 = vector.broadcast %41 : vector<1x8xf32> to vector<7x8xf32>
    %1027 = arith.addf %1025, %1026 : vector<7x8xf32>
    %cst_370 = arith.constant dense<0xFF800000> : vector<7xf32>
    %1028 = vector.multi_reduction <maximumf>, %1027, %cst_370 [1] : vector<7x8xf32> to vector<7xf32>
    %1029 = vector.shape_cast %1028 : vector<7xf32> to vector<7x1xf32>
    %1030 = vector.broadcast %1029 : vector<7x1xf32> to vector<7x8xf32>
    %1031 = arith.subf %1027, %1030 : vector<7x8xf32>
    %1032 = math.exp %1031 : vector<7x8xf32>
    %cst_371 = arith.constant dense<0.000000e+00> : vector<7xf32>
    %1033 = vector.multi_reduction <add>, %1032, %cst_371 [1] : vector<7x8xf32> to vector<7xf32>
    %1034 = vector.shape_cast %1033 : vector<7xf32> to vector<7x1xf32>
    %1035 = tpu.reciprocal %1034 {approx = true} : vector<7x1xf32> -> vector<7x1xf32>
    %1036 = vector.broadcast %1035 : vector<7x1xf32> to vector<7x8xf32>
    %1037 = arith.mulf %1032, %1036 : vector<7x8xf32>
    %1038 = arith.truncf %1037 : vector<7x8xf32> to vector<7x8xbf16>
    %cst_372 = arith.constant dense<0.000000e+00> : vector<7x8xf32>
    %1039 = tpu.matmul %1038, %1022, %cst_372 {dimension_numbers = #tpu.dot_dimension_numbers<[1], [0], [0], [1], [0, 0, 1, 1], [], []>} : vector<7x8xbf16>, vector<8x8xbf16>, vector<7x8xf32> -> vector<7x8xf32>
    %1040 = arith.truncf %1039 : vector<7x8xf32> to vector<7x8xbf16>
    %1041 = vector.extract_strided_slice %932 {offsets = [24, 0], sizes = [8, 32], strides = [1, 1]} : vector<32x32xbf16> to vector<8x32xbf16>
    %cst_373 = arith.constant dense<0.000000e+00> : vector<7x32xf32>
    %1042 = tpu.matmul %1040, %1041, %cst_373 {dimension_numbers = #tpu.dot_dimension_numbers<[1], [0], [0], [1], [0, 0, 1, 1], [], []>} : vector<7x8xbf16>, vector<8x32xbf16>, vector<7x32xf32> -> vector<7x32xf32>
    %1043 = arith.addf %1016, %1042 : vector<7x32xf32>
    %1044 = vector.broadcast %934 : vector<1x32xf32> to vector<7x32xf32>
    %1045 = arith.addf %1043, %1044 : vector<7x32xf32>
    %1046 = arith.addf %912, %1045 : vector<7x32xf32>
    %c2_374 = arith.constant 2 : index
    %c0_375 = arith.constant 0 : index
    %c0_376 = arith.constant 0 : index
    %1047 = vector.load %arg18[%c2_374, %c0_375, %c0_376] : memref<3x1x32xf32, #tpu.memory_space<vmem>>, vector<1x1x32xf32>
    %1048 = vector.shape_cast %1047 : vector<1x1x32xf32> to vector<1x32xf32>
    %c2_377 = arith.constant 2 : index
    %c0_378 = arith.constant 0 : index
    %c0_379 = arith.constant 0 : index
    %1049 = vector.load %arg19[%c2_377, %c0_378, %c0_379] : memref<3x1x32xf32, #tpu.memory_space<vmem>>, vector<1x1x32xf32>
    %1050 = vector.shape_cast %1049 : vector<1x1x32xf32> to vector<1x32xf32>
    %cst_380 = arith.constant dense<0.000000e+00> : vector<7xf32>
    %1051 = vector.multi_reduction <add>, %1046, %cst_380 [1] : vector<7x32xf32> to vector<7xf32>
    %1052 = vector.shape_cast %1051 : vector<7xf32> to vector<7x1xf32>
    %cst_381 = arith.constant 3.200000e+01 : f32
    %1053 = vector.broadcast %cst_381 : f32 to vector<7x1xf32>
    %1054 = arith.divf %1052, %1053 : vector<7x1xf32>
    %1055 = vector.broadcast %1054 : vector<7x1xf32> to vector<7x32xf32>
    %1056 = arith.subf %1046, %1055 : vector<7x32xf32>
    %1057 = vector.broadcast %1054 : vector<7x1xf32> to vector<7x32xf32>
    %1058 = arith.subf %1046, %1057 : vector<7x32xf32>
    %1059 = arith.mulf %1056, %1058 : vector<7x32xf32>
    %cst_382 = arith.constant dense<0.000000e+00> : vector<7xf32>
    %1060 = vector.multi_reduction <add>, %1059, %cst_382 [1] : vector<7x32xf32> to vector<7xf32>
    %1061 = vector.shape_cast %1060 : vector<7xf32> to vector<7x1xf32>
    %cst_383 = arith.constant 3.200000e+01 : f32
    %1062 = vector.broadcast %cst_383 : f32 to vector<7x1xf32>
    %1063 = arith.divf %1061, %1062 : vector<7x1xf32>
    %1064 = vector.broadcast %1054 : vector<7x1xf32> to vector<7x32xf32>
    %1065 = arith.subf %1046, %1064 : vector<7x32xf32>
    %cst_384 = arith.constant 9.99999996E-13 : f32
    %1066 = vector.broadcast %cst_384 : f32 to vector<7x1xf32>
    %1067 = arith.addf %1063, %1066 : vector<7x1xf32>
    %1068 = math.rsqrt %1067 : vector<7x1xf32>
    %1069 = vector.broadcast %1068 : vector<7x1xf32> to vector<7x32xf32>
    %1070 = arith.mulf %1065, %1069 : vector<7x32xf32>
    %1071 = vector.broadcast %1048 : vector<1x32xf32> to vector<7x32xf32>
    %1072 = arith.mulf %1070, %1071 : vector<7x32xf32>
    %1073 = vector.broadcast %1050 : vector<1x32xf32> to vector<7x32xf32>
    %1074 = arith.addf %1072, %1073 : vector<7x32xf32>
    %c2_385 = arith.constant 2 : index
    %c0_386 = arith.constant 0 : index
    %c0_387 = arith.constant 0 : index
    %1075 = vector.load %arg20[%c2_385, %c0_386, %c0_387] : memref<3x32x128xbf16, #tpu.memory_space<vmem>>, vector<1x32x128xbf16>
    %1076 = vector.shape_cast %1075 : vector<1x32x128xbf16> to vector<32x128xbf16>
    %c2_388 = arith.constant 2 : index
    %c0_389 = arith.constant 0 : index
    %c0_390 = arith.constant 0 : index
    %1077 = vector.load %arg21[%c2_388, %c0_389, %c0_390] : memref<3x1x128xf32, #tpu.memory_space<vmem>>, vector<1x1x128xf32>
    %1078 = vector.shape_cast %1077 : vector<1x1x128xf32> to vector<1x128xf32>
    %1079 = arith.truncf %1074 : vector<7x32xf32> to vector<7x32xbf16>
    %cst_391 = arith.constant dense<0.000000e+00> : vector<7x128xf32>
    %1080 = tpu.matmul %1079, %1076, %cst_391 {dimension_numbers = #tpu.dot_dimension_numbers<[1], [0], [0], [1], [0, 0, 1, 1], [], []>} : vector<7x32xbf16>, vector<32x128xbf16>, vector<7x128xf32> -> vector<7x128xf32>
    %1081 = vector.broadcast %1078 : vector<1x128xf32> to vector<7x128xf32>
    %1082 = arith.addf %1080, %1081 : vector<7x128xf32>
    %cst_392 = arith.constant 0.000000e+00 : f32
    %1083 = vector.broadcast %cst_392 : f32 to vector<7x128xf32>
    %1084 = arith.maximumf %1082, %1083 : vector<7x128xf32>
    %c2_393 = arith.constant 2 : index
    %c0_394 = arith.constant 0 : index
    %c0_395 = arith.constant 0 : index
    %1085 = vector.load %arg22[%c2_393, %c0_394, %c0_395] : memref<3x128x32xbf16, #tpu.memory_space<vmem>>, vector<1x128x32xbf16>
    %1086 = vector.shape_cast %1085 : vector<1x128x32xbf16> to vector<128x32xbf16>
    %c2_396 = arith.constant 2 : index
    %c0_397 = arith.constant 0 : index
    %c0_398 = arith.constant 0 : index
    %1087 = vector.load %arg23[%c2_396, %c0_397, %c0_398] : memref<3x1x32xf32, #tpu.memory_space<vmem>>, vector<1x1x32xf32>
    %1088 = vector.shape_cast %1087 : vector<1x1x32xf32> to vector<1x32xf32>
    %1089 = arith.truncf %1084 : vector<7x128xf32> to vector<7x128xbf16>
    %cst_399 = arith.constant dense<0.000000e+00> : vector<7x32xf32>
    %1090 = tpu.matmul %1089, %1086, %cst_399 {dimension_numbers = #tpu.dot_dimension_numbers<[1], [0], [0], [1], [0, 0, 1, 1], [], []>} : vector<7x128xbf16>, vector<128x32xbf16>, vector<7x32xf32> -> vector<7x32xf32>
    %1091 = vector.broadcast %1088 : vector<1x32xf32> to vector<7x32xf32>
    %1092 = arith.addf %1090, %1091 : vector<7x32xf32>
    %1093 = arith.addf %1074, %1092 : vector<7x32xf32>
    %c2_400 = arith.constant 2 : index
    %c0_401 = arith.constant 0 : index
    %c0_402 = arith.constant 0 : index
    %1094 = vector.load %arg24[%c2_400, %c0_401, %c0_402] : memref<3x1x32xf32, #tpu.memory_space<vmem>>, vector<1x1x32xf32>
    %1095 = vector.shape_cast %1094 : vector<1x1x32xf32> to vector<1x32xf32>
    %c2_403 = arith.constant 2 : index
    %c0_404 = arith.constant 0 : index
    %c0_405 = arith.constant 0 : index
    %1096 = vector.load %arg25[%c2_403, %c0_404, %c0_405] : memref<3x1x32xf32, #tpu.memory_space<vmem>>, vector<1x1x32xf32>
    %1097 = vector.shape_cast %1096 : vector<1x1x32xf32> to vector<1x32xf32>
    %cst_406 = arith.constant dense<0.000000e+00> : vector<7xf32>
    %1098 = vector.multi_reduction <add>, %1093, %cst_406 [1] : vector<7x32xf32> to vector<7xf32>
    %1099 = vector.shape_cast %1098 : vector<7xf32> to vector<7x1xf32>
    %cst_407 = arith.constant 3.200000e+01 : f32
    %1100 = vector.broadcast %cst_407 : f32 to vector<7x1xf32>
    %1101 = arith.divf %1099, %1100 : vector<7x1xf32>
    %1102 = vector.broadcast %1101 : vector<7x1xf32> to vector<7x32xf32>
    %1103 = arith.subf %1093, %1102 : vector<7x32xf32>
    %1104 = vector.broadcast %1101 : vector<7x1xf32> to vector<7x32xf32>
    %1105 = arith.subf %1093, %1104 : vector<7x32xf32>
    %1106 = arith.mulf %1103, %1105 : vector<7x32xf32>
    %cst_408 = arith.constant dense<0.000000e+00> : vector<7xf32>
    %1107 = vector.multi_reduction <add>, %1106, %cst_408 [1] : vector<7x32xf32> to vector<7xf32>
    %1108 = vector.shape_cast %1107 : vector<7xf32> to vector<7x1xf32>
    %cst_409 = arith.constant 3.200000e+01 : f32
    %1109 = vector.broadcast %cst_409 : f32 to vector<7x1xf32>
    %1110 = arith.divf %1108, %1109 : vector<7x1xf32>
    %1111 = vector.broadcast %1101 : vector<7x1xf32> to vector<7x32xf32>
    %1112 = arith.subf %1093, %1111 : vector<7x32xf32>
    %cst_410 = arith.constant 9.99999996E-13 : f32
    %1113 = vector.broadcast %cst_410 : f32 to vector<7x1xf32>
    %1114 = arith.addf %1110, %1113 : vector<7x1xf32>
    %1115 = math.rsqrt %1114 : vector<7x1xf32>
    %1116 = vector.broadcast %1115 : vector<7x1xf32> to vector<7x32xf32>
    %1117 = arith.mulf %1112, %1116 : vector<7x32xf32>
    %1118 = vector.broadcast %1095 : vector<1x32xf32> to vector<7x32xf32>
    %1119 = arith.mulf %1117, %1118 : vector<7x32xf32>
    %1120 = vector.broadcast %1097 : vector<1x32xf32> to vector<7x32xf32>
    %1121 = arith.addf %1119, %1120 : vector<7x32xf32>
    %c0_411 = arith.constant 0 : index
    %c0_412 = arith.constant 0 : index
    %1122 = vector.load %arg26[%c0_411, %c0_412] : memref<32x128xbf16, #tpu.memory_space<vmem>>, vector<32x128xbf16>
    %c0_413 = arith.constant 0 : index
    %c0_414 = arith.constant 0 : index
    %1123 = vector.load %arg27[%c0_413, %c0_414] : memref<1x128xf32, #tpu.memory_space<vmem>>, vector<1x128xf32>
    %1124 = arith.truncf %1121 : vector<7x32xf32> to vector<7x32xbf16>
    %cst_415 = arith.constant dense<0.000000e+00> : vector<7x128xf32>
    %1125 = tpu.matmul %1124, %1122, %cst_415 {dimension_numbers = #tpu.dot_dimension_numbers<[1], [0], [0], [1], [0, 0, 1, 1], [], []>} : vector<7x32xbf16>, vector<32x128xbf16>, vector<7x128xf32> -> vector<7x128xf32>
    %1126 = vector.broadcast %1123 : vector<1x128xf32> to vector<7x128xf32>
    %1127 = arith.addf %1125, %1126 : vector<7x128xf32>
    %c0_416 = arith.constant 0 : index
    %c0_417 = arith.constant 0 : index
    %c0_418 = arith.constant 0 : index
    %1128 = vector.load %arg28[%c0_416, %c0_417, %c0_418] : memref<1x7x128xf32, #tpu.memory_space<vmem>>, vector<1x7x128xf32>
    %1129 = vector.shape_cast %1128 : vector<1x7x128xf32> to vector<7x128xf32>
    %1130 = vector.shape_cast %1127 : vector<7x128xf32> to vector<1x7x128xf32>
    tpu.vector_store %arg28[%c0_416, %c0_417, %c0_418], %1130 {strides = array<i32>} : memref<1x7x128xf32, #tpu.memory_space<vmem>>, vector<1x7x128xf32>,
    return
  }
  func.func @transform_0(%arg0: i32) -> (i32, i32, i32) {
    %c0_i32 = arith.constant 0 : i32
    %c0_i32_0 = arith.constant 0 : i32
    %c0_i32_1 = arith.constant 0 : i32
    return %arg0, %c0_i32, %c0_i32_0 : i32, i32, i32
  }
  func.func @transform_1(%arg0: i32) -> (i32, i32, i32) {
    %c0_i32 = arith.constant 0 : i32
    %c0_i32_0 = arith.constant 0 : i32
    %c0_i32_1 = arith.constant 0 : i32
    return %arg0, %c0_i32, %c0_i32_0 : i32, i32, i32
  }
  func.func @transform_2(%arg0: i32) -> (i32, i32, i32) {
    %c0_i32 = arith.constant 0 : i32
    %c0_i32_0 = arith.constant 0 : i32
    %c0_i32_1 = arith.constant 0 : i32
    return %arg0, %c0_i32, %c0_i32_0 : i32, i32, i32
  }
  func.func @transform_3(%arg0: i32) -> (i32, i32) {
    %c0_i32 = arith.constant 0 : i32
    %c0_i32_0 = arith.constant 0 : i32
    %c0_i32_1 = arith.constant 0 : i32
    return %c0_i32, %c0_i32_0 : i32, i32
  }
  func.func @transform_4(%arg0: i32) -> (i32, i32) {
    %c0_i32 = arith.constant 0 : i32
    %c0_i32_0 = arith.constant 0 : i32
    %c0_i32_1 = arith.constant 0 : i32
    return %c0_i32, %c0_i32_0 : i32, i32
  }
  func.func @transform_5(%arg0: i32) -> (i32, i32, i32) {
    %c0_i32 = arith.constant 0 : i32
    %c0_i32_0 = arith.constant 0 : i32
    %c0_i32_1 = arith.constant 0 : i32
    %c0_i32_2 = arith.constant 0 : i32
    return %c0_i32, %c0_i32_0, %c0_i32_1 : i32, i32, i32
  }
  func.func @transform_6(%arg0: i32) -> (i32, i32, i32) {
    %c0_i32 = arith.constant 0 : i32
    %c0_i32_0 = arith.constant 0 : i32
    %c0_i32_1 = arith.constant 0 : i32
    %c0_i32_2 = arith.constant 0 : i32
    return %c0_i32, %c0_i32_0, %c0_i32_1 : i32, i32, i32
  }
  func.func @transform_7(%arg0: i32) -> (i32, i32, i32) {
    %c0_i32 = arith.constant 0 : i32
    %c0_i32_0 = arith.constant 0 : i32
    %c0_i32_1 = arith.constant 0 : i32
    %c0_i32_2 = arith.constant 0 : i32
    return %c0_i32, %c0_i32_0, %c0_i32_1 : i32, i32, i32
  }
  func.func @transform_8(%arg0: i32) -> (i32, i32, i32) {
    %c0_i32 = arith.constant 0 : i32
    %c0_i32_0 = arith.constant 0 : i32
    %c0_i32_1 = arith.constant 0 : i32
    %c0_i32_2 = arith.constant 0 : i32
    return %c0_i32, %c0_i32_0, %c0_i32_1 : i32, i32, i32
  }
  func.func @transform_9(%arg0: i32) -> (i32, i32, i32) {
    %c0_i32 = arith.constant 0 : i32
    %c0_i32_0 = arith.constant 0 : i32
    %c0_i32_1 = arith.constant 0 : i32
    %c0_i32_2 = arith.constant 0 : i32
    return %c0_i32, %c0_i32_0, %c0_i32_1 : i32, i32, i32
  }
  func.func @transform_10(%arg0: i32) -> (i32, i32, i32) {
    %c0_i32 = arith.constant 0 : i32
    %c0_i32_0 = arith.constant 0 : i32
    %c0_i32_1 = arith.constant 0 : i32
    %c0_i32_2 = arith.constant 0 : i32
    return %c0_i32, %c0_i32_0, %c0_i32_1 : i32, i32, i32
  }
  func.func @transform_11(%arg0: i32) -> (i32, i32, i32) {
    %c0_i32 = arith.constant 0 : i32
    %c0_i32_0 = arith.constant 0 : i32
    %c0_i32_1 = arith.constant 0 : i32
    %c0_i32_2 = arith.constant 0 : i32
    return %c0_i32, %c0_i32_0, %c0_i32_1 : i32, i32, i32
  }
  func.func @transform_12(%arg0: i32) -> (i32, i32, i32) {
    %c0_i32 = arith.constant 0 : i32
    %c0_i32_0 = arith.constant 0 : i32
    %c0_i32_1 = arith.constant 0 : i32
    %c0_i32_2 = arith.constant 0 : i32
    return %c0_i32, %c0_i32_0, %c0_i32_1 : i32, i32, i32
  }
  func.func @transform_13(%arg0: i32) -> (i32, i32, i32) {
    %c0_i32 = arith.constant 0 : i32
    %c0_i32_0 = arith.constant 0 : i32
    %c0_i32_1 = arith.constant 0 : i32
    %c0_i32_2 = arith.constant 0 : i32
    return %c0_i32, %c0_i32_0, %c0_i32_1 : i32, i32, i32
  }
  func.func @transform_14(%arg0: i32) -> (i32, i32, i32) {
    %c0_i32 = arith.constant 0 : i32
    %c0_i32_0 = arith.constant 0 : i32
    %c0_i32_1 = arith.constant 0 : i32
    %c0_i32_2 = arith.constant 0 : i32
    return %c0_i32, %c0_i32_0, %c0_i32_1 : i32, i32, i32
  }
  func.func @transform_15(%arg0: i32) -> (i32, i32, i32) {
    %c0_i32 = arith.constant 0 : i32
    %c0_i32_0 = arith.constant 0 : i32
    %c0_i32_1 = arith.constant 0 : i32
    %c0_i32_2 = arith.constant 0 : i32
    return %c0_i32, %c0_i32_0, %c0_i32_1 : i32, i32, i32
  }
  func.func @transform_16(%arg0: i32) -> (i32, i32, i32) {
    %c0_i32 = arith.constant 0 : i32
    %c0_i32_0 = arith.constant 0 : i32
    %c0_i32_1 = arith.constant 0 : i32
    %c0_i32_2 = arith.constant 0 : i32
    return %c0_i32, %c0_i32_0, %c0_i32_1 : i32, i32, i32
  }
  func.func @transform_17(%arg0: i32) -> (i32, i32, i32) {
    %c0_i32 = arith.constant 0 : i32
    %c0_i32_0 = arith.constant 0 : i32
    %c0_i32_1 = arith.constant 0 : i32
    %c0_i32_2 = arith.constant 0 : i32
    return %c0_i32, %c0_i32_0, %c0_i32_1 : i32, i32, i32
  }
  func.func @transform_18(%arg0: i32) -> (i32, i32, i32) {
    %c0_i32 = arith.constant 0 : i32
    %c0_i32_0 = arith.constant 0 : i32
    %c0_i32_1 = arith.constant 0 : i32
    %c0_i32_2 = arith.constant 0 : i32
    return %c0_i32, %c0_i32_0, %c0_i32_1 : i32, i32, i32
  }
  func.func @transform_19(%arg0: i32) -> (i32, i32, i32) {
    %c0_i32 = arith.constant 0 : i32
    %c0_i32_0 = arith.constant 0 : i32
    %c0_i32_1 = arith.constant 0 : i32
    %c0_i32_2 = arith.constant 0 : i32
    return %c0_i32, %c0_i32_0, %c0_i32_1 : i32, i32, i32
  }
  func.func @transform_20(%arg0: i32) -> (i32, i32, i32) {
    %c0_i32 = arith.constant 0 : i32
    %c0_i32_0 = arith.constant 0 : i32
    %c0_i32_1 = arith.constant 0 : i32
    %c0_i32_2 = arith.constant 0 : i32
    return %c0_i32, %c0_i32_0, %c0_i32_1 : i32, i32, i32
  }
  func.func @transform_21(%arg0: i32) -> (i32, i32, i32) {
    %c0_i32 = arith.constant 0 : i32
    %c0_i32_0 = arith.constant 0 : i32
    %c0_i32_1 = arith.constant 0 : i32
    %c0_i32_2 = arith.constant 0 : i32
    return %c0_i32, %c0_i32_0, %c0_i32_1 : i32, i32, i32
  }
  func.func @transform_22(%arg0: i32) -> (i32, i32, i32) {
    %c0_i32 = arith.constant 0 : i32
    %c0_i32_0 = arith.constant 0 : i32
    %c0_i32_1 = arith.constant 0 : i32
    %c0_i32_2 = arith.constant 0 : i32
    return %c0_i32, %c0_i32_0, %c0_i32_1 : i32, i32, i32
  }
  func.func @transform_23(%arg0: i32) -> (i32, i32, i32) {
    %c0_i32 = arith.constant 0 : i32
    %c0_i32_0 = arith.constant 0 : i32
    %c0_i32_1 = arith.constant 0 : i32
    %c0_i32_2 = arith.constant 0 : i32
    return %c0_i32, %c0_i32_0, %c0_i32_1 : i32, i32, i32
  }
  func.func @transform_24(%arg0: i32) -> (i32, i32, i32) {
    %c0_i32 = arith.constant 0 : i32
    %c0_i32_0 = arith.constant 0 : i32
    %c0_i32_1 = arith.constant 0 : i32
    %c0_i32_2 = arith.constant 0 : i32
    return %c0_i32, %c0_i32_0, %c0_i32_1 : i32, i32, i32
  }
  func.func @transform_25(%arg0: i32) -> (i32, i32) {
    %c0_i32 = arith.constant 0 : i32
    %c0_i32_0 = arith.constant 0 : i32
    %c0_i32_1 = arith.constant 0 : i32
    return %c0_i32, %c0_i32_0 : i32, i32
  }
  func.func @transform_26(%arg0: i32) -> (i32, i32) {
    %c0_i32 = arith.constant 0 : i32
    %c0_i32_0 = arith.constant 0 : i32
    %c0_i32_1 = arith.constant 0 : i32
    return %c0_i32, %c0_i32_0 : i32, i32
  }
  func.func @transform_27(%arg0: i32) -> (i32, i32, i32) {
    %c0_i32 = arith.constant 0 : i32
    %c0_i32_0 = arith.constant 0 : i32
    %c0_i32_1 = arith.constant 0 : i32
    return %arg0, %c0_i32, %c0_i32_0 : i32, i32, i32
  }
}

</mosaic_0001>

<bundles_post_ra>
// kernel: fwd.2
= control target key start
LH: loop header
LB: loop body
LE: loop exit
PB: predicated region body
PF: predicated region fallthrough
CT: control target
= control target key end

     0   :  { %s3084_s21 = smov 0   ;;  %s3495_s0 = inlined_call_operand.vmem [shape: f32[2,8,32], index: 0, kind: input, shape index: {}]   ;;  %s3496_s1 = inlined_call_operand.vmem [shape: f32[2,1,8], index: 1, kind: input, shape index: {}]   ;;  %s3497_s2 = inlined_call_operand.vmem [shape: f32[1,32], index: 2, kind: input, shape index: {}]   ;;  %s3498_s3 = inlined_call_operand.vmem [shape: f32[1,32], index: 3, kind: input, shape index: {}]   ;;  %s3499_s4 = inlined_call_operand.vmem [shape: bf16[2,32,96], index: 4, kind: input, shape index: {}]   ;;  %s3500_s5 = inlined_call_operand.vmem [shape: f32[2,1,96], index: 5, kind: input, shape index: {}]   ;;  %s3501_s6 = inlined_call_operand.vmem [shape: bf16[2,32,32], index: 6, kind: input, shape index: {}]   ;;  %s3502_s7 = inlined_call_operand.vmem [shape: f32[2,1,32], index: 7, kind: input, shape index: {}]   ;;  %s3503_s8 = inlined_call_operand.vmem [shape: f32[2,1,32], index: 8, kind: input, shape index: {}]   ;;  %s3504_s9 = inlined_call_operand.vmem [shape: f32[2,1,32], index: 9, kind: input, shape index: {}]   ;;  %s3505_s10 = inlined_call_operand.vmem [shape: bf16[2,32,64], index: 10, kind: input, shape index: {}]   ;;  %s3506_s11 = inlined_call_operand.vmem [shape: f32[2,1,64], index: 11, kind: input, shape index: {}]   ;;  %s3507_s12 = inlined_call_operand.vmem [shape: bf16[2,64,32], index: 12, kind: input, shape index: {}]   ;;  %s3508_s13 = inlined_call_operand.vmem [shape: f32[2,1,32], index: 13, kind: input, shape index: {}]   ;;  %s3509_s14 = inlined_call_operand.vmem [shape: f32[2,1,32], index: 14, kind: input, shape index: {}]   ;;  %s3510_s15 = inlined_call_operand.vmem [shape: f32[2,1,32], index: 15, kind: input, shape index: {}]   ;;  %s3511_s16 = inlined_call_operand.vmem [shape: f32[2,8,32], index: 16, kind: output, shape index: {}]  }
   0x1   :  { %3519 = sst [smem:[#allocation2_spill]] %s3495_s0 }
   0x2 LB: > { %s2523_s22 = sadd.s32 4294967295, %s2984_s21   ;;  %p2527_p0 = scmp.ge.s32.totalorder %s2984_s21, 1  ;;  %s2984_s21 = sphi %s3084_s21, %s26_s21  }
   0x3   : > { %p469_p1 = scmp.lt.s32.totalorder %s2984_s21, 3 }
   0x5   : > { %p470_p2 = pnand %p2527_p0, %p469_p1 }
   0x6   : > { %p520_p3 = scmp.lt.s32.totalorder (!%p470_p2), %s2523_s22, 1  ;;  %vm535_vm0 = vcmask (!%p470_p2), 261120   ;;  %s3520_s26 = sld [smem:[#allocation2_spill]] (!%p470_p2)  ;;  %v2916_v7 = vld [vmem:[%s3499_s4] sm:$0xff] (!%p470_p2)   ;;  %v2986_v8 = vmov (!%p470_p2), 0.0   ;;  %v2917_v9 = vld [vmem:[%s3499_s4 + $0x8] sm:$0xff] (!%p470_p2)   ;;  %v692_v32 = vlaneseq (!%p470_p2) }
   0x7   : > { %473 = sbr.rel (%p470_p2) target bundleno = 7718 (0x1e26), region = 84  ;;  %2695 = vmatprep.subr.bf16.mxu1 (!%p470_p2), %v2986_v8  ;;  %2709 = vmatprep.subr.bf16.mxu0 (!%p470_p2), %v2986_v8  ;;  %vm2987_vm1 = vmmov (!%p470_p2), 0   ;;  %v2530_v14 = vld [vmem:[%s3497_s2] ss:$0 sm:$0xff] (!%p470_p2)  ;;  %s2990_s28 = smov (!%p470_p2), 88   ;;  %vm643_vm2 = vcmask (!%p470_p2), 64512  }
   0x8   : > { %2696 = vmatpush3.bf16.msra.mxu1 (!%p470_p2), %v2916_v7  ;;  %2699 = vmatprep.mubr.msk.bf16.mxu1 (!%p470_p2), %vm2987_vm1, %v2986_v8  ;;  %v2531_v16 = vld [vmem:[%s3498_s3] ss:$0 sm:$0xff] (!%p470_p2)  ;;  %v693_v35 = vshrl.u32 (!%p470_p2), %v692_v32, 7  ;;  %s2991_s17 = smov (!%p470_p2), 56   ;;  %s3518_s18 = smov (!%p470_p2), 64   ;;  %vm715_vm3 = vcmask (!%p470_p2), 1043456  }
   0x9   : > { %2697 = vmatprep.subr.bf16.mxu1 (!%p470_p2), %v2986_v8  ;;  %2711 = vmatprep.mubr.msk.bf16.mxu0 (!%p470_p2), %vm2987_vm1, %v2986_v8  ;;  %v2533_v20 = vld [vmem:[%s3500_s5] ss:$0 sm:$0xff] (!%p470_p2)  ;;  %s2993_s19 = smov (!%p470_p2), 80   ;;  %s3517_s20 = smov (!%p470_p2), 112   ;;  %vm1438_vm4 = vcmask (!%p470_p2), 523264  }
   0xa   : > { %v694_v37 = vsub.s32 (!%p470_p2), 0, %v693_v35  ;;  %s3515_s24 = smov (!%p470_p2), 104   ;;  %s3516_s25 = smov (!%p470_p2), 72  }
   0xb   : > { %s3513_s29 = smov (!%p470_p2), 40   ;;  %s3525_s30 = smov (!%p470_p2), 48  }
   0xc   : > { %2698 = vmatpush3.bf16.msra.mxu1 (!%p470_p2), %v2917_v9 }
   0xd   : > { %2703 = vmatprep.subr.bf16.mxu1 (!%p470_p2), %v2986_v8 }
   0xe   : > { %s3529_s22 = smov (!%p520_p3, %s2523_s22), 1 }
   0xf   : > { %s3512_s23 = sshll.u32 %s3529_s22, 3  ;;  %s526_s0 = scalar_lea.vmem %s3496_s1, %s3529_s22 }
  0x10   : > { %s523_s27 = scalar_lea.vmem %s3520_s26, %s3512_s23  ;;  %s2988_s26 = smov 120   ;;  %v564_v33 = vld [vmem:[%s526_s0] sm:$0x1] }
  0x11   : > { %v532_v0 = vld [vmem:[%s523_s27] sm:$0xff]  ;;  %s2989_s27 = smov 96   ;;  %v2532_v34 = vadd.f32 -1.0, %v564_v33  ;;  %s3514_s0 = smov 48  }
  0x12   : > { %v536_v1 = vsel %vm535_vm0, %v532_v0, 0.0 }
  0x13   : > { %537 = vadd.xlane.f32.xlu0 %v536_v1  ;;  %v566_v36 = vmul.f32 1e+09, %v2532_v34 }
  0x15   : > { %v3155_v38 = vrot.slane %v566_v36, %v694_v37 }
  0xa0   : > { %v538_v2 = vpop.xlane.xlu0 %537 }
  0xa1   : > { %v540_v3 = vmul.f32 0.03125, %v538_v2 }
  0xa3   : > { %v541_v4 = vsub.f32 %v532_v0, %v540_v3 }
  0xa5   : > { %v542_v5 = vmul.f32 %v541_v4, %v541_v4 }
  0xa7   : > { %v543_v6 = vsel %vm535_vm0, %v542_v5, 0.0 }
  0xa8   : > { %544 = vadd.xlane.f32.xlu0 %v543_v6 }
 0x135   : > { %v545_v10 = vpop.xlane.xlu0 %544 }
 0x136   : > { %v546_v11 = vmul.f32 0.03125, %v545_v10 }
 0x138   : > { %v547_v12 = vadd.f32 1e-12, %v546_v11 }
 0x13a   : > { %2932 = vrsqrt.f32 %v547_v12  ;;  %v634_v12 = vld [vmem:[%s3501_s6] sm:$0xf] }
 0x144   : > { %v2933_v13 = vpop.eup %2932 }
 0x145   : > { %v549_v15 = vmul.f32 %v2933_v13, %v541_v4  ;;  %v923_v13 = vsel %vm715_vm3, %v634_v12, 0 }
 0x147   : > { %v556_v17 = vmul.f32 %v2530_v14, %v549_v15  ;;  %v635_v14 = vld [vmem:[%s3501_s6 + $0x4] sm:$0xf] }
 0x148   : > { %v877_v15 = vsel %vm715_vm3, %v635_v14, 0 }
 0x149   : > { %v3122_v18 = vadd.f32 %v2531_v16, %v556_v17 }
 0x14b   : > { %v572_v19 = vpack.c.bf16 %v3122_v18, %v3122_v18 }
 0x14d   : > { %2700 = vmatmul.mubr.msk.bf16.vlgmr.msra.gmra.mrb[0].mxu1 %vm535_vm0, %v572_v19 }
 0x14e   : > { %2705 = vmatprep.mubr.msk.bf16.mxu1 %vm2987_vm1, %v2986_v8 }
 0x220   : > { %v628_v21 = vpop.f32.mrb[0].mxu1 }
 0x221   : > { %v629_v22 = vadd.f32 %v2533_v20, %v628_v21  ;;  %v2701_v23 = vpop.f32.mrb[1].mxu1 }
 0x222   : > { %v631_v24 = vpop.f32.mrb[2].mxu1 }
 0x223   : > { %v3132_v25 = vpack.c.bf16 %v629_v22, %v629_v22  ;;  %v2702_v26 = vpop.f32.mrb[3].mxu1 }
 0x225   : > { %760 = vrot.lane.b32.xlu0 %v3132_v25, %s2988_s26  ;;  %641 = vrot.lane.b32.xlu1 %v3132_v25, %s2989_s27 }
 0x229   : > { %762 = vrot.lane.b32.xlu1 %v3132_v25, %s2990_s28 }
 0x297   : > { %v642_v27 = vpop.permute.xlu1 %641  ;;  %v761_v31 = vpop.permute.xlu0 %760 }
 0x298   : > { %v648_v28 = vsel %vm643_vm2, %v642_v27, 0 }
 0x299   : > { %2704 = vmatpush3.bf16.xpose.msra.mxu1 %v648_v28 }
 0x29a   : > { %2715 = vmatprep.subr.bf16.mxu1 %v2986_v8 }
 0x29b   : > { %v763_v29 = vpop.permute.xlu1 %762 }
 0x29c   : > { %v768_v30 = vsel %vm643_vm2, %v763_v29, 0 }
 0x2a0   : > { %2706 = vmatmul.mubr.msk.bf16.vlgmr.msra.gmra.mrb[4].mxu1 %vm643_vm2, %v3132_v25 }
 0x2a1   : > { %2716 = vmatpush3.bf16.xpose.msra.mxu1 %v768_v30  ;;  %2717 = vmatprep.mubr.msk.bf16.mxu1 %vm2987_vm1, %v2986_v8 }
 0x2a2   : > { %2727 = vmatprep.subr.bf16.mxu1 %v2986_v8 }
 0x2a8   : > { %2718 = vmatmul.mubr.msk.bf16.vlgmr.msra.gmra.mrb[8].mxu1 %vm643_vm2, %v761_v31 }
 0x2a9   : > { %2729 = vmatprep.mubr.msk.bf16.mxu1 %vm2987_vm1, %v2986_v8  ;;  %2728 = vmatpush3.bf16.msra.mxu1 %v877_v15 }
 0x2aa   : > { %2739 = vmatprep.subr.bf16.mxu1 %v2986_v8 }
 0x373   : > { %v684_v39 = vpop.f32.mrb[4].mxu1 }
 0x374   : > { %v690_v40 = vmul.f32 0.35355338, %v684_v39  ;;  %v2707_v41 = vpop.f32.mrb[5].mxu1 }
 0x375   : > { %v687_v42 = vpop.f32.mrb[6].mxu1 }
 0x376   : > { %v2708_v43 = vpop.f32.mrb[7].mxu1  ;;  %v697_v44 = vadd.f32 %v3155_v38, %v690_v40 }
 0x378   : > { %v698_v45 = vsel %vm643_vm2, %v697_v44, -inf }
 0x379   : > { %699 = vmax.xlane.f32.xlu1 %v698_v45 }
 0x37b   : > { %v804_v46 = vpop.f32.mrb[8].mxu1 }
 0x37c   : > { %v810_v47 = vmul.f32 0.35355338, %v804_v46  ;;  %v2719_v48 = vpop.f32.mrb[9].mxu1 }
 0x37d   : > { %v807_v49 = vpop.f32.mrb[10].mxu1 }
 0x37e   : > { %v2720_v50 = vpop.f32.mrb[11].mxu1  ;;  %v811_v51 = vadd.f32 %v810_v47, %v3155_v38 }
 0x380   : > { %v812_v52 = vsel %vm643_vm2, %v811_v51, -inf }
 0x381   : > { %813 = vmax.xlane.f32.xlu0 %v812_v52 }
 0x397   : > { %824 = vrot.lane.b32.xlu0 %v3132_v25, %s2991_s17 }
 0x406   : > { %v700_v53 = vpop.xlane.xlu1 %699 }
 0x407   : > { %v701_v54 = vsub.f32 %v697_v44, %v700_v53 }
 0x409   : > { %v702_v55 = vmul.f32 1.442695, %v701_v54 }
 0x40b   : > { %2934 = vpow2.f32 %v702_v55 }
 0x40e   : > { %v814_v56 = vpop.xlane.xlu0 %813 }
 0x40f   : > { %v815_v57 = vsub.f32 %v811_v51, %v814_v56 }
 0x411   : > { %v816_v58 = vmul.f32 1.442695, %v815_v57 }
 0x412   : > { %v825_v5 = vpop.permute.xlu0 %824 }
 0x413   : > { %2936 = vpow2.f32 %v816_v58  ;;  %v830_v7 = vsel %vm715_vm3, %v825_v5, 0 }
 0x415   : > { %v2935_v59 = vpop.eup %2934 }
 0x416   : > { %v704_v60 = vsel %vm643_vm2, %v2935_v59, 0.0 }
 0x417   : > { %705 = vadd.xlane.f32.xlu1 %v704_v60 }
 0x41d   : > { %v2937_v61 = vpop.eup %2936 }
 0x41e   : > { %v818_v62 = vsel %vm643_vm2, %v2937_v61, 0.0 }
 0x41f   : > { %819 = vadd.xlane.f32.xlu1 %v818_v62  ;;  %v636_v62 = vld [vmem:[%s3501_s6 + $0x8] sm:$0xf] }
 0x430   : > { %710 = vrot.lane.b32.xlu1 %v3132_v25, %s3518_s18 }
 0x434   : > { %967 = vrot.lane.b32.xlu1 %v3132_v25, %s2993_s19 }
 0x438   : > { %965 = vrot.lane.b32.xlu1 %v3132_v25, %s3517_s20 }
 0x4a4   : > { %v706_v63 = vpop.xlane.xlu1 %705 }
 0x4a5   : > { %2938 = vrcp.f32 %v706_v63  ;;  %v1082_v63 = vsel %vm715_vm3, %v636_v62, 0 }
 0x4ac   : > { %v820_v0 = vpop.xlane.xlu1 %819 }
 0x4ad   : > { %2940 = vrcp.f32 %v820_v0 }
 0x4af   : > { %v2939_v1 = vpop.eup %2938 }
 0x4b0   : > { %v711_v2 = vpop.permute.xlu1 %710  ;;  %v708_v3 = vmul.f32 %v2939_v1, %v2935_v59 }
 0x4b1   : > { %v717_v4 = vsel %vm715_vm3, %v711_v2, 0 }
 0x4b2   : > { %2710 = vmatpush3.bf16.msra.mxu0 %v717_v4  ;;  %v709_v6 = vpack.c.bf16 %v708_v3, %v708_v3 }
 0x4b3   : > { %2721 = vmatprep.subr.bf16.mxu0 %v2986_v8 }
 0x4b4   : > { %v968_v22 = vpop.permute.xlu1 %967 }
 0x4b5   : > { %2712 = vmatmul.mubr.msk.bf16.vlgmr.msra.gmra.mrb[0].mxu0 %vm643_vm2, %v709_v6  ;;  %v973_v28 = vsel %vm643_vm2, %v968_v22, 0 }
 0x4b6   : > { %2722 = vmatpush3.bf16.msra.mxu0 %v830_v7  ;;  %2723 = vmatprep.mubr.msk.bf16.mxu0 %vm2987_vm1, %v2986_v8 }
 0x4b7   : > { %v2941_v9 = vpop.eup %2940  ;;  %2733 = vmatprep.subr.bf16.mxu0 %v2986_v8 }
 0x4b8   : > { %v822_v10 = vmul.f32 %v2941_v9, %v2937_v61  ;;  %v966_v30 = vpop.permute.xlu1 %965 }
 0x4ba   : > { %v823_v11 = vpack.c.bf16 %v822_v10, %v822_v10 }
 0x4bd   : > { %2724 = vmatmul.mubr.msk.bf16.vlgmr.msra.gmra.mrb[4].mxu0 %vm643_vm2, %v823_v11 }
 0x4be   : > { %2735 = vmatprep.mubr.msk.bf16.mxu0 %vm2987_vm1, %v2986_v8  ;;  %2734 = vmatpush3.bf16.msra.mxu0 %v923_v13 }
 0x4bf   : > { %2745 = vmatprep.subr.bf16.mxu0 %v2986_v8 }
 0x588   : > { %v753_v16 = vpop.f32.mrb[0].mxu0 }
 0x589   : > { %v759_v17 = vpack.c.bf16 %v753_v16, %v753_v16  ;;  %v2713_v19 = vpop.f32.mrb[1].mxu0 }
 0x58a   : > { %v756_v20 = vpop.f32.mrb[2].mxu0 }
 0x58b   : > { %v2714_v21 = vpop.f32.mrb[3].mxu0  ;;  %2736 = vmatmul.mubr.msk.bf16.vlgmr.msra.gmra.mrb[8].mxu0 %vm643_vm2, %v759_v17 }
 0x58c   : > { %2747 = vmatprep.mubr.msk.bf16.mxu0 %vm2987_vm1, %v2986_v8 }
 0x590   : > { %v866_v23 = vpop.f32.mrb[4].mxu0 }
 0x591   : > { %v872_v24 = vpack.c.bf16 %v866_v23, %v866_v23  ;;  %v2725_v26 = vpop.f32.mrb[5].mxu0 }
 0x592   : > { %v869_v27 = vpop.f32.mrb[6].mxu0 }
 0x593   : > { %v2726_v29 = vpop.f32.mrb[7].mxu0  ;;  %2730 = vmatmul.mubr.msk.bf16.vlgmr.msra.gmra.mrb[12].mxu1 %vm643_vm2, %v872_v24 }
 0x594   : > { %2740 = vmatpush3.bf16.xpose.msra.mxu1 %v973_v28  ;;  %2741 = vmatprep.mubr.msk.bf16.mxu1 %vm2987_vm1, %v2986_v8 }
 0x595   : > { %2751 = vmatprep.subr.bf16.mxu1 %v2986_v8 }
 0x59b   : > { %2742 = vmatmul.mubr.msk.bf16.vlgmr.msra.gmra.mrb[16].mxu1 %vm643_vm2, %v966_v30 }
 0x59c   : > { %2753 = vmatprep.mubr.msk.bf16.mxu1 %vm2987_vm1, %v2986_v8  ;;  %2752 = vmatpush3.bf16.msra.mxu1 %v1082_v63  ;;  %v2920_v63 = vld [vmem:[%s3507_s12] sm:$0xff]  }
 0x59d   : > { %2763 = vmatprep.subr.bf16.mxu1 %v2986_v8 }
 0x65e   : > { %v959_v31 = vpop.f32.mrb[8].mxu0 }
 0x65f   : > { %v2737_v32 = vpop.f32.mrb[9].mxu0 }
 0x660   : > { %v962_v33 = vpop.f32.mrb[10].mxu0 }
 0x661   : > { %v2738_v34 = vpop.f32.mrb[11].mxu0 }
 0x666   : > { %v913_v35 = vpop.f32.mrb[12].mxu1 }
 0x667   : > { %v3202_v36 = vadd.f32 %v959_v31, %v913_v35  ;;  %v2731_v37 = vpop.f32.mrb[13].mxu1 }
 0x668   : > { %v916_v39 = vpop.f32.mrb[14].mxu1  ;;  %v2549_v37 = vld [vmem:[%s3502_s7] ss:$0 sm:$0xff] }
 0x669   : > { %v2732_v40 = vpop.f32.mrb[15].mxu1 }
 0x66e   : > { %v1009_v41 = vpop.f32.mrb[16].mxu1 }
 0x66f   : > { %v1015_v42 = vmul.f32 0.35355338, %v1009_v41  ;;  %v2743_v43 = vpop.f32.mrb[17].mxu1 }
 0x670   : > { %v1012_v44 = vpop.f32.mrb[18].mxu1 }
 0x671   : > { %v2744_v45 = vpop.f32.mrb[19].mxu1  ;;  %v1016_v46 = vadd.f32 %v1015_v42, %v3155_v38 }
 0x673   : > { %v1017_v47 = vsel %vm643_vm2, %v1016_v46, -inf }
 0x674   : > { %1018 = vmax.xlane.f32.xlu1 %v1017_v47 }
 0x685   : > { %1029 = vrot.lane.b32.xlu1 %v3132_v25, %s3514_s0  ;;  %s3523_s0 = smov 72  }
 0x689   : > { %1125 = vrot.lane.b32.xlu1 %v3132_v25, %s3515_s24  ;;  %s3526_s24 = smov 40  }
 0x701   : > { %v1019_v48 = vpop.xlane.xlu1 %1018 }
 0x702   : > { %v1020_v49 = vsub.f32 %v1016_v46, %v1019_v48 }
 0x704   : > { %v1021_v50 = vmul.f32 1.442695, %v1020_v49 }
 0x705   : > { %v1030_v51 = vpop.permute.xlu1 %1029 }
 0x706   : > { %2942 = vpow2.f32 %v1021_v50  ;;  %v1035_v52 = vsel %vm715_vm3, %v1030_v51, 0 }
 0x707   : > { %2746 = vmatpush3.bf16.msra.mxu0 %v1035_v52  ;;  %v2918_v52 = vld [vmem:[%s3505_s10] sm:$0xff]  }
 0x708   : > { %2757 = vmatprep.subr.bf16.mxu0 %v2986_v8 }
 0x709   : > { %v1126_v61 = vpop.permute.xlu1 %1125 }
 0x710   : > { %v2943_v53 = vpop.eup %2942 }
 0x711   : > { %v1023_v54 = vsel %vm643_vm2, %v2943_v53, 0.0 }
 0x712   : > { %1024 = vadd.xlane.f32.xlu0 %v1023_v54 }
 0x728   : > { %1127 = vrot.lane.b32.xlu0 %v3132_v25, %s3516_s25 }
 0x79f   : > { %v1025_v55 = vpop.xlane.xlu0 %1024 }
 0x7a0   : > { %2944 = vrcp.f32 %v1025_v55 }
 0x7a3   : > { %v1128_v58 = vpop.permute.xlu0 %1127 }
 0x7a4   : > { %v1133_v60 = vsel %vm643_vm2, %v1128_v58, 0 }
 0x7aa   : > { %v2945_v56 = vpop.eup %2944 }
 0x7ab   : > { %v1027_v57 = vmul.f32 %v2945_v56, %v2943_v53  ;;  %v2919_v53 = vld [vmem:[%s3505_s10 + $0x8] sm:$0xff]  }
 0x7ad   : > { %v1028_v59 = vpack.c.bf16 %v1027_v57, %v1027_v57  ;;  %v2550_v57 = vld [vmem:[%s3503_s8] ss:$0 sm:$0xff] }
 0x7af   : > { %2748 = vmatmul.mubr.msk.bf16.vlgmr.msra.gmra.mrb[12].mxu0 %vm643_vm2, %v1028_v59  ;;  %v2551_v59 = vld [vmem:[%s3504_s9] ss:$0 sm:$0xff] }
 0x7b0   : > { %2758 = vmatpush3.bf16.xpose.msra.mxu0 %v1133_v60  ;;  %2759 = vmatprep.mubr.msk.bf16.mxu0 %vm2987_vm1, %v2986_v8 }
 0x7b1   : > { %2769 = vmatprep.subr.bf16.mxu0 %v2986_v8 }
 0x7b7   : > { %2760 = vmatmul.mubr.msk.bf16.vlgmr.msra.gmra.mrb[16].mxu0 %vm643_vm2, %v1126_v61 }
 0x7b8   : > { %2771 = vmatprep.mubr.msk.bf16.mxu0 %vm2987_vm1, %v2986_v8 }
 0x882   : > { %v1071_v0 = vpop.f32.mrb[12].mxu0 }
 0x883   : > { %v1077_v1 = vpack.c.bf16 %v1071_v0, %v1071_v0  ;;  %v2749_v2 = vpop.f32.mrb[13].mxu0  ;;  %v2921_v0 = vld [vmem:[%s3507_s12 + $0x8] sm:$0xff]  }
 0x884   : > { %v1074_v3 = vpop.f32.mrb[14].mxu0  ;;  %v2923_v2 = vld [vmem:[%s3507_s12 + $0x18] sm:$0xff]  }
 0x885   : > { %v2750_v4 = vpop.f32.mrb[15].mxu0  ;;  %2754 = vmatmul.mubr.msk.bf16.vlgmr.msra.gmra.mrb[20].mxu1 %vm643_vm2, %v1077_v1  ;;  %v2922_v1 = vld [vmem:[%s3507_s12 + $0x10] sm:$0xff]   ;;  %v2552_v3 = vld [vmem:[%s3506_s11] ss:$0 sm:$0xff] }
 0x886   : > { %2765 = vmatprep.mubr.msk.bf16.mxu1 %vm2987_vm1, %v2986_v8 }
 0x88a   : > { %v1169_v5 = vpop.f32.mrb[16].mxu0 }
 0x88b   : > { %v1175_v6 = vmul.f32 0.35355338, %v1169_v5  ;;  %v2761_v7 = vpop.f32.mrb[17].mxu0 }
 0x88c   : > { %v1172_v9 = vpop.f32.mrb[18].mxu0 }
 0x88d   : > { %v2762_v10 = vpop.f32.mrb[19].mxu0  ;;  %v1176_v11 = vadd.f32 %v1175_v6, %v3155_v38 }
 0x88f   : > { %v1177_v12 = vsel %vm643_vm2, %v1176_v11, -inf }
 0x890   : > { %1178 = vmax.xlane.f32.xlu1 %v1177_v12 }
 0x91d   : > { %v1179_v13 = vpop.xlane.xlu1 %1178 }
 0x91e   : > { %v1180_v14 = vsub.f32 %v1176_v11, %v1179_v13 }
 0x920   : > { %v1181_v15 = vmul.f32 1.442695, %v1180_v14 }
 0x922   : > { %2946 = vpow2.f32 %v1181_v15 }
 0x92c   : > { %v2947_v16 = vpop.eup %2946 }
 0x92d   : > { %v1183_v17 = vsel %vm643_vm2, %v2947_v16, 0.0 }
 0x92e   : > { %1184 = vadd.xlane.f32.xlu0 %v1183_v17 }
 0x944   : > { %1189 = vrot.lane.b32.xlu0 %v3132_v25, %s3513_s29  ;;  %v637_v25 = vld [vmem:[%s3501_s6 + $0xc] sm:$0xf]  ;;  %s3524_s29 = smov 104  }
 0x945   : > { %v1242_v31 = vsel %vm715_vm3, %v637_v25, 0 }
 0x946   : > { %2770 = vmatpush3.bf16.msra.mxu0 %v1242_v31 }
 0x947   : > { %2783 = vmatprep.subr.bf16.mxu0 %v2986_v8 }
 0x958   : > { %v1118_v19 = vpop.f32.mrb[20].mxu1 }
 0x959   : > { %v1124_v20 = vadd.f32 %v1118_v19, %v3202_v36  ;;  %v2755_v21 = vpop.f32.mrb[21].mxu1 }
 0x95a   : > { %v1121_v22 = vpop.f32.mrb[22].mxu1  ;;  %v2556_v21 = vld [vmem:[%s3508_s13] ss:$0 sm:$0xff] }
 0x95b   : > { %v2756_v23 = vpop.f32.mrb[23].mxu1 }
 0x9bb   : > { %v1185_v24 = vpop.xlane.xlu0 %1184 }
 0x9bc   : > { %2948 = vrcp.f32 %v1185_v24 }
 0x9bf   : > { %v1190_v26 = vpop.permute.xlu0 %1189 }
 0x9c0   : > { %v1195_v27 = vsel %vm715_vm3, %v1190_v26, 0 }
 0x9c1   : > { %2764 = vmatpush3.bf16.msra.mxu1 %v1195_v27 }
 0x9c2   : > { %2775 = vmatprep.subr.bf16.mxu1 %v2986_v8 }
 0x9c6   : > { %v2949_v28 = vpop.eup %2948 }
 0x9c7   : > { %v1187_v29 = vmul.f32 %v2949_v28, %v2947_v16 }
 0x9c9   : > { %v1188_v30 = vpack.c.bf16 %v1187_v29, %v1187_v29 }
 0x9cb   : > { %2766 = vmatmul.mubr.msk.bf16.vlgmr.msra.gmra.mrb[24].mxu1 %vm643_vm2, %v1188_v30 }
 0x9cc   : > { %2779 = vmatprep.mubr.msk.bf16.mxu1 %vm2987_vm1, %v2986_v8  ;;  %2776 = vmatpush3.bf16.msra.mxu1 %v2918_v52 }
 0x9cd   : > { %2777 = vmatprep.subr.bf16.mxu1 %v2986_v8 }
 0x9d0   : > { %2778 = vmatpush3.bf16.msra.mxu1 %v2919_v53 }
 0x9d1   : > { %2795 = vmatprep.subr.bf16.mxu1 %v2986_v8 }
 0xa9e   : > { %v1231_v32 = vpop.f32.mrb[24].mxu1 }
 0xa9f   : > { %v1237_v33 = vpack.c.bf16 %v1231_v32, %v1231_v32  ;;  %v2767_v34 = vpop.f32.mrb[25].mxu1 }
 0xaa0   : > { %v1234_v35 = vpop.f32.mrb[26].mxu1  ;;  %v2924_v34 = vld [vmem:[%s3499_s4 + $0x10] sm:$0xff]  }
 0xaa1   : > { %v2768_v36 = vpop.f32.mrb[27].mxu1  ;;  %2772 = vmatmul.mubr.msk.bf16.vlgmr.msra.gmra.mrb[20].mxu0 %vm643_vm2, %v1237_v33  ;;  %v2925_v35 = vld [vmem:[%s3499_s4 + $0x18] sm:$0xff]  }
 0xaa2   : > { %2791 = vmatprep.mubr.msk.bf16.mxu0 %vm2987_vm1, %v2986_v8  ;;  %2784 = vmatpush3.bf16.msra.mxu0 %v2920_v63 }
 0xaa3   : > { %2785 = vmatprep.subr.bf16.mxu0 %v2986_v8 }
 0xaa6   : > { %2786 = vmatpush3.bf16.msra.mxu0 %v2921_v0 }
 0xaa7   : > { %2787 = vmatprep.subr.bf16.mxu0 %v2986_v8 }
 0xaaa   : > { %2788 = vmatpush3.bf16.msra.mxu0 %v2922_v1 }
 0xaab   : > { %2789 = vmatprep.subr.bf16.mxu0 %v2986_v8 }
 0xaae   : > { %2790 = vmatpush3.bf16.msra.mxu0 %v2923_v2 }
 0xaaf   : > { %2809 = vmatprep.subr.bf16.mxu0 %v2986_v8 }
 0xb74   : > { %v1278_v39 = vpop.f32.mrb[20].mxu0 }
 0xb75   : > { %v1284_v40 = vadd.f32 %v1278_v39, %v1124_v20  ;;  %v2773_v41 = vpop.f32.mrb[21].mxu0 }
 0xb76   : > { %v1281_v42 = vpop.f32.mrb[22].mxu0  ;;  %v2562_v41 = vld [vmem:[%s3509_s14] ss:$0 sm:$0xff] }
 0xb77   : > { %v1291_v43 = vadd.f32 %v2549_v37, %v1284_v40  ;;  %v2774_v44 = vpop.f32.mrb[23].mxu0 }
 0xb79   : > { %v1292_v45 = vadd.f32 %v1291_v43, %v3122_v18  ;;  %v2563_v43 = vld [vmem:[%s3510_s15] ss:$0 sm:$0xff] }
 0xb7b   : > { %v1295_v46 = vsel %vm535_vm0, %v1292_v45, 0.0 }
 0xb7c   : > { %1296 = vadd.xlane.f32.xlu1 %v1295_v46 }
 0xc09   : > { %v1297_v47 = vpop.xlane.xlu1 %1296 }
 0xc0a   : > { %v1298_v48 = vmul.f32 0.03125, %v1297_v47  ;;  %v2569_v47 = vld [vmem:[%s3500_s5 + $0x1] ss:$0 sm:$0xff] }
 0xc0c   : > { %v1299_v49 = vsub.f32 %v1292_v45, %v1298_v48 }
 0xc0e   : > { %v1300_v50 = vmul.f32 %v1299_v49, %v1299_v49 }
 0xc10   : > { %v1301_v51 = vsel %vm535_vm0, %v1300_v50, 0.0 }
 0xc11   : > { %1302 = vadd.xlane.f32.xlu1 %v1301_v51 }
 0xc9e   : > { %v1303_v18 = vpop.xlane.xlu1 %1302 }
 0xc9f   : > { %v1304_v54 = vmul.f32 0.03125, %v1303_v18 }
 0xca1   : > { %v1305_v55 = vadd.f32 1e-12, %v1304_v54 }
 0xca3   : > { %2950 = vrsqrt.f32 %v1305_v55 }
 0xcad   : > { %v2951_v56 = vpop.eup %2950 }
 0xcae   : > { %v1307_v58 = vmul.f32 %v2951_v56, %v1299_v49 }
 0xcb0   : > { %v1314_v60 = vmul.f32 %v2550_v57, %v1307_v58 }
 0xcb2   : > { %v1321_v61 = vadd.f32 %v2551_v59, %v1314_v60 }
 0xcb4   : > { %v1327_v62 = vpack.c.bf16 %v1321_v61, %v1321_v61 }
 0xcb6   : > { %2780 = vmatmul.mubr.msk.bf16.vlgmr.msra.gmra.mrb[28].mxu1 %vm535_vm0, %v1327_v62 }
 0xcb7   : > { %2799 = vmatprep.mubr.msk.bf16.mxu1 %vm2987_vm1, %v2986_v8  ;;  %2796 = vmatpush3.bf16.msra.mxu1 %v2924_v34  ;;  %v2574_v34 = vld [vmem:[%s3501_s6 + $0x14] sm:$0xf] }
 0xcb8   : > { %2797 = vmatprep.subr.bf16.mxu1 %v2986_v8 }
 0xcbb   : > { %2798 = vmatpush3.bf16.msra.mxu1 %v2925_v35  ;;  %v1818_v35 = vsel %vm715_vm3, %v2574_v34, 0 }
 0xcbc   : > { %2803 = vmatprep.subr.bf16.mxu1 %v2986_v8 }
 0xd89   : > { %v1383_v4 = vpop.f32.mrb[28].mxu1 }
 0xd8a   : > { %v1384_v5 = vadd.f32 %v2552_v3, %v1383_v4  ;;  %v2781_v6 = vpop.f32.mrb[29].mxu1 }
 0xd8b   : > { %v1386_v7 = vpop.f32.mrb[30].mxu1 }
 0xd8c   : > { %v1390_v9 = vmul.f32 0.044715, %v1384_v5  ;;  %v2782_v10 = vpop.f32.mrb[31].mxu1  ;;  %v1389_v16 = vmul.f32 0.5, %v1384_v5 }
 0xd8e   : > { %v1391_v11 = vmul.f32 %v1390_v9, %v1384_v5 }
 0xd90   : > { %v1392_v12 = vmul.f32 %v1391_v11, %v1384_v5 }
 0xd92   : > { %v1393_v13 = vadd.f32 %v1392_v12, %v1384_v5 }
 0xd94   : > { %v1394_v14 = vmul.f32 0.7978846, %v1393_v13 }
 0xd96   : > { %2952 = vtanh.f32 %v1394_v14 }
 0xda0   : > { %v2953_v15 = vpop.eup %2952 }
 0xda1   : > { %v1396_v17 = vadd.f32 1.0, %v2953_v15 }
 0xda3   : > { %v1397_v19 = vmul.f32 %v1396_v17, %v1389_v16 }
 0xda5   : > { %v1407_v20 = vpack.c.bf16 %v1397_v19, %v1397_v19 }
 0xda7   : > { %2792 = vmatmul.mubr.msk.bf16.vlgmr.msra.gmra.mrb[24].mxu0 %vm1438_vm4, %v1407_v20 }
 0xda8   : > { %2811 = vmatprep.mubr.msk.bf16.mxu0 %vm2987_vm1, %v2986_v8 }
 0xe7a   : > { %v1476_v22 = vpop.f32.mrb[24].mxu0 }
 0xe7b   : > { %v1477_v23 = vadd.f32 %v2556_v21, %v1476_v22  ;;  %v2793_v24 = vpop.f32.mrb[25].mxu0 }
 0xe7c   : > { %v1479_v26 = vpop.f32.mrb[26].mxu0 }
 0xe7d   : > { %v2794_v27 = vpop.f32.mrb[27].mxu0  ;;  %v1482_v28 = vadd.f32 %v1477_v23, %v1321_v61 }
 0xe7f   : > { %v1485_v29 = vsel %vm535_vm0, %v1482_v28, 0.0 }
 0xe80   : > { %1486 = vadd.xlane.f32.xlu1 %v1485_v29 }
 0xf0d   : > { %v1487_v30 = vpop.xlane.xlu1 %1486 }
 0xf0e   : > { %v1488_v25 = vmul.f32 0.03125, %v1487_v30 }
 0xf10   : > { %v1489_v31 = vsub.f32 %v1482_v28, %v1488_v25 }
 0xf12   : > { %v1490_v32 = vmul.f32 %v1489_v31, %v1489_v31 }
 0xf14   : > { %v1491_v33 = vsel %vm535_vm0, %v1490_v32, 0.0  ;;  %v2573_v32 = vld [vmem:[%s3501_s6 + $0x10] sm:$0xf] }
 0xf15   : > { %1492 = vadd.xlane.f32.xlu1 %v1491_v33  ;;  %v1864_v33 = vsel %vm715_vm3, %v2573_v32, 0 }
 0xfa2   : > { %v1493_v36 = vpop.xlane.xlu1 %1492 }
 0xfa3   : > { %v1494_v37 = vmul.f32 0.03125, %v1493_v36 }
 0xfa5   : > { %v1495_v39 = vadd.f32 1e-12, %v1494_v37 }
 0xfa7   : > { %2954 = vrsqrt.f32 %v1495_v39 }
 0xfb1   : > { %v2955_v40 = vpop.eup %2954 }
 0xfb2   : > { %v1497_v42 = vmul.f32 %v2955_v40, %v1489_v31 }
 0xfb4   : > { %v1504_v44 = vmul.f32 %v2562_v41, %v1497_v42 }
 0xfb6   : > { %v3314_v45 = vadd.f32 %v2563_v43, %v1504_v44 }
 0xfb8   : > { %v1519_v46 = vpack.c.bf16 %v3314_v45, %v3314_v45 }
 0xfba   : > { %2800 = vmatmul.mubr.msk.bf16.vlgmr.msra.gmra.mrb[32].mxu1 %vm535_vm0, %v1519_v46 }
 0xfbb   : > { %2805 = vmatprep.mubr.msk.bf16.mxu1 %vm2987_vm1, %v2986_v8 }
0x108d   : > { %v1575_v48 = vpop.f32.mrb[32].mxu1 }
0x108e   : > { %v1576_v49 = vadd.f32 %v2569_v47, %v1575_v48  ;;  %v2801_v50 = vpop.f32.mrb[33].mxu1 }
0x108f   : > { %v1578_v51 = vpop.f32.mrb[34].mxu1 }
0x1090   : > { %v3324_v52 = vpack.c.bf16 %v1576_v49, %v1576_v49  ;;  %v2802_v53 = vpop.f32.mrb[35].mxu1 }
0x1092   : > { %1703 = vrot.lane.b32.xlu0 %v3324_v52, %s2990_s28  ;;  %1590 = vrot.lane.b32.xlu1 %v3324_v52, %s2989_s27  ;;  %s3522_s27 = smov 112  }
0x1096   : > { %1701 = vrot.lane.b32.xlu0 %v3324_v52, %s2988_s26  ;;  %s3521_s26 = smov 64  }
0x1104   : > { %v1591_v18 = vpop.permute.xlu1 %1590  ;;  %v1704_v55 = vpop.permute.xlu0 %1703 }
0x1105   : > { %v1596_v54 = vsel %vm643_vm2, %v1591_v18, 0  ;;  %v1709_v56 = vsel %vm643_vm2, %v1704_v55, 0 }
0x1106   : > { %2804 = vmatpush3.bf16.xpose.msra.mxu1 %v1596_v54 }
0x1107   : > { %2815 = vmatprep.subr.bf16.mxu1 %v2986_v8 }
0x1108   : > { %v1702_v57 = vpop.permute.xlu0 %1701 }
0x110d   : > { %2806 = vmatmul.mubr.msk.bf16.vlgmr.msra.gmra.mrb[36].mxu1 %vm643_vm2, %v3324_v52 }
0x110e   : > { %2816 = vmatpush3.bf16.xpose.msra.mxu1 %v1709_v56  ;;  %2817 = vmatprep.mubr.msk.bf16.mxu1 %vm2987_vm1, %v2986_v8 }
0x110f   : > { %2827 = vmatprep.subr.bf16.mxu1 %v2986_v8 }
0x1115   : > { %2818 = vmatmul.mubr.msk.bf16.vlgmr.msra.gmra.mrb[40].mxu1 %vm643_vm2, %v1702_v57 }
0x1116   : > { %2829 = vmatprep.mubr.msk.bf16.mxu1 %vm2987_vm1, %v2986_v8  ;;  %2828 = vmatpush3.bf16.msra.mxu1 %v1818_v35 }
0x1117   : > { %2839 = vmatprep.subr.bf16.mxu1 %v2986_v8 }
0x11e0   : > { %v1632_v58 = vpop.f32.mrb[36].mxu1 }
0x11e1   : > { %v1638_v59 = vmul.f32 0.35355338, %v1632_v58  ;;  %v2807_v60 = vpop.f32.mrb[37].mxu1 }
0x11e2   : > { %v1635_v61 = vpop.f32.mrb[38].mxu1 }
0x11e3   : > { %v2808_v62 = vpop.f32.mrb[39].mxu1  ;;  %v1639_v63 = vadd.f32 %v1638_v59, %v3155_v38 }
0x11e5   : > { %v1640_v0 = vsel %vm643_vm2, %v1639_v63, -inf }
0x11e6   : > { %1641 = vmax.xlane.f32.xlu0 %v1640_v0 }
0x11e8   : > { %v1745_v1 = vpop.f32.mrb[40].mxu1 }
0x11e9   : > { %v1751_v2 = vmul.f32 0.35355338, %v1745_v1  ;;  %v2819_v3 = vpop.f32.mrb[41].mxu1 }
0x11ea   : > { %v1748_v4 = vpop.f32.mrb[42].mxu1 }
0x11eb   : > { %v2820_v5 = vpop.f32.mrb[43].mxu1  ;;  %v1752_v6 = vadd.f32 %v1751_v2, %v3155_v38 }
0x11ed   : > { %v1753_v7 = vsel %vm643_vm2, %v1752_v6, -inf }
0x11ee   : > { %1754 = vmax.xlane.f32.xlu1 %v1753_v7 }
0x11ff   : > { %1765 = vrot.lane.b32.xlu1 %v3324_v52, %s2991_s17 }
0x1203   : > { %1908 = vrot.lane.b32.xlu1 %v3324_v52, %s2993_s19 }
0x1273   : > { %v1642_v9 = vpop.xlane.xlu0 %1641 }
0x1274   : > { %v1643_v10 = vsub.f32 %v1639_v63, %v1642_v9 }
0x1276   : > { %v1644_v11 = vmul.f32 1.442695, %v1643_v10 }
0x1278   : > { %2956 = vpow2.f32 %v1644_v11 }
0x127b   : > { %v1755_v12 = vpop.xlane.xlu1 %1754 }
0x127c   : > { %v1756_v13 = vsub.f32 %v1752_v6, %v1755_v12 }
0x127e   : > { %v1757_v14 = vmul.f32 1.442695, %v1756_v13 }
0x127f   : > { %v1766_v27 = vpop.permute.xlu1 %1765 }
0x1280   : > { %2958 = vpow2.f32 %v1757_v14  ;;  %v1771_v29 = vsel %vm715_vm3, %v1766_v27, 0 }
0x1282   : > { %v2957_v15 = vpop.eup %2956 }
0x1283   : > { %v1646_v16 = vsel %vm643_vm2, %v2957_v15, 0.0  ;;  %v1909_v42 = vpop.permute.xlu1 %1908 }
0x1284   : > { %1647 = vadd.xlane.f32.xlu0 %v1646_v16  ;;  %v1914_v48 = vsel %vm643_vm2, %v1909_v42, 0 }
0x128a   : > { %v2959_v17 = vpop.eup %2958 }
0x128b   : > { %v1759_v19 = vsel %vm643_vm2, %v2959_v17, 0.0 }
0x128c   : > { %1760 = vadd.xlane.f32.xlu0 %v1759_v19  ;;  %v2575_v19 = vld [vmem:[%s3501_s6 + $0x18] sm:$0xf] }
0x12a2   : > { %1652 = vrot.lane.b32.xlu0 %v3324_v52, %s3521_s26 }
0x12a6   : > { %1906 = vrot.lane.b32.xlu0 %v3324_v52, %s3522_s27  ;;  %s3527_s27 = sshll.u32 %s3529_s22, 3 }
0x12a7   : > { %s530_s19 = scalar_lea.vmem %s3511_s16, %s3527_s27 }
0x1311   : > { %v1648_v20 = vpop.xlane.xlu0 %1647 }
0x1312   : > { %2960 = vrcp.f32 %v1648_v20  ;;  %v2023_v20 = vsel %vm715_vm3, %v2575_v19, 0  ;;  %v2928_v19 = vld [vmem:[%s3507_s12 + $0x20] sm:$0xff]  }
0x1319   : > { %v1761_v21 = vpop.xlane.xlu0 %1760 }
0x131a   : > { %2962 = vrcp.f32 %v1761_v21 }
0x131c   : > { %v2961_v22 = vpop.eup %2960 }
0x131d   : > { %v1650_v23 = vmul.f32 %v2961_v22, %v2957_v15  ;;  %v1653_v24 = vpop.permute.xlu0 %1652 }
0x131e   : > { %v1658_v26 = vsel %vm715_vm3, %v1653_v24, 0 }
0x131f   : > { %2810 = vmatpush3.bf16.msra.mxu0 %v1658_v26  ;;  %v1651_v28 = vpack.c.bf16 %v1650_v23, %v1650_v23 }
0x1320   : > { %2821 = vmatprep.subr.bf16.mxu0 %v2986_v8 }
0x1321   : > { %v1907_v50 = vpop.permute.xlu0 %1906 }
0x1322   : > { %2812 = vmatmul.mubr.msk.bf16.vlgmr.msra.gmra.mrb[28].mxu0 %vm643_vm2, %v1651_v28 }
0x1323   : > { %2822 = vmatpush3.bf16.msra.mxu0 %v1771_v29  ;;  %2823 = vmatprep.mubr.msk.bf16.mxu0 %vm2987_vm1, %v2986_v8 }
0x1324   : > { %v2963_v30 = vpop.eup %2962  ;;  %2833 = vmatprep.subr.bf16.mxu0 %v2986_v8 }
0x1325   : > { %v1763_v25 = vmul.f32 %v2963_v30, %v2959_v17 }
0x1327   : > { %v1764_v31 = vpack.c.bf16 %v1763_v25, %v1763_v25 }
0x132a   : > { %2824 = vmatmul.mubr.msk.bf16.vlgmr.msra.gmra.mrb[32].mxu0 %vm643_vm2, %v1764_v31 }
0x132b   : > { %2835 = vmatprep.mubr.msk.bf16.mxu0 %vm2987_vm1, %v2986_v8  ;;  %2834 = vmatpush3.bf16.msra.mxu0 %v1864_v33 }
0x132c   : > { %2845 = vmatprep.subr.bf16.mxu0 %v2986_v8 }
0x13f5   : > { %v1694_v36 = vpop.f32.mrb[28].mxu0 }
0x13f6   : > { %v1700_v37 = vpack.c.bf16 %v1694_v36, %v1694_v36  ;;  %v2813_v39 = vpop.f32.mrb[29].mxu0 }
0x13f7   : > { %v1697_v40 = vpop.f32.mrb[30].mxu0 }
0x13f8   : > { %v2814_v41 = vpop.f32.mrb[31].mxu0  ;;  %2836 = vmatmul.mubr.msk.bf16.vlgmr.msra.gmra.mrb[36].mxu0 %vm643_vm2, %v1700_v37 }
0x13f9   : > { %2847 = vmatprep.mubr.msk.bf16.mxu0 %vm2987_vm1, %v2986_v8 }
0x13fd   : > { %v1807_v43 = vpop.f32.mrb[32].mxu0 }
0x13fe   : > { %v1813_v44 = vpack.c.bf16 %v1807_v43, %v1807_v43  ;;  %v2825_v46 = vpop.f32.mrb[33].mxu0 }
0x13ff   : > { %v1810_v47 = vpop.f32.mrb[34].mxu0 }
0x1400   : > { %v2826_v49 = vpop.f32.mrb[35].mxu0  ;;  %2830 = vmatmul.mubr.msk.bf16.vlgmr.msra.gmra.mrb[44].mxu1 %vm643_vm2, %v1813_v44 }
0x1401   : > { %2840 = vmatpush3.bf16.xpose.msra.mxu1 %v1914_v48  ;;  %2841 = vmatprep.mubr.msk.bf16.mxu1 %vm2987_vm1, %v2986_v8  ;;  %v2576_v49 = vld [vmem:[%s3501_s6 + $0x1c] sm:$0xf] }
0x1402   : > { %2851 = vmatprep.subr.bf16.mxu1 %v2986_v8 }
0x1408   : > { %2842 = vmatmul.mubr.msk.bf16.vlgmr.msra.gmra.mrb[48].mxu1 %vm643_vm2, %v1907_v50  ;;  %v2183_v50 = vsel %vm715_vm3, %v2576_v49, 0 }
0x1409   : > { %2853 = vmatprep.mubr.msk.bf16.mxu1 %vm2987_vm1, %v2986_v8  ;;  %2852 = vmatpush3.bf16.msra.mxu1 %v2023_v20  ;;  %v2929_v20 = vld [vmem:[%s3507_s12 + $0x28] sm:$0xff]  }
0x140a   : > { %2863 = vmatprep.subr.bf16.mxu1 %v2986_v8 }
0x14cb   : > { %v1900_v51 = vpop.f32.mrb[36].mxu0 }
0x14cc   : > { %v2837_v53 = vpop.f32.mrb[37].mxu0 }
0x14cd   : > { %v1903_v18 = vpop.f32.mrb[38].mxu0 }
0x14ce   : > { %v2838_v54 = vpop.f32.mrb[39].mxu0 }
0x14d3   : > { %v1854_v55 = vpop.f32.mrb[44].mxu1 }
0x14d4   : > { %v3388_v56 = vadd.f32 %v1900_v51, %v1854_v55  ;;  %v2831_v57 = vpop.f32.mrb[45].mxu1 }
0x14d5   : > { %v1857_v58 = vpop.f32.mrb[46].mxu1 }
0x14d6   : > { %v2832_v59 = vpop.f32.mrb[47].mxu1 }
0x14db   : > { %v1950_v60 = vpop.f32.mrb[48].mxu1 }
0x14dc   : > { %v1956_v61 = vmul.f32 0.35355338, %v1950_v60  ;;  %v2843_v62 = vpop.f32.mrb[49].mxu1 }
0x14dd   : > { %v1953_v63 = vpop.f32.mrb[50].mxu1 }
0x14de   : > { %v2844_v0 = vpop.f32.mrb[51].mxu1  ;;  %v1957_v1 = vadd.f32 %v1956_v61, %v3155_v38 }
0x14e0   : > { %v1958_v2 = vsel %vm643_vm2, %v1957_v1, -inf }
0x14e1   : > { %1959 = vmax.xlane.f32.xlu1 %v1958_v2 }
0x14f2   : > { %2068 = vrot.lane.b32.xlu1 %v3324_v52, %s3523_s0 }
0x14f6   : > { %2066 = vrot.lane.b32.xlu1 %v3324_v52, %s3524_s29 }
0x156e   : > { %v1960_v3 = vpop.xlane.xlu1 %1959 }
0x156f   : > { %v1961_v4 = vsub.f32 %v1957_v1, %v1960_v3 }
0x1571   : > { %v1962_v5 = vmul.f32 1.442695, %v1961_v4 }
0x1572   : > { %v2069_v14 = vpop.permute.xlu1 %2068 }
0x1573   : > { %2964 = vpow2.f32 %v1962_v5  ;;  %v2074_v16 = vsel %vm643_vm2, %v2069_v14, 0  ;;  %v2594_v14 = vld [vmem:[%s3504_s9 + $0x1] ss:$0 sm:$0xff] }
0x1576   : > { %v2067_v17 = vpop.permute.xlu1 %2066 }
0x157d   : > { %v2965_v6 = vpop.eup %2964 }
0x157e   : > { %v1964_v7 = vsel %vm643_vm2, %v2965_v6, 0.0 }
0x157f   : > { %1965 = vadd.xlane.f32.xlu0 %v1964_v7  ;;  %v2927_v7 = vld [vmem:[%s3505_s10 + $0x18] sm:$0xff]  }
0x1595   : > { %1970 = vrot.lane.b32.xlu0 %v3324_v52, %s3525_s30 }
0x160c   : > { %v1966_v9 = vpop.xlane.xlu0 %1965 }
0x160d   : > { %2966 = vrcp.f32 %v1966_v9 }
0x1610   : > { %v1971_v10 = vpop.permute.xlu0 %1970 }
0x1611   : > { %v1976_v11 = vsel %vm715_vm3, %v1971_v10, 0 }
0x1612   : > { %2846 = vmatpush3.bf16.msra.mxu0 %v1976_v11 }
0x1613   : > { %2857 = vmatprep.subr.bf16.mxu0 %v2986_v8 }
0x1617   : > { %v2967_v12 = vpop.eup %2966 }
0x1618   : > { %v1968_v13 = vmul.f32 %v2967_v12, %v2965_v6  ;;  %v2926_v6 = vld [vmem:[%s3505_s10 + $0x10] sm:$0xff]   ;;  %v2593_v12 = vld [vmem:[%s3503_s8 + $0x1] ss:$0 sm:$0xff] }
0x161a   : > { %v1969_v15 = vpack.c.bf16 %v1968_v13, %v1968_v13 }
0x161c   : > { %2848 = vmatmul.mubr.msk.bf16.vlgmr.msra.gmra.mrb[40].mxu0 %vm643_vm2, %v1969_v15 }
0x161d   : > { %2858 = vmatpush3.bf16.xpose.msra.mxu0 %v2074_v16  ;;  %2859 = vmatprep.mubr.msk.bf16.mxu0 %vm2987_vm1, %v2986_v8 }
0x161e   : > { %2869 = vmatprep.subr.bf16.mxu0 %v2986_v8 }
0x1624   : > { %2860 = vmatmul.mubr.msk.bf16.vlgmr.msra.gmra.mrb[44].mxu0 %vm643_vm2, %v2067_v17 }
0x1625   : > { %2871 = vmatprep.mubr.msk.bf16.mxu0 %vm2987_vm1, %v2986_v8  ;;  %2870 = vmatpush3.bf16.msra.mxu0 %v2183_v50 }
0x1626   : > { %2883 = vmatprep.subr.bf16.mxu0 %v2986_v8 }
0x16ef   : > { %v2012_v21 = vpop.f32.mrb[40].mxu0 }
0x16f0   : > { %v2018_v22 = vpack.c.bf16 %v2012_v21, %v2012_v21  ;;  %v2849_v23 = vpop.f32.mrb[41].mxu0  ;;  %v2930_v21 = vld [vmem:[%s3507_s12 + $0x30] sm:$0xff]  }
0x16f1   : > { %v2015_v24 = vpop.f32.mrb[42].mxu0  ;;  %v2600_v23 = vld [vmem:[%s3506_s11 + $0x1] ss:$0 sm:$0xff] }
0x16f2   : > { %v2850_v26 = vpop.f32.mrb[43].mxu0  ;;  %2854 = vmatmul.mubr.msk.bf16.vlgmr.msra.gmra.mrb[52].mxu1 %vm643_vm2, %v2018_v22  ;;  %v2931_v22 = vld [vmem:[%s3507_s12 + $0x38] sm:$0xff]  }
0x16f3   : > { %2865 = vmatprep.mubr.msk.bf16.mxu1 %vm2987_vm1, %v2986_v8 }
0x16f7   : > { %v2110_v27 = vpop.f32.mrb[44].mxu0 }
0x16f8   : > { %v2116_v28 = vmul.f32 0.35355338, %v2110_v27  ;;  %v2861_v29 = vpop.f32.mrb[45].mxu0 }
0x16f9   : > { %v2113_v30 = vpop.f32.mrb[46].mxu0 }
0x16fa   : > { %v2862_v25 = vpop.f32.mrb[47].mxu0  ;;  %v2117_v31 = vadd.f32 %v2116_v28, %v3155_v38 }
0x16fc   : > { %v2118_v32 = vsel %vm643_vm2, %v2117_v31, -inf }
0x16fd   : > { %2119 = vmax.xlane.f32.xlu0 %v2118_v32 }
0x1713   : > { %2130 = vrot.lane.b32.xlu0 %v3324_v52, %s3526_s24 }
0x178a   : > { %v2120_v33 = vpop.xlane.xlu0 %2119 }
0x178b   : > { %v2121_v34 = vsub.f32 %v2117_v31, %v2120_v33 }
0x178d   : > { %v2122_v35 = vmul.f32 1.442695, %v2121_v34 }
0x178e   : > { %v2131_v36 = vpop.permute.xlu0 %2130 }
0x178f   : > { %2968 = vpow2.f32 %v2122_v35  ;;  %v2136_v37 = vsel %vm715_vm3, %v2131_v36, 0 }
0x1790   : > { %2864 = vmatpush3.bf16.msra.mxu1 %v2136_v37 }
0x1791   : > { %2875 = vmatprep.subr.bf16.mxu1 %v2986_v8 }
0x1799   : > { %v2969_v39 = vpop.eup %2968 }
0x179a   : > { %v2124_v40 = vsel %vm643_vm2, %v2969_v39, 0.0 }
0x179b   : > { %2125 = vadd.xlane.f32.xlu1 %v2124_v40 }
0x17c5   : > { %v2059_v38 = vpop.f32.mrb[52].mxu1 }
0x17c6   : > { %v2065_v41 = vadd.f32 %v2059_v38, %v3388_v56  ;;  %v2855_v42 = vpop.f32.mrb[53].mxu1  ;;  %v2590_v56 = vld [vmem:[%s3502_s7 + $0x1] ss:$0 sm:$0xff] }
0x17c7   : > { %v2062_v43 = vpop.f32.mrb[54].mxu1 }
0x17c8   : > { %v2856_v52 = vpop.f32.mrb[55].mxu1 }
0x1828   : > { %v2126_v44 = vpop.xlane.xlu1 %2125 }
0x1829   : > { %2970 = vrcp.f32 %v2126_v44 }
0x1833   : > { %v2971_v46 = vpop.eup %2970 }
0x1834   : > { %v2128_v47 = vmul.f32 %v2971_v46, %v2969_v39  ;;  %v2613_v39 = vld [vmem:[%s3508_s13 + $0x1] ss:$0 sm:$0xff] }
0x1836   : > { %v2129_v48 = vpack.c.bf16 %v2128_v47, %v2128_v47 }
0x1838   : > { %2866 = vmatmul.mubr.msk.bf16.vlgmr.msra.gmra.mrb[56].mxu1 %vm643_vm2, %v2129_v48 }
0x1839   : > { %2879 = vmatprep.mubr.msk.bf16.mxu1 %vm2987_vm1, %v2986_v8  ;;  %2876 = vmatpush3.bf16.msra.mxu1 %v2926_v6 }
0x183a   : > { %2877 = vmatprep.subr.bf16.mxu1 %v2986_v8 }
0x183d   : > { %2878 = vmatpush3.bf16.msra.mxu1 %v2927_v7 }
0x190b   : > { %v2172_v51 = vpop.f32.mrb[56].mxu1 }
0x190c   : > { %v2178_v53 = vpack.c.bf16 %v2172_v51, %v2172_v51  ;;  %v2867_v18 = vpop.f32.mrb[57].mxu1 }
0x190d   : > { %v2175_v54 = vpop.f32.mrb[58].mxu1 }
0x190e   : > { %v2868_v55 = vpop.f32.mrb[59].mxu1  ;;  %2872 = vmatmul.mubr.msk.bf16.vlgmr.msra.gmra.mrb[48].mxu0 %vm643_vm2, %v2178_v53 }
0x190f   : > { %2891 = vmatprep.mubr.msk.bf16.mxu0 %vm2987_vm1, %v2986_v8  ;;  %2884 = vmatpush3.bf16.msra.mxu0 %v2928_v19  ;;  %v2621_v55 = vld [vmem:[%s3509_s14 + $0x1] ss:$0 sm:$0xff] }
0x1910   : > { %2885 = vmatprep.subr.bf16.mxu0 %v2986_v8 }
0x1913   : > { %2886 = vmatpush3.bf16.msra.mxu0 %v2929_v20 }
0x1914   : > { %2887 = vmatprep.subr.bf16.mxu0 %v2986_v8 }
0x1917   : > { %2888 = vmatpush3.bf16.msra.mxu0 %v2930_v21 }
0x1918   : > { %2889 = vmatprep.subr.bf16.mxu0 %v2986_v8 }
0x191b   : > { %2890 = vmatpush3.bf16.msra.mxu0 %v2931_v22 }
0x19e1   : > { %v2219_v57 = vpop.f32.mrb[48].mxu0 }
0x19e2   : > { %v2225_v58 = vadd.f32 %v2219_v57, %v2065_v41  ;;  %v2873_v59 = vpop.f32.mrb[49].mxu0  ;;  %v2622_v57 = vld [vmem:[%s3510_s15 + $0x1] ss:$0 sm:$0xff] }
0x19e3   : > { %v2222_v60 = vpop.f32.mrb[50].mxu0 }
0x19e4   : > { %v2232_v61 = vadd.f32 %v2590_v56, %v2225_v58  ;;  %v2874_v62 = vpop.f32.mrb[51].mxu0 }
0x19e6   : > { %v2233_v63 = vadd.f32 %v2232_v61, %v3314_v45 }
0x19e8   : > { %v2238_v0 = vsel %vm535_vm0, %v2233_v63, 0.0 }
0x19e9   : > { %2239 = vadd.xlane.f32.xlu1 %v2238_v0 }
0x1a76   : > { %v2240_v1 = vpop.xlane.xlu1 %2239 }
0x1a77   : > { %v2241_v2 = vmul.f32 0.03125, %v2240_v1 }
0x1a79   : > { %v2242_v3 = vsub.f32 %v2233_v63, %v2241_v2 }
0x1a7b   : > { %v2243_v4 = vmul.f32 %v2242_v3, %v2242_v3 }
0x1a7d   : > { %v2244_v5 = vsel %vm535_vm0, %v2243_v4, 0.0 }
0x1a7e   : > { %2245 = vadd.xlane.f32.xlu1 %v2244_v5 }
0x1b0b   : > { %v2246_v45 = vpop.xlane.xlu1 %2245 }
0x1b0c   : > { %v2247_v9 = vmul.f32 0.03125, %v2246_v45 }
0x1b0e   : > { %v2248_v10 = vadd.f32 1e-12, %v2247_v9 }
0x1b10   : > { %2972 = vrsqrt.f32 %v2248_v10 }
0x1b1a   : > { %v2973_v11 = vpop.eup %2972 }
0x1b1b   : > { %v2250_v13 = vmul.f32 %v2973_v11, %v2242_v3 }
0x1b1d   : > { %v2257_v15 = vmul.f32 %v2593_v12, %v2250_v13 }
0x1b1f   : > { %v2264_v16 = vadd.f32 %v2594_v14, %v2257_v15 }
0x1b21   : > { %v2272_v17 = vpack.c.bf16 %v2264_v16, %v2264_v16 }
0x1b23   : > { %2880 = vmatmul.mubr.msk.bf16.vlgmr.msra.gmra.mrb[60].mxu1 %vm535_vm0, %v2272_v17 }
0x1bf6   : > { %v2328_v24 = vpop.f32.mrb[60].mxu1 }
0x1bf7   : > { %v2329_v26 = vadd.f32 %v2600_v23, %v2328_v24  ;;  %v2881_v27 = vpop.f32.mrb[61].mxu1 }
0x1bf8   : > { %v2331_v28 = vpop.f32.mrb[62].mxu1 }
0x1bf9   : > { %v2335_v29 = vmul.f32 0.044715, %v2329_v26  ;;  %v2882_v30 = vpop.f32.mrb[63].mxu1  ;;  %v2334_v35 = vmul.f32 0.5, %v2329_v26 }
0x1bfb   : > { %v2336_v25 = vmul.f32 %v2335_v29, %v2329_v26 }
0x1bfd   : > { %v2337_v31 = vmul.f32 %v2336_v25, %v2329_v26 }
0x1bff   : > { %v2338_v32 = vadd.f32 %v2337_v31, %v2329_v26 }
0x1c01   : > { %v2339_v33 = vmul.f32 0.7978846, %v2338_v32 }
0x1c03   : > { %2974 = vtanh.f32 %v2339_v33 }
0x1c0d   : > { %v2975_v34 = vpop.eup %2974 }
0x1c0e   : > { %v2341_v36 = vadd.f32 1.0, %v2975_v34 }
0x1c10   : > { %v2342_v8 = vmul.f32 %v2341_v36, %v2334_v35 }
0x1c12   : > { %v2354_v37 = vpack.c.bf16 %v2342_v8, %v2342_v8 }
0x1c14   : > { %2892 = vmatmul.mubr.msk.bf16.vlgmr.msra.gmra.mrb[52].mxu0 %vm1438_vm4, %v2354_v37 }
0x1ce7   : > { %v2422_v40 = vpop.f32.mrb[52].mxu0 }
0x1ce8   : > { %v2423_v38 = vadd.f32 %v2613_v39, %v2422_v40  ;;  %v2893_v41 = vpop.f32.mrb[53].mxu0 }
0x1ce9   : > { %v2425_v42 = vpop.f32.mrb[54].mxu0 }
0x1cea   : > { %v2894_v43 = vpop.f32.mrb[55].mxu0  ;;  %v2428_v52 = vadd.f32 %v2423_v38, %v2264_v16 }
0x1cec   : > { %v2433_v44 = vsel %vm535_vm0, %v2428_v52, 0.0 }
0x1ced   : > { %2434 = vadd.xlane.f32.xlu1 %v2433_v44 }
0x1d7a   : > { %v2435_v46 = vpop.xlane.xlu1 %2434 }
0x1d7b   : > { %v2436_v47 = vmul.f32 0.03125, %v2435_v46 }
0x1d7d   : > { %v2437_v48 = vsub.f32 %v2428_v52, %v2436_v47 }
0x1d7f   : > { %v2438_v49 = vmul.f32 %v2437_v48, %v2437_v48 }
0x1d81   : > { %v2439_v50 = vsel %vm535_vm0, %v2438_v49, 0.0 }
0x1d82   : > { %2440 = vadd.xlane.f32.xlu1 %v2439_v50 }
0x1e0f   : > { %v2441_v51 = vpop.xlane.xlu1 %2440 }
0x1e10   : > { %v2442_v53 = vmul.f32 0.03125, %v2441_v51 }
0x1e12   : > { %v2443_v18 = vadd.f32 1e-12, %v2442_v53 }
0x1e14   : > { %2976 = vrsqrt.f32 %v2443_v18 }
0x1e1e   : > { %v2977_v54 = vpop.eup %2976 }
0x1e1f   : > { %v2445_v56 = vmul.f32 %v2977_v54, %v2437_v48 }
0x1e21   : > { %v2452_v58 = vmul.f32 %v2621_v55, %v2445_v56 }
0x1e23   : > { %v2459_v59 = vadd.f32 %v2622_v57, %v2452_v58 }
0x1e25   : > { %2460 = vst.msk [vmem:[%s530_s19] sm:$0xff] %vm535_vm0, %v2459_v59 }
0x1e26 PF: > { %s26_s21 = sadd.s32 1, %s2984_s21  }
0x1e27   : > { %p23_p4 = scmp.ge.s32.totalorder %s26_s21, 4  }
0x1e29   :  { %25 = sbr.rel (!%p23_p4) target bundleno = 2 (0x2), region = 129 }

// kernel: fwd.3
= control target key start
LH: loop header
LB: loop body
LE: loop exit
PB: predicated region body
PF: predicated region fallthrough
CT: control target
= control target key end

     0   :  { %s8984_s0 = inlined_call_operand.vmem [shape: f32[2,7,32], index: 0, kind: input, shape index: {}]   ;;  %s8985_s1 = inlined_call_operand.vmem [shape: f32[2,8,32], index: 1, kind: input, shape index: {}]   ;;  %s8986_s2 = inlined_call_operand.vmem [shape: f32[2,1,8], index: 2, kind: input, shape index: {}]   ;;  %s8987_s3 = inlined_call_operand.vmem [shape: f32[1,32], index: 3, kind: input, shape index: {}]   ;;  %s8988_s4 = inlined_call_operand.vmem [shape: f32[1,32], index: 4, kind: input, shape index: {}]   ;;  %s8989_s5 = inlined_call_operand.vmem [shape: bf16[3,32,96], index: 5, kind: input, shape index: {}]   ;;  %s8990_s6 = inlined_call_operand.vmem [shape: f32[3,1,96], index: 6, kind: input, shape index: {}]   ;;  %s8991_s7 = inlined_call_operand.vmem [shape: bf16[3,32,32], index: 7, kind: input, shape index: {}]   ;;  %s8992_s8 = inlined_call_operand.vmem [shape: f32[3,1,32], index: 8, kind: input, shape index: {}]   ;;  %s8993_s9 = inlined_call_operand.vmem [shape: f32[3,1,32], index: 9, kind: input, shape index: {}]   ;;  %s8994_s10 = inlined_call_operand.vmem [shape: f32[3,1,32], index: 10, kind: input, shape index: {}]   ;;  %s8995_s11 = inlined_call_operand.vmem [shape: bf16[3,32,32], index: 11, kind: input, shape index: {}]   ;;  %s8996_s12 = inlined_call_operand.vmem [shape: f32[3,1,32], index: 12, kind: input, shape index: {}]   ;;  %s8997_s13 = inlined_call_operand.vmem [shape: bf16[3,32,64], index: 13, kind: input, shape index: {}]   ;;  %s8998_s14 = inlined_call_operand.vmem [shape: f32[3,1,64], index: 14, kind: input, shape index: {}]   ;;  %s8999_s15 = inlined_call_operand.vmem [shape: bf16[3,32,32], index: 15, kind: input, shape index: {}]   ;;  %s9000_s16 = inlined_call_operand.vmem [shape: f32[3,1,32], index: 16, kind: input, shape index: {}]   ;;  %s9001_s17 = inlined_call_operand.vmem [shape: f32[3,1,32], index: 17, kind: input, shape index: {}]   ;;  %s9002_s18 = inlined_call_operand.vmem [shape: f32[3,1,32], index: 18, kind: input, shape index: {}]   ;;  %s9003_s19 = inlined_call_operand.vmem [shape: bf16[3,32,128], index: 19, kind: input, shape index: {}]   ;;  %s9004_s20 = inlined_call_operand.vmem [shape: f32[3,1,128], index: 20, kind: input, shape index: {}]   ;;  %s9005_s21 = inlined_call_operand.vmem [shape: bf16[3,128,32], index: 21, kind: input, shape index: {}]   ;;  %s9006_s22 = inlined_call_operand.vmem [shape: f32[3,1,32], index: 22, kind: input, shape index: {}]   ;;  %s9007_s23 = inlined_call_operand.vmem [shape: f32[3,1,32], index: 23, kind: input, shape index: {}]   ;;  %s9008_s24 = inlined_call_operand.vmem [shape: f32[3,1,32], index: 24, kind: input, shape index: {}]   ;;  %s9009_s25 = inlined_call_operand.vmem [shape: bf16[32,128], index: 25, kind: input, shape index: {}]   ;;  %s9010_s26 = inlined_call_operand.vmem [shape: f32[1,128], index: 26, kind: input, shape index: {}]   ;;  %s9011_s27 = inlined_call_operand.vmem [shape: f32[2,7,128], index: 27, kind: output, shape index: {}]  }
   0x1   :  { %9052 = sst [smem:[#allocation4_spill]] %s8984_s0 }
   0x2   :  { %9053 = sst [smem:[#allocation5_spill]] %s8985_s1 }
   0x3   :  { %9054 = sst [smem:[#allocation6_spill]] %s8986_s2 }
   0x4   :  { %9055 = sst [smem:[#allocation7_spill]] %s8987_s3 }
   0x5   :  { %9056 = sst [smem:[#allocation8_spill]] %s8988_s4 }
   0x6   :  { %9057 = sst [smem:[#allocation9_spill]] %s8989_s5 }
   0x7   :  { %9058 = sst [smem:[#allocation10_spill]] %s8990_s6 }
   0x8   :  { %9059 = sst [smem:[#allocation11_spill]] %s8991_s7  ;;  %s7842_s7 = smov 0  }
   0x9   :  { %9060 = sst [smem:[#allocation12_spill]] %s8992_s8 }
   0xa   :  { %9061 = sst [smem:[#allocation13_spill]] %s8993_s9 }
   0xb   :  { %9062 = sst [smem:[#allocation14_spill]] %s8994_s10 }
   0xc   :  { %9063 = sst [smem:[#allocation15_spill]] %s8995_s11 }
   0xd   :  { %9064 = sst [smem:[#allocation16_spill]] %s8996_s12 }
   0xe   :  { %9065 = sst [smem:[#allocation17_spill]] %s8998_s14 }
   0xf   :  { %9066 = sst [smem:[#allocation18_spill]] %s8999_s15 }
  0x10   :  { %9067 = sst [smem:[#allocation19_spill]] %s9000_s16 }
  0x11   :  { %9068 = sst [smem:[#allocation20_spill]] %s9009_s25 }
  0x12   :  { %9069 = sst [smem:[#allocation21_spill]] %s9010_s26 }
  0x13   :  { %9070 = sst [smem:[#allocation22_spill]] %s9011_s27 }
  0x14 LB: > { %9071 = sst [smem:[#allocation2_spill]] %s7685_s7  ;;  %s6390_s4 = sadd.s32 4294967295, %s7685_s7   ;;  %s7685_s7 = sphi %s7842_s7, %s37_s7  }
  0x15   : > { %p6394_p0 = scmp.ge.s32.totalorder %s7685_s7, 1  ;;  %p753_p1 = scmp.lt.s32.totalorder %s7685_s7, 3 }
  0x17   : > { %p754_p2 = pnand %p6394_p0, %p753_p1 }
  0x19   : > { %757 = sbr.rel (%p754_p2) target bundleno = 21357 (0x536d), region = 128 }
  0x20   : > { %p830_p3 = scmp.lt.s32.totalorder %s6390_s4, 1  ;;  %v879_v0 = vlaneseq  ;;  %vm849_vm0 = vcmask 260096   ;;  %s9073_s5 = sld [smem:[#allocation6_spill]]  ;;  %v7687_v15 = vmov 0.0   ;;  %vm7688_vm1 = vmmov 0  }
  0x21   : > { %s9074_s29 = sld [smem:[#allocation4_spill]]  ;;  %s9075_s2 = sld [smem:[#allocation9_spill]]  ;;  %6894 = vmatprep.subr.bf16.mxu1 %v7687_v15  ;;  %6898 = vmatprep.mubr.msk.bf16.mxu1 %vm7688_vm1, %v7687_v15  ;;  %vm912_vm2 = vcmask 261120   ;;  %vm965_vm3 = vcmask 64512   ;;  %v7692_v40 = vmov -1e+09  }
  0x22   : > { %s9119_s4 = smov (!%p830_p3, %s6390_s4), 1  ;;  %v7856_v1 = vshrl.u32 %v879_v0, 7  ;;  %6908 = vmatprep.subr.bf16.mxu0 %v7687_v15  ;;  %6910 = vmatprep.mubr.msk.bf16.mxu0 %vm7688_vm1, %v7687_v15  ;;  %s9077_s10 = sld [smem:[#allocation8_spill]]  ;;  %v882_v39 = vand.u32 127, %v879_v0  ;;  %vm1014_vm5 = vcmask 55296   ;;  %vm1033_vm6 = vcmask 1042432  }
  0x23   : > { %s7850_s8 = sshll.u32 %s9119_s4, 3  ;;  %s9078_s6 = sld [smem:[#allocation10_spill]]  ;;  %vm1034_vm7 = vcmask 1043456   ;;  %vm1029_vm8 = vcmask 56320   ;;  %vm1838_vm9 = vcmask 63488  }
  0x24   : > { %9072 = sst [smem:[#allocation3_spill]] %s7850_s8  ;;  %v1834_v5 = vsub.s32 0, %v7856_v1  ;;  %s9039_s11 = smov 120   ;;  %vm883_vm4 = vcmp.ge.s32.totalorder %v7856_v1, %v882_v39 }
  0x25   : > { %s9037_s3 = smov 96   ;;  %v7918_v41 = vsel %vm883_vm4, 0.0, %v7692_v40  ;;  %s9019_s30 = smov 56  }
  0x26   : > { %s840_s28 = scalar_lea.vmem %s9073_s5, %s9119_s4  ;;  %s9076_s5 = sld [smem:[#allocation7_spill]] }
  0x27   : > { %s833_s1 = scalar_lea.vmem %s9074_s29, %s7850_s8  ;;  %v885_v2 = vld [vmem:[%s840_s28] sm:$0x1]  ;;  %v7514_v16 = vld [vmem:[%s9075_s2 + $0x8] sm:$0xff]   ;;  %s9033_s4 = smov 88  }
  0x28   : > { %v846_v3 = vld [vmem:[%s833_s1] sm:$0x7f]  ;;  %v6400_v4 = vadd.f32 -1.0, %v885_v2  ;;  %s9025_s9 = smov 64   ;;  %s9035_s28 = smov 112  }
  0x29   : > { %v850_v6 = vsel %vm849_vm0, %v846_v3, 0.0  ;;  %v7513_v14 = vld [vmem:[%s9075_s2] sm:$0xff]   ;;  %s9079_s29 = sld [smem:[#allocation11_spill]]  ;;  %s9029_s0 = smov 104  }
  0x2a   : > { %v887_v7 = vmul.f32 1e+09, %v6400_v4  ;;  %851 = vadd.xlane.f32.xlu0 %v850_v6  ;;  %6895 = vmatpush3.bf16.msra.mxu1 %v7513_v14  ;;  %v6399_v23 = vld [vmem:[%s9077_s10] ss:$0 sm:$0xff]  ;;  %v7697_v4 = vmov 65535   ;;  %s9027_s10 = smov 72  }
  0x2b   : > { %6896 = vmatprep.subr.bf16.mxu1 %v7687_v15  ;;  %v6401_v27 = vld [vmem:[%s9078_s6] ss:$0 sm:$0xff]  ;;  %s9085_s14 = sld [smem:[#allocation17_spill]]  ;;  %s9087_s12 = sld [smem:[#allocation16_spill]] }
  0x2c   : > { %v7864_v8 = vrot.slane %v887_v7, %v1834_v5  ;;  %v6398_v21 = vld [vmem:[%s9076_s5] ss:$0 sm:$0xff]  ;;  %s9031_s5 = smov 80   ;;  %v1035_v5 = vsel %vm1033_vm6, 4294967295, %v7697_v4  ;;  %s9091_s15 = sld [smem:[#allocation18_spill]] }
  0x2d   : > { %v7935_v7 = vsel %vm1034_vm7, %v1035_v5, 0  ;;  %s9092_s27 = smov 80   ;;  %s9093_s7 = smov 104  }
  0x2e   : > { %6897 = vmatpush3.bf16.msra.mxu1 %v7514_v16  ;;  %s9095_s16 = sld [smem:[#allocation19_spill]]  ;;  %s9099_s26 = smov 40  }
  0x2f   : > { %6902 = vmatprep.subr.bf16.mxu1 %v7687_v15  ;;  %v958_v5 = vld [vmem:[%s9079_s29 + $0x8] sm:$0xf]  ;;  %s9102_s25 = sld [smem:[#allocation18_spill]] }
  0xb7   : > { %v852_v9 = vpop.xlane.xlu0 %851 }
  0xb8   : > { %v854_v10 = vmul.f32 0.03125, %v852_v9 }
  0xba   : > { %v855_v11 = vsub.f32 %v846_v3, %v854_v10 }
  0xbc   : > { %v856_v12 = vmul.f32 %v855_v11, %v855_v11 }
  0xbe   : > { %v857_v13 = vsel %vm849_vm0, %v856_v12, 0.0 }
  0xbf   : > { %858 = vadd.xlane.f32.xlu0 %v857_v13 }
 0x14c   : > { %v859_v17 = vpop.xlane.xlu0 %858 }
 0x14d   : > { %v860_v18 = vmul.f32 0.03125, %v859_v17 }
 0x14f   : > { %v861_v19 = vadd.f32 1e-12, %v860_v18 }
 0x151   : > { %7563 = vrsqrt.f32 %v861_v19  ;;  %v956_v19 = vld [vmem:[%s9079_s29] sm:$0xf] }
 0x15b   : > { %v7564_v20 = vpop.eup %7563 }
 0x15c   : > { %v863_v22 = vmul.f32 %v7564_v20, %v855_v11  ;;  %v1244_v20 = vsel %vm1034_vm7, %v956_v19, 0 }
 0x15e   : > { %v870_v24 = vmul.f32 %v6398_v21, %v863_v22  ;;  %v957_v21 = vld [vmem:[%s9079_s29 + $0x4] sm:$0xf] }
 0x15f   : > { %v1198_v22 = vsel %vm1034_vm7, %v957_v21, 0 }
 0x160   : > { %v7887_v25 = vadd.f32 %v6399_v23, %v870_v24 }
 0x162   : > { %v893_v26 = vpack.c.bf16 %v7887_v25, %v7887_v25 }
 0x164   : > { %6899 = vmatmul.mubr.msk.bf16.vlgmr.msra.gmra.mrb[0].mxu1 %vm912_vm2, %v893_v26 }
 0x165   : > { %6904 = vmatprep.mubr.msk.bf16.mxu1 %vm7688_vm1, %v7687_v15 }
 0x237   : > { %v950_v28 = vpop.f32.mrb[0].mxu1 }
 0x238   : > { %v951_v29 = vadd.f32 %v6401_v27, %v950_v28  ;;  %v6900_v30 = vpop.f32.mrb[1].mxu1 }
 0x239   : > { %v953_v31 = vpop.f32.mrb[2].mxu1 }
 0x23a   : > { %v7897_v32 = vpack.c.bf16 %v951_v29, %v951_v29  ;;  %v6901_v33 = vpop.f32.mrb[3].mxu1 }
 0x23c   : > { %1081 = vrot.lane.b32.xlu0 %v7897_v32, %s9039_s11  ;;  %963 = vrot.lane.b32.xlu1 %v7897_v32, %s9037_s3  ;;  %s9084_s11 = sld [smem:[#allocation14_spill]]  ;;  %s9086_s3 = smov 120  }
 0x240   : > { %1083 = vrot.lane.b32.xlu1 %v7897_v32, %s9033_s4 }
 0x2ae   : > { %v964_v34 = vpop.permute.xlu1 %963  ;;  %v1082_v38 = vpop.permute.xlu0 %1081 }
 0x2af   : > { %v970_v35 = vsel %vm965_vm3, %v964_v34, 0 }
 0x2b0   : > { %6903 = vmatpush3.bf16.xpose.msra.mxu1 %v970_v35 }
 0x2b1   : > { %6914 = vmatprep.subr.bf16.mxu1 %v7687_v15 }
 0x2b2   : > { %v1084_v36 = vpop.permute.xlu1 %1083 }
 0x2b3   : > { %v1089_v37 = vsel %vm965_vm3, %v1084_v36, 0 }
 0x2b7   : > { %6905 = vmatmul.mubr.msk.bf16.vlgmr.msra.gmra.mrb[4].mxu1 %vm965_vm3, %v7897_v32 }
 0x2b8   : > { %6915 = vmatpush3.bf16.xpose.msra.mxu1 %v1089_v37  ;;  %6916 = vmatprep.mubr.msk.bf16.mxu1 %vm7688_vm1, %v7687_v15 }
 0x2b9   : > { %6926 = vmatprep.subr.bf16.mxu1 %v7687_v15 }
 0x2bf   : > { %6917 = vmatmul.mubr.msk.bf16.vlgmr.msra.gmra.mrb[8].mxu1 %vm965_vm3, %v1082_v38 }
 0x2c0   : > { %6928 = vmatprep.mubr.msk.bf16.mxu1 %vm7688_vm1, %v7687_v15  ;;  %6927 = vmatpush3.bf16.msra.mxu1 %v1198_v22 }
 0x2c1   : > { %6938 = vmatprep.subr.bf16.mxu1 %v7687_v15 }
 0x38a   : > { %v1006_v42 = vpop.f32.mrb[4].mxu1 }
 0x38b   : > { %v1012_v43 = vmul.f32 0.35355338, %v1006_v42  ;;  %v6906_v44 = vpop.f32.mrb[5].mxu1 }
 0x38c   : > { %v1009_v45 = vpop.f32.mrb[6].mxu1 }
 0x38d   : > { %v6907_v46 = vpop.f32.mrb[7].mxu1  ;;  %v1013_v47 = vadd.f32 %v1012_v43, %v7918_v41 }
 0x38f   : > { %v1015_v48 = vsel %vm1014_vm5, %v1013_v47, -inf }
 0x390   : > { %1016 = vmax.xlane.f32.xlu1 %v1015_v48 }
 0x392   : > { %v1125_v49 = vpop.f32.mrb[8].mxu1 }
 0x393   : > { %v1131_v50 = vmul.f32 0.35355338, %v1125_v49  ;;  %v6918_v51 = vpop.f32.mrb[9].mxu1 }
 0x394   : > { %v1128_v52 = vpop.f32.mrb[10].mxu1 }
 0x395   : > { %v6919_v53 = vpop.f32.mrb[11].mxu1  ;;  %v1132_v54 = vadd.f32 %v1131_v50, %v7918_v41 }
 0x397   : > { %v1133_v55 = vsel %vm1014_vm5, %v1132_v54, -inf }
 0x398   : > { %1134 = vmax.xlane.f32.xlu0 %v1133_v55 }
 0x3ae   : > { %1145 = vrot.lane.b32.xlu0 %v7897_v32, %s9019_s30  ;;  %s9021_s30 = smov 48  }
 0x41d   : > { %v1017_v56 = vpop.xlane.xlu1 %1016 }
 0x41e   : > { %v1018_v57 = vsub.f32 %v1013_v47, %v1017_v56 }
 0x420   : > { %v1019_v58 = vmul.f32 1.442695, %v1018_v57 }
 0x422   : > { %7565 = vpow2.f32 %v1019_v58 }
 0x425   : > { %v1135_v59 = vpop.xlane.xlu0 %1134 }
 0x426   : > { %v1136_v60 = vsub.f32 %v1132_v54, %v1135_v59 }
 0x428   : > { %v1137_v61 = vmul.f32 1.442695, %v1136_v60 }
 0x429   : > { %v1146_v12 = vpop.permute.xlu0 %1145 }
 0x42a   : > { %7567 = vpow2.f32 %v1137_v61  ;;  %v1151_v14 = vand.u32 %v1146_v12, %v7935_v7 }
 0x42c   : > { %v7566_v62 = vpop.eup %7565 }
 0x42d   : > { %v1021_v63 = vsel %vm1014_vm5, %v7566_v62, 0.0 }
 0x42e   : > { %1022 = vadd.xlane.f32.xlu1 %v1021_v63 }
 0x434   : > { %v7568_v0 = vpop.eup %7567 }
 0x435   : > { %v1139_v1 = vsel %vm1014_vm5, %v7568_v0, 0.0 }
 0x436   : > { %1140 = vadd.xlane.f32.xlu1 %v1139_v1 }
 0x447   : > { %1027 = vrot.lane.b32.xlu1 %v7897_v32, %s9025_s9  ;;  %s9082_s9 = sld [smem:[#allocation15_spill]] }
 0x44b   : > { %1288 = vrot.lane.b32.xlu1 %v7897_v32, %s9031_s5  ;;  %s9088_s5 = smov 96  }
 0x44f   : > { %1286 = vrot.lane.b32.xlu1 %v7897_v32, %s9035_s28  ;;  %s9094_s28 = smov 72  }
 0x4bb   : > { %v1023_v2 = vpop.xlane.xlu1 %1022 }
 0x4bc   : > { %7569 = vrcp.f32 %v1023_v2 }
 0x4c3   : > { %v1141_v3 = vpop.xlane.xlu1 %1140 }
 0x4c4   : > { %7571 = vrcp.f32 %v1141_v3 }
 0x4c6   : > { %v7570_v6 = vpop.eup %7569 }
 0x4c7   : > { %v1028_v9 = vpop.permute.xlu1 %1027  ;;  %v1025_v10 = vmul.f32 %v7570_v6, %v7566_v62  ;;  %v1403_v6 = vsel %vm1034_vm7, %v958_v5, 0 }
 0x4c8   : > { %v1038_v11 = vand.u32 %v7935_v7, %v1028_v9 }
 0x4c9   : > { %v1026_v13 = vpack.c.bf16 %v1025_v10, %v1025_v10 }
 0x4ca   : > { %6909 = vmatpush3.bf16.msra.mxu0 %v1038_v11 }
 0x4cb   : > { %6920 = vmatprep.subr.bf16.mxu0 %v7687_v15  ;;  %v1289_v29 = vpop.permute.xlu1 %1288 }
 0x4cc   : > { %v1294_v35 = vsel %vm965_vm3, %v1289_v29, 0 }
 0x4cd   : > { %6911 = vmatmul.mubr.msk.bf16.vlgmr.msra.gmra.mrb[0].mxu0 %vm1029_vm8, %v1026_v13 }
 0x4ce   : > { %v7572_v16 = vpop.eup %7571  ;;  %6921 = vmatpush3.bf16.msra.mxu0 %v1151_v14  ;;  %6922 = vmatprep.mubr.msk.bf16.mxu0 %vm7688_vm1, %v7687_v15 }
 0x4cf   : > { %v1143_v17 = vmul.f32 %v7572_v16, %v7568_v0  ;;  %6932 = vmatprep.subr.bf16.mxu0 %v7687_v15  ;;  %v1287_v37 = vpop.permute.xlu1 %1286 }
 0x4d1   : > { %v1144_v18 = vpack.c.bf16 %v1143_v17, %v1143_v17 }
 0x4d5   : > { %6923 = vmatmul.mubr.msk.bf16.vlgmr.msra.gmra.mrb[4].mxu0 %vm1029_vm8, %v1144_v18 }
 0x4d6   : > { %6934 = vmatprep.mubr.msk.bf16.mxu0 %vm7688_vm1, %v7687_v15  ;;  %6933 = vmatpush3.bf16.msra.mxu0 %v1244_v20 }
 0x4d7   : > { %6944 = vmatprep.subr.bf16.mxu0 %v7687_v15 }
 0x5a0   : > { %v1074_v23 = vpop.f32.mrb[0].mxu0 }
 0x5a1   : > { %v1080_v24 = vpack.c.bf16 %v1074_v23, %v1074_v23  ;;  %v6912_v26 = vpop.f32.mrb[1].mxu0 }
 0x5a2   : > { %v1077_v27 = vpop.f32.mrb[2].mxu0 }
 0x5a3   : > { %v6913_v28 = vpop.f32.mrb[3].mxu0  ;;  %6935 = vmatmul.mubr.msk.bf16.vlgmr.msra.gmra.mrb[8].mxu0 %vm965_vm3, %v1080_v24 }
 0x5a4   : > { %6946 = vmatprep.mubr.msk.bf16.mxu0 %vm7688_vm1, %v7687_v15 }
 0x5a8   : > { %v1187_v30 = vpop.f32.mrb[4].mxu0 }
 0x5a9   : > { %v1193_v31 = vpack.c.bf16 %v1187_v30, %v1187_v30  ;;  %v6924_v33 = vpop.f32.mrb[5].mxu0 }
 0x5aa   : > { %v1190_v34 = vpop.f32.mrb[6].mxu0 }
 0x5ab   : > { %v6925_v36 = vpop.f32.mrb[7].mxu0  ;;  %6929 = vmatmul.mubr.msk.bf16.vlgmr.msra.gmra.mrb[12].mxu1 %vm965_vm3, %v1193_v31 }
 0x5ac   : > { %6939 = vmatpush3.bf16.xpose.msra.mxu1 %v1294_v35  ;;  %6940 = vmatprep.mubr.msk.bf16.mxu1 %vm7688_vm1, %v7687_v15 }
 0x5ad   : > { %6950 = vmatprep.subr.bf16.mxu1 %v7687_v15 }
 0x5b3   : > { %6941 = vmatmul.mubr.msk.bf16.vlgmr.msra.gmra.mrb[16].mxu1 %vm965_vm3, %v1287_v37 }
 0x5b4   : > { %6952 = vmatprep.mubr.msk.bf16.mxu1 %vm7688_vm1, %v7687_v15  ;;  %6951 = vmatpush3.bf16.msra.mxu1 %v1403_v6 }
 0x5b5   : > { %6962 = vmatprep.subr.bf16.mxu1 %v7687_v15 }
 0x676   : > { %v1280_v38 = vpop.f32.mrb[8].mxu0 }
 0x677   : > { %v6936_v39 = vpop.f32.mrb[9].mxu0 }
 0x678   : > { %v1283_v40 = vpop.f32.mrb[10].mxu0 }
 0x679   : > { %v6937_v42 = vpop.f32.mrb[11].mxu0 }
 0x67e   : > { %v1234_v43 = vpop.f32.mrb[12].mxu1 }
 0x67f   : > { %v7968_v44 = vadd.f32 %v1280_v38, %v1234_v43  ;;  %v6930_v45 = vpop.f32.mrb[13].mxu1 }
 0x680   : > { %v1237_v46 = vpop.f32.mrb[14].mxu1 }
 0x681   : > { %v6931_v47 = vpop.f32.mrb[15].mxu1 }
 0x686   : > { %v1330_v48 = vpop.f32.mrb[16].mxu1 }
 0x687   : > { %v1336_v49 = vmul.f32 0.35355338, %v1330_v48  ;;  %v6942_v50 = vpop.f32.mrb[17].mxu1 }
 0x688   : > { %v1333_v51 = vpop.f32.mrb[18].mxu1 }
 0x689   : > { %v6943_v52 = vpop.f32.mrb[19].mxu1  ;;  %v1337_v53 = vadd.f32 %v1336_v49, %v7918_v41 }
 0x68b   : > { %v1338_v54 = vsel %vm1014_vm5, %v1337_v53, -inf }
 0x68c   : > { %1339 = vmax.xlane.f32.xlu1 %v1338_v54 }
 0x69d   : > { %1350 = vrot.lane.b32.xlu1 %v7897_v32, %s9021_s30  ;;  %s9023_s30 = smov 40  }
 0x6a1   : > { %1446 = vrot.lane.b32.xlu1 %v7897_v32, %s9029_s0  ;;  %s9080_s0 = sld [smem:[#allocation12_spill]] }
 0x6a7   : > { %v6417_v47 = vld [vmem:[%s9080_s0] ss:$0 sm:$0xff] }
 0x719   : > { %v1340_v55 = vpop.xlane.xlu1 %1339 }
 0x71a   : > { %v1341_v56 = vsub.f32 %v1337_v53, %v1340_v55 }
 0x71c   : > { %v1342_v57 = vmul.f32 1.442695, %v1341_v56 }
 0x71d   : > { %v1351_v58 = vpop.permute.xlu1 %1350 }
 0x71e   : > { %7573 = vpow2.f32 %v1342_v57  ;;  %v1356_v59 = vand.u32 %v1351_v58, %v7935_v7 }
 0x720   : > { %6945 = vmatpush3.bf16.msra.mxu0 %v1356_v59 }
 0x721   : > { %6956 = vmatprep.subr.bf16.mxu0 %v7687_v15  ;;  %v1447_v4 = vpop.permute.xlu1 %1446 }
 0x728   : > { %v7574_v60 = vpop.eup %7573 }
 0x729   : > { %v1344_v61 = vsel %vm1014_vm5, %v7574_v60, 0.0 }
 0x72a   : > { %1345 = vadd.xlane.f32.xlu0 %v1344_v61  ;;  %v7515_v61 = vld [vmem:[%s8997_s13] sm:$0xff]  }
 0x740   : > { %1448 = vrot.lane.b32.xlu0 %v7897_v32, %s9027_s10  ;;  %s9089_s10 = smov 112  }
 0x7b7   : > { %v1346_v62 = vpop.xlane.xlu0 %1345 }
 0x7b8   : > { %7575 = vrcp.f32 %v1346_v62 }
 0x7bb   : > { %v1449_v1 = vpop.permute.xlu0 %1448 }
 0x7bc   : > { %v1454_v3 = vsel %vm965_vm3, %v1449_v1, 0  ;;  %v7518_v1 = vld [vmem:[%s9082_s9 + $0x8] sm:$0xff]  }
 0x7c2   : > { %v7576_v63 = vpop.eup %7575 }
 0x7c3   : > { %v1348_v0 = vmul.f32 %v7576_v63, %v7574_v60 }
 0x7c5   : > { %v1349_v2 = vpack.c.bf16 %v1348_v0, %v1348_v0  ;;  %v7517_v0 = vld [vmem:[%s9082_s9] sm:$0xff]  }
 0x7c7   : > { %6947 = vmatmul.mubr.msk.bf16.vlgmr.msra.gmra.mrb[12].mxu0 %vm1029_vm8, %v1349_v2 }
 0x7c8   : > { %6957 = vmatpush3.bf16.xpose.msra.mxu0 %v1454_v3  ;;  %6958 = vmatprep.mubr.msk.bf16.mxu0 %vm7688_vm1, %v7687_v15 }
 0x7c9   : > { %6968 = vmatprep.subr.bf16.mxu0 %v7687_v15 }
 0x7cf   : > { %6959 = vmatmul.mubr.msk.bf16.vlgmr.msra.gmra.mrb[16].mxu0 %vm965_vm3, %v1447_v4 }
 0x7d0   : > { %6970 = vmatprep.mubr.msk.bf16.mxu0 %vm7688_vm1, %v7687_v15 }
 0x89a   : > { %v1392_v9 = vpop.f32.mrb[12].mxu0 }
 0x89b   : > { %v1398_v10 = vpack.c.bf16 %v1392_v9, %v1392_v9  ;;  %v6948_v11 = vpop.f32.mrb[13].mxu0 }
 0x89c   : > { %v1395_v12 = vpop.f32.mrb[14].mxu0 }
 0x89d   : > { %v6949_v13 = vpop.f32.mrb[15].mxu0  ;;  %6953 = vmatmul.mubr.msk.bf16.vlgmr.msra.gmra.mrb[20].mxu1 %vm965_vm3, %v1398_v10  ;;  %v6419_v10 = vld [vmem:[%s9084_s11] ss:$0 sm:$0xff] }
 0x89e   : > { %6964 = vmatprep.mubr.msk.bf16.mxu1 %vm7688_vm1, %v7687_v15 }
 0x8a2   : > { %v1490_v14 = vpop.f32.mrb[16].mxu0 }
 0x8a3   : > { %v1496_v16 = vmul.f32 0.35355338, %v1490_v14  ;;  %v6960_v17 = vpop.f32.mrb[17].mxu0  ;;  %v6424_v14 = vld [vmem:[%s9085_s14] ss:$0 sm:$0xff]  ;;  %s9096_s14 = smov 64  }
 0x8a4   : > { %v1493_v18 = vpop.f32.mrb[18].mxu0 }
 0x8a5   : > { %v6961_v19 = vpop.f32.mrb[19].mxu0  ;;  %v1497_v20 = vadd.f32 %v1496_v16, %v7918_v41 }
 0x8a7   : > { %v1498_v21 = vsel %vm1014_vm5, %v1497_v20, -inf }
 0x8a8   : > { %1499 = vmax.xlane.f32.xlu1 %v1498_v21 }
 0x935   : > { %v1500_v22 = vpop.xlane.xlu1 %1499 }
 0x936   : > { %v1501_v23 = vsub.f32 %v1497_v20, %v1500_v22 }
 0x938   : > { %v1502_v24 = vmul.f32 1.442695, %v1501_v23  ;;  %v6420_v23 = vld [vmem:[%s9087_s12] ss:$0 sm:$0xff]  ;;  %s9100_s12 = sld [smem:[#allocation17_spill]] }
 0x93a   : > { %7577 = vpow2.f32 %v1502_v24 }
 0x944   : > { %v7578_v26 = vpop.eup %7577 }
 0x945   : > { %v1504_v27 = vsel %vm1014_vm5, %v7578_v26, 0.0 }
 0x946   : > { %1505 = vadd.xlane.f32.xlu0 %v1504_v27 }
 0x95c   : > { %1510 = vrot.lane.b32.xlu0 %v7897_v32, %s9023_s30  ;;  %v959_v32 = vld [vmem:[%s9079_s29 + $0xc] sm:$0xf]  ;;  %s9081_s30 = sld [smem:[#allocation5_spill]] }
 0x95d   : > { %v1563_v40 = vsel %vm1034_vm7, %v959_v32, 0 }
 0x95e   : > { %6969 = vmatpush3.bf16.msra.mxu0 %v1563_v40 }
 0x95f   : > { %6982 = vmatprep.subr.bf16.mxu0 %v7687_v15 }
 0x962   : > { %s837_s1 = scalar_lea.vmem %s9081_s30, %s7850_s8  ;;  %s9090_s30 = smov 88  }
 0x963   : > { %v878_v62 = vld [vmem:[%s837_s1] sm:$0xff]  ;;  %s9083_s1 = sld [smem:[#allocation13_spill]] }
 0x964   : > { %v8033_v63 = vpack.c.bf16 %v878_v62, %v878_v62 }
 0x969   : > { %v6418_v6 = vld [vmem:[%s9083_s1] ss:$0 sm:$0xff] }
 0x970   : > { %v1439_v28 = vpop.f32.mrb[20].mxu1 }
 0x971   : > { %v1445_v29 = vadd.f32 %v1439_v28, %v7968_v44  ;;  %v6954_v30 = vpop.f32.mrb[21].mxu1 }
 0x972   : > { %v1442_v31 = vpop.f32.mrb[22].mxu1 }
 0x973   : > { %v6955_v33 = vpop.f32.mrb[23].mxu1 }
 0x9d3   : > { %v1506_v34 = vpop.xlane.xlu0 %1505 }
 0x9d4   : > { %7579 = vrcp.f32 %v1506_v34 }
 0x9d7   : > { %v1511_v35 = vpop.permute.xlu0 %1510 }
 0x9d8   : > { %v1516_v36 = vand.u32 %v1511_v35, %v7935_v7 }
 0x9da   : > { %6963 = vmatpush3.bf16.msra.mxu1 %v1516_v36 }
 0x9db   : > { %6974 = vmatprep.subr.bf16.mxu1 %v7687_v15 }
 0x9de   : > { %v7580_v37 = vpop.eup %7579 }
 0x9df   : > { %v1508_v38 = vmul.f32 %v7580_v37, %v7578_v26 }
 0x9e1   : > { %v1509_v39 = vpack.c.bf16 %v1508_v38, %v1508_v38 }
 0x9e3   : > { %6965 = vmatmul.mubr.msk.bf16.vlgmr.msra.gmra.mrb[24].mxu1 %vm1029_vm8, %v1509_v39 }
 0x9e4   : > { %6978 = vmatprep.mubr.msk.bf16.mxu1 %vm7688_vm1, %v7687_v15  ;;  %6975 = vmatpush3.bf16.msra.mxu1 %v7517_v0 }
 0x9e5   : > { %6976 = vmatprep.subr.bf16.mxu1 %v7687_v15 }
 0x9e8   : > { %6977 = vmatpush3.bf16.msra.mxu1 %v7518_v1  ;;  %v1778_v1 = vld [vmem:[%s9091_s15 + $0x4] sm:$0xf] }
 0x9e9   : > { %6990 = vmatprep.subr.bf16.mxu1 %v7687_v15 }
 0xab6   : > { %v1552_v42 = vpop.f32.mrb[24].mxu1 }
 0xab7   : > { %v1558_v43 = vpack.c.bf16 %v1552_v42, %v1552_v42  ;;  %v6966_v44 = vpop.f32.mrb[25].mxu1 }
 0xab8   : > { %v1555_v45 = vpop.f32.mrb[26].mxu1 }
 0xab9   : > { %v6967_v46 = vpop.f32.mrb[27].mxu1  ;;  %6971 = vmatmul.mubr.msk.bf16.vlgmr.msra.gmra.mrb[20].mxu0 %vm965_vm3, %v1558_v43 }
 0xaba   : > { %6986 = vmatprep.mubr.msk.bf16.mxu0 %vm7688_vm1, %v7687_v15  ;;  %6983 = vmatpush3.bf16.msra.mxu0 %v7515_v61 }
 0xabb   : > { %6984 = vmatprep.subr.bf16.mxu0 %v7687_v15 }
 0xb8c   : > { %v1599_v48 = vpop.f32.mrb[20].mxu0 }
 0xb8d   : > { %v1605_v49 = vadd.f32 %v1599_v48, %v1445_v29  ;;  %v6972_v50 = vpop.f32.mrb[21].mxu0 }
 0xb8e   : > { %v1602_v51 = vpop.f32.mrb[22].mxu0 }
 0xb8f   : > { %v1612_v52 = vadd.f32 %v6417_v47, %v1605_v49  ;;  %v6973_v53 = vpop.f32.mrb[23].mxu0 }
 0xb91   : > { %v1613_v54 = vadd.f32 %v1612_v52, %v7887_v25  ;;  %v7516_v25 = vld [vmem:[%s8997_s13 + $0x8] sm:$0xff]  }
 0xb92   : > { %6985 = vmatpush3.bf16.msra.mxu0 %v7516_v25 }
 0xb93   : > { %v1616_v55 = vsel %vm849_vm0, %v1613_v54, 0.0  ;;  %6996 = vmatprep.subr.bf16.mxu0 %v7687_v15 }
 0xb94   : > { %1617 = vadd.xlane.f32.xlu1 %v1616_v55 }
 0xb95   : > { %6987 = vmatmul.mubr.msk.bf16.vlgmr.msra.gmra.mrb[24].mxu0 %vm912_vm2, %v8033_v63 }
 0xb96   : > { %6998 = vmatprep.mubr.msk.bf16.mxu0 %vm7688_vm1, %v7687_v15 }
 0xc21   : > { %v1618_v56 = vpop.xlane.xlu1 %1617 }
 0xc22   : > { %v1619_v57 = vmul.f32 0.03125, %v1618_v56 }
 0xc24   : > { %v1620_v58 = vsub.f32 %v1613_v54, %v1619_v57 }
 0xc26   : > { %v1621_v59 = vmul.f32 %v1620_v58, %v1620_v58 }
 0xc28   : > { %v1622_v60 = vsel %vm849_vm0, %v1621_v59, 0.0 }
 0xc29   : > { %1623 = vadd.xlane.f32.xlu1 %v1622_v60 }
 0xc68   : > { %v1771_v16 = vpop.f32.mrb[24].mxu0 }
 0xc69   : > { %v1772_v17 = vadd.f32 %v6424_v14, %v1771_v16  ;;  %v6988_v18 = vpop.f32.mrb[25].mxu0 }
 0xc6a   : > { %v1774_v19 = vpop.f32.mrb[26].mxu0 }
 0xc6b   : > { %v8064_v20 = vpack.c.bf16 %v1772_v17, %v1772_v17  ;;  %v6989_v21 = vpop.f32.mrb[27].mxu0 }
 0xc6d   : > { %1904 = vrot.lane.b32.xlu1 %v8064_v20, %s9086_s3  ;;  %v1788_v22 = vsel %vm965_vm3, %v8064_v20, 0 }
 0xcb6   : > { %v1624_v2 = vpop.xlane.xlu1 %1623 }
 0xcb7   : > { %v1625_v3 = vmul.f32 0.03125, %v1624_v2  ;;  %v2019_v2 = vsel %vm1034_vm7, %v1778_v1, 0 }
 0xcb9   : > { %v1626_v4 = vadd.f32 1e-12, %v1625_v3 }
 0xcbb   : > { %7581 = vrsqrt.f32 %v1626_v4 }
 0xcc5   : > { %v7582_v5 = vpop.eup %7581 }
 0xcc6   : > { %v1628_v9 = vmul.f32 %v7582_v5, %v1620_v58 }
 0xcc8   : > { %v1635_v11 = vmul.f32 %v6418_v6, %v1628_v9  ;;  %v1777_v9 = vld [vmem:[%s9091_s15] sm:$0xf] }
 0xcca   : > { %v8054_v12 = vadd.f32 %v6419_v10, %v1635_v11 }
 0xccc   : > { %v1648_v13 = vpack.c.bf16 %v8054_v12, %v8054_v12 }
 0xcce   : > { %6979 = vmatmul.mubr.msk.bf16.vlgmr.msra.gmra.mrb[28].mxu1 %vm912_vm2, %v1648_v13  ;;  %v2065_v13 = vsel %vm1034_vm7, %v1777_v9, 0 }
 0xccf   : > { %6992 = vmatprep.mubr.msk.bf16.mxu1 %vm7688_vm1, %v7687_v15  ;;  %6991 = vmatpush3.bf16.xpose.msra.mxu1 %v1788_v22 }
 0xcd0   : > { %7002 = vmatprep.subr.bf16.mxu1 %v7687_v15 }
 0xcdf   : > { %v1905_v26 = vpop.permute.xlu1 %1904 }
 0xce0   : > { %v1910_v33 = vsel %vm965_vm3, %v1905_v26, 0 }
 0xda1   : > { %v1704_v24 = vpop.f32.mrb[28].mxu1 }
 0xda2   : > { %v1705_v27 = vadd.f32 %v6420_v23, %v1704_v24  ;;  %v6980_v28 = vpop.f32.mrb[29].mxu1 }
 0xda3   : > { %v1707_v29 = vpop.f32.mrb[30].mxu1 }
 0xda4   : > { %v8074_v30 = vpack.c.bf16 %v1705_v27, %v1705_v27  ;;  %v6981_v31 = vpop.f32.mrb[31].mxu1 }
 0xda6   : > { %1902 = vrot.lane.b32.xlu0 %v8074_v30, %s9086_s3  ;;  %6993 = vmatmul.mubr.msk.bf16.vlgmr.msra.gmra.mrb[32].mxu1 %vm965_vm3, %v8074_v30 }
 0xda7   : > { %7003 = vmatpush3.bf16.xpose.msra.mxu1 %v1910_v33  ;;  %7004 = vmatprep.mubr.msk.bf16.mxu1 %vm7688_vm1, %v7687_v15 }
 0xda8   : > { %7014 = vmatprep.subr.bf16.mxu1 %v7687_v15 }
 0xe18   : > { %v1903_v34 = vpop.permute.xlu0 %1902 }
 0xe19   : > { %7005 = vmatmul.mubr.msk.bf16.vlgmr.msra.gmra.mrb[36].mxu1 %vm965_vm3, %v1903_v34 }
 0xe1a   : > { %7016 = vmatprep.mubr.msk.bf16.mxu1 %vm7688_vm1, %v7687_v15  ;;  %7015 = vmatpush3.bf16.msra.mxu1 %v2019_v2 }
 0xe1b   : > { %7026 = vmatprep.subr.bf16.mxu1 %v7687_v15 }
 0xe79   : > { %v1824_v35 = vpop.f32.mrb[32].mxu1 }
 0xe7a   : > { %v1830_v36 = vmul.f32 0.35355338, %v1824_v35  ;;  %v6994_v37 = vpop.f32.mrb[33].mxu1 }
 0xe7b   : > { %v1827_v38 = vpop.f32.mrb[34].mxu1 }
 0xe7c   : > { %v6995_v39 = vpop.f32.mrb[35].mxu1  ;;  %v1837_v32 = vadd.f32 %v7864_v8, %v1830_v36 }
 0xe7e   : > { %v1839_v40 = vsel %vm1838_vm9, %v1837_v32, -inf }
 0xe7f   : > { %1840 = vmax.xlane.f32.xlu0 %v1839_v40 }
 0xeec   : > { %v1946_v42 = vpop.f32.mrb[36].mxu1 }
 0xeed   : > { %v1952_v43 = vmul.f32 0.35355338, %v1946_v42  ;;  %v7006_v44 = vpop.f32.mrb[37].mxu1 }
 0xeee   : > { %v1949_v45 = vpop.f32.mrb[38].mxu1 }
 0xeef   : > { %v7007_v46 = vpop.f32.mrb[39].mxu1  ;;  %v1953_v47 = vadd.f32 %v1952_v43, %v7864_v8 }
 0xef1   : > { %v1954_v48 = vsel %vm1838_vm9, %v1953_v47, -inf }
 0xef2   : > { %1955 = vmax.xlane.f32.xlu1 %v1954_v48 }
 0xf03   : > { %1852 = vrot.lane.b32.xlu1 %v8064_v20, %s9088_s5 }
 0xf07   : > { %2109 = vrot.lane.b32.xlu1 %v8064_v20, %s9089_s10 }
 0xf0b   : > { %2107 = vrot.lane.b32.xlu1 %v8074_v30, %s9089_s10 }
 0xf0c   : > { %v1841_v49 = vpop.xlane.xlu0 %1840 }
 0xf0d   : > { %v1842_v50 = vsub.f32 %v1837_v32, %v1841_v49 }
 0xf0f   : > { %v1843_v51 = vmul.f32 1.442695, %v1842_v50 }
 0xf11   : > { %7583 = vpow2.f32 %v1843_v51 }
 0xf1b   : > { %v7584_v52 = vpop.eup %7583 }
 0xf1c   : > { %v1845_v53 = vsel %vm1838_vm9, %v7584_v52, 0.0 }
 0xf1d   : > { %1846 = vadd.xlane.f32.xlu0 %v1845_v53 }
 0xf7f   : > { %v1956_v54 = vpop.xlane.xlu1 %1955 }
 0xf80   : > { %v1957_v55 = vsub.f32 %v1953_v47, %v1956_v54 }
 0xf82   : > { %v1958_v56 = vmul.f32 1.442695, %v1957_v55 }
 0xf83   : > { %v1853_v57 = vpop.permute.xlu1 %1852 }
 0xf84   : > { %7585 = vpow2.f32 %v1958_v56  ;;  %v1858_v58 = vsel %vm1034_vm7, %v1853_v57, 0 }
 0xf85   : > { %6997 = vmatpush3.bf16.msra.mxu0 %v1858_v58 }
 0xf86   : > { %7008 = vmatprep.subr.bf16.mxu0 %v7687_v15 }
 0xf87   : > { %v2110_v21 = vpop.permute.xlu1 %2109 }
 0xf88   : > { %v2115_v27 = vsel %vm965_vm3, %v2110_v21, 0 }
 0xf8b   : > { %v2108_v29 = vpop.permute.xlu1 %2107 }
 0xf8e   : > { %v7586_v59 = vpop.eup %7585 }
 0xf8f   : > { %v1960_v60 = vsel %vm1838_vm9, %v7586_v59, 0.0 }
 0xf90   : > { %1961 = vadd.xlane.f32.xlu0 %v1960_v60 }
 0xfa6   : > { %1966 = vrot.lane.b32.xlu0 %v8064_v20, %s9090_s30 }
 0xfaa   : > { %v1847_v61 = vpop.xlane.xlu0 %1846 }
 0xfab   : > { %7587 = vrcp.f32 %v1847_v61  ;;  %v1779_v61 = vld [vmem:[%s9091_s15 + $0x8] sm:$0xf] }
 0xfb5   : > { %v7588_v62 = vpop.eup %7587 }
 0xfb6   : > { %v1849_v25 = vmul.f32 %v7588_v62, %v7584_v52  ;;  %v2224_v62 = vsel %vm1034_vm7, %v1779_v61, 0 }
 0xfb8   : > { %v1850_v0 = vpack.c.bf16 %v1849_v25, %v1849_v25 }
 0xfba   : > { %6999 = vmatmul.mubr.msk.bf16.vlgmr.msra.gmra.mrb[28].mxu0 %vm965_vm3, %v1850_v0 }
 0xfbb   : > { %7010 = vmatprep.mubr.msk.bf16.mxu0 %vm7688_vm1, %v7687_v15 }
0x101d   : > { %v1962_v3 = vpop.xlane.xlu0 %1961 }
0x101e   : > { %7589 = vrcp.f32 %v1962_v3 }
0x1021   : > { %v1967_v4 = vpop.permute.xlu0 %1966 }
0x1022   : > { %v1972_v5 = vsel %vm1034_vm7, %v1967_v4, 0 }
0x1023   : > { %7009 = vmatpush3.bf16.msra.mxu0 %v1972_v5 }
0x1024   : > { %7020 = vmatprep.subr.bf16.mxu0 %v7687_v15 }
0x1028   : > { %v7590_v6 = vpop.eup %7589 }
0x1029   : > { %v1964_v10 = vmul.f32 %v7590_v6, %v7586_v59 }
0x102b   : > { %v1965_v11 = vpack.c.bf16 %v1964_v10, %v1964_v10 }
0x102d   : > { %7011 = vmatmul.mubr.msk.bf16.vlgmr.msra.gmra.mrb[32].mxu0 %vm965_vm3, %v1965_v11 }
0x102e   : > { %7021 = vmatpush3.bf16.msra.mxu0 %v2065_v13  ;;  %7022 = vmatprep.mubr.msk.bf16.mxu0 %vm7688_vm1, %v7687_v15 }
0x102f   : > { %7032 = vmatprep.subr.bf16.mxu0 %v7687_v15 }
0x108d   : > { %v1894_v14 = vpop.f32.mrb[28].mxu0 }
0x108e   : > { %v1900_v16 = vpack.c.bf16 %v1894_v14, %v1894_v14  ;;  %v7000_v17 = vpop.f32.mrb[29].mxu0 }
0x108f   : > { %v1897_v18 = vpop.f32.mrb[30].mxu0 }
0x1090   : > { %v7001_v19 = vpop.f32.mrb[31].mxu0  ;;  %7023 = vmatmul.mubr.msk.bf16.vlgmr.msra.gmra.mrb[36].mxu0 %vm965_vm3, %v1900_v16 }
0x1091   : > { %7034 = vmatprep.mubr.msk.bf16.mxu0 %vm7688_vm1, %v7687_v15 }
0x1100   : > { %v2008_v22 = vpop.f32.mrb[32].mxu0 }
0x1101   : > { %v2014_v23 = vpack.c.bf16 %v2008_v22, %v2008_v22  ;;  %v7012_v24 = vpop.f32.mrb[33].mxu0 }
0x1102   : > { %v2011_v26 = vpop.f32.mrb[34].mxu0 }
0x1103   : > { %v7013_v28 = vpop.f32.mrb[35].mxu0  ;;  %7017 = vmatmul.mubr.msk.bf16.vlgmr.msra.gmra.mrb[40].mxu1 %vm965_vm3, %v2014_v23 }
0x1104   : > { %7027 = vmatpush3.bf16.xpose.msra.mxu1 %v2115_v27  ;;  %7028 = vmatprep.mubr.msk.bf16.mxu1 %vm7688_vm1, %v7687_v15 }
0x1105   : > { %7038 = vmatprep.subr.bf16.mxu1 %v7687_v15 }
0x110b   : > { %7029 = vmatmul.mubr.msk.bf16.vlgmr.msra.gmra.mrb[44].mxu1 %vm965_vm3, %v2108_v29 }
0x110c   : > { %7040 = vmatprep.mubr.msk.bf16.mxu1 %vm7688_vm1, %v7687_v15  ;;  %7039 = vmatpush3.bf16.msra.mxu1 %v2224_v62 }
0x110d   : > { %7050 = vmatprep.subr.bf16.mxu1 %v7687_v15 }
0x1163   : > { %v2101_v31 = vpop.f32.mrb[36].mxu0 }
0x1164   : > { %v7024_v33 = vpop.f32.mrb[37].mxu0 }
0x1165   : > { %v2104_v34 = vpop.f32.mrb[38].mxu0 }
0x1166   : > { %v7025_v35 = vpop.f32.mrb[39].mxu0 }
0x11d6   : > { %v2055_v36 = vpop.f32.mrb[40].mxu1 }
0x11d7   : > { %v8132_v37 = vadd.f32 %v2101_v31, %v2055_v36  ;;  %v7018_v38 = vpop.f32.mrb[41].mxu1 }
0x11d8   : > { %v2058_v39 = vpop.f32.mrb[42].mxu1 }
0x11d9   : > { %v7019_v32 = vpop.f32.mrb[43].mxu1 }
0x11de   : > { %v2151_v40 = vpop.f32.mrb[44].mxu1 }
0x11df   : > { %v2157_v42 = vmul.f32 0.35355338, %v2151_v40  ;;  %v7030_v43 = vpop.f32.mrb[45].mxu1  ;;  %v6440_v40 = vld [vmem:[%s9095_s16] ss:$0 sm:$0xff]  ;;  %s9097_s16 = smov 56  }
0x11e0   : > { %v2154_v44 = vpop.f32.mrb[46].mxu1 }
0x11e1   : > { %v7031_v45 = vpop.f32.mrb[47].mxu1  ;;  %v2158_v46 = vadd.f32 %v2157_v42, %v7864_v8 }
0x11e3   : > { %v2159_v47 = vsel %vm1838_vm9, %v2158_v46, -inf }
0x11e4   : > { %2160 = vmax.xlane.f32.xlu0 %v2159_v47 }
0x11fa   : > { %2171 = vrot.lane.b32.xlu0 %v8064_v20, %s9092_s27 }
0x11fe   : > { %2267 = vrot.lane.b32.xlu0 %v8074_v30, %s9093_s7 }
0x1271   : > { %v2161_v48 = vpop.xlane.xlu0 %2160 }
0x1272   : > { %v2162_v49 = vsub.f32 %v2158_v46, %v2161_v48 }
0x1274   : > { %v2163_v50 = vmul.f32 1.442695, %v2162_v49 }
0x1275   : > { %v2172_v51 = vpop.permute.xlu0 %2171 }
0x1276   : > { %7591 = vpow2.f32 %v2163_v50  ;;  %v2177_v52 = vsel %vm1034_vm7, %v2172_v51, 0 }
0x1277   : > { %7033 = vmatpush3.bf16.msra.mxu0 %v2177_v52 }
0x1278   : > { %7044 = vmatprep.subr.bf16.mxu0 %v7687_v15 }
0x1279   : > { %v2268_v60 = vpop.permute.xlu0 %2267 }
0x1280   : > { %v7592_v53 = vpop.eup %7591 }
0x1281   : > { %v2165_v54 = vsel %vm1838_vm9, %v7592_v53, 0.0 }
0x1282   : > { %2166 = vadd.xlane.f32.xlu1 %v2165_v54 }
0x1293   : > { %2269 = vrot.lane.b32.xlu1 %v8064_v20, %s9093_s7 }
0x130f   : > { %v2167_v55 = vpop.xlane.xlu1 %2166 }
0x1310   : > { %7593 = vrcp.f32 %v2167_v55  ;;  %v7519_v55 = vld [vmem:[%s9003_s19] sm:$0xff]  }
0x1313   : > { %v2270_v57 = vpop.permute.xlu1 %2269 }
0x1314   : > { %v2275_v59 = vsel %vm965_vm3, %v2270_v57, 0  ;;  %v7523_v57 = vld [vmem:[%s9005_s21 + $0x10] sm:$0xff]  }
0x131a   : > { %v7594_v30 = vpop.eup %7593 }
0x131b   : > { %v2169_v56 = vmul.f32 %v7594_v30, %v7592_v53  ;;  %v7520_v30 = vld [vmem:[%s9003_s19 + $0x8] sm:$0xff]  }
0x131d   : > { %v2170_v58 = vpack.c.bf16 %v2169_v56, %v2169_v56  ;;  %v7522_v56 = vld [vmem:[%s9005_s21 + $0x8] sm:$0xff]  }
0x131f   : > { %7035 = vmatmul.mubr.msk.bf16.vlgmr.msra.gmra.mrb[40].mxu0 %vm965_vm3, %v2170_v58  ;;  %v7524_v58 = vld [vmem:[%s9005_s21 + $0x18] sm:$0xff]  }
0x1320   : > { %7045 = vmatpush3.bf16.xpose.msra.mxu0 %v2275_v59  ;;  %7046 = vmatprep.mubr.msk.bf16.mxu0 %vm7688_vm1, %v7687_v15  ;;  %v7525_v59 = vld [vmem:[%s9005_s21 + $0x20] sm:$0xff]  }
0x1321   : > { %7056 = vmatprep.subr.bf16.mxu0 %v7687_v15 }
0x1327   : > { %7047 = vmatmul.mubr.msk.bf16.vlgmr.msra.gmra.mrb[44].mxu0 %vm965_vm3, %v2268_v60  ;;  %v7526_v60 = vld [vmem:[%s9005_s21 + $0x28] sm:$0xff]  }
0x1328   : > { %7058 = vmatprep.mubr.msk.bf16.mxu0 %vm7688_vm1, %v7687_v15 }
0x13f2   : > { %v2213_v25 = vpop.f32.mrb[40].mxu0 }
0x13f3   : > { %v2219_v0 = vpack.c.bf16 %v2213_v25, %v2213_v25  ;;  %v7036_v1 = vpop.f32.mrb[41].mxu0 }
0x13f4   : > { %v2216_v2 = vpop.f32.mrb[42].mxu0  ;;  %v6441_v1 = vld [vmem:[%s9001_s17] ss:$0 sm:$0xff] }
0x13f5   : > { %v7037_v3 = vpop.f32.mrb[43].mxu0  ;;  %7041 = vmatmul.mubr.msk.bf16.vlgmr.msra.gmra.mrb[48].mxu1 %vm965_vm3, %v2219_v0 }
0x13f6   : > { %7052 = vmatprep.mubr.msk.bf16.mxu1 %vm7688_vm1, %v7687_v15  ;;  %v6442_v3 = vld [vmem:[%s9002_s18] ss:$0 sm:$0xff] }
0x13fa   : > { %v2311_v4 = vpop.f32.mrb[44].mxu0 }
0x13fb   : > { %v2317_v5 = vmul.f32 0.35355338, %v2311_v4  ;;  %v7048_v6 = vpop.f32.mrb[45].mxu0 }
0x13fc   : > { %v2314_v9 = vpop.f32.mrb[46].mxu0 }
0x13fd   : > { %v7049_v10 = vpop.f32.mrb[47].mxu0  ;;  %v2318_v11 = vadd.f32 %v2317_v5, %v7864_v8  ;;  %v7527_v9 = vld [vmem:[%s9005_s21 + $0x30] sm:$0xff]  }
0x13fe   : > { %v7528_v10 = vld [vmem:[%s9005_s21 + $0x38] sm:$0xff]  }
0x13ff   : > { %v2319_v13 = vsel %vm1838_vm9, %v2318_v11, -inf }
0x1400   : > { %2320 = vmax.xlane.f32.xlu1 %v2319_v13 }
0x148d   : > { %v2321_v14 = vpop.xlane.xlu1 %2320 }
0x148e   : > { %v2322_v16 = vsub.f32 %v2318_v11, %v2321_v14  ;;  %v6443_v11 = vld [vmem:[%s9004_s20] ss:$0 sm:$0xff] }
0x1490   : > { %v2323_v17 = vmul.f32 1.442695, %v2322_v16 }
0x1492   : > { %7595 = vpow2.f32 %v2323_v17 }
0x149c   : > { %v7596_v18 = vpop.eup %7595 }
0x149d   : > { %v2325_v19 = vsel %vm1838_vm9, %v7596_v18, 0.0 }
0x149e   : > { %2326 = vadd.xlane.f32.xlu0 %v2325_v19 }
0x14b4   : > { %2331 = vrot.lane.b32.xlu0 %v8064_v20, %s9094_s28  ;;  %v1780_v20 = vld [vmem:[%s9091_s15 + $0xc] sm:$0xf]  ;;  %s9098_s15 = smov 48  }
0x14b5   : > { %v2384_v35 = vsel %vm1034_vm7, %v1780_v20, 0 }
0x14b6   : > { %7057 = vmatpush3.bf16.msra.mxu0 %v2384_v35 }
0x14b7   : > { %7070 = vmatprep.subr.bf16.mxu0 %v7687_v15 }
0x14c8   : > { %v2260_v21 = vpop.f32.mrb[48].mxu1 }
0x14c9   : > { %v2266_v22 = vadd.f32 %v2260_v21, %v8132_v37  ;;  %v7042_v23 = vpop.f32.mrb[49].mxu1 }
0x14ca   : > { %v2263_v24 = vpop.f32.mrb[50].mxu1 }
0x14cb   : > { %v7043_v26 = vpop.f32.mrb[51].mxu1 }
0x152b   : > { %v2327_v27 = vpop.xlane.xlu0 %2326 }
0x152c   : > { %7597 = vrcp.f32 %v2327_v27 }
0x152f   : > { %v2332_v28 = vpop.permute.xlu0 %2331 }
0x1530   : > { %v2337_v29 = vsel %vm1034_vm7, %v2332_v28, 0 }
0x1531   : > { %7051 = vmatpush3.bf16.msra.mxu1 %v2337_v29 }
0x1532   : > { %7062 = vmatprep.subr.bf16.mxu1 %v7687_v15 }
0x1536   : > { %v7598_v31 = vpop.eup %7597 }
0x1537   : > { %v2329_v33 = vmul.f32 %v7598_v31, %v7596_v18 }
0x1539   : > { %v2330_v34 = vpack.c.bf16 %v2329_v33, %v2329_v33 }
0x153b   : > { %7053 = vmatmul.mubr.msk.bf16.vlgmr.msra.gmra.mrb[52].mxu1 %vm965_vm3, %v2330_v34 }
0x153c   : > { %7066 = vmatprep.mubr.msk.bf16.mxu1 %vm7688_vm1, %v7687_v15  ;;  %7063 = vmatpush3.bf16.msra.mxu1 %v7519_v55 }
0x153d   : > { %7064 = vmatprep.subr.bf16.mxu1 %v7687_v15 }
0x1540   : > { %7065 = vmatpush3.bf16.msra.mxu1 %v7520_v30 }
0x1541   : > { %7090 = vmatprep.subr.bf16.mxu1 %v7687_v15 }
0x160e   : > { %v2373_v36 = vpop.f32.mrb[52].mxu1 }
0x160f   : > { %v2379_v37 = vpack.c.bf16 %v2373_v36, %v2373_v36  ;;  %v7054_v38 = vpop.f32.mrb[53].mxu1 }
0x1610   : > { %v2376_v39 = vpop.f32.mrb[54].mxu1  ;;  %v7530_v38 = vld [vmem:[%s9075_s2 + $0x18] sm:$0xff]  }
0x1611   : > { %v7055_v32 = vpop.f32.mrb[55].mxu1  ;;  %7059 = vmatmul.mubr.msk.bf16.vlgmr.msra.gmra.mrb[48].mxu0 %vm965_vm3, %v2379_v37  ;;  %v7529_v37 = vld [vmem:[%s9075_s2 + $0x10] sm:$0xff]  }
0x1612   : > { %7086 = vmatprep.mubr.msk.bf16.mxu0 %vm7688_vm1, %v7687_v15 }
0x16e4   : > { %v2420_v42 = vpop.f32.mrb[48].mxu0 }
0x16e5   : > { %v2426_v43 = vadd.f32 %v2420_v42, %v2266_v22  ;;  %v7060_v44 = vpop.f32.mrb[49].mxu0  ;;  %v6447_v22 = vld [vmem:[%s9006_s22] ss:$0 sm:$0xff] }
0x16e6   : > { %v2423_v45 = vpop.f32.mrb[50].mxu0 }
0x16e7   : > { %v2433_v46 = vadd.f32 %v6440_v40, %v2426_v43  ;;  %v7061_v47 = vpop.f32.mrb[51].mxu0  ;;  %v6456_v43 = vld [vmem:[%s9007_s23] ss:$0 sm:$0xff] }
0x16e8   : > { %v6457_v45 = vld [vmem:[%s9008_s24] ss:$0 sm:$0xff] }
0x16e9   : > { %v2434_v48 = vadd.f32 %v2433_v46, %v8054_v12  ;;  %v7521_v12 = vld [vmem:[%s9005_s21] sm:$0xff]  }
0x16ea   : > { %7071 = vmatpush3.bf16.msra.mxu0 %v7521_v12 }
0x16eb   : > { %v2437_v49 = vsel %vm849_vm0, %v2434_v48, 0.0  ;;  %7072 = vmatprep.subr.bf16.mxu0 %v7687_v15 }
0x16ec   : > { %2438 = vadd.xlane.f32.xlu1 %v2437_v49  ;;  %v6463_v49 = vld [vmem:[%s9078_s6 + $0x1] ss:$0 sm:$0xff] }
0x16ee   : > { %7073 = vmatpush3.bf16.msra.mxu0 %v7522_v56 }
0x16ef   : > { %7074 = vmatprep.subr.bf16.mxu0 %v7687_v15 }
0x16f2   : > { %7075 = vmatpush3.bf16.msra.mxu0 %v7523_v57 }
0x16f3   : > { %7076 = vmatprep.subr.bf16.mxu0 %v7687_v15 }
0x16f6   : > { %7077 = vmatpush3.bf16.msra.mxu0 %v7524_v58 }
0x16f7   : > { %7078 = vmatprep.subr.bf16.mxu0 %v7687_v15 }
0x16fa   : > { %7079 = vmatpush3.bf16.msra.mxu0 %v7525_v59 }
0x16fb   : > { %7080 = vmatprep.subr.bf16.mxu0 %v7687_v15 }
0x16fe   : > { %7081 = vmatpush3.bf16.msra.mxu0 %v7526_v60 }
0x16ff   : > { %7082 = vmatprep.subr.bf16.mxu0 %v7687_v15 }
0x1702   : > { %7083 = vmatpush3.bf16.msra.mxu0 %v7527_v9 }
0x1703   : > { %7084 = vmatprep.subr.bf16.mxu0 %v7687_v15 }
0x1706   : > { %7085 = vmatpush3.bf16.msra.mxu0 %v7528_v10 }
0x1707   : > { %7116 = vmatprep.subr.bf16.mxu0 %v7687_v15 }
0x1779   : > { %v2439_v50 = vpop.xlane.xlu1 %2438 }
0x177a   : > { %v2440_v51 = vmul.f32 0.03125, %v2439_v50 }
0x177c   : > { %v2441_v52 = vsub.f32 %v2434_v48, %v2440_v51 }
0x177e   : > { %v2442_v53 = vmul.f32 %v2441_v52, %v2441_v52 }
0x1780   : > { %v2443_v54 = vsel %vm849_vm0, %v2442_v53, 0.0 }
0x1781   : > { %2444 = vadd.xlane.f32.xlu1 %v2443_v54 }
0x180e   : > { %v2445_v61 = vpop.xlane.xlu1 %2444 }
0x180f   : > { %v2446_v62 = vmul.f32 0.03125, %v2445_v61 }
0x1811   : > { %v2447_v25 = vadd.f32 1e-12, %v2446_v62 }
0x1813   : > { %7599 = vrsqrt.f32 %v2447_v25 }
0x181d   : > { %v7600_v0 = vpop.eup %7599 }
0x181e   : > { %v2449_v2 = vmul.f32 %v7600_v0, %v2441_v52 }
0x1820   : > { %v2456_v4 = vmul.f32 %v6441_v1, %v2449_v2 }
0x1822   : > { %v2463_v5 = vadd.f32 %v6442_v3, %v2456_v4 }
0x1824   : > { %v2469_v6 = vpack.c.bf16 %v2463_v5, %v2463_v5 }
0x1826   : > { %7067 = vmatmul.mubr.msk.bf16.vlgmr.msra.gmra.mrb[56].mxu1 %vm912_vm2, %v2469_v6 }
0x1827   : > { %7094 = vmatprep.mubr.msk.bf16.mxu1 %vm7688_vm1, %v7687_v15  ;;  %7091 = vmatpush3.bf16.msra.mxu1 %v7529_v37 }
0x1828   : > { %7092 = vmatprep.subr.bf16.mxu1 %v7687_v15 }
0x182b   : > { %7093 = vmatpush3.bf16.msra.mxu1 %v7530_v38  ;;  %v6468_v38 = vld [vmem:[%s9079_s29 + $0x14] sm:$0xf] }
0x182c   : > { %7098 = vmatprep.subr.bf16.mxu1 %v7687_v15 }
0x18f9   : > { %v2525_v13 = vpop.f32.mrb[56].mxu1 }
0x18fa   : > { %v2526_v14 = vadd.f32 %v6443_v11, %v2525_v13  ;;  %v7068_v16 = vpop.f32.mrb[57].mxu1 }
0x18fb   : > { %v2528_v17 = vpop.f32.mrb[58].mxu1 }
0x18fc   : > { %v2531_v18 = vmax.f32 %v2526_v14, 0.0  ;;  %v7069_v19 = vpop.f32.mrb[59].mxu1 }
0x18fe   : > { %v2549_v21 = vpack.c.bf16 %v2531_v18, %v2531_v18 }
0x1900   : > { %7087 = vmatmul.mubr.bf16.vlgmr.msra.gmra.mrb[52].mxu0 %v2549_v21 }
0x1901   : > { %7118 = vmatprep.mubr.msk.bf16.mxu0 %vm7688_vm1, %v7687_v15 }
0x19d3   : > { %v2638_v23 = vpop.f32.mrb[52].mxu0 }
0x19d4   : > { %v2639_v24 = vadd.f32 %v6447_v22, %v2638_v23  ;;  %v7088_v26 = vpop.f32.mrb[53].mxu0 }
0x19d5   : > { %v2641_v27 = vpop.f32.mrb[54].mxu0 }
0x19d6   : > { %v7089_v28 = vpop.f32.mrb[55].mxu0  ;;  %v2644_v29 = vadd.f32 %v2639_v24, %v2463_v5 }
0x19d8   : > { %v2647_v31 = vsel %vm849_vm0, %v2644_v29, 0.0 }
0x19d9   : > { %2648 = vadd.xlane.f32.xlu1 %v2647_v31 }
0x1a66   : > { %v2649_v33 = vpop.xlane.xlu1 %2648 }
0x1a67   : > { %v2650_v34 = vmul.f32 0.03125, %v2649_v33 }
0x1a69   : > { %v2651_v20 = vsub.f32 %v2644_v29, %v2650_v34 }
0x1a6b   : > { %v2652_v35 = vmul.f32 %v2651_v20, %v2651_v20 }
0x1a6d   : > { %v2653_v36 = vsel %vm849_vm0, %v2652_v35, 0.0 }
0x1a6e   : > { %2654 = vadd.xlane.f32.xlu1 %v2653_v36 }
0x1afb   : > { %v2655_v39 = vpop.xlane.xlu1 %2654 }
0x1afc   : > { %v2656_v32 = vmul.f32 0.03125, %v2655_v39  ;;  %v2980_v39 = vsel %vm1034_vm7, %v6468_v38, 0 }
0x1afe   : > { %v2657_v40 = vadd.f32 1e-12, %v2656_v32 }
0x1b00   : > { %7601 = vrsqrt.f32 %v2657_v40 }
0x1b0a   : > { %v7602_v42 = vpop.eup %7601 }
0x1b0b   : > { %v2659_v44 = vmul.f32 %v7602_v42, %v2651_v20  ;;  %v6467_v42 = vld [vmem:[%s9079_s29 + $0x10] sm:$0xf] }
0x1b0d   : > { %v2666_v46 = vmul.f32 %v6456_v43, %v2659_v44 }
0x1b0f   : > { %v8259_v47 = vadd.f32 %v6457_v45, %v2666_v46  ;;  %v3026_v45 = vsel %vm1034_vm7, %v6467_v42, 0 }
0x1b11   : > { %v2681_v48 = vpack.c.bf16 %v8259_v47, %v8259_v47 }
0x1b13   : > { %7095 = vmatmul.mubr.msk.bf16.vlgmr.msra.gmra.mrb[60].mxu1 %vm912_vm2, %v2681_v48 }
0x1b14   : > { %7100 = vmatprep.mubr.msk.bf16.mxu1 %vm7688_vm1, %v7687_v15 }
0x1be6   : > { %v2737_v50 = vpop.f32.mrb[60].mxu1 }
0x1be7   : > { %v2738_v51 = vadd.f32 %v6463_v49, %v2737_v50  ;;  %v7096_v52 = vpop.f32.mrb[61].mxu1 }
0x1be8   : > { %v2740_v53 = vpop.f32.mrb[62].mxu1 }
0x1be9   : > { %v8269_v54 = vpack.c.bf16 %v2738_v51, %v2738_v51  ;;  %v7097_v55 = vpop.f32.mrb[63].mxu1 }
0x1beb   : > { %2752 = vrot.lane.b32.xlu1 %v8269_v54, %s9088_s5 }
0x1c5d   : > { %v2753_v30 = vpop.permute.xlu1 %2752 }
0x1c5e   : > { %v2758_v12 = vsel %vm965_vm3, %v2753_v30, 0 }
0x1c5f   : > { %7099 = vmatpush3.bf16.xpose.msra.mxu1 %v2758_v12 }
0x1c60   : > { %7104 = vmatprep.subr.bf16.mxu1 %v7687_v15 }
0x1c66   : > { %7101 = vmatmul.mubr.msk.bf16.vlgmr.msra.gmra.mrb[64].mxu1 %vm965_vm3, %v8269_v54 }
0x1c67   : > { %7106 = vmatprep.mubr.msk.bf16.mxu1 %vm7688_vm1, %v7687_v15 }
0x1d39   : > { %v2794_v56 = vpop.f32.mrb[64].mxu1 }
0x1d3a   : > { %v2800_v57 = vmul.f32 0.35355338, %v2794_v56  ;;  %v7102_v58 = vpop.f32.mrb[65].mxu1 }
0x1d3b   : > { %v2797_v59 = vpop.f32.mrb[66].mxu1 }
0x1d3c   : > { %v7103_v60 = vpop.f32.mrb[67].mxu1  ;;  %v2801_v61 = vadd.f32 %v2800_v57, %v7918_v41 }
0x1d3e   : > { %v2802_v62 = vsel %vm1014_vm5, %v2801_v61, -inf }
0x1d3f   : > { %2803 = vmax.xlane.f32.xlu0 %v2802_v62 }
0x1d55   : > { %2814 = vrot.lane.b32.xlu0 %v8269_v54, %s9096_s14 }
0x1d59   : > { %2863 = vrot.lane.b32.xlu0 %v8269_v54, %s9086_s3 }
0x1dcc   : > { %v2804_v25 = vpop.xlane.xlu0 %2803 }
0x1dcd   : > { %v2805_v0 = vsub.f32 %v2801_v61, %v2804_v25 }
0x1dcf   : > { %v2806_v1 = vmul.f32 1.442695, %v2805_v0 }
0x1dd0   : > { %v2815_v2 = vpop.permute.xlu0 %2814 }
0x1dd1   : > { %7603 = vpow2.f32 %v2806_v1  ;;  %v2820_v3 = vand.u32 %v2815_v2, %v7935_v7 }
0x1dd3   : > { %7105 = vmatpush3.bf16.msra.mxu1 %v2820_v3 }
0x1dd4   : > { %7110 = vmatprep.subr.bf16.mxu1 %v7687_v15  ;;  %v2864_v16 = vpop.permute.xlu0 %2863 }
0x1ddb   : > { %v7604_v4 = vpop.eup %7603 }
0x1ddc   : > { %v2808_v5 = vsel %vm1014_vm5, %v7604_v4, 0.0 }
0x1ddd   : > { %2809 = vadd.xlane.f32.xlu1 %v2808_v5 }
0x1dee   : > { %2865 = vrot.lane.b32.xlu1 %v8269_v54, %s9090_s30 }
0x1e6a   : > { %v2810_v6 = vpop.xlane.xlu1 %2809 }
0x1e6b   : > { %7605 = vrcp.f32 %v2810_v6 }
0x1e6e   : > { %v2866_v11 = vpop.permute.xlu1 %2865 }
0x1e6f   : > { %v2871_v14 = vsel %vm965_vm3, %v2866_v11, 0 }
0x1e75   : > { %v7606_v9 = vpop.eup %7605 }
0x1e76   : > { %v2812_v10 = vmul.f32 %v7606_v9, %v7604_v4 }
0x1e78   : > { %v2813_v13 = vpack.c.bf16 %v2812_v10, %v2812_v10 }
0x1e7a   : > { %7107 = vmatmul.mubr.msk.bf16.vlgmr.msra.gmra.mrb[68].mxu1 %vm1029_vm8, %v2813_v13 }
0x1e7b   : > { %7111 = vmatpush3.bf16.xpose.msra.mxu1 %v2871_v14  ;;  %7112 = vmatprep.mubr.msk.bf16.mxu1 %vm7688_vm1, %v7687_v15 }
0x1e7c   : > { %7122 = vmatprep.subr.bf16.mxu1 %v7687_v15 }
0x1e82   : > { %7113 = vmatmul.mubr.msk.bf16.vlgmr.msra.gmra.mrb[72].mxu1 %vm965_vm3, %v2864_v16 }
0x1e83   : > { %7124 = vmatprep.mubr.msk.bf16.mxu1 %vm7688_vm1, %v7687_v15  ;;  %7123 = vmatpush3.bf16.msra.mxu1 %v2980_v39 }
0x1e84   : > { %7134 = vmatprep.subr.bf16.mxu1 %v7687_v15 }
0x1f4d   : > { %v2856_v17 = vpop.f32.mrb[68].mxu1 }
0x1f4e   : > { %v7108_v18 = vpop.f32.mrb[69].mxu1  ;;  %v2862_v46 = vpack.c.bf16 %v2856_v17, %v2856_v17 }
0x1f4f   : > { %v2859_v19 = vpop.f32.mrb[70].mxu1 }
0x1f50   : > { %v7109_v21 = vpop.f32.mrb[71].mxu1 }
0x1f55   : > { %v2907_v22 = vpop.f32.mrb[72].mxu1 }
0x1f56   : > { %v2913_v23 = vmul.f32 0.35355338, %v2907_v22  ;;  %v7114_v24 = vpop.f32.mrb[73].mxu1 }
0x1f57   : > { %v2910_v26 = vpop.f32.mrb[74].mxu1 }
0x1f58   : > { %v7115_v27 = vpop.f32.mrb[75].mxu1  ;;  %v2914_v28 = vadd.f32 %v2913_v23, %v7918_v41 }
0x1f59   : > { %v6469_v27 = vld [vmem:[%s9079_s29 + $0x18] sm:$0xf] }
0x1f5a   : > { %v2915_v29 = vsel %vm1014_vm5, %v2914_v28, -inf }
0x1f5b   : > { %2916 = vmax.xlane.f32.xlu0 %v2915_v29 }
0x1f71   : > { %2927 = vrot.lane.b32.xlu0 %v8269_v54, %s9097_s16 }
0x1f75   : > { %3068 = vrot.lane.b32.xlu0 %v8269_v54, %s9089_s10 }
0x1fe8   : > { %v2917_v31 = vpop.xlane.xlu0 %2916 }
0x1fe9   : > { %v2918_v33 = vsub.f32 %v2914_v28, %v2917_v31  ;;  %v3185_v28 = vsel %vm1034_vm7, %v6469_v27, 0  ;;  %v6487_v27 = vld [vmem:[%s9083_s1 + $0x1] ss:$0 sm:$0xff] }
0x1feb   : > { %v2919_v34 = vmul.f32 1.442695, %v2918_v33 }
0x1fec   : > { %v2928_v20 = vpop.permute.xlu0 %2927 }
0x1fed   : > { %7607 = vpow2.f32 %v2919_v34  ;;  %v2933_v35 = vand.u32 %v2928_v20, %v7935_v7 }
0x1fef   : > { %7117 = vmatpush3.bf16.msra.mxu0 %v2933_v35 }
0x1ff0   : > { %7128 = vmatprep.subr.bf16.mxu0 %v7687_v15  ;;  %v3069_v56 = vpop.permute.xlu0 %3068 }
0x1ff7   : > { %v7608_v36 = vpop.eup %7607 }
0x1ff8   : > { %v2921_v37 = vsel %vm1014_vm5, %v7608_v36, 0.0 }
0x1ff9   : > { %2922 = vadd.xlane.f32.xlu1 %v2921_v37 }
0x200a   : > { %3070 = vrot.lane.b32.xlu1 %v8269_v54, %s9092_s27 }
0x2086   : > { %v2923_v32 = vpop.xlane.xlu1 %2922 }
0x2087   : > { %7609 = vrcp.f32 %v2923_v32 }
0x208a   : > { %v3071_v48 = vpop.permute.xlu1 %3070 }
0x208b   : > { %v3076_v53 = vsel %vm965_vm3, %v3071_v48, 0 }
0x2091   : > { %v7610_v40 = vpop.eup %7609 }
0x2092   : > { %v2925_v43 = vmul.f32 %v7610_v40, %v7608_v36 }
0x2094   : > { %v2926_v44 = vpack.c.bf16 %v2925_v43, %v2925_v43 }
0x2096   : > { %7119 = vmatmul.mubr.msk.bf16.vlgmr.msra.gmra.mrb[56].mxu0 %vm1029_vm8, %v2926_v44 }
0x2097   : > { %7129 = vmatpush3.bf16.msra.mxu0 %v3026_v45  ;;  %7130 = vmatprep.mubr.msk.bf16.mxu0 %vm7688_vm1, %v7687_v15 }
0x2098   : > { %7140 = vmatprep.subr.bf16.mxu0 %v7687_v15 }
0x209e   : > { %7131 = vmatmul.mubr.msk.bf16.vlgmr.msra.gmra.mrb[60].mxu0 %vm965_vm3, %v2862_v46 }
0x209f   : > { %7142 = vmatprep.mubr.msk.bf16.mxu0 %vm7688_vm1, %v7687_v15 }
0x2169   : > { %v2969_v49 = vpop.f32.mrb[56].mxu0 }
0x216a   : > { %v2975_v50 = vpack.c.bf16 %v2969_v49, %v2969_v49  ;;  %v7120_v51 = vpop.f32.mrb[57].mxu0 }
0x216b   : > { %v2972_v52 = vpop.f32.mrb[58].mxu0 }
0x216c   : > { %v7121_v55 = vpop.f32.mrb[59].mxu0  ;;  %7125 = vmatmul.mubr.msk.bf16.vlgmr.msra.gmra.mrb[76].mxu1 %vm965_vm3, %v2975_v50 }
0x216d   : > { %7135 = vmatpush3.bf16.xpose.msra.mxu1 %v3076_v53  ;;  %7136 = vmatprep.mubr.msk.bf16.mxu1 %vm7688_vm1, %v7687_v15 }
0x216e   : > { %7146 = vmatprep.subr.bf16.mxu1 %v7687_v15 }
0x2171   : > { %v3062_v30 = vpop.f32.mrb[60].mxu0 }
0x2172   : > { %v7132_v12 = vpop.f32.mrb[61].mxu0 }
0x2173   : > { %v3065_v57 = vpop.f32.mrb[62].mxu0 }
0x2174   : > { %v7133_v58 = vpop.f32.mrb[63].mxu0  ;;  %7137 = vmatmul.mubr.msk.bf16.vlgmr.msra.gmra.mrb[80].mxu1 %vm965_vm3, %v3069_v56  ;;  %v6470_v57 = vld [vmem:[%s9079_s29 + $0x1c] sm:$0xf] }
0x2175   : > { %7148 = vmatprep.mubr.msk.bf16.mxu1 %vm7688_vm1, %v7687_v15  ;;  %7147 = vmatpush3.bf16.msra.mxu1 %v3185_v28  ;;  %v3345_v58 = vsel %vm1034_vm7, %v6470_v57, 0 }
0x2176   : > { %7158 = vmatprep.subr.bf16.mxu1 %v7687_v15 }
0x223f   : > { %v3016_v59 = vpop.f32.mrb[76].mxu1 }
0x2240   : > { %v8333_v60 = vadd.f32 %v3062_v30, %v3016_v59  ;;  %v7126_v61 = vpop.f32.mrb[77].mxu1 }
0x2241   : > { %v3019_v62 = vpop.f32.mrb[78].mxu1 }
0x2242   : > { %v7127_v25 = vpop.f32.mrb[79].mxu1 }
0x2247   : > { %v3112_v0 = vpop.f32.mrb[80].mxu1 }
0x2248   : > { %v3118_v1 = vmul.f32 0.35355338, %v3112_v0  ;;  %v7138_v2 = vpop.f32.mrb[81].mxu1  ;;  %v6484_v0 = vld [vmem:[%s9080_s0 + $0x1] ss:$0 sm:$0xff]  ;;  %s9104_s0 = smov 40  }
0x2249   : > { %v3115_v3 = vpop.f32.mrb[82].mxu1 }
0x224a   : > { %v7139_v4 = vpop.f32.mrb[83].mxu1  ;;  %v3119_v5 = vadd.f32 %v3118_v1, %v7918_v41 }
0x224c   : > { %v3120_v6 = vsel %vm1014_vm5, %v3119_v5, -inf }
0x224d   : > { %3121 = vmax.xlane.f32.xlu0 %v3120_v6 }
0x2263   : > { %3132 = vrot.lane.b32.xlu0 %v8269_v54, %s9098_s15 }
0x2267   : > { %3228 = vrot.lane.b32.xlu0 %v8269_v54, %s9093_s7 }
0x22da   : > { %v3122_v9 = vpop.xlane.xlu0 %3121 }
0x22db   : > { %v3123_v10 = vsub.f32 %v3119_v5, %v3122_v9 }
0x22dd   : > { %v3124_v11 = vmul.f32 1.442695, %v3123_v10 }
0x22de   : > { %v3133_v13 = vpop.permute.xlu0 %3132 }
0x22df   : > { %7611 = vpow2.f32 %v3124_v11  ;;  %v3138_v14 = vand.u32 %v3133_v13, %v7935_v7 }
0x22e1   : > { %7141 = vmatpush3.bf16.msra.mxu0 %v3138_v14 }
0x22e2   : > { %7152 = vmatprep.subr.bf16.mxu0 %v7687_v15  ;;  %v3229_v26 = vpop.permute.xlu0 %3228 }
0x22e9   : > { %v7612_v16 = vpop.eup %7611 }
0x22ea   : > { %v3126_v17 = vsel %vm1014_vm5, %v7612_v16, 0.0 }
0x22eb   : > { %3127 = vadd.xlane.f32.xlu1 %v3126_v17 }
0x22fc   : > { %3230 = vrot.lane.b32.xlu1 %v8269_v54, %s9094_s28 }
0x2378   : > { %v3128_v18 = vpop.xlane.xlu1 %3127 }
0x2379   : > { %7613 = vrcp.f32 %v3128_v18  ;;  %v7531_v18 = vld [vmem:[%s8997_s13 + $0x10] sm:$0xff]  }
0x237c   : > { %v3231_v22 = vpop.permute.xlu1 %3230 }
0x237d   : > { %v3236_v24 = vsel %vm965_vm3, %v3231_v22, 0 }
0x2383   : > { %v7614_v19 = vpop.eup %7613 }
0x2384   : > { %v3130_v21 = vmul.f32 %v7614_v19, %v7612_v16  ;;  %v7533_v19 = vld [vmem:[%s9082_s9 + $0x10] sm:$0xff]  }
0x2386   : > { %v3131_v23 = vpack.c.bf16 %v3130_v21, %v3130_v21  ;;  %v7534_v21 = vld [vmem:[%s9082_s9 + $0x18] sm:$0xff]  }
0x2388   : > { %7143 = vmatmul.mubr.msk.bf16.vlgmr.msra.gmra.mrb[64].mxu0 %vm1029_vm8, %v3131_v23 }
0x2389   : > { %7153 = vmatpush3.bf16.xpose.msra.mxu0 %v3236_v24  ;;  %7154 = vmatprep.mubr.msk.bf16.mxu0 %vm7688_vm1, %v7687_v15 }
0x238a   : > { %7164 = vmatprep.subr.bf16.mxu0 %v7687_v15 }
0x2390   : > { %7155 = vmatmul.mubr.msk.bf16.vlgmr.msra.gmra.mrb[68].mxu0 %vm965_vm3, %v3229_v26 }
0x2391   : > { %7166 = vmatprep.mubr.msk.bf16.mxu0 %vm7688_vm1, %v7687_v15  ;;  %7165 = vmatpush3.bf16.msra.mxu0 %v3345_v58 }
0x2392   : > { %7178 = vmatprep.subr.bf16.mxu0 %v7687_v15 }
0x245b   : > { %v3174_v29 = vpop.f32.mrb[64].mxu0 }
0x245c   : > { %v3180_v31 = vpack.c.bf16 %v3174_v29, %v3174_v29  ;;  %v7144_v33 = vpop.f32.mrb[65].mxu0  ;;  %v6488_v29 = vld [vmem:[%s9084_s11 + $0x1] ss:$0 sm:$0xff]  ;;  %s9110_s11 = sld [smem:[#allocation18_spill]] }
0x245d   : > { %v3177_v34 = vpop.f32.mrb[66].mxu0 }
0x245e   : > { %v7145_v20 = vpop.f32.mrb[67].mxu0  ;;  %7149 = vmatmul.mubr.msk.bf16.vlgmr.msra.gmra.mrb[84].mxu1 %vm965_vm3, %v3180_v31 }
0x245f   : > { %7160 = vmatprep.mubr.msk.bf16.mxu1 %vm7688_vm1, %v7687_v15  ;;  %v6503_v20 = vld [vmem:[%s9100_s12 + $0x1] ss:$0 sm:$0xff]  ;;  %s9103_s12 = sld [smem:[#allocation19_spill]] }
0x2463   : > { %v3272_v35 = vpop.f32.mrb[68].mxu0 }
0x2464   : > { %v3278_v36 = vmul.f32 0.35355338, %v3272_v35  ;;  %v7156_v37 = vpop.f32.mrb[69].mxu0 }
0x2465   : > { %v3275_v38 = vpop.f32.mrb[70].mxu0 }
0x2466   : > { %v7157_v39 = vpop.f32.mrb[71].mxu0  ;;  %v3279_v32 = vadd.f32 %v3278_v36, %v7918_v41 }
0x2468   : > { %v3280_v40 = vsel %vm1014_vm5, %v3279_v32, -inf }
0x2469   : > { %3281 = vmax.xlane.f32.xlu0 %v3280_v40 }
0x247f   : > { %3292 = vrot.lane.b32.xlu0 %v8269_v54, %s9099_s26  ;;  %s9101_s26 = sld [smem:[#allocation16_spill]] }
0x24f6   : > { %v3282_v42 = vpop.xlane.xlu0 %3281 }
0x24f7   : > { %v3283_v43 = vsub.f32 %v3279_v32, %v3282_v42  ;;  %v6494_v42 = vld [vmem:[%s9101_s26 + $0x1] ss:$0 sm:$0xff] }
0x24f9   : > { %v3284_v44 = vmul.f32 1.442695, %v3283_v43 }
0x24fa   : > { %v3293_v45 = vpop.permute.xlu0 %3292 }
0x24fb   : > { %7615 = vpow2.f32 %v3284_v44  ;;  %v3298_v46 = vand.u32 %v3293_v45, %v7935_v7 }
0x24fd   : > { %7159 = vmatpush3.bf16.msra.mxu1 %v3298_v46 }
0x24fe   : > { %7170 = vmatprep.subr.bf16.mxu1 %v7687_v15 }
0x2505   : > { %v7616_v48 = vpop.eup %7615 }
0x2506   : > { %v3286_v49 = vsel %vm1014_vm5, %v7616_v48, 0.0 }
0x2507   : > { %3287 = vadd.xlane.f32.xlu1 %v3286_v49 }
0x2531   : > { %v3221_v50 = vpop.f32.mrb[84].mxu1 }
0x2532   : > { %v3227_v51 = vadd.f32 %v3221_v50, %v8333_v60  ;;  %v7150_v52 = vpop.f32.mrb[85].mxu1 }
0x2533   : > { %v3224_v53 = vpop.f32.mrb[86].mxu1 }
0x2534   : > { %v7151_v54 = vpop.f32.mrb[87].mxu1 }
0x2594   : > { %v3288_v55 = vpop.xlane.xlu1 %3287 }
0x2595   : > { %7617 = vrcp.f32 %v3288_v55 }
0x259f   : > { %v7618_v30 = vpop.eup %7617 }
0x25a0   : > { %v3290_v12 = vmul.f32 %v7618_v30, %v7616_v48 }
0x25a2   : > { %v3291_v56 = vpack.c.bf16 %v3290_v12, %v3290_v12 }
0x25a4   : > { %7161 = vmatmul.mubr.msk.bf16.vlgmr.msra.gmra.mrb[88].mxu1 %vm1029_vm8, %v3291_v56 }
0x25a5   : > { %7174 = vmatprep.mubr.msk.bf16.mxu1 %vm7688_vm1, %v7687_v15  ;;  %7171 = vmatpush3.bf16.msra.mxu1 %v7533_v19 }
0x25a6   : > { %7172 = vmatprep.subr.bf16.mxu1 %v7687_v15 }
0x25a9   : > { %7173 = vmatpush3.bf16.msra.mxu1 %v7534_v21 }
0x25aa   : > { %7186 = vmatprep.subr.bf16.mxu1 %v7687_v15 }
0x2677   : > { %v3334_v59 = vpop.f32.mrb[88].mxu1 }
0x2678   : > { %v3340_v60 = vpack.c.bf16 %v3334_v59, %v3334_v59  ;;  %v7162_v61 = vpop.f32.mrb[89].mxu1 }
0x2679   : > { %v3337_v62 = vpop.f32.mrb[90].mxu1 }
0x267a   : > { %v7163_v25 = vpop.f32.mrb[91].mxu1  ;;  %7167 = vmatmul.mubr.msk.bf16.vlgmr.msra.gmra.mrb[72].mxu0 %vm965_vm3, %v3340_v60 }
0x267b   : > { %7182 = vmatprep.mubr.msk.bf16.mxu0 %vm7688_vm1, %v7687_v15  ;;  %7179 = vmatpush3.bf16.msra.mxu0 %v7531_v18 }
0x267c   : > { %7180 = vmatprep.subr.bf16.mxu0 %v7687_v15 }
0x274d   : > { %v3381_v1 = vpop.f32.mrb[72].mxu0 }
0x274e   : > { %v3387_v2 = vadd.f32 %v3381_v1, %v3227_v51  ;;  %v7168_v3 = vpop.f32.mrb[73].mxu0 }
0x274f   : > { %v3384_v4 = vpop.f32.mrb[74].mxu0 }
0x2750   : > { %v3394_v5 = vadd.f32 %v6484_v0, %v3387_v2  ;;  %v7169_v6 = vpop.f32.mrb[75].mxu0 }
0x2752   : > { %v3395_v9 = vadd.f32 %v3394_v5, %v8259_v47  ;;  %v7532_v47 = vld [vmem:[%s8997_s13 + $0x18] sm:$0xff]  }
0x2753   : > { %7181 = vmatpush3.bf16.msra.mxu0 %v7532_v47 }
0x2754   : > { %v3400_v10 = vsel %vm849_vm0, %v3395_v9, 0.0  ;;  %7192 = vmatprep.subr.bf16.mxu0 %v7687_v15 }
0x2755   : > { %3401 = vadd.xlane.f32.xlu1 %v3400_v10 }
0x2756   : > { %7183 = vmatmul.mubr.msk.bf16.vlgmr.msra.gmra.mrb[76].mxu0 %vm912_vm2, %v8033_v63 }
0x2757   : > { %7194 = vmatprep.mubr.msk.bf16.mxu0 %vm7688_vm1, %v7687_v15 }
0x27e2   : > { %v3402_v11 = vpop.xlane.xlu1 %3401 }
0x27e3   : > { %v3403_v13 = vmul.f32 0.03125, %v3402_v11 }
0x27e5   : > { %v3404_v14 = vsub.f32 %v3395_v9, %v3403_v13 }
0x27e7   : > { %v3405_v16 = vmul.f32 %v3404_v14, %v3404_v14 }
0x27e9   : > { %v3406_v17 = vsel %vm849_vm0, %v3405_v16, 0.0 }
0x27ea   : > { %3407 = vadd.xlane.f32.xlu1 %v3406_v17 }
0x2829   : > { %v3555_v35 = vpop.f32.mrb[76].mxu0 }
0x282a   : > { %v3556_v36 = vadd.f32 %v6503_v20, %v3555_v35  ;;  %v7184_v37 = vpop.f32.mrb[77].mxu0 }
0x282b   : > { %v3558_v38 = vpop.f32.mrb[78].mxu0 }
0x282c   : > { %v8423_v39 = vpack.c.bf16 %v3556_v36, %v3556_v36  ;;  %v7185_v32 = vpop.f32.mrb[79].mxu0 }
0x282e   : > { %3683 = vrot.lane.b32.xlu1 %v8423_v39, %s9086_s3  ;;  %v3574_v40 = vsel %vm965_vm3, %v8423_v39, 0 }
0x2877   : > { %v3408_v22 = vpop.xlane.xlu1 %3407 }
0x2878   : > { %v3409_v23 = vmul.f32 0.03125, %v3408_v22 }
0x287a   : > { %v3410_v24 = vadd.f32 1e-12, %v3409_v23 }
0x287c   : > { %7619 = vrsqrt.f32 %v3410_v24 }
0x2886   : > { %v7620_v26 = vpop.eup %7619 }
0x2887   : > { %v3412_v28 = vmul.f32 %v7620_v26, %v3404_v14 }
0x2889   : > { %v3419_v31 = vmul.f32 %v6487_v27, %v3412_v28  ;;  %v6507_v28 = vld [vmem:[%s9102_s25 + $0x10] sm:$0xf] }
0x288b   : > { %v8413_v33 = vadd.f32 %v6488_v29, %v3419_v31  ;;  %v3844_v29 = vsel %vm1034_vm7, %v6507_v28, 0  ;;  %v6508_v31 = vld [vmem:[%s9102_s25 + $0x14] sm:$0xf] }
0x288d   : > { %v3434_v34 = vpack.c.bf16 %v8413_v33, %v8413_v33 }
0x288f   : > { %7175 = vmatmul.mubr.msk.bf16.vlgmr.msra.gmra.mrb[92].mxu1 %vm912_vm2, %v3434_v34  ;;  %v3798_v34 = vsel %vm1034_vm7, %v6508_v31, 0 }
0x2890   : > { %7188 = vmatprep.mubr.msk.bf16.mxu1 %vm7688_vm1, %v7687_v15  ;;  %7187 = vmatpush3.bf16.xpose.msra.mxu1 %v3574_v40 }
0x2891   : > { %7198 = vmatprep.subr.bf16.mxu1 %v7687_v15 }
0x28a0   : > { %v3684_v44 = vpop.permute.xlu1 %3683 }
0x28a1   : > { %v3689_v51 = vsel %vm965_vm3, %v3684_v44, 0 }
0x2962   : > { %v3490_v43 = vpop.f32.mrb[92].mxu1 }
0x2963   : > { %v3491_v45 = vadd.f32 %v6494_v42, %v3490_v43  ;;  %v7176_v46 = vpop.f32.mrb[93].mxu1 }
0x2964   : > { %v3493_v48 = vpop.f32.mrb[94].mxu1 }
0x2965   : > { %v8433_v49 = vpack.c.bf16 %v3491_v45, %v3491_v45  ;;  %v7177_v50 = vpop.f32.mrb[95].mxu1 }
0x2967   : > { %3681 = vrot.lane.b32.xlu0 %v8433_v49, %s9086_s3  ;;  %7189 = vmatmul.mubr.msk.bf16.vlgmr.msra.gmra.mrb[96].mxu1 %vm965_vm3, %v8433_v49 }
0x2968   : > { %7199 = vmatpush3.bf16.xpose.msra.mxu1 %v3689_v51  ;;  %7200 = vmatprep.mubr.msk.bf16.mxu1 %vm7688_vm1, %v7687_v15 }
0x2969   : > { %7210 = vmatprep.subr.bf16.mxu1 %v7687_v15 }
0x29d9   : > { %v3682_v52 = vpop.permute.xlu0 %3681 }
0x29da   : > { %7201 = vmatmul.mubr.msk.bf16.vlgmr.msra.gmra.mrb[100].mxu1 %vm965_vm3, %v3682_v52 }
0x29db   : > { %7212 = vmatprep.mubr.msk.bf16.mxu1 %vm7688_vm1, %v7687_v15  ;;  %7211 = vmatpush3.bf16.msra.mxu1 %v3798_v34 }
0x29dc   : > { %7222 = vmatprep.subr.bf16.mxu1 %v7687_v15 }
0x2a3a   : > { %v3610_v53 = vpop.f32.mrb[96].mxu1 }
0x2a3b   : > { %v3616_v54 = vmul.f32 0.35355338, %v3610_v53  ;;  %v7190_v55 = vpop.f32.mrb[97].mxu1 }
0x2a3c   : > { %v3613_v30 = vpop.f32.mrb[98].mxu1 }
0x2a3d   : > { %v7191_v12 = vpop.f32.mrb[99].mxu1  ;;  %v3617_v56 = vadd.f32 %v3616_v54, %v7864_v8 }
0x2a3f   : > { %v3618_v57 = vsel %vm1838_vm9, %v3617_v56, -inf }
0x2a40   : > { %3619 = vmax.xlane.f32.xlu0 %v3618_v57 }
0x2aad   : > { %v3725_v58 = vpop.f32.mrb[100].mxu1 }
0x2aae   : > { %v3731_v59 = vmul.f32 0.35355338, %v3725_v58  ;;  %v7202_v60 = vpop.f32.mrb[101].mxu1 }
0x2aaf   : > { %v3728_v61 = vpop.f32.mrb[102].mxu1 }
0x2ab0   : > { %v7203_v62 = vpop.f32.mrb[103].mxu1  ;;  %v3732_v25 = vadd.f32 %v3731_v59, %v7864_v8 }
0x2ab2   : > { %v3733_v0 = vsel %vm1838_vm9, %v3732_v25, -inf }
0x2ab3   : > { %3734 = vmax.xlane.f32.xlu1 %v3733_v0 }
0x2ac4   : > { %3745 = vrot.lane.b32.xlu1 %v8423_v39, %s9090_s30 }
0x2ac8   : > { %3888 = vrot.lane.b32.xlu1 %v8423_v39, %s9089_s10 }
0x2acd   : > { %v3620_v1 = vpop.xlane.xlu0 %3619 }
0x2ace   : > { %v3621_v2 = vsub.f32 %v3617_v56, %v3620_v1 }
0x2ad0   : > { %v3622_v3 = vmul.f32 1.442695, %v3621_v2 }
0x2ad2   : > { %7621 = vpow2.f32 %v3622_v3 }
0x2adc   : > { %v7622_v4 = vpop.eup %7621 }
0x2add   : > { %v3624_v5 = vsel %vm1838_vm9, %v7622_v4, 0.0 }
0x2ade   : > { %3625 = vadd.xlane.f32.xlu0 %v3624_v5 }
0x2b40   : > { %v3735_v6 = vpop.xlane.xlu1 %3734 }
0x2b41   : > { %v3736_v9 = vsub.f32 %v3732_v25, %v3735_v6 }
0x2b43   : > { %v3737_v10 = vmul.f32 1.442695, %v3736_v9 }
0x2b44   : > { %v3746_v21 = vpop.permute.xlu1 %3745 }
0x2b45   : > { %7623 = vpow2.f32 %v3737_v10  ;;  %v3751_v23 = vsel %vm1034_vm7, %v3746_v21, 0 }
0x2b48   : > { %v3889_v32 = vpop.permute.xlu1 %3888 }
0x2b49   : > { %v3894_v45 = vsel %vm965_vm3, %v3889_v32, 0 }
0x2b4f   : > { %v7624_v11 = vpop.eup %7623 }
0x2b50   : > { %v3739_v13 = vsel %vm1838_vm9, %v7624_v11, 0.0 }
0x2b51   : > { %3740 = vadd.xlane.f32.xlu0 %v3739_v13 }
0x2b67   : > { %3631 = vrot.lane.b32.xlu0 %v8423_v39, %s9088_s5 }
0x2b6b   : > { %3886 = vrot.lane.b32.xlu0 %v8433_v49, %s9089_s10  ;;  %v3626_v14 = vpop.xlane.xlu0 %3625 }
0x2b6c   : > { %7625 = vrcp.f32 %v3626_v14 }
0x2b76   : > { %v7626_v16 = vpop.eup %7625 }
0x2b77   : > { %v3628_v18 = vmul.f32 %v7626_v16, %v7622_v4 }
0x2b79   : > { %v3629_v22 = vpack.c.bf16 %v3628_v18, %v3628_v18 }
0x2bde   : > { %v3741_v17 = vpop.xlane.xlu0 %3740 }
0x2bdf   : > { %7627 = vrcp.f32 %v3741_v17  ;;  %v6509_v17 = vld [vmem:[%s9102_s25 + $0x18] sm:$0xf] }
0x2be0   : > { %v4003_v18 = vsel %vm1034_vm7, %v6509_v17, 0 }
0x2be2   : > { %v3632_v47 = vpop.permute.xlu0 %3631 }
0x2be3   : > { %v3637_v19 = vsel %vm1034_vm7, %v3632_v47, 0 }
0x2be4   : > { %7193 = vmatpush3.bf16.msra.mxu0 %v3637_v19 }
0x2be5   : > { %7204 = vmatprep.subr.bf16.mxu0 %v7687_v15 }
0x2be6   : > { %v3887_v48 = vpop.permute.xlu0 %3886 }
0x2be7   : > { %7195 = vmatmul.mubr.msk.bf16.vlgmr.msra.gmra.mrb[80].mxu0 %vm965_vm3, %v3629_v22 }
0x2be8   : > { %7205 = vmatpush3.bf16.msra.mxu0 %v3751_v23  ;;  %7206 = vmatprep.mubr.msk.bf16.mxu0 %vm7688_vm1, %v7687_v15 }
0x2be9   : > { %v7628_v24 = vpop.eup %7627  ;;  %7216 = vmatprep.subr.bf16.mxu0 %v7687_v15 }
0x2bea   : > { %v3743_v26 = vmul.f32 %v7628_v24, %v7624_v11 }
0x2bec   : > { %v3744_v27 = vpack.c.bf16 %v3743_v26, %v3743_v26 }
0x2bef   : > { %7207 = vmatmul.mubr.msk.bf16.vlgmr.msra.gmra.mrb[84].mxu0 %vm965_vm3, %v3744_v27 }
0x2bf0   : > { %7218 = vmatprep.mubr.msk.bf16.mxu0 %vm7688_vm1, %v7687_v15  ;;  %7217 = vmatpush3.bf16.msra.mxu0 %v3844_v29 }
0x2bf1   : > { %7228 = vmatprep.subr.bf16.mxu0 %v7687_v15 }
0x2cba   : > { %v3673_v20 = vpop.f32.mrb[80].mxu0 }
0x2cbb   : > { %v3679_v35 = vpack.c.bf16 %v3673_v20, %v3673_v20  ;;  %v7196_v36 = vpop.f32.mrb[81].mxu0 }
0x2cbc   : > { %v3676_v37 = vpop.f32.mrb[82].mxu0 }
0x2cbd   : > { %v7197_v38 = vpop.f32.mrb[83].mxu0  ;;  %7219 = vmatmul.mubr.msk.bf16.vlgmr.msra.gmra.mrb[88].mxu0 %vm965_vm3, %v3679_v35 }
0x2cbe   : > { %7230 = vmatprep.mubr.msk.bf16.mxu0 %vm7688_vm1, %v7687_v15 }
0x2cc2   : > { %v3787_v40 = vpop.f32.mrb[84].mxu0 }
0x2cc3   : > { %v3793_v42 = vpack.c.bf16 %v3787_v40, %v3787_v40  ;;  %v7208_v43 = vpop.f32.mrb[85].mxu0 }
0x2cc4   : > { %v3790_v44 = vpop.f32.mrb[86].mxu0 }
0x2cc5   : > { %v7209_v46 = vpop.f32.mrb[87].mxu0  ;;  %7213 = vmatmul.mubr.msk.bf16.vlgmr.msra.gmra.mrb[104].mxu1 %vm965_vm3, %v3793_v42 }
0x2cc6   : > { %7223 = vmatpush3.bf16.xpose.msra.mxu1 %v3894_v45  ;;  %7224 = vmatprep.mubr.msk.bf16.mxu1 %vm7688_vm1, %v7687_v15 }
0x2cc7   : > { %7234 = vmatprep.subr.bf16.mxu1 %v7687_v15 }
0x2ccd   : > { %7225 = vmatmul.mubr.msk.bf16.vlgmr.msra.gmra.mrb[108].mxu1 %vm965_vm3, %v3887_v48 }
0x2cce   : > { %7236 = vmatprep.mubr.msk.bf16.mxu1 %vm7688_vm1, %v7687_v15  ;;  %7235 = vmatpush3.bf16.msra.mxu1 %v4003_v18 }
0x2ccf   : > { %7246 = vmatprep.subr.bf16.mxu1 %v7687_v15 }
0x2d90   : > { %v3880_v50 = vpop.f32.mrb[88].mxu0 }
0x2d91   : > { %v7220_v51 = vpop.f32.mrb[89].mxu0 }
0x2d92   : > { %v3883_v52 = vpop.f32.mrb[90].mxu0 }
0x2d93   : > { %v7221_v53 = vpop.f32.mrb[91].mxu0  ;;  %v6510_v52 = vld [vmem:[%s9102_s25 + $0x1c] sm:$0xf]  ;;  %s9107_s25 = sld [smem:[#allocation14_spill]] }
0x2d94   : > { %v4163_v53 = vsel %vm1034_vm7, %v6510_v52, 0 }
0x2d98   : > { %v3834_v54 = vpop.f32.mrb[104].mxu1 }
0x2d99   : > { %v8491_v55 = vadd.f32 %v3880_v50, %v3834_v54  ;;  %v7214_v30 = vpop.f32.mrb[105].mxu1 }
0x2d9a   : > { %v3837_v12 = vpop.f32.mrb[106].mxu1 }
0x2d9b   : > { %v7215_v56 = vpop.f32.mrb[107].mxu1 }
0x2da0   : > { %v3930_v57 = vpop.f32.mrb[108].mxu1 }
0x2da1   : > { %v3936_v58 = vmul.f32 0.35355338, %v3930_v57  ;;  %v7226_v59 = vpop.f32.mrb[109].mxu1  ;;  %v6524_v57 = vld [vmem:[%s9103_s12 + $0x1] ss:$0 sm:$0xff]  ;;  %s9109_s12 = sld [smem:[#allocation16_spill]] }
0x2da2   : > { %v3933_v60 = vpop.f32.mrb[110].mxu1 }
0x2da3   : > { %v7227_v61 = vpop.f32.mrb[111].mxu1  ;;  %v3937_v62 = vadd.f32 %v3936_v58, %v7864_v8 }
0x2da5   : > { %v3938_v25 = vsel %vm1838_vm9, %v3937_v62, -inf }
0x2da6   : > { %3939 = vmax.xlane.f32.xlu1 %v3938_v25 }
0x2db7   : > { %4048 = vrot.lane.b32.xlu1 %v8423_v39, %s9093_s7 }
0x2dbb   : > { %4046 = vrot.lane.b32.xlu1 %v8433_v49, %s9093_s7 }
0x2e33   : > { %v3940_v0 = vpop.xlane.xlu1 %3939 }
0x2e34   : > { %v3941_v1 = vsub.f32 %v3937_v62, %v3940_v0 }
0x2e36   : > { %v3942_v2 = vmul.f32 1.442695, %v3941_v1 }
0x2e37   : > { %v4049_v11 = vpop.permute.xlu1 %4048 }
0x2e38   : > { %7629 = vpow2.f32 %v3942_v2  ;;  %v4054_v14 = vsel %vm965_vm3, %v4049_v11, 0  ;;  %v7539_v11 = vld [vmem:[%s9005_s21 + $0x50] sm:$0xff]  }
0x2e3b   : > { %v4047_v16 = vpop.permute.xlu1 %4046 }
0x2e42   : > { %v7630_v3 = vpop.eup %7629 }
0x2e43   : > { %v3944_v4 = vsel %vm1838_vm9, %v7630_v3, 0.0 }
0x2e44   : > { %3945 = vadd.xlane.f32.xlu0 %v3944_v4 }
0x2e5a   : > { %3950 = vrot.lane.b32.xlu0 %v8423_v39, %s9092_s27 }
0x2ed1   : > { %v3946_v5 = vpop.xlane.xlu0 %3945 }
0x2ed2   : > { %7631 = vrcp.f32 %v3946_v5 }
0x2ed5   : > { %v3951_v6 = vpop.permute.xlu0 %3950 }
0x2ed6   : > { %v3956_v9 = vsel %vm1034_vm7, %v3951_v6, 0 }
0x2ed7   : > { %7229 = vmatpush3.bf16.msra.mxu0 %v3956_v9  ;;  %v7535_v9 = vld [vmem:[%s9003_s19 + $0x10] sm:$0xff]  }
0x2ed8   : > { %7240 = vmatprep.subr.bf16.mxu0 %v7687_v15 }
0x2edc   : > { %v7632_v49 = vpop.eup %7631 }
0x2edd   : > { %v3948_v10 = vmul.f32 %v7632_v49, %v7630_v3  ;;  %v7536_v49 = vld [vmem:[%s9003_s19 + $0x18] sm:$0xff]  }
0x2edf   : > { %v3949_v13 = vpack.c.bf16 %v3948_v10, %v3948_v10  ;;  %v7538_v10 = vld [vmem:[%s9005_s21 + $0x48] sm:$0xff]  }
0x2ee1   : > { %7231 = vmatmul.mubr.msk.bf16.vlgmr.msra.gmra.mrb[92].mxu0 %vm965_vm3, %v3949_v13  ;;  %v7540_v13 = vld [vmem:[%s9005_s21 + $0x58] sm:$0xff]  }
0x2ee2   : > { %7241 = vmatpush3.bf16.xpose.msra.mxu0 %v4054_v14  ;;  %7242 = vmatprep.mubr.msk.bf16.mxu0 %vm7688_vm1, %v7687_v15  ;;  %v7541_v14 = vld [vmem:[%s9005_s21 + $0x60] sm:$0xff]  }
0x2ee3   : > { %7252 = vmatprep.subr.bf16.mxu0 %v7687_v15 }
0x2ee9   : > { %7243 = vmatmul.mubr.msk.bf16.vlgmr.msra.gmra.mrb[96].mxu0 %vm965_vm3, %v4047_v16  ;;  %v7542_v16 = vld [vmem:[%s9005_s21 + $0x68] sm:$0xff]  }
0x2eea   : > { %7254 = vmatprep.mubr.msk.bf16.mxu0 %vm7688_vm1, %v7687_v15  ;;  %7253 = vmatpush3.bf16.msra.mxu0 %v4163_v53 }
0x2eeb   : > { %7266 = vmatprep.subr.bf16.mxu0 %v7687_v15 }
0x2fb4   : > { %v3992_v47 = vpop.f32.mrb[92].mxu0 }
0x2fb5   : > { %v3998_v19 = vpack.c.bf16 %v3992_v47, %v3992_v47  ;;  %v7232_v21 = vpop.f32.mrb[93].mxu0 }
0x2fb6   : > { %v3995_v22 = vpop.f32.mrb[94].mxu0  ;;  %v6527_v21 = vld [vmem:[%s9001_s17 + $0x1] ss:$0 sm:$0xff] }
0x2fb7   : > { %v7233_v23 = vpop.f32.mrb[95].mxu0  ;;  %7237 = vmatmul.mubr.msk.bf16.vlgmr.msra.gmra.mrb[112].mxu1 %vm965_vm3, %v3998_v19 }
0x2fb8   : > { %7248 = vmatprep.mubr.msk.bf16.mxu1 %vm7688_vm1, %v7687_v15  ;;  %v6528_v23 = vld [vmem:[%s9002_s18 + $0x1] ss:$0 sm:$0xff] }
0x2fbc   : > { %v4090_v24 = vpop.f32.mrb[96].mxu0 }
0x2fbd   : > { %v4096_v26 = vmul.f32 0.35355338, %v4090_v24  ;;  %v7244_v27 = vpop.f32.mrb[97].mxu0 }
0x2fbe   : > { %v4093_v28 = vpop.f32.mrb[98].mxu0 }
0x2fbf   : > { %v7245_v29 = vpop.f32.mrb[99].mxu0  ;;  %v4097_v31 = vadd.f32 %v4096_v26, %v7864_v8  ;;  %v7543_v28 = vld [vmem:[%s9005_s21 + $0x70] sm:$0xff]  }
0x2fc0   : > { %v7544_v29 = vld [vmem:[%s9005_s21 + $0x78] sm:$0xff]  }
0x2fc1   : > { %v4098_v34 = vsel %vm1838_vm9, %v4097_v31, -inf }
0x2fc2   : > { %4099 = vmax.xlane.f32.xlu0 %v4098_v34 }
0x2fd8   : > { %4110 = vrot.lane.b32.xlu0 %v8423_v39, %s9094_s28 }
0x304f   : > { %v4100_v20 = vpop.xlane.xlu0 %4099 }
0x3050   : > { %v4101_v35 = vsub.f32 %v4097_v31, %v4100_v20  ;;  %v6534_v31 = vld [vmem:[%s9004_s20 + $0x1] ss:$0 sm:$0xff] }
0x3052   : > { %v4102_v36 = vmul.f32 1.442695, %v4101_v35 }
0x3053   : > { %v4111_v37 = vpop.permute.xlu0 %4110 }
0x3054   : > { %7633 = vpow2.f32 %v4102_v36  ;;  %v4116_v38 = vsel %vm1034_vm7, %v4111_v37, 0 }
0x3055   : > { %7247 = vmatpush3.bf16.msra.mxu1 %v4116_v38 }
0x3056   : > { %7258 = vmatprep.subr.bf16.mxu1 %v7687_v15 }
0x305e   : > { %v7634_v32 = vpop.eup %7633 }
0x305f   : > { %v4104_v40 = vsel %vm1838_vm9, %v7634_v32, 0.0 }
0x3060   : > { %4105 = vadd.xlane.f32.xlu1 %v4104_v40  ;;  %v6555_v40 = vld [vmem:[%s9006_s22 + $0x1] ss:$0 sm:$0xff] }
0x308a   : > { %v4039_v42 = vpop.f32.mrb[112].mxu1 }
0x308b   : > { %v4045_v43 = vadd.f32 %v4039_v42, %v8491_v55  ;;  %v7238_v44 = vpop.f32.mrb[113].mxu1 }
0x308c   : > { %v4042_v45 = vpop.f32.mrb[114].mxu1 }
0x308d   : > { %v7239_v39 = vpop.f32.mrb[115].mxu1 }
0x30ed   : > { %v4106_v46 = vpop.xlane.xlu1 %4105 }
0x30ee   : > { %7635 = vrcp.f32 %v4106_v46 }
0x30f8   : > { %v7636_v48 = vpop.eup %7635 }
0x30f9   : > { %v4108_v50 = vmul.f32 %v7636_v48, %v7634_v32 }
0x30fb   : > { %v4109_v51 = vpack.c.bf16 %v4108_v50, %v4108_v50 }
0x30fd   : > { %7249 = vmatmul.mubr.msk.bf16.vlgmr.msra.gmra.mrb[116].mxu1 %vm965_vm3, %v4109_v51 }
0x30fe   : > { %7262 = vmatprep.mubr.msk.bf16.mxu1 %vm7688_vm1, %v7687_v15  ;;  %7259 = vmatpush3.bf16.msra.mxu1 %v7535_v9 }
0x30ff   : > { %7260 = vmatprep.subr.bf16.mxu1 %v7687_v15 }
0x3102   : > { %7261 = vmatpush3.bf16.msra.mxu1 %v7536_v49 }
0x3103   : > { %7286 = vmatprep.subr.bf16.mxu1 %v7687_v15 }
0x31d0   : > { %v4152_v54 = vpop.f32.mrb[116].mxu1 }
0x31d1   : > { %v4158_v55 = vpack.c.bf16 %v4152_v54, %v4152_v54  ;;  %v7250_v30 = vpop.f32.mrb[117].mxu1 }
0x31d2   : > { %v4155_v12 = vpop.f32.mrb[118].mxu1  ;;  %v7546_v30 = vld [vmem:[%s9075_s2 + $0x28] sm:$0xff]  }
0x31d3   : > { %v7251_v56 = vpop.f32.mrb[119].mxu1  ;;  %7255 = vmatmul.mubr.msk.bf16.vlgmr.msra.gmra.mrb[100].mxu0 %vm965_vm3, %v4158_v55  ;;  %v7545_v55 = vld [vmem:[%s9075_s2 + $0x20] sm:$0xff]  }
0x31d4   : > { %7282 = vmatprep.mubr.msk.bf16.mxu0 %vm7688_vm1, %v7687_v15 }
0x32a6   : > { %v4199_v58 = vpop.f32.mrb[100].mxu0 }
0x32a7   : > { %v4205_v59 = vadd.f32 %v4199_v58, %v4045_v43  ;;  %v7256_v60 = vpop.f32.mrb[101].mxu0 }
0x32a8   : > { %v4202_v61 = vpop.f32.mrb[102].mxu0 }
0x32a9   : > { %v4212_v62 = vadd.f32 %v6524_v57, %v4205_v59  ;;  %v7257_v25 = vpop.f32.mrb[103].mxu0  ;;  %v6566_v59 = vld [vmem:[%s9007_s23 + $0x1] ss:$0 sm:$0xff] }
0x32aa   : > { %v6567_v61 = vld [vmem:[%s9008_s24 + $0x1] ss:$0 sm:$0xff] }
0x32ab   : > { %v4213_v0 = vadd.f32 %v4212_v62, %v8413_v33  ;;  %v7537_v33 = vld [vmem:[%s9005_s21 + $0x40] sm:$0xff]  }
0x32ac   : > { %7267 = vmatpush3.bf16.msra.mxu0 %v7537_v33 }
0x32ad   : > { %v4218_v1 = vsel %vm849_vm0, %v4213_v0, 0.0  ;;  %7268 = vmatprep.subr.bf16.mxu0 %v7687_v15 }
0x32ae   : > { %4219 = vadd.xlane.f32.xlu1 %v4218_v1  ;;  %v6573_v1 = vld [vmem:[%s9078_s6 + $0x2] ss:$0 sm:$0xff] }
0x32b0   : > { %7269 = vmatpush3.bf16.msra.mxu0 %v7538_v10 }
0x32b1   : > { %7270 = vmatprep.subr.bf16.mxu0 %v7687_v15 }
0x32b4   : > { %7271 = vmatpush3.bf16.msra.mxu0 %v7539_v11 }
0x32b5   : > { %7272 = vmatprep.subr.bf16.mxu0 %v7687_v15 }
0x32b8   : > { %7273 = vmatpush3.bf16.msra.mxu0 %v7540_v13 }
0x32b9   : > { %7274 = vmatprep.subr.bf16.mxu0 %v7687_v15 }
0x32bc   : > { %7275 = vmatpush3.bf16.msra.mxu0 %v7541_v14 }
0x32bd   : > { %7276 = vmatprep.subr.bf16.mxu0 %v7687_v15 }
0x32c0   : > { %7277 = vmatpush3.bf16.msra.mxu0 %v7542_v16 }
0x32c1   : > { %7278 = vmatprep.subr.bf16.mxu0 %v7687_v15 }
0x32c4   : > { %7279 = vmatpush3.bf16.msra.mxu0 %v7543_v28 }
0x32c5   : > { %7280 = vmatprep.subr.bf16.mxu0 %v7687_v15 }
0x32c8   : > { %7281 = vmatpush3.bf16.msra.mxu0 %v7544_v29 }
0x32c9   : > { %7312 = vmatprep.subr.bf16.mxu0 %v7687_v15 }
0x333b   : > { %v4220_v2 = vpop.xlane.xlu1 %4219 }
0x333c   : > { %v4221_v3 = vmul.f32 0.03125, %v4220_v2 }
0x333e   : > { %v4222_v4 = vsub.f32 %v4213_v0, %v4221_v3 }
0x3340   : > { %v4223_v5 = vmul.f32 %v4222_v4, %v4222_v4 }
0x3342   : > { %v4224_v6 = vsel %vm849_vm0, %v4223_v5, 0.0 }
0x3343   : > { %4225 = vadd.xlane.f32.xlu1 %v4224_v6 }
0x33d0   : > { %v4226_v17 = vpop.xlane.xlu1 %4225 }
0x33d1   : > { %v4227_v18 = vmul.f32 0.03125, %v4226_v17 }
0x33d3   : > { %v4228_v47 = vadd.f32 1e-12, %v4227_v18 }
0x33d5   : > { %7637 = vrsqrt.f32 %v4228_v47 }
0x33df   : > { %v7638_v19 = vpop.eup %7637 }
0x33e0   : > { %v4230_v22 = vmul.f32 %v7638_v19, %v4222_v4 }
0x33e2   : > { %v4237_v24 = vmul.f32 %v6527_v21, %v4230_v22 }
0x33e4   : > { %v4244_v26 = vadd.f32 %v6528_v23, %v4237_v24 }
0x33e6   : > { %v4252_v27 = vpack.c.bf16 %v4244_v26, %v4244_v26 }
0x33e8   : > { %7263 = vmatmul.mubr.msk.bf16.vlgmr.msra.gmra.mrb[120].mxu1 %vm912_vm2, %v4252_v27 }
0x33e9   : > { %7290 = vmatprep.mubr.msk.bf16.mxu1 %vm7688_vm1, %v7687_v15  ;;  %7287 = vmatpush3.bf16.msra.mxu1 %v7545_v55 }
0x33ea   : > { %7288 = vmatprep.subr.bf16.mxu1 %v7687_v15 }
0x33ed   : > { %7289 = vmatpush3.bf16.msra.mxu1 %v7546_v30 }
0x33ee   : > { %7294 = vmatprep.subr.bf16.mxu1 %v7687_v15 }
0x34bb   : > { %v4308_v34 = vpop.f32.mrb[120].mxu1 }
0x34bc   : > { %v4309_v20 = vadd.f32 %v6534_v31, %v4308_v34  ;;  %v7264_v35 = vpop.f32.mrb[121].mxu1 }
0x34bd   : > { %v4311_v36 = vpop.f32.mrb[122].mxu1 }
0x34be   : > { %v4314_v37 = vmax.f32 %v4309_v20, 0.0  ;;  %v7265_v38 = vpop.f32.mrb[123].mxu1 }
0x34c0   : > { %v4334_v32 = vpack.c.bf16 %v4314_v37, %v4314_v37 }
0x34c2   : > { %7283 = vmatmul.mubr.bf16.vlgmr.msra.gmra.mrb[104].mxu0 %v4334_v32 }
0x34c3   : > { %7314 = vmatprep.mubr.msk.bf16.mxu0 %vm7688_vm1, %v7687_v15 }
0x3595   : > { %v4423_v42 = vpop.f32.mrb[104].mxu0 }
0x3596   : > { %v4424_v43 = vadd.f32 %v6555_v40, %v4423_v42  ;;  %v7284_v44 = vpop.f32.mrb[105].mxu0 }
0x3597   : > { %v4426_v45 = vpop.f32.mrb[106].mxu0 }
0x3598   : > { %v7285_v39 = vpop.f32.mrb[107].mxu0  ;;  %v4429_v46 = vadd.f32 %v4424_v43, %v4244_v26 }
0x359a   : > { %v4434_v48 = vsel %vm849_vm0, %v4429_v46, 0.0 }
0x359b   : > { %4435 = vadd.xlane.f32.xlu1 %v4434_v48 }
0x3628   : > { %v4436_v50 = vpop.xlane.xlu1 %4435 }
0x3629   : > { %v4437_v51 = vmul.f32 0.03125, %v4436_v50 }
0x362b   : > { %v4438_v52 = vsub.f32 %v4429_v46, %v4437_v51 }
0x362d   : > { %v4439_v53 = vmul.f32 %v4438_v52, %v4438_v52 }
0x362f   : > { %v4440_v54 = vsel %vm849_vm0, %v4439_v53, 0.0 }
0x3630   : > { %4441 = vadd.xlane.f32.xlu1 %v4440_v54  ;;  %v6578_v54 = vld [vmem:[%s9079_s29 + $0x24] sm:$0xf] }
0x3631   : > { %v4767_v55 = vsel %vm1034_vm7, %v6578_v54, 0 }
0x36bd   : > { %v4442_v12 = vpop.xlane.xlu1 %4441 }
0x36be   : > { %v4443_v56 = vmul.f32 0.03125, %v4442_v12 }
0x36c0   : > { %v4444_v57 = vadd.f32 1e-12, %v4443_v56 }
0x36c2   : > { %7639 = vrsqrt.f32 %v4444_v57 }
0x36cc   : > { %v7640_v58 = vpop.eup %7639 }
0x36cd   : > { %v4446_v60 = vmul.f32 %v7640_v58, %v4438_v52  ;;  %v6577_v58 = vld [vmem:[%s9079_s29 + $0x20] sm:$0xf] }
0x36cf   : > { %v4453_v62 = vmul.f32 %v6566_v59, %v4446_v60 }
0x36d1   : > { %v8618_v25 = vadd.f32 %v6567_v61, %v4453_v62  ;;  %v4813_v61 = vsel %vm1034_vm7, %v6577_v58, 0 }
0x36d3   : > { %v4468_v0 = vpack.c.bf16 %v8618_v25, %v8618_v25 }
0x36d5   : > { %7291 = vmatmul.mubr.msk.bf16.vlgmr.msra.gmra.mrb[124].mxu1 %vm912_vm2, %v4468_v0 }
0x36d6   : > { %7296 = vmatprep.mubr.msk.bf16.mxu1 %vm7688_vm1, %v7687_v15 }
0x37a8   : > { %v4524_v2 = vpop.f32.mrb[124].mxu1 }
0x37a9   : > { %v4525_v3 = vadd.f32 %v6573_v1, %v4524_v2  ;;  %v7292_v4 = vpop.f32.mrb[125].mxu1 }
0x37aa   : > { %v4527_v5 = vpop.f32.mrb[126].mxu1 }
0x37ab   : > { %v8628_v6 = vpack.c.bf16 %v4525_v3, %v4525_v3  ;;  %v7293_v9 = vpop.f32.mrb[127].mxu1 }
0x37ad   : > { %4539 = vrot.lane.b32.xlu0 %v8628_v6, %s9088_s5 }
0x381f   : > { %v4540_v49 = vpop.permute.xlu0 %4539 }
0x3820   : > { %v4545_v33 = vsel %vm965_vm3, %v4540_v49, 0 }
0x3821   : > { %7295 = vmatpush3.bf16.xpose.msra.mxu1 %v4545_v33 }
0x3822   : > { %7300 = vmatprep.subr.bf16.mxu1 %v7687_v15 }
0x3828   : > { %7297 = vmatmul.mubr.msk.bf16.vlgmr.msra.gmra.mrb[128].mxu1 %vm965_vm3, %v8628_v6 }
0x3829   : > { %7302 = vmatprep.mubr.msk.bf16.mxu1 %vm7688_vm1, %v7687_v15 }
0x38fb   : > { %v4581_v10 = vpop.f32.mrb[128].mxu1 }
0x38fc   : > { %v4587_v11 = vmul.f32 0.35355338, %v4581_v10  ;;  %v7298_v13 = vpop.f32.mrb[129].mxu1 }
0x38fd   : > { %v4584_v14 = vpop.f32.mrb[130].mxu1 }
0x38fe   : > { %v7299_v16 = vpop.f32.mrb[131].mxu1  ;;  %v4588_v17 = vadd.f32 %v4587_v11, %v7918_v41 }
0x3900   : > { %v4589_v18 = vsel %vm1014_vm5, %v4588_v17, -inf }
0x3901   : > { %4590 = vmax.xlane.f32.xlu1 %v4589_v18 }
0x3912   : > { %4601 = vrot.lane.b32.xlu1 %v8628_v6, %s9096_s14  ;;  %s9105_s14 = sld [smem:[#allocation12_spill]] }
0x3916   : > { %4652 = vrot.lane.b32.xlu1 %v8628_v6, %s9090_s30 }
0x391a   : > { %4650 = vrot.lane.b32.xlu1 %v8628_v6, %s9086_s3 }
0x398e   : > { %v4591_v47 = vpop.xlane.xlu1 %4590 }
0x398f   : > { %v4592_v19 = vsub.f32 %v4588_v17, %v4591_v47 }
0x3991   : > { %v4593_v21 = vmul.f32 1.442695, %v4592_v19 }
0x3992   : > { %v4602_v22 = vpop.permute.xlu1 %4601 }
0x3993   : > { %7641 = vpow2.f32 %v4593_v21  ;;  %v4607_v23 = vand.u32 %v4602_v22, %v7935_v7 }
0x3995   : > { %7301 = vmatpush3.bf16.msra.mxu1 %v4607_v23 }
0x3996   : > { %7306 = vmatprep.subr.bf16.mxu1 %v7687_v15  ;;  %v4653_v31 = vpop.permute.xlu1 %4652 }
0x3997   : > { %v4658_v20 = vsel %vm965_vm3, %v4653_v31, 0 }
0x399a   : > { %v4651_v35 = vpop.permute.xlu1 %4650 }
0x399d   : > { %v7642_v24 = vpop.eup %7641 }
0x399e   : > { %v4595_v26 = vsel %vm1014_vm5, %v7642_v24, 0.0 }
0x399f   : > { %4596 = vadd.xlane.f32.xlu0 %v4595_v26 }
0x3a2c   : > { %v4597_v27 = vpop.xlane.xlu0 %4596 }
0x3a2d   : > { %7643 = vrcp.f32 %v4597_v27 }
0x3a37   : > { %v7644_v28 = vpop.eup %7643 }
0x3a38   : > { %v4599_v29 = vmul.f32 %v7644_v28, %v7642_v24 }
0x3a3a   : > { %v4600_v34 = vpack.c.bf16 %v4599_v29, %v4599_v29 }
0x3a3c   : > { %7303 = vmatmul.mubr.msk.bf16.vlgmr.msra.gmra.mrb[132].mxu1 %vm1029_vm8, %v4600_v34 }
0x3a3d   : > { %7307 = vmatpush3.bf16.xpose.msra.mxu1 %v4658_v20  ;;  %7308 = vmatprep.mubr.msk.bf16.mxu1 %vm7688_vm1, %v7687_v15 }
0x3a3e   : > { %7318 = vmatprep.subr.bf16.mxu1 %v7687_v15 }
0x3a44   : > { %7309 = vmatmul.mubr.msk.bf16.vlgmr.msra.gmra.mrb[136].mxu1 %vm965_vm3, %v4651_v35 }
0x3a45   : > { %7320 = vmatprep.mubr.msk.bf16.mxu1 %vm7688_vm1, %v7687_v15  ;;  %7319 = vmatpush3.bf16.msra.mxu1 %v4767_v55 }
0x3a46   : > { %7330 = vmatprep.subr.bf16.mxu1 %v7687_v15 }
0x3b0f   : > { %v4643_v36 = vpop.f32.mrb[132].mxu1 }
0x3b10   : > { %v7304_v37 = vpop.f32.mrb[133].mxu1  ;;  %v4649_v62 = vpack.c.bf16 %v4643_v36, %v4643_v36 }
0x3b11   : > { %v4646_v38 = vpop.f32.mrb[134].mxu1 }
0x3b12   : > { %v7305_v32 = vpop.f32.mrb[135].mxu1 }
0x3b17   : > { %v4694_v40 = vpop.f32.mrb[136].mxu1 }
0x3b18   : > { %v4700_v42 = vmul.f32 0.35355338, %v4694_v40  ;;  %v7310_v43 = vpop.f32.mrb[137].mxu1 }
0x3b19   : > { %v4697_v44 = vpop.f32.mrb[138].mxu1 }
0x3b1a   : > { %v4701_v45 = vadd.f32 %v4700_v42, %v7918_v41  ;;  %v7311_v39 = vpop.f32.mrb[139].mxu1 }
0x3b1c   : > { %v4702_v46 = vsel %vm1014_vm5, %v4701_v45, -inf }
0x3b1d   : > { %4703 = vmax.xlane.f32.xlu1 %v4702_v46 }
0x3baa   : > { %v4704_v48 = vpop.xlane.xlu1 %4703 }
0x3bab   : > { %v4705_v50 = vsub.f32 %v4701_v45, %v4704_v48  ;;  %v6579_v45 = vld [vmem:[%s9079_s29 + $0x28] sm:$0xf] }
0x3bac   : > { %v4972_v39 = vsel %vm1034_vm7, %v6579_v45, 0 }
0x3bad   : > { %v4706_v51 = vmul.f32 1.442695, %v4705_v50 }
0x3baf   : > { %7645 = vpow2.f32 %v4706_v51 }
0x3bb9   : > { %v7646_v52 = vpop.eup %7645 }
0x3bba   : > { %v4708_v53 = vsel %vm1014_vm5, %v7646_v52, 0.0 }
0x3bbb   : > { %4709 = vadd.xlane.f32.xlu0 %v4708_v53 }
0x3bd1   : > { %4714 = vrot.lane.b32.xlu0 %v8628_v6, %s9097_s16  ;;  %s9114_s16 = sld [smem:[#allocation3_spill]] }
0x3bd5   : > { %4857 = vrot.lane.b32.xlu0 %v8628_v6, %s9092_s27 }
0x3bd9   : > { %4855 = vrot.lane.b32.xlu0 %v8628_v6, %s9089_s10 }
0x3c48   : > { %v4710_v30 = vpop.xlane.xlu0 %4709 }
0x3c49   : > { %7647 = vrcp.f32 %v4710_v30 }
0x3c4c   : > { %v4715_v12 = vpop.permute.xlu0 %4714 }
0x3c4d   : > { %v4720_v56 = vand.u32 %v4715_v12, %v7935_v7 }
0x3c4f   : > { %7313 = vmatpush3.bf16.msra.mxu0 %v4720_v56 }
0x3c50   : > { %7324 = vmatprep.subr.bf16.mxu0 %v7687_v15  ;;  %v4858_v0 = vpop.permute.xlu0 %4857 }
0x3c51   : > { %v4863_v5 = vsel %vm965_vm3, %v4858_v0, 0 }
0x3c53   : > { %v7648_v57 = vpop.eup %7647 }
0x3c54   : > { %v4712_v59 = vmul.f32 %v7648_v57, %v7646_v52  ;;  %v4856_v10 = vpop.permute.xlu0 %4855 }
0x3c56   : > { %v4713_v60 = vpack.c.bf16 %v4712_v59, %v4712_v59 }
0x3c58   : > { %7315 = vmatmul.mubr.msk.bf16.vlgmr.msra.gmra.mrb[108].mxu0 %vm1029_vm8, %v4713_v60 }
0x3c59   : > { %7325 = vmatpush3.bf16.msra.mxu0 %v4813_v61  ;;  %7326 = vmatprep.mubr.msk.bf16.mxu0 %vm7688_vm1, %v7687_v15 }
0x3c5a   : > { %7336 = vmatprep.subr.bf16.mxu0 %v7687_v15 }
0x3c60   : > { %7327 = vmatmul.mubr.msk.bf16.vlgmr.msra.gmra.mrb[112].mxu0 %vm965_vm3, %v4649_v62 }
0x3c61   : > { %7338 = vmatprep.mubr.msk.bf16.mxu0 %vm7688_vm1, %v7687_v15 }
0x3d2b   : > { %v4756_v1 = vpop.f32.mrb[108].mxu0 }
0x3d2c   : > { %v4762_v2 = vpack.c.bf16 %v4756_v1, %v4756_v1  ;;  %v7316_v3 = vpop.f32.mrb[109].mxu0 }
0x3d2d   : > { %v4759_v4 = vpop.f32.mrb[110].mxu0 }
0x3d2e   : > { %v7317_v9 = vpop.f32.mrb[111].mxu0  ;;  %7321 = vmatmul.mubr.msk.bf16.vlgmr.msra.gmra.mrb[140].mxu1 %vm965_vm3, %v4762_v2 }
0x3d2f   : > { %7331 = vmatpush3.bf16.xpose.msra.mxu1 %v4863_v5  ;;  %7332 = vmatprep.mubr.msk.bf16.mxu1 %vm7688_vm1, %v7687_v15 }
0x3d30   : > { %7342 = vmatprep.subr.bf16.mxu1 %v7687_v15 }
0x3d33   : > { %v4849_v49 = vpop.f32.mrb[112].mxu0 }
0x3d34   : > { %v7328_v33 = vpop.f32.mrb[113].mxu0 }
0x3d35   : > { %v4852_v11 = vpop.f32.mrb[114].mxu0 }
0x3d36   : > { %v7329_v13 = vpop.f32.mrb[115].mxu0  ;;  %7333 = vmatmul.mubr.msk.bf16.vlgmr.msra.gmra.mrb[144].mxu1 %vm965_vm3, %v4856_v10 }
0x3d37   : > { %7344 = vmatprep.mubr.msk.bf16.mxu1 %vm7688_vm1, %v7687_v15  ;;  %7343 = vmatpush3.bf16.msra.mxu1 %v4972_v39 }
0x3d38   : > { %7354 = vmatprep.subr.bf16.mxu1 %v7687_v15 }
0x3e01   : > { %v4803_v14 = vpop.f32.mrb[140].mxu1 }
0x3e02   : > { %v8692_v16 = vadd.f32 %v4849_v49, %v4803_v14  ;;  %v7322_v17 = vpop.f32.mrb[141].mxu1 }
0x3e03   : > { %v4806_v18 = vpop.f32.mrb[142].mxu1 }
0x3e04   : > { %v7323_v47 = vpop.f32.mrb[143].mxu1  ;;  %v6594_v18 = vld [vmem:[%s9105_s14 + $0x2] ss:$0 sm:$0xff]  ;;  %s9106_s14 = sld [smem:[#allocation13_spill]] }
0x3e09   : > { %v4899_v19 = vpop.f32.mrb[144].mxu1 }
0x3e0a   : > { %v4905_v21 = vmul.f32 0.35355338, %v4899_v19  ;;  %v7334_v22 = vpop.f32.mrb[145].mxu1 }
0x3e0b   : > { %v4902_v23 = vpop.f32.mrb[146].mxu1 }
0x3e0c   : > { %v4906_v24 = vadd.f32 %v4905_v21, %v7918_v41  ;;  %v7335_v26 = vpop.f32.mrb[147].mxu1 }
0x3e0e   : > { %v4907_v27 = vsel %vm1014_vm5, %v4906_v24, -inf }
0x3e0f   : > { %4908 = vmax.xlane.f32.xlu1 %v4907_v27 }
0x3e20   : > { %4919 = vrot.lane.b32.xlu1 %v8628_v6, %s9098_s15 }
0x3e24   : > { %5017 = vrot.lane.b32.xlu1 %v8628_v6, %s9094_s28 }
0x3e28   : > { %5015 = vrot.lane.b32.xlu1 %v8628_v6, %s9093_s7 }
0x3e9c   : > { %v4909_v28 = vpop.xlane.xlu1 %4908 }
0x3e9d   : > { %v4910_v29 = vsub.f32 %v4906_v24, %v4909_v28 }
0x3e9f   : > { %v4911_v31 = vmul.f32 1.442695, %v4910_v29 }
0x3ea0   : > { %v4920_v34 = vpop.permute.xlu1 %4919 }
0x3ea1   : > { %7649 = vpow2.f32 %v4911_v31  ;;  %v4925_v20 = vand.u32 %v4920_v34, %v7935_v7 }
0x3ea3   : > { %7337 = vmatpush3.bf16.msra.mxu0 %v4925_v20 }
0x3ea4   : > { %7348 = vmatprep.subr.bf16.mxu0 %v7687_v15  ;;  %v5018_v40 = vpop.permute.xlu1 %5017 }
0x3ea5   : > { %v5023_v43 = vsel %vm965_vm3, %v5018_v40, 0 }
0x3ea8   : > { %v5016_v44 = vpop.permute.xlu1 %5015 }
0x3eab   : > { %v7650_v35 = vpop.eup %7649 }
0x3eac   : > { %v4913_v36 = vsel %vm1014_vm5, %v7650_v35, 0.0 }
0x3ead   : > { %4914 = vadd.xlane.f32.xlu0 %v4913_v36  ;;  %v7549_v36 = vld [vmem:[%s9082_s9 + $0x20] sm:$0xff]  }
0x3f3a   : > { %v4915_v37 = vpop.xlane.xlu0 %4914 }
0x3f3b   : > { %7651 = vrcp.f32 %v4915_v37  ;;  %v7550_v37 = vld [vmem:[%s9082_s9 + $0x28] sm:$0xff]  }
0x3f45   : > { %v7652_v38 = vpop.eup %7651 }
0x3f46   : > { %v4917_v32 = vmul.f32 %v7652_v38, %v7650_v35  ;;  %v7547_v35 = vld [vmem:[%s8997_s13 + $0x20] sm:$0xff]  }
0x3f48   : > { %v4918_v42 = vpack.c.bf16 %v4917_v32, %v4917_v32 }
0x3f4a   : > { %7339 = vmatmul.mubr.msk.bf16.vlgmr.msra.gmra.mrb[116].mxu0 %vm1029_vm8, %v4918_v42  ;;  %v6597_v42 = vld [vmem:[%s9106_s14 + $0x2] ss:$0 sm:$0xff] }
0x3f4b   : > { %7349 = vmatpush3.bf16.xpose.msra.mxu0 %v5023_v43  ;;  %7350 = vmatprep.mubr.msk.bf16.mxu0 %vm7688_vm1, %v7687_v15 }
0x3f4c   : > { %7360 = vmatprep.subr.bf16.mxu0 %v7687_v15 }
0x3f52   : > { %7351 = vmatmul.mubr.msk.bf16.vlgmr.msra.gmra.mrb[120].mxu0 %vm965_vm3, %v5016_v44  ;;  %v6598_v44 = vld [vmem:[%s9107_s25 + $0x2] ss:$0 sm:$0xff]  ;;  %s9111_s25 = sld [smem:[#allocation19_spill]] }
0x3f53   : > { %7362 = vmatprep.mubr.msk.bf16.mxu0 %vm7688_vm1, %v7687_v15 }
0x401d   : > { %v4961_v46 = vpop.f32.mrb[116].mxu0 }
0x401e   : > { %v4967_v48 = vpack.c.bf16 %v4961_v46, %v4961_v46  ;;  %v7340_v50 = vpop.f32.mrb[117].mxu0 }
0x401f   : > { %v4964_v51 = vpop.f32.mrb[118].mxu0 }
0x4020   : > { %v7341_v52 = vpop.f32.mrb[119].mxu0  ;;  %7345 = vmatmul.mubr.msk.bf16.vlgmr.msra.gmra.mrb[148].mxu1 %vm965_vm3, %v4967_v48 }
0x4021   : > { %7356 = vmatprep.mubr.msk.bf16.mxu1 %vm7688_vm1, %v7687_v15 }
0x4025   : > { %v5059_v53 = vpop.f32.mrb[120].mxu0 }
0x4026   : > { %v5065_v54 = vmul.f32 0.35355338, %v5059_v53  ;;  %v7352_v55 = vpop.f32.mrb[121].mxu0 }
0x4027   : > { %v5062_v30 = vpop.f32.mrb[122].mxu0 }
0x4028   : > { %v5066_v12 = vadd.f32 %v5065_v54, %v7918_v41  ;;  %v7353_v56 = vpop.f32.mrb[123].mxu0 }
0x402a   : > { %v5067_v57 = vsel %vm1014_vm5, %v5066_v12, -inf }
0x402b   : > { %5068 = vmax.xlane.f32.xlu1 %v5067_v57 }
0x40b8   : > { %v5069_v58 = vpop.xlane.xlu1 %5068 }
0x40b9   : > { %v5070_v59 = vsub.f32 %v5066_v12, %v5069_v58  ;;  %v6604_v12 = vld [vmem:[%s9109_s12 + $0x2] ss:$0 sm:$0xff]  ;;  %s9115_s12 = sld [smem:[#allocation21_spill]] }
0x40bb   : > { %v5071_v60 = vmul.f32 1.442695, %v5070_v59 }
0x40bd   : > { %7653 = vpow2.f32 %v5071_v60 }
0x40c7   : > { %v7654_v61 = vpop.eup %7653 }
0x40c8   : > { %v5073_v62 = vsel %vm1014_vm5, %v7654_v61, 0.0 }
0x40c9   : > { %5074 = vadd.xlane.f32.xlu0 %v5073_v62 }
0x40df   : > { %5079 = vrot.lane.b32.xlu0 %v8628_v6, %s9104_s0  ;;  %v6580_v6 = vld [vmem:[%s9079_s29 + $0x2c] sm:$0xf]  ;;  %s9108_s0 = sld [smem:[#allocation17_spill]] }
0x40e0   : > { %v5132_v11 = vsel %vm1034_vm7, %v6580_v6, 0 }
0x40e1   : > { %7361 = vmatpush3.bf16.msra.mxu0 %v5132_v11 }
0x40e2   : > { %7374 = vmatprep.subr.bf16.mxu0 %v7687_v15 }
0x40e5   : > { %v6613_v48 = vld [vmem:[%s9108_s0 + $0x2] ss:$0 sm:$0xff] }
0x40f3   : > { %v5008_v0 = vpop.f32.mrb[148].mxu1 }
0x40f4   : > { %v5014_v1 = vadd.f32 %v5008_v0, %v8692_v16  ;;  %v7346_v2 = vpop.f32.mrb[149].mxu1 }
0x40f5   : > { %v5011_v41 = vpop.f32.mrb[150].mxu1 }
0x40f6   : > { %v7347_v3 = vpop.f32.mrb[151].mxu1 }
0x4156   : > { %v5075_v4 = vpop.xlane.xlu0 %5074 }
0x4157   : > { %7655 = vrcp.f32 %v5075_v4 }
0x415a   : > { %v5080_v5 = vpop.permute.xlu0 %5079 }
0x415b   : > { %v5085_v9 = vand.u32 %v5080_v5, %v7935_v7 }
0x415d   : > { %7355 = vmatpush3.bf16.msra.mxu1 %v5085_v9 }
0x415e   : > { %7366 = vmatprep.subr.bf16.mxu1 %v7687_v15 }
0x4161   : > { %v7656_v49 = vpop.eup %7655 }
0x4162   : > { %v5077_v33 = vmul.f32 %v7656_v49, %v7654_v61 }
0x4164   : > { %v5078_v10 = vpack.c.bf16 %v5077_v33, %v5077_v33 }
0x4166   : > { %7357 = vmatmul.mubr.msk.bf16.vlgmr.msra.gmra.mrb[152].mxu1 %vm1029_vm8, %v5078_v10 }
0x4167   : > { %7370 = vmatprep.mubr.msk.bf16.mxu1 %vm7688_vm1, %v7687_v15  ;;  %7367 = vmatpush3.bf16.msra.mxu1 %v7549_v36 }
0x4168   : > { %7368 = vmatprep.subr.bf16.mxu1 %v7687_v15 }
0x416b   : > { %7369 = vmatpush3.bf16.msra.mxu1 %v7550_v37 }
0x416c   : > { %7382 = vmatprep.subr.bf16.mxu1 %v7687_v15 }
0x4239   : > { %v5121_v7 = vpop.f32.mrb[152].mxu1 }
0x423a   : > { %v5127_v13 = vpack.c.bf16 %v5121_v7, %v5121_v7  ;;  %v7358_v14 = vpop.f32.mrb[153].mxu1 }
0x423b   : > { %v5124_v16 = vpop.f32.mrb[154].mxu1 }
0x423c   : > { %v7359_v17 = vpop.f32.mrb[155].mxu1  ;;  %7363 = vmatmul.mubr.msk.bf16.vlgmr.msra.gmra.mrb[124].mxu0 %vm965_vm3, %v5127_v13 }
0x423d   : > { %7378 = vmatprep.mubr.msk.bf16.mxu0 %vm7688_vm1, %v7687_v15  ;;  %7375 = vmatpush3.bf16.msra.mxu0 %v7547_v35  ;;  %v6618_v35 = vld [vmem:[%s9110_s11 + $0x24] sm:$0xf] }
0x423e   : > { %7376 = vmatprep.subr.bf16.mxu0 %v7687_v15 }
0x430f   : > { %v5168_v47 = vpop.f32.mrb[124].mxu0 }
0x4310   : > { %v5174_v19 = vadd.f32 %v5168_v47, %v5014_v1  ;;  %v7364_v21 = vpop.f32.mrb[125].mxu0 }
0x4311   : > { %v5171_v22 = vpop.f32.mrb[126].mxu0 }
0x4312   : > { %v5181_v23 = vadd.f32 %v6594_v18, %v5174_v19  ;;  %v7365_v24 = vpop.f32.mrb[127].mxu0 }
0x4314   : > { %v5182_v26 = vadd.f32 %v5181_v23, %v8618_v25  ;;  %v7548_v25 = vld [vmem:[%s8997_s13 + $0x28] sm:$0xff]  }
0x4315   : > { %7377 = vmatpush3.bf16.msra.mxu0 %v7548_v25  ;;  %v5585_v25 = vsel %vm1034_vm7, %v6618_v35, 0 }
0x4316   : > { %v5187_v27 = vsel %vm849_vm0, %v5182_v26, 0.0  ;;  %7388 = vmatprep.subr.bf16.mxu0 %v7687_v15 }
0x4317   : > { %5188 = vadd.xlane.f32.xlu0 %v5187_v27 }
0x4318   : > { %7379 = vmatmul.mubr.msk.bf16.vlgmr.msra.gmra.mrb[128].mxu0 %vm912_vm2, %v8033_v63 }
0x4319   : > { %7390 = vmatprep.mubr.msk.bf16.mxu0 %vm7688_vm1, %v7687_v15 }
0x43a4   : > { %v5189_v28 = vpop.xlane.xlu0 %5188 }
0x43a5   : > { %v5190_v29 = vmul.f32 0.03125, %v5189_v28 }
0x43a7   : > { %v5191_v31 = vsub.f32 %v5182_v26, %v5190_v29 }
0x43a9   : > { %v5192_v34 = vmul.f32 %v5191_v31, %v5191_v31 }
0x43ab   : > { %v5193_v20 = vsel %vm849_vm0, %v5192_v34, 0.0 }
0x43ac   : > { %5194 = vadd.xlane.f32.xlu1 %v5193_v20 }
0x43eb   : > { %v5342_v50 = vpop.f32.mrb[128].mxu0 }
0x43ec   : > { %v5343_v51 = vadd.f32 %v6613_v48, %v5342_v50  ;;  %v7380_v52 = vpop.f32.mrb[129].mxu0 }
0x43ed   : > { %v5345_v53 = vpop.f32.mrb[130].mxu0 }
0x43ee   : > { %v8782_v54 = vpack.c.bf16 %v5343_v51, %v5343_v51  ;;  %v7381_v55 = vpop.f32.mrb[131].mxu0 }
0x43f0   : > { %5470 = vrot.lane.b32.xlu1 %v8782_v54, %s9086_s3  ;;  %v5361_v30 = vsel %vm965_vm3, %v8782_v54, 0 }
0x4439   : > { %v5195_v38 = vpop.xlane.xlu1 %5194 }
0x443a   : > { %v5196_v32 = vmul.f32 0.03125, %v5195_v38 }
0x443c   : > { %v5197_v63 = vadd.f32 1e-12, %v5196_v32 }
0x443e   : > { %7657 = vrsqrt.f32 %v5197_v63  ;;  %v6617_v63 = vld [vmem:[%s9110_s11 + $0x20] sm:$0xf] }
0x4448   : > { %v7658_v40 = vpop.eup %7657 }
0x4449   : > { %v5199_v43 = vmul.f32 %v7658_v40, %v5191_v31 }
0x444b   : > { %v5206_v45 = vmul.f32 %v6597_v42, %v5199_v43  ;;  %v5631_v43 = vsel %vm1034_vm7, %v6617_v63, 0 }
0x444d   : > { %v8772_v39 = vadd.f32 %v6598_v44, %v5206_v45 }
0x444f   : > { %v5221_v46 = vpack.c.bf16 %v8772_v39, %v8772_v39 }
0x4451   : > { %7371 = vmatmul.mubr.msk.bf16.vlgmr.msra.gmra.mrb[156].mxu1 %vm912_vm2, %v5221_v46 }
0x4452   : > { %7384 = vmatprep.mubr.msk.bf16.mxu1 %vm7688_vm1, %v7687_v15  ;;  %7383 = vmatpush3.bf16.xpose.msra.mxu1 %v5361_v30 }
0x4453   : > { %7394 = vmatprep.subr.bf16.mxu1 %v7687_v15 }
0x4462   : > { %v5471_v57 = vpop.permute.xlu1 %5470 }
0x4463   : > { %v5476_v0 = vsel %vm965_vm3, %v5471_v57, 0 }
0x4524   : > { %v5277_v56 = vpop.f32.mrb[156].mxu1 }
0x4525   : > { %v5278_v58 = vadd.f32 %v6604_v12, %v5277_v56  ;;  %v7372_v59 = vpop.f32.mrb[157].mxu1 }
0x4526   : > { %v5280_v60 = vpop.f32.mrb[158].mxu1 }
0x4527   : > { %v8792_v61 = vpack.c.bf16 %v5278_v58, %v5278_v58  ;;  %v7373_v62 = vpop.f32.mrb[159].mxu1 }
0x4529   : > { %5468 = vrot.lane.b32.xlu1 %v8792_v61, %s9086_s3  ;;  %7385 = vmatmul.mubr.msk.bf16.vlgmr.msra.gmra.mrb[160].mxu1 %vm965_vm3, %v8792_v61 }
0x452a   : > { %7395 = vmatpush3.bf16.xpose.msra.mxu1 %v5476_v0  ;;  %7396 = vmatprep.mubr.msk.bf16.mxu1 %vm7688_vm1, %v7687_v15 }
0x452b   : > { %7406 = vmatprep.subr.bf16.mxu1 %v7687_v15 }
0x459b   : > { %v5469_v1 = vpop.permute.xlu1 %5468 }
0x459c   : > { %7397 = vmatmul.mubr.msk.bf16.vlgmr.msra.gmra.mrb[164].mxu1 %vm965_vm3, %v5469_v1 }
0x459d   : > { %7408 = vmatprep.mubr.msk.bf16.mxu1 %vm7688_vm1, %v7687_v15  ;;  %7407 = vmatpush3.bf16.msra.mxu1 %v5585_v25 }
0x459e   : > { %7418 = vmatprep.subr.bf16.mxu1 %v7687_v15 }
0x45fc   : > { %v5397_v2 = vpop.f32.mrb[160].mxu1 }
0x45fd   : > { %v5403_v41 = vmul.f32 0.35355338, %v5397_v2  ;;  %v7386_v3 = vpop.f32.mrb[161].mxu1 }
0x45fe   : > { %v5400_v4 = vpop.f32.mrb[162].mxu1 }
0x45ff   : > { %v5404_v5 = vadd.f32 %v5403_v41, %v7864_v8  ;;  %v7387_v9 = vpop.f32.mrb[163].mxu1 }
0x4601   : > { %v5405_v49 = vsel %vm1838_vm9, %v5404_v5, -inf }
0x4602   : > { %5406 = vmax.xlane.f32.xlu1 %v5405_v49 }
0x4613   : > { %5675 = vrot.lane.b32.xlu1 %v8782_v54, %s9089_s10 }
0x466f   : > { %v5512_v33 = vpop.f32.mrb[164].mxu1 }
0x4670   : > { %v5518_v10 = vmul.f32 0.35355338, %v5512_v33  ;;  %v7398_v6 = vpop.f32.mrb[165].mxu1 }
0x4671   : > { %v5515_v11 = vpop.f32.mrb[166].mxu1 }
0x4672   : > { %v5519_v7 = vadd.f32 %v5518_v10, %v7864_v8  ;;  %v7399_v13 = vpop.f32.mrb[167].mxu1 }
0x4674   : > { %v5520_v14 = vsel %vm1838_vm9, %v5519_v7, -inf }
0x4675   : > { %5521 = vmax.xlane.f32.xlu0 %v5520_v14 }
0x468b   : > { %5418 = vrot.lane.b32.xlu0 %v8782_v54, %s9088_s5 }
0x468f   : > { %v5407_v16 = vpop.xlane.xlu1 %5406 }
0x4690   : > { %v5408_v17 = vsub.f32 %v5404_v5, %v5407_v16 }
0x4692   : > { %v5409_v18 = vmul.f32 1.442695, %v5408_v17 }
0x4693   : > { %v5676_v51 = vpop.permute.xlu1 %5675 }
0x4694   : > { %7659 = vpow2.f32 %v5409_v18  ;;  %v5681_v12 = vsel %vm965_vm3, %v5676_v51, 0 }
0x469e   : > { %v7660_v47 = vpop.eup %7659 }
0x469f   : > { %v5411_v19 = vsel %vm1838_vm9, %v7660_v47, 0.0 }
0x46aa   : > { %5412 = vadd.xlane.f32.xlu0 %v5411_v19 }
0x4702   : > { %v5522_v21 = vpop.xlane.xlu0 %5521 }
0x4703   : > { %v5523_v22 = vsub.f32 %v5519_v7, %v5522_v21 }
0x4705   : > { %v5524_v23 = vmul.f32 1.442695, %v5523_v22 }
0x4706   : > { %v5419_v24 = vpop.permute.xlu0 %5418 }
0x4707   : > { %7661 = vpow2.f32 %v5524_v23  ;;  %v5424_v26 = vsel %vm1034_vm7, %v5419_v24, 0 }
0x4708   : > { %7389 = vmatpush3.bf16.msra.mxu0 %v5424_v26  ;;  %v6619_v26 = vld [vmem:[%s9110_s11 + $0x28] sm:$0xf] }
0x4709   : > { %7400 = vmatprep.subr.bf16.mxu0 %v7687_v15 }
0x4711   : > { %v7662_v27 = vpop.eup %7661 }
0x4712   : > { %v5526_v28 = vsel %vm1838_vm9, %v7662_v27, 0.0 }
0x4713   : > { %5527 = vadd.xlane.f32.xlu0 %v5526_v28 }
0x4729   : > { %5532 = vrot.lane.b32.xlu0 %v8782_v54, %s9090_s30 }
0x472d   : > { %5673 = vrot.lane.b32.xlu0 %v8792_v61, %s9089_s10 }
0x4737   : > { %v5413_v29 = vpop.xlane.xlu0 %5412 }
0x4738   : > { %7663 = vrcp.f32 %v5413_v29 }
0x4742   : > { %v7664_v31 = vpop.eup %7663 }
0x4743   : > { %v5415_v34 = vmul.f32 %v7664_v31, %v7660_v47 }
0x4745   : > { %v5416_v20 = vpack.c.bf16 %v5415_v34, %v5415_v34 }
0x4747   : > { %7391 = vmatmul.mubr.msk.bf16.vlgmr.msra.gmra.mrb[132].mxu0 %vm965_vm3, %v5416_v20 }
0x4748   : > { %7402 = vmatprep.mubr.msk.bf16.mxu0 %vm7688_vm1, %v7687_v15 }
0x47a0   : > { %v5528_v36 = vpop.xlane.xlu0 %5527 }
0x47a1   : > { %7665 = vrcp.f32 %v5528_v36 }
0x47a4   : > { %v5533_v37 = vpop.permute.xlu0 %5532 }
0x47a5   : > { %v5538_v38 = vsel %vm1034_vm7, %v5533_v37, 0 }
0x47a6   : > { %7401 = vmatpush3.bf16.msra.mxu0 %v5538_v38 }
0x47a7   : > { %7412 = vmatprep.subr.bf16.mxu0 %v7687_v15 }
0x47a8   : > { %v5674_v57 = vpop.permute.xlu0 %5673 }
0x47ab   : > { %v7666_v32 = vpop.eup %7665 }
0x47ac   : > { %v5530_v40 = vmul.f32 %v7666_v32, %v7662_v27  ;;  %v5790_v27 = vsel %vm1034_vm7, %v6619_v26, 0  ;;  %v6637_v26 = vld [vmem:[%s9001_s17 + $0x2] ss:$0 sm:$0xff] }
0x47ae   : > { %v5531_v42 = vpack.c.bf16 %v5530_v40, %v5530_v40 }
0x47b0   : > { %7403 = vmatmul.mubr.msk.bf16.vlgmr.msra.gmra.mrb[136].mxu0 %vm965_vm3, %v5531_v42 }
0x47b1   : > { %7413 = vmatpush3.bf16.msra.mxu0 %v5631_v43  ;;  %7414 = vmatprep.mubr.msk.bf16.mxu0 %vm7688_vm1, %v7687_v15 }
0x47b2   : > { %7424 = vmatprep.subr.bf16.mxu0 %v7687_v15 }
0x481a   : > { %v5460_v44 = vpop.f32.mrb[132].mxu0 }
0x481b   : > { %v5466_v45 = vpack.c.bf16 %v5460_v44, %v5460_v44  ;;  %v7392_v46 = vpop.f32.mrb[133].mxu0 }
0x481c   : > { %v5463_v48 = vpop.f32.mrb[134].mxu0 }
0x481d   : > { %v7393_v50 = vpop.f32.mrb[135].mxu0  ;;  %7415 = vmatmul.mubr.msk.bf16.vlgmr.msra.gmra.mrb[140].mxu0 %vm965_vm3, %v5466_v45 }
0x481e   : > { %7426 = vmatprep.mubr.msk.bf16.mxu0 %vm7688_vm1, %v7687_v15 }
0x4883   : > { %v5574_v52 = vpop.f32.mrb[136].mxu0 }
0x4884   : > { %v5580_v53 = vpack.c.bf16 %v5574_v52, %v5574_v52  ;;  %v7404_v55 = vpop.f32.mrb[137].mxu0 }
0x4885   : > { %v5577_v30 = vpop.f32.mrb[138].mxu0 }
0x4886   : > { %v7405_v56 = vpop.f32.mrb[139].mxu0  ;;  %7409 = vmatmul.mubr.msk.bf16.vlgmr.msra.gmra.mrb[168].mxu1 %vm965_vm3, %v5580_v53 }
0x4887   : > { %7419 = vmatpush3.bf16.xpose.msra.mxu1 %v5681_v12  ;;  %7420 = vmatprep.mubr.msk.bf16.mxu1 %vm7688_vm1, %v7687_v15  ;;  %v6620_v56 = vld [vmem:[%s9110_s11 + $0x2c] sm:$0xf]  ;;  %s9116_s11 = sld [smem:[#allocation22_spill]] }
0x4888   : > { %7430 = vmatprep.subr.bf16.mxu1 %v7687_v15 }
0x488d   : > { %s844_s10 = scalar_lea.vmem %s9116_s11, %s9114_s16 }
0x488e   : > { %7421 = vmatmul.mubr.msk.bf16.vlgmr.msra.gmra.mrb[172].mxu1 %vm965_vm3, %v5674_v57  ;;  %v5950_v57 = vsel %vm1034_vm7, %v6620_v56, 0 }
0x488f   : > { %7432 = vmatprep.mubr.msk.bf16.mxu1 %vm7688_vm1, %v7687_v15  ;;  %7431 = vmatpush3.bf16.msra.mxu1 %v5790_v27 }
0x4890   : > { %7442 = vmatprep.subr.bf16.mxu1 %v7687_v15 }
0x48f0   : > { %v5667_v58 = vpop.f32.mrb[140].mxu0 }
0x48f1   : > { %v7416_v59 = vpop.f32.mrb[141].mxu0 }
0x48f2   : > { %v5670_v60 = vpop.f32.mrb[142].mxu0 }
0x48f3   : > { %v7417_v62 = vpop.f32.mrb[143].mxu0 }
0x4959   : > { %v5621_v0 = vpop.f32.mrb[168].mxu1 }
0x495a   : > { %v8850_v1 = vadd.f32 %v5667_v58, %v5621_v0  ;;  %v7410_v2 = vpop.f32.mrb[169].mxu1 }
0x495b   : > { %v5624_v41 = vpop.f32.mrb[170].mxu1 }
0x495c   : > { %v7411_v3 = vpop.f32.mrb[171].mxu1 }
0x4961   : > { %v5717_v4 = vpop.f32.mrb[172].mxu1 }
0x4962   : > { %v5723_v5 = vmul.f32 0.35355338, %v5717_v4  ;;  %v7422_v9 = vpop.f32.mrb[173].mxu1 }
0x4963   : > { %v5720_v49 = vpop.f32.mrb[174].mxu1 }
0x4964   : > { %v5724_v33 = vadd.f32 %v5723_v5, %v7864_v8  ;;  %v7423_v10 = vpop.f32.mrb[175].mxu1 }
0x4966   : > { %v5725_v6 = vsel %vm1838_vm9, %v5724_v33, -inf }
0x4967   : > { %5726 = vmax.xlane.f32.xlu0 %v5725_v6 }
0x497d   : > { %5737 = vrot.lane.b32.xlu0 %v8782_v54, %s9092_s27 }
0x4981   : > { %5833 = vrot.lane.b32.xlu0 %v8792_v61, %s9093_s7 }
0x49f4   : > { %v5727_v11 = vpop.xlane.xlu0 %5726 }
0x49f5   : > { %v5728_v7 = vsub.f32 %v5724_v33, %v5727_v11 }
0x49f7   : > { %v5729_v13 = vmul.f32 1.442695, %v5728_v7 }
0x49f8   : > { %v5738_v14 = vpop.permute.xlu0 %5737 }
0x49f9   : > { %7667 = vpow2.f32 %v5729_v13  ;;  %v5743_v16 = vsel %vm1034_vm7, %v5738_v14, 0  ;;  %v7551_v14 = vld [vmem:[%s9003_s19 + $0x20] sm:$0xff]  }
0x49fa   : > { %7425 = vmatpush3.bf16.msra.mxu0 %v5743_v16  ;;  %v7552_v16 = vld [vmem:[%s9003_s19 + $0x28] sm:$0xff]  }
0x49fb   : > { %7436 = vmatprep.subr.bf16.mxu0 %v7687_v15 }
0x49fc   : > { %v5834_v24 = vpop.permute.xlu0 %5833 }
0x4a03   : > { %v7668_v17 = vpop.eup %7667 }
0x4a04   : > { %v5731_v18 = vsel %vm1838_vm9, %v7668_v17, 0.0 }
0x4a05   : > { %5732 = vadd.xlane.f32.xlu1 %v5731_v18  ;;  %v7555_v18 = vld [vmem:[%s9005_s21 + $0x90] sm:$0xff]  }
0x4a16   : > { %5835 = vrot.lane.b32.xlu1 %v8782_v54, %s9093_s7  ;;  %s9112_s7 = sld [smem:[#allocation20_spill]] }
0x4a92   : > { %v5733_v47 = vpop.xlane.xlu1 %5732 }
0x4a93   : > { %7669 = vrcp.f32 %v5733_v47  ;;  %v7556_v47 = vld [vmem:[%s9005_s21 + $0x98] sm:$0xff]  }
0x4a96   : > { %v5836_v21 = vpop.permute.xlu1 %5835 }
0x4a97   : > { %v5841_v23 = vsel %vm965_vm3, %v5836_v21, 0 }
0x4a9d   : > { %v7670_v61 = vpop.eup %7669 }
0x4a9e   : > { %v5735_v19 = vmul.f32 %v7670_v61, %v7668_v17  ;;  %v7554_v17 = vld [vmem:[%s9005_s21 + $0x88] sm:$0xff]   ;;  %v7557_v61 = vld [vmem:[%s9005_s21 + $0xa0] sm:$0xff]  }
0x4aa0   : > { %v5736_v22 = vpack.c.bf16 %v5735_v19, %v5735_v19  ;;  %v7558_v19 = vld [vmem:[%s9005_s21 + $0xa8] sm:$0xff]  }
0x4aa2   : > { %7427 = vmatmul.mubr.msk.bf16.vlgmr.msra.gmra.mrb[144].mxu0 %vm965_vm3, %v5736_v22 }
0x4aa3   : > { %7437 = vmatpush3.bf16.xpose.msra.mxu0 %v5841_v23  ;;  %7438 = vmatprep.mubr.msk.bf16.mxu0 %vm7688_vm1, %v7687_v15 }
0x4aa4   : > { %7448 = vmatprep.subr.bf16.mxu0 %v7687_v15 }
0x4aaa   : > { %7439 = vmatmul.mubr.msk.bf16.vlgmr.msra.gmra.mrb[148].mxu0 %vm965_vm3, %v5834_v24 }
0x4aab   : > { %7450 = vmatprep.mubr.msk.bf16.mxu0 %vm7688_vm1, %v7687_v15  ;;  %7449 = vmatpush3.bf16.msra.mxu0 %v5950_v57 }
0x4aac   : > { %7462 = vmatprep.subr.bf16.mxu0 %v7687_v15 }
0x4b75   : > { %v5779_v28 = vpop.f32.mrb[144].mxu0 }
0x4b76   : > { %v5785_v29 = vpack.c.bf16 %v5779_v28, %v5779_v28  ;;  %v7428_v31 = vpop.f32.mrb[145].mxu0  ;;  %v6638_v28 = vld [vmem:[%s9002_s18 + $0x2] ss:$0 sm:$0xff] }
0x4b77   : > { %v5782_v34 = vpop.f32.mrb[146].mxu0 }
0x4b78   : > { %v7429_v20 = vpop.f32.mrb[147].mxu0  ;;  %7433 = vmatmul.mubr.msk.bf16.vlgmr.msra.gmra.mrb[176].mxu1 %vm965_vm3, %v5785_v29 }
0x4b79   : > { %7444 = vmatprep.mubr.msk.bf16.mxu1 %vm7688_vm1, %v7687_v15  ;;  %v7559_v20 = vld [vmem:[%s9005_s21 + $0xb0] sm:$0xff]  }
0x4b7d   : > { %v5877_v35 = vpop.f32.mrb[148].mxu0 }
0x4b7e   : > { %v5883_v25 = vmul.f32 0.35355338, %v5877_v35  ;;  %v7440_v36 = vpop.f32.mrb[149].mxu0  ;;  %v7560_v35 = vld [vmem:[%s9005_s21 + $0xb8] sm:$0xff]  }
0x4b7f   : > { %v5880_v37 = vpop.f32.mrb[150].mxu0 }
0x4b80   : > { %v5884_v38 = vadd.f32 %v5883_v25, %v7864_v8  ;;  %v7441_v32 = vpop.f32.mrb[151].mxu0  ;;  %v6644_v25 = vld [vmem:[%s9004_s20 + $0x2] ss:$0 sm:$0xff] }
0x4b82   : > { %v5885_v63 = vsel %vm1838_vm9, %v5884_v38, -inf }
0x4b83   : > { %5886 = vmax.xlane.f32.xlu0 %v5885_v63 }
0x4b99   : > { %5897 = vrot.lane.b32.xlu0 %v8782_v54, %s9094_s28  ;;  %s9113_s28 = smov %s9112_s7 }
0x4b9a   : > { %v7562_v56 = vld [vmem:[%s9113_s28 + $0x8] sm:$0xff]  }
0x4c10   : > { %v5887_v40 = vpop.xlane.xlu0 %5886 }
0x4c11   : > { %v5888_v42 = vsub.f32 %v5884_v38, %v5887_v40 }
0x4c13   : > { %v5889_v43 = vmul.f32 1.442695, %v5888_v42 }
0x4c14   : > { %v5898_v44 = vpop.permute.xlu0 %5897 }
0x4c15   : > { %7671 = vpow2.f32 %v5889_v43  ;;  %v5903_v45 = vsel %vm1034_vm7, %v5898_v44, 0  ;;  %v6665_v43 = vld [vmem:[%s9006_s22 + $0x2] ss:$0 sm:$0xff] }
0x4c16   : > { %7443 = vmatpush3.bf16.msra.mxu1 %v5903_v45 }
0x4c17   : > { %7454 = vmatprep.subr.bf16.mxu1 %v7687_v15 }
0x4c1f   : > { %v7672_v46 = vpop.eup %7671 }
0x4c20   : > { %v5891_v8 = vsel %vm1838_vm9, %v7672_v46, 0.0 }
0x4c21   : > { %5892 = vadd.xlane.f32.xlu1 %v5891_v8 }
0x4c4b   : > { %v5826_v48 = vpop.f32.mrb[176].mxu1 }
0x4c4c   : > { %v5832_v50 = vadd.f32 %v5826_v48, %v8850_v1  ;;  %v7434_v51 = vpop.f32.mrb[177].mxu1  ;;  %v6634_v1 = vld [vmem:[%s9111_s25 + $0x2] ss:$0 sm:$0xff] }
0x4c4d   : > { %v5829_v52 = vpop.f32.mrb[178].mxu1 }
0x4c4e   : > { %v7435_v54 = vpop.f32.mrb[179].mxu1 }
0x4cae   : > { %v5893_v53 = vpop.xlane.xlu1 %5892 }
0x4caf   : > { %7673 = vrcp.f32 %v5893_v53 }
0x4cb9   : > { %v7674_v55 = vpop.eup %7673 }
0x4cba   : > { %v5895_v30 = vmul.f32 %v7674_v55, %v7672_v46 }
0x4cbc   : > { %v5896_v12 = vpack.c.bf16 %v5895_v30, %v5895_v30 }
0x4cbe   : > { %7445 = vmatmul.mubr.msk.bf16.vlgmr.msra.gmra.mrb[180].mxu1 %vm965_vm3, %v5896_v12  ;;  %v7561_v12 = vld [vmem:[%s9112_s7] sm:$0xff]  }
0x4cbf   : > { %7458 = vmatprep.mubr.msk.bf16.mxu1 %vm7688_vm1, %v7687_v15  ;;  %7455 = vmatpush3.bf16.msra.mxu1 %v7551_v14 }
0x4cc0   : > { %7456 = vmatprep.subr.bf16.mxu1 %v7687_v15 }
0x4cc3   : > { %7457 = vmatpush3.bf16.msra.mxu1 %v7552_v16 }
0x4cc4   : > { %7482 = vmatprep.subr.bf16.mxu1 %v7687_v15 }
0x4d91   : > { %v5939_v58 = vpop.f32.mrb[180].mxu1 }
0x4d92   : > { %v5945_v59 = vpack.c.bf16 %v5939_v58, %v5939_v58  ;;  %v7446_v60 = vpop.f32.mrb[181].mxu1 }
0x4d93   : > { %v5942_v62 = vpop.f32.mrb[182].mxu1 }
0x4d94   : > { %v7447_v0 = vpop.f32.mrb[183].mxu1  ;;  %7451 = vmatmul.mubr.msk.bf16.vlgmr.msra.gmra.mrb[152].mxu0 %vm965_vm3, %v5945_v59  ;;  %v6676_v62 = vld [vmem:[%s9007_s23 + $0x2] ss:$0 sm:$0xff] }
0x4d95   : > { %7478 = vmatprep.mubr.msk.bf16.mxu0 %vm7688_vm1, %v7687_v15 }
0x4e67   : > { %v5986_v2 = vpop.f32.mrb[152].mxu0 }
0x4e68   : > { %v5992_v41 = vadd.f32 %v5986_v2, %v5832_v50  ;;  %v7452_v3 = vpop.f32.mrb[153].mxu0 }
0x4e69   : > { %v5989_v4 = vpop.f32.mrb[154].mxu0 }
0x4e6a   : > { %v5999_v5 = vadd.f32 %v6634_v1, %v5992_v41  ;;  %v7453_v9 = vpop.f32.mrb[155].mxu0  ;;  %v6677_v1 = vld [vmem:[%s9008_s24 + $0x2] ss:$0 sm:$0xff] }
0x4e6c   : > { %v6000_v49 = vadd.f32 %v5999_v5, %v8772_v39  ;;  %v7553_v39 = vld [vmem:[%s9005_s21 + $0x80] sm:$0xff]  }
0x4e6d   : > { %7463 = vmatpush3.bf16.msra.mxu0 %v7553_v39 }
0x4e6e   : > { %v6005_v33 = vsel %vm849_vm0, %v6000_v49, 0.0  ;;  %7464 = vmatprep.subr.bf16.mxu0 %v7687_v15 }
0x4e6f   : > { %6006 = vadd.xlane.f32.xlu1 %v6005_v33 }
0x4e71   : > { %7465 = vmatpush3.bf16.msra.mxu0 %v7554_v17 }
0x4e72   : > { %7466 = vmatprep.subr.bf16.mxu0 %v7687_v15 }
0x4e75   : > { %7467 = vmatpush3.bf16.msra.mxu0 %v7555_v18 }
0x4e76   : > { %7468 = vmatprep.subr.bf16.mxu0 %v7687_v15 }
0x4e79   : > { %7469 = vmatpush3.bf16.msra.mxu0 %v7556_v47 }
0x4e7a   : > { %7470 = vmatprep.subr.bf16.mxu0 %v7687_v15 }
0x4e7d   : > { %7471 = vmatpush3.bf16.msra.mxu0 %v7557_v61 }
0x4e7e   : > { %7472 = vmatprep.subr.bf16.mxu0 %v7687_v15 }
0x4e81   : > { %7473 = vmatpush3.bf16.msra.mxu0 %v7558_v19 }
0x4e82   : > { %7474 = vmatprep.subr.bf16.mxu0 %v7687_v15 }
0x4e85   : > { %7475 = vmatpush3.bf16.msra.mxu0 %v7559_v20 }
0x4e86   : > { %7476 = vmatprep.subr.bf16.mxu0 %v7687_v15 }
0x4e89   : > { %7477 = vmatpush3.bf16.msra.mxu0 %v7560_v35 }
0x4efc   : > { %v6007_v10 = vpop.xlane.xlu1 %6006 }
0x4efd   : > { %v6008_v6 = vmul.f32 0.03125, %v6007_v10 }
0x4eff   : > { %v6009_v11 = vsub.f32 %v6000_v49, %v6008_v6 }
0x4f01   : > { %v6010_v7 = vmul.f32 %v6009_v11, %v6009_v11 }
0x4f03   : > { %v6011_v13 = vsel %vm849_vm0, %v6010_v7, 0.0 }
0x4f04   : > { %6012 = vadd.xlane.f32.xlu1 %v6011_v13 }
0x4f91   : > { %v6013_v21 = vpop.xlane.xlu1 %6012 }
0x4f92   : > { %v6014_v22 = vmul.f32 0.03125, %v6013_v21 }
0x4f94   : > { %v6015_v23 = vadd.f32 1e-12, %v6014_v22 }
0x4f96   : > { %7675 = vrsqrt.f32 %v6015_v23 }
0x4fa0   : > { %v7676_v24 = vpop.eup %7675 }
0x4fa1   : > { %v6017_v27 = vmul.f32 %v7676_v24, %v6009_v11 }
0x4fa3   : > { %v6024_v29 = vmul.f32 %v6637_v26, %v6017_v27 }
0x4fa5   : > { %v6031_v31 = vadd.f32 %v6638_v28, %v6024_v29 }
0x4fa7   : > { %v6039_v34 = vpack.c.bf16 %v6031_v31, %v6031_v31 }
0x4fa9   : > { %7459 = vmatmul.mubr.msk.bf16.vlgmr.msra.gmra.mrb[184].mxu1 %vm912_vm2, %v6039_v34 }
0x4faa   : > { %7486 = vmatprep.mubr.msk.bf16.mxu1 %vm7688_vm1, %v7687_v15  ;;  %7483 = vmatpush3.bf16.msra.mxu1 %v7561_v12 }
0x4fab   : > { %7484 = vmatprep.subr.bf16.mxu1 %v7687_v15  ;;  %v6678_v15 = vld [vmem:[%s9115_s12] ss:$0 sm:$0xff] }
0x4fae   : > { %7485 = vmatpush3.bf16.msra.mxu1 %v7562_v56 }
0x507c   : > { %v6095_v36 = vpop.f32.mrb[184].mxu1 }
0x507d   : > { %v6096_v37 = vadd.f32 %v6644_v25, %v6095_v36  ;;  %v7460_v38 = vpop.f32.mrb[185].mxu1 }
0x507e   : > { %v6098_v32 = vpop.f32.mrb[186].mxu1 }
0x507f   : > { %v6101_v63 = vmax.f32 %v6096_v37, 0.0  ;;  %v7461_v40 = vpop.f32.mrb[187].mxu1 }
0x5081   : > { %v6121_v42 = vpack.c.bf16 %v6101_v63, %v6101_v63 }
0x5083   : > { %7479 = vmatmul.mubr.bf16.vlgmr.msra.gmra.mrb[156].mxu0 %v6121_v42 }
0x5156   : > { %v6210_v44 = vpop.f32.mrb[156].mxu0 }
0x5157   : > { %v6211_v45 = vadd.f32 %v6665_v43, %v6210_v44  ;;  %v7480_v46 = vpop.f32.mrb[157].mxu0 }
0x5158   : > { %v6213_v8 = vpop.f32.mrb[158].mxu0 }
0x5159   : > { %v6216_v48 = vadd.f32 %v6211_v45, %v6031_v31  ;;  %v7481_v50 = vpop.f32.mrb[159].mxu0 }
0x515b   : > { %v6221_v51 = vsel %vm849_vm0, %v6216_v48, 0.0 }
0x515c   : > { %6222 = vadd.xlane.f32.xlu1 %v6221_v51 }
0x51e9   : > { %v6223_v52 = vpop.xlane.xlu1 %6222 }
0x51ea   : > { %v6224_v54 = vmul.f32 0.03125, %v6223_v52 }
0x51ec   : > { %v6225_v53 = vsub.f32 %v6216_v48, %v6224_v54 }
0x51ee   : > { %v6226_v55 = vmul.f32 %v6225_v53, %v6225_v53 }
0x51f0   : > { %v6227_v30 = vsel %vm849_vm0, %v6226_v55, 0.0 }
0x51f1   : > { %6228 = vadd.xlane.f32.xlu0 %v6227_v30 }
0x527e   : > { %v6229_v57 = vpop.xlane.xlu0 %6228 }
0x527f   : > { %v6230_v58 = vmul.f32 0.03125, %v6229_v57 }
0x5281   : > { %v6231_v59 = vadd.f32 1e-12, %v6230_v58 }
0x5283   : > { %7677 = vrsqrt.f32 %v6231_v59 }
0x528d   : > { %v7678_v60 = vpop.eup %7677 }
0x528e   : > { %v6233_v0 = vmul.f32 %v7678_v60, %v6225_v53 }
0x5290   : > { %v6240_v2 = vmul.f32 %v6676_v62, %v6233_v0 }
0x5292   : > { %v6247_v41 = vadd.f32 %v6677_v1, %v6240_v2 }
0x5294   : > { %v6253_v3 = vpack.c.bf16 %v6247_v41, %v6247_v41 }
0x5296   : > { %7487 = vmatmul.mubr.msk.bf16.vlgmr.msra.gmra.mrb[188].mxu1 %vm912_vm2, %v6253_v3 }
0x5369   : > { %v6309_v4 = vpop.f32.mrb[188].mxu1 }
0x536a   : > { %v6310_v5 = vadd.f32 %v6678_v15, %v6309_v4  ;;  %v7488_v9 = vpop.f32.mrb[189].mxu1 }
0x536b   : > { %v6312_v49 = vpop.f32.mrb[190].mxu1 }
0x536c   : > { %6315 = vst [vmem:[%s844_s10] sm:$0x7f] %v6310_v5  ;;  %v7489_v33 = vpop.f32.mrb[191].mxu1 }
0x536d PF: > { %s9117_s30 = sld [smem:[#allocation2_spill]] }
0x5373   : > { %s37_s7 = sadd.s32 1, %s9117_s30  }
0x5374   : > { %p34_p4 = scmp.ge.s32.totalorder %s37_s7, 4  }
0x5376   :  { %36 = sbr.rel (!%p34_p4) target bundleno = 20 (0x14), region = 204 }

</bundles_post_ra>
